<compile_context>
chip_gen: v5e
topology: v5e:2x2
jax: 0.10.0
libtpu: 0.0.40
codegen_flags: <defaults>
</compile_context>

<pallas_src>
import functools

import jax
import jax.numpy as jnp
from jax.experimental import pallas as pl
from jax.experimental.pallas import tpu as pltpu


_PARALLEL = pltpu.CompilerParams(dimension_semantics=("parallel",))


def _round_up(x, m):
    return (x + m - 1) // m * m


def _row_tile(m, target):
    """Row tile: multiple of 8, <= target, and grid >= 2 whenever m allows
    (keeps both v7x TensorCores busy)."""
    if m <= 16:
        return m                                  # full array — always legal
    half = _round_up(pl.cdiv(m, 2), 8)
    return min(target, half)


# ----------------------------------------------------------------------------
# Pallas kernels
# ----------------------------------------------------------------------------
def _conv_bn_relu_pool_kernel(p0_ref, p1_ref, p2_ref, p3_ref, w_ref, b_ref, o_ref):
    """Fused Conv2d(+folded BN) + ReLU + MaxPool2d(2,2) for one row block.

    Each p*_ref holds the im2col patches of one 2x2 pool-window corner for the
    same block of pooled output rows; conv+pool == elementwise max of the four
    corner matmuls (bias/ReLU commute with the max since x -> relu(x+b) is
    monotone and the BN scale is already folded into w).
    """
    w = w_ref[...]
    acc = jnp.maximum(
        jnp.maximum(jnp.dot(p0_ref[...], w, preferred_element_type=jnp.float32),
                    jnp.dot(p1_ref[...], w, preferred_element_type=jnp.float32)),
        jnp.maximum(jnp.dot(p2_ref[...], w, preferred_element_type=jnp.float32),
                    jnp.dot(p3_ref[...], w, preferred_element_type=jnp.float32)))
    o_ref[...] = jnp.maximum(acc + b_ref[...], 0.0).astype(o_ref.dtype)


def _fc_stack_kernel(x_ref, w1_ref, b1_ref, w2_ref, b2_ref, w3_ref, b3_ref, o_ref):
    # fc1 -> Dropout2d(0.25) (eval: identity) -> fc2 -> fc3; intermediates stay
    # in VMEM/vregs, f32 accumulation, bf16 re-cast between lane-dense MXU dots.
    h = jnp.dot(x_ref[...], w1_ref[...], preferred_element_type=jnp.float32) + b1_ref[...]
    h = jnp.dot(h.astype(w2_ref.dtype), w2_ref[...],
                preferred_element_type=jnp.float32) + b2_ref[...]
    h = jnp.dot(h.astype(w3_ref.dtype), w3_ref[...],
                preferred_element_type=jnp.float32) + b3_ref[...]
    o_ref[...] = h.astype(o_ref.dtype)


# ----------------------------------------------------------------------------
# Kernel wrappers
# ----------------------------------------------------------------------------
def conv_bn_relu_pool(quads, w, b, *, out_dtype=jnp.bfloat16, tm=4096):
    """Fused conv(+BN)+ReLU+2x2-maxpool.  quads: 4 x (M, K) pool-corner patches."""
    m, k = quads[0].shape
    c = w.shape[1]
    tm = _row_tile(m, tm)
    patch_spec = pl.BlockSpec((tm, k), lambda i: (i, 0))
    return pl.pallas_call(
        _conv_bn_relu_pool_kernel,
        out_shape=jax.ShapeDtypeStruct((m, c), out_dtype),
        grid=(pl.cdiv(m, tm),),
        in_specs=[patch_spec, patch_spec, patch_spec, patch_spec,
                  pl.BlockSpec((k, c), lambda i: (0, 0)),
                  pl.BlockSpec((1, c), lambda i: (0, 0))],
        out_specs=pl.BlockSpec((tm, c), lambda i: (i, 0)),
        compiler_params=_PARALLEL,
    )(*[q.astype(jnp.bfloat16) for q in quads],
      w.astype(jnp.bfloat16), b.reshape(1, c).astype(jnp.float32))


def fc_stack(x, w1, b1, w2, b2, w3, b3, *, tm=256):
    """Fused fc1 -> fc2 -> fc3.  Weights stored (in, out); fc1/fc2/fc3 outputs
    zero-padded to lane-dense 640/128/128 (final logits sliced back to 10)."""
    m, k1 = x.shape
    n1 = _round_up(w1.shape[1], 128)          # 600 -> 640
    n2 = _round_up(w2.shape[1], 128)          # 120 -> 128
    n3 = w3.shape[1]
    n3p = 128
    w1p = jnp.pad(w1, ((0, 0), (0, n1 - w1.shape[1])))
    b1p = jnp.pad(b1, (0, n1 - b1.shape[0]))
    w2p = jnp.pad(w2, ((0, n1 - w2.shape[0]), (0, n2 - w2.shape[1])))
    b2p = jnp.pad(b2, (0, n2 - b2.shape[0]))
    w3p = jnp.pad(w3, ((0, n2 - w3.shape[0]), (0, n3p - n3)))
    b3p = jnp.pad(b3, (0, n3p - n3))
    tm = _row_tile(m, tm)
    out = pl.pallas_call(
        _fc_stack_kernel,
        out_shape=jax.ShapeDtypeStruct((m, n3p), jnp.float32),
        grid=(pl.cdiv(m, tm),),
        in_specs=[
            pl.BlockSpec((tm, k1), lambda i: (i, 0)),
            pl.BlockSpec((k1, n1), lambda i: (0, 0)),
            pl.BlockSpec((1, n1), lambda i: (0, 0)),
            pl.BlockSpec((n1, n2), lambda i: (0, 0)),
            pl.BlockSpec((1, n2), lambda i: (0, 0)),
            pl.BlockSpec((n2, n3p), lambda i: (0, 0)),
            pl.BlockSpec((1, n3p), lambda i: (0, 0)),
        ],
        out_specs=pl.BlockSpec((tm, n3p), lambda i: (i, 0)),
        compiler_params=_PARALLEL,
    )(x.astype(jnp.bfloat16),
      w1p.astype(jnp.bfloat16), b1p.reshape(1, n1).astype(jnp.float32),
      w2p.astype(jnp.bfloat16), b2p.reshape(1, n2).astype(jnp.float32),
      w3p.astype(jnp.bfloat16), b3p.reshape(1, n3p).astype(jnp.float32))
    return out[:, :n3]


# ----------------------------------------------------------------------------
# Glue: pool-corner im2col, BN folding, flatten-permutation folding (wrapper)
# ----------------------------------------------------------------------------
def _im2col_pool_quadrants(x_nhwc, ksize, pad):
    """4 patch matrices (one per 2x2 pool-window corner), each of shape
    (N*Ho/2*Wo/2, k*k*C); rows in (n, ph, pw) order, tap order (kh, kw, cin)."""
    n, h, w, c = x_nhwc.shape
    if pad:
        x_nhwc = jnp.pad(x_nhwc, ((0, 0), (pad, pad), (pad, pad), (0, 0)))
    ho = h + 2 * pad - ksize + 1
    wo = w + 2 * pad - ksize + 1
    taps = [x_nhwc[:, dy:dy + ho, dx:dx + wo, :]
            for dy in range(ksize) for dx in range(ksize)]
    patches = jnp.concatenate(taps, axis=-1)                    # (n, ho, wo, k*k*c)
    kk = ksize * ksize * c
    p6 = patches.reshape(n, ho // 2, 2, wo // 2, 2, kk)
    quads = [p6[:, :, di, :, dj, :].reshape(n * (ho // 2) * (wo // 2), kk)
             for di in range(2) for dj in range(2)]
    return quads, ho // 2, wo // 2


def _fold_conv_bn(w_oihw, conv_b, gamma, beta, mean, var, eps=1e-5):
    """torch (Cout,Cin,kh,kw) conv + eval-mode BN -> (k*k*Cin, Cout) weight, (Cout,) bias."""
    cout = w_oihw.shape[0]
    wm = jnp.transpose(w_oihw, (2, 3, 1, 0)).reshape(-1, cout)   # (kh,kw,cin) order
    scale = gamma / jnp.sqrt(var + eps)
    return wm * scale[None, :], (conv_b - mean) * scale + beta


def _permute_fc1_for_nhwc(w_fc1, h, w, c):
    """fc1 weight rows are in torch NCHW-flat order (c,h,w); reorder to (h,w,c)
    so the NHWC-flattened activation can be fed directly (no transpose op)."""
    return w_fc1.reshape(c, h, w, -1).transpose(1, 2, 0, 3).reshape(h * w * c, -1)


# ----------------------------------------------------------------------------
# FashionCNN forward
# ----------------------------------------------------------------------------
def fashion_cnn_forward(x_nchw, params):
    n = x_nchw.shape[0]
    # NCHW -> NHWC is a free reshape here because Cin == 1.
    x = x_nchw.reshape(n, 28, 28, 1).astype(jnp.bfloat16)

    # layer1: Conv2d(1,32,3,pad=1) + BatchNorm2d + ReLU + MaxPool2d(2) — 1 kernel.
    w1, b1 = _fold_conv_bn(params["conv1_w"], params["conv1_b"],
                           params["bn1_gamma"], params["bn1_beta"],
                           params["bn1_mean"], params["bn1_var"])
    q1, ph1, pw1 = _im2col_pool_quadrants(x, ksize=3, pad=1)       # 4 x (n*196, 9)
    y = conv_bn_relu_pool(q1, w1, b1, tm=4096)                     # (n*196, 32) bf16

    # layer2: Conv2d(32,64,3) + BatchNorm2d + ReLU + MaxPool2d(2) — 1 kernel.
    w2, b2 = _fold_conv_bn(params["conv2_w"], params["conv2_b"],
                           params["bn2_gamma"], params["bn2_beta"],
                           params["bn2_mean"], params["bn2_var"])
    q2, ph2, pw2 = _im2col_pool_quadrants(y.reshape(n, ph1, pw1, 32), ksize=3, pad=0)
    y = conv_bn_relu_pool(q2, w2, b2, tm=2048)                     # (n*36, 64) bf16

    # Flatten in NHWC order (free reshape); PyTorch's NCHW out.view(N,-1)
    # permutation is folded into fc1's weight instead of transposing activations.
    flat = y.reshape(n, ph2 * pw2 * 64)
    fc1_w = _permute_fc1_for_nhwc(params["fc1_w"], ph2, pw2, 64)

    # fc1 -> Dropout2d(0.25) (eval: identity) -> fc2 -> fc3 fused in one kernel.
    # TODO(synk): training-mode Dropout2d mask not implemented (eval-mode identity).
    return fc_stack(flat, fc1_w, params["fc1_b"],
                    params["fc2_w"], params["fc2_b"],
                    params["fc3_w"], params["fc3_b"])


# ----------------------------------------------------------------------------
# Deterministic parameter init (shapes from FashionCNN.__init__).
# FC weights stored pre-transposed as (in, out) so no .T per forward.
# ----------------------------------------------------------------------------
def init_params(key):
    ks = jax.random.split(key, 18)
    nrm = lambda k, shape, s=0.05: jax.random.normal(k, shape, jnp.float32) * s
    return {
        "conv1_w": nrm(ks[0], (32, 1, 3, 3)),
        "conv1_b": nrm(ks[1], (32,)),
        "bn1_gamma": 1.0 + nrm(ks[2], (32,)),
        "bn1_beta": nrm(ks[3], (32,)),
        "bn1_mean": nrm(ks[4], (32,)),
        "bn1_var": jax.random.uniform(ks[5], (32,), jnp.float32, 0.5, 1.5),
        "conv2_w": nrm(ks[6], (64, 32, 3, 3)),
        "conv2_b": nrm(ks[7], (64,)),
        "bn2_gamma": 1.0 + nrm(ks[8], (64,)),
        "bn2_beta": nrm(ks[9], (64,)),
        "bn2_mean": nrm(ks[10], (64,)),
        "bn2_var": jax.random.uniform(ks[11], (64,), jnp.float32, 0.5, 1.5),
        "fc1_w": nrm(ks[12], (2304, 600)),   # (in, out), in indexed NCHW-flat
        "fc1_b": nrm(ks[13], (600,)),
        "fc2_w": nrm(ks[14], (600, 120)),    # (in, out)
        "fc2_b": nrm(ks[15], (120,)),
        "fc3_w": nrm(ks[16], (120, 10)),     # (in, out)
        "fc3_b": nrm(ks[17], (10,)),
    }


if __name__ == "__main__":
    key = jax.random.PRNGKey(0)
    pkey, xkey = jax.random.split(key)
    params = init_params(pkey)
    # Spatial size is fixed by fc1 (64*6*6) -> 28x28; small batch=2, 1 channel.
    x = jax.random.normal(xkey, (2, 1, 28, 28), jnp.float32)

    out = jax.jit(fashion_cnn_forward)(x, params)
    out = jax.block_until_ready(out)
    assert out.shape == (2, 10) and out.dtype == jnp.float32
    print("KERNEL_OK")
</pallas_src>

<mosaic_0001>
module attributes {stable_mosaic.version = 11 : i64} {
  func.func @_conv_bn_relu_pool_kernel(%arg0: i32, %arg1: memref<200x9xbf16, #tpu.memory_space<vmem>>, %arg2: memref<200x9xbf16, #tpu.memory_space<vmem>>, %arg3: memref<200x9xbf16, #tpu.memory_space<vmem>>, %arg4: memref<200x9xbf16, #tpu.memory_space<vmem>>, %arg5: memref<9x32xbf16, #tpu.memory_space<vmem>>, %arg6: memref<1x32xf32, #tpu.memory_space<vmem>>, %arg7: memref<200x32xbf16, #tpu.memory_space<vmem>>) attributes {dimension_semantics = [#tpu.dimension_semantics<parallel>], iteration_bounds = array<i64: 2>, scalar_prefetch = 0 : i64, scratch_operands = 0 : i64, tpu.core_type = #tpu.core_type<tc>, window_params = [{transform_indices = @transform_0, window_bounds = array<i64: 200, 9>}, {transform_indices = @transform_1, window_bounds = array<i64: 200, 9>}, {transform_indices = @transform_2, window_bounds = array<i64: 200, 9>}, {transform_indices = @transform_3, window_bounds = array<i64: 200, 9>}, {pipeline_mode = #tpu.pipeline_mode<synchronous>, transform_indices = @transform_4, window_bounds = array<i64: 9, 32>}, {pipeline_mode = #tpu.pipeline_mode<synchronous>, transform_indices = @transform_5, window_bounds = array<i64: 1, 32>}, {transform_indices = @transform_6, window_bounds = array<i64: 200, 32>}]} {
    %c0 = arith.constant 0 : index
    %c0_0 = arith.constant 0 : index
    %0 = vector.load %arg5[%c0, %c0_0] : memref<9x32xbf16, #tpu.memory_space<vmem>>, vector<9x32xbf16>
    %c0_1 = arith.constant 0 : index
    %c0_2 = arith.constant 0 : index
    %1 = vector.load %arg1[%c0_1, %c0_2] : memref<200x9xbf16, #tpu.memory_space<vmem>>, vector<200x9xbf16>
    %cst = arith.constant dense<0.000000e+00> : vector<200x32xf32>
    %2 = tpu.matmul %1, %0, %cst {dimension_numbers = #tpu.dot_dimension_numbers<[1], [0], [0], [1], [0, 0, 1, 1], [], []>} : vector<200x9xbf16>, vector<9x32xbf16>, vector<200x32xf32> -> vector<200x32xf32>
    %c0_3 = arith.constant 0 : index
    %c0_4 = arith.constant 0 : index
    %3 = vector.load %arg2[%c0_3, %c0_4] : memref<200x9xbf16, #tpu.memory_space<vmem>>, vector<200x9xbf16>
    %cst_5 = arith.constant dense<0.000000e+00> : vector<200x32xf32>
    %4 = tpu.matmul %3, %0, %cst_5 {dimension_numbers = #tpu.dot_dimension_numbers<[1], [0], [0], [1], [0, 0, 1, 1], [], []>} : vector<200x9xbf16>, vector<9x32xbf16>, vector<200x32xf32> -> vector<200x32xf32>
    %5 = arith.maximumf %2, %4 : vector<200x32xf32>
    %c0_6 = arith.constant 0 : index
    %c0_7 = arith.constant 0 : index
    %6 = vector.load %arg3[%c0_6, %c0_7] : memref<200x9xbf16, #tpu.memory_space<vmem>>, vector<200x9xbf16>
    %cst_8 = arith.constant dense<0.000000e+00> : vector<200x32xf32>
    %7 = tpu.matmul %6, %0, %cst_8 {dimension_numbers = #tpu.dot_dimension_numbers<[1], [0], [0], [1], [0, 0, 1, 1], [], []>} : vector<200x9xbf16>, vector<9x32xbf16>, vector<200x32xf32> -> vector<200x32xf32>
    %c0_9 = arith.constant 0 : index
    %c0_10 = arith.constant 0 : index
    %8 = vector.load %arg4[%c0_9, %c0_10] : memref<200x9xbf16, #tpu.memory_space<vmem>>, vector<200x9xbf16>
    %cst_11 = arith.constant dense<0.000000e+00> : vector<200x32xf32>
    %9 = tpu.matmul %8, %0, %cst_11 {dimension_numbers = #tpu.dot_dimension_numbers<[1], [0], [0], [1], [0, 0, 1, 1], [], []>} : vector<200x9xbf16>, vector<9x32xbf16>, vector<200x32xf32> -> vector<200x32xf32>
    %10 = arith.maximumf %7, %9 : vector<200x32xf32>
    %11 = arith.maximumf %5, %10 : vector<200x32xf32>
    %c0_12 = arith.constant 0 : index
    %c0_13 = arith.constant 0 : index
    %12 = vector.load %arg6[%c0_12, %c0_13] : memref<1x32xf32, #tpu.memory_space<vmem>>, vector<1x32xf32>
    %13 = vector.broadcast %12 : vector<1x32xf32> to vector<200x32xf32>
    %14 = arith.addf %11, %13 : vector<200x32xf32>
    %cst_14 = arith.constant 0.000000e+00 : f32
    %15 = vector.broadcast %cst_14 : f32 to vector<200x32xf32>
    %16 = arith.maximumf %14, %15 : vector<200x32xf32>
    %17 = arith.truncf %16 : vector<200x32xf32> to vector<200x32xbf16>
    %c0_15 = arith.constant 0 : index
    %c0_16 = arith.constant 0 : index
    %18 = vector.load %arg7[%c0_15, %c0_16] : memref<200x32xbf16, #tpu.memory_space<vmem>>, vector<200x32xbf16>
    tpu.vector_store %arg7[%c0_15, %c0_16], %17 {strides = array<i32>} : memref<200x32xbf16, #tpu.memory_space<vmem>>, vector<200x32xbf16>,
    return
  }
  func.func @transform_0(%arg0: i32) -> (i32, i32) {
    %c0_i32 = arith.constant 0 : i32
    %c0_i32_0 = arith.constant 0 : i32
    return %arg0, %c0_i32 : i32, i32
  }
  func.func @transform_1(%arg0: i32) -> (i32, i32) {
    %c0_i32 = arith.constant 0 : i32
    %c0_i32_0 = arith.constant 0 : i32
    return %arg0, %c0_i32 : i32, i32
  }
  func.func @transform_2(%arg0: i32) -> (i32, i32) {
    %c0_i32 = arith.constant 0 : i32
    %c0_i32_0 = arith.constant 0 : i32
    return %arg0, %c0_i32 : i32, i32
  }
  func.func @transform_3(%arg0: i32) -> (i32, i32) {
    %c0_i32 = arith.constant 0 : i32
    %c0_i32_0 = arith.constant 0 : i32
    return %arg0, %c0_i32 : i32, i32
  }
  func.func @transform_4(%arg0: i32) -> (i32, i32) {
    %c0_i32 = arith.constant 0 : i32
    %c0_i32_0 = arith.constant 0 : i32
    %c0_i32_1 = arith.constant 0 : i32
    return %c0_i32, %c0_i32_0 : i32, i32
  }
  func.func @transform_5(%arg0: i32) -> (i32, i32) {
    %c0_i32 = arith.constant 0 : i32
    %c0_i32_0 = arith.constant 0 : i32
    %c0_i32_1 = arith.constant 0 : i32
    return %c0_i32, %c0_i32_0 : i32, i32
  }
  func.func @transform_6(%arg0: i32) -> (i32, i32) {
    %c0_i32 = arith.constant 0 : i32
    %c0_i32_0 = arith.constant 0 : i32
    return %arg0, %c0_i32 : i32, i32
  }
}

module attributes {stable_mosaic.version = 11 : i64} {
  func.func @_conv_bn_relu_pool_kernel(%arg0: i32, %arg1: memref<40x288xbf16, #tpu.memory_space<vmem>>, %arg2: memref<40x288xbf16, #tpu.memory_space<vmem>>, %arg3: memref<40x288xbf16, #tpu.memory_space<vmem>>, %arg4: memref<40x288xbf16, #tpu.memory_space<vmem>>, %arg5: memref<288x64xbf16, #tpu.memory_space<vmem>>, %arg6: memref<1x64xf32, #tpu.memory_space<vmem>>, %arg7: memref<40x64xbf16, #tpu.memory_space<vmem>>) attributes {dimension_semantics = [#tpu.dimension_semantics<parallel>], iteration_bounds = array<i64: 2>, scalar_prefetch = 0 : i64, scratch_operands = 0 : i64, tpu.core_type = #tpu.core_type<tc>, window_params = [{transform_indices = @transform_0, window_bounds = array<i64: 40, 288>}, {transform_indices = @transform_1, window_bounds = array<i64: 40, 288>}, {transform_indices = @transform_2, window_bounds = array<i64: 40, 288>}, {transform_indices = @transform_3, window_bounds = array<i64: 40, 288>}, {pipeline_mode = #tpu.pipeline_mode<synchronous>, transform_indices = @transform_4, window_bounds = array<i64: 288, 64>}, {pipeline_mode = #tpu.pipeline_mode<synchronous>, transform_indices = @transform_5, window_bounds = array<i64: 1, 64>}, {transform_indices = @transform_6, window_bounds = array<i64: 40, 64>}]} {
    %c0 = arith.constant 0 : index
    %c0_0 = arith.constant 0 : index
    %0 = vector.load %arg5[%c0, %c0_0] : memref<288x64xbf16, #tpu.memory_space<vmem>>, vector<288x64xbf16>
    %c0_1 = arith.constant 0 : index
    %c0_2 = arith.constant 0 : index
    %1 = vector.load %arg1[%c0_1, %c0_2] : memref<40x288xbf16, #tpu.memory_space<vmem>>, vector<40x288xbf16>
    %cst = arith.constant dense<0.000000e+00> : vector<40x64xf32>
    %2 = tpu.matmul %1, %0, %cst {dimension_numbers = #tpu.dot_dimension_numbers<[1], [0], [0], [1], [0, 0, 1, 1], [], []>} : vector<40x288xbf16>, vector<288x64xbf16>, vector<40x64xf32> -> vector<40x64xf32>
    %c0_3 = arith.constant 0 : index
    %c0_4 = arith.constant 0 : index
    %3 = vector.load %arg2[%c0_3, %c0_4] : memref<40x288xbf16, #tpu.memory_space<vmem>>, vector<40x288xbf16>
    %cst_5 = arith.constant dense<0.000000e+00> : vector<40x64xf32>
    %4 = tpu.matmul %3, %0, %cst_5 {dimension_numbers = #tpu.dot_dimension_numbers<[1], [0], [0], [1], [0, 0, 1, 1], [], []>} : vector<40x288xbf16>, vector<288x64xbf16>, vector<40x64xf32> -> vector<40x64xf32>
    %5 = arith.maximumf %2, %4 : vector<40x64xf32>
    %c0_6 = arith.constant 0 : index
    %c0_7 = arith.constant 0 : index
    %6 = vector.load %arg3[%c0_6, %c0_7] : memref<40x288xbf16, #tpu.memory_space<vmem>>, vector<40x288xbf16>
    %cst_8 = arith.constant dense<0.000000e+00> : vector<40x64xf32>
    %7 = tpu.matmul %6, %0, %cst_8 {dimension_numbers = #tpu.dot_dimension_numbers<[1], [0], [0], [1], [0, 0, 1, 1], [], []>} : vector<40x288xbf16>, vector<288x64xbf16>, vector<40x64xf32> -> vector<40x64xf32>
    %c0_9 = arith.constant 0 : index
    %c0_10 = arith.constant 0 : index
    %8 = vector.load %arg4[%c0_9, %c0_10] : memref<40x288xbf16, #tpu.memory_space<vmem>>, vector<40x288xbf16>
    %cst_11 = arith.constant dense<0.000000e+00> : vector<40x64xf32>
    %9 = tpu.matmul %8, %0, %cst_11 {dimension_numbers = #tpu.dot_dimension_numbers<[1], [0], [0], [1], [0, 0, 1, 1], [], []>} : vector<40x288xbf16>, vector<288x64xbf16>, vector<40x64xf32> -> vector<40x64xf32>
    %10 = arith.maximumf %7, %9 : vector<40x64xf32>
    %11 = arith.maximumf %5, %10 : vector<40x64xf32>
    %c0_12 = arith.constant 0 : index
    %c0_13 = arith.constant 0 : index
    %12 = vector.load %arg6[%c0_12, %c0_13] : memref<1x64xf32, #tpu.memory_space<vmem>>, vector<1x64xf32>
    %13 = vector.broadcast %12 : vector<1x64xf32> to vector<40x64xf32>
    %14 = arith.addf %11, %13 : vector<40x64xf32>
    %cst_14 = arith.constant 0.000000e+00 : f32
    %15 = vector.broadcast %cst_14 : f32 to vector<40x64xf32>
    %16 = arith.maximumf %14, %15 : vector<40x64xf32>
    %17 = arith.truncf %16 : vector<40x64xf32> to vector<40x64xbf16>
    %c0_15 = arith.constant 0 : index
    %c0_16 = arith.constant 0 : index
    %18 = vector.load %arg7[%c0_15, %c0_16] : memref<40x64xbf16, #tpu.memory_space<vmem>>, vector<40x64xbf16>
    tpu.vector_store %arg7[%c0_15, %c0_16], %17 {strides = array<i32>} : memref<40x64xbf16, #tpu.memory_space<vmem>>, vector<40x64xbf16>,
    return
  }
  func.func @transform_0(%arg0: i32) -> (i32, i32) {
    %c0_i32 = arith.constant 0 : i32
    %c0_i32_0 = arith.constant 0 : i32
    return %arg0, %c0_i32 : i32, i32
  }
  func.func @transform_1(%arg0: i32) -> (i32, i32) {
    %c0_i32 = arith.constant 0 : i32
    %c0_i32_0 = arith.constant 0 : i32
    return %arg0, %c0_i32 : i32, i32
  }
  func.func @transform_2(%arg0: i32) -> (i32, i32) {
    %c0_i32 = arith.constant 0 : i32
    %c0_i32_0 = arith.constant 0 : i32
    return %arg0, %c0_i32 : i32, i32
  }
  func.func @transform_3(%arg0: i32) -> (i32, i32) {
    %c0_i32 = arith.constant 0 : i32
    %c0_i32_0 = arith.constant 0 : i32
    return %arg0, %c0_i32 : i32, i32
  }
  func.func @transform_4(%arg0: i32) -> (i32, i32) {
    %c0_i32 = arith.constant 0 : i32
    %c0_i32_0 = arith.constant 0 : i32
    %c0_i32_1 = arith.constant 0 : i32
    return %c0_i32, %c0_i32_0 : i32, i32
  }
  func.func @transform_5(%arg0: i32) -> (i32, i32) {
    %c0_i32 = arith.constant 0 : i32
    %c0_i32_0 = arith.constant 0 : i32
    %c0_i32_1 = arith.constant 0 : i32
    return %c0_i32, %c0_i32_0 : i32, i32
  }
  func.func @transform_6(%arg0: i32) -> (i32, i32) {
    %c0_i32 = arith.constant 0 : i32
    %c0_i32_0 = arith.constant 0 : i32
    return %arg0, %c0_i32 : i32, i32
  }
}

module attributes {stable_mosaic.version = 11 : i64} {
  func.func @_fc_stack_kernel(%arg0: i32, %arg1: memref<2x2304xbf16, #tpu.memory_space<vmem>>, %arg2: memref<2304x640xbf16, #tpu.memory_space<vmem>>, %arg3: memref<1x640xf32, #tpu.memory_space<vmem>>, %arg4: memref<640x128xbf16, #tpu.memory_space<vmem>>, %arg5: memref<1x128xf32, #tpu.memory_space<vmem>>, %arg6: memref<128x128xbf16, #tpu.memory_space<vmem>>, %arg7: memref<1x128xf32, #tpu.memory_space<vmem>>, %arg8: memref<2x128xf32, #tpu.memory_space<vmem>>) attributes {dimension_semantics = [#tpu.dimension_semantics<parallel>], iteration_bounds = array<i64: 1>, scalar_prefetch = 0 : i64, scratch_operands = 0 : i64, tpu.core_type = #tpu.core_type<tc>, window_params = [{transform_indices = @transform_0, window_bounds = array<i64: 2, 2304>}, {pipeline_mode = #tpu.pipeline_mode<synchronous>, transform_indices = @transform_1, window_bounds = array<i64: 2304, 640>}, {pipeline_mode = #tpu.pipeline_mode<synchronous>, transform_indices = @transform_2, window_bounds = array<i64: 1, 640>}, {pipeline_mode = #tpu.pipeline_mode<synchronous>, transform_indices = @transform_3, window_bounds = array<i64: 640, 128>}, {pipeline_mode = #tpu.pipeline_mode<synchronous>, transform_indices = @transform_4, window_bounds = array<i64: 1, 128>}, {pipeline_mode = #tpu.pipeline_mode<synchronous>, transform_indices = @transform_5, window_bounds = array<i64: 128, 128>}, {pipeline_mode = #tpu.pipeline_mode<synchronous>, transform_indices = @transform_6, window_bounds = array<i64: 1, 128>}, {transform_indices = @transform_7, window_bounds = array<i64: 2, 128>}]} {
    %c0 = arith.constant 0 : index
    %c0_0 = arith.constant 0 : index
    %0 = vector.load %arg1[%c0, %c0_0] : memref<2x2304xbf16, #tpu.memory_space<vmem>>, vector<2x2304xbf16>
    %c0_1 = arith.constant 0 : index
    %c0_2 = arith.constant 0 : index
    %1 = vector.load %arg2[%c0_1, %c0_2] : memref<2304x640xbf16, #tpu.memory_space<vmem>>, vector<2304x640xbf16>
    %cst = arith.constant dense<0.000000e+00> : vector<2x640xf32>
    %2 = tpu.matmul %0, %1, %cst {dimension_numbers = #tpu.dot_dimension_numbers<[1], [0], [0], [1], [0, 0, 1, 1], [], []>} : vector<2x2304xbf16>, vector<2304x640xbf16>, vector<2x640xf32> -> vector<2x640xf32>
    %c0_3 = arith.constant 0 : index
    %c0_4 = arith.constant 0 : index
    %3 = vector.load %arg3[%c0_3, %c0_4] : memref<1x640xf32, #tpu.memory_space<vmem>>, vector<1x640xf32>
    %4 = vector.broadcast %3 : vector<1x640xf32> to vector<2x640xf32>
    %5 = arith.addf %2, %4 : vector<2x640xf32>
    %6 = arith.truncf %5 : vector<2x640xf32> to vector<2x640xbf16>
    %c0_5 = arith.constant 0 : index
    %c0_6 = arith.constant 0 : index
    %7 = vector.load %arg4[%c0_5, %c0_6] : memref<640x128xbf16, #tpu.memory_space<vmem>>, vector<640x128xbf16>
    %cst_7 = arith.constant dense<0.000000e+00> : vector<2x128xf32>
    %8 = tpu.matmul %6, %7, %cst_7 {dimension_numbers = #tpu.dot_dimension_numbers<[1], [0], [0], [1], [0, 0, 1, 1], [], []>} : vector<2x640xbf16>, vector<640x128xbf16>, vector<2x128xf32> -> vector<2x128xf32>
    %c0_8 = arith.constant 0 : index
    %c0_9 = arith.constant 0 : index
    %9 = vector.load %arg5[%c0_8, %c0_9] : memref<1x128xf32, #tpu.memory_space<vmem>>, vector<1x128xf32>
    %10 = vector.broadcast %9 : vector<1x128xf32> to vector<2x128xf32>
    %11 = arith.addf %8, %10 : vector<2x128xf32>
    %12 = arith.truncf %11 : vector<2x128xf32> to vector<2x128xbf16>
    %c0_10 = arith.constant 0 : index
    %c0_11 = arith.constant 0 : index
    %13 = vector.load %arg6[%c0_10, %c0_11] : memref<128x128xbf16, #tpu.memory_space<vmem>>, vector<128x128xbf16>
    %cst_12 = arith.constant dense<0.000000e+00> : vector<2x128xf32>
    %14 = tpu.matmul %12, %13, %cst_12 {dimension_numbers = #tpu.dot_dimension_numbers<[1], [0], [0], [1], [0, 0, 1, 1], [], []>} : vector<2x128xbf16>, vector<128x128xbf16>, vector<2x128xf32> -> vector<2x128xf32>
    %c0_13 = arith.constant 0 : index
    %c0_14 = arith.constant 0 : index
    %15 = vector.load %arg7[%c0_13, %c0_14] : memref<1x128xf32, #tpu.memory_space<vmem>>, vector<1x128xf32>
    %16 = vector.broadcast %15 : vector<1x128xf32> to vector<2x128xf32>
    %17 = arith.addf %14, %16 : vector<2x128xf32>
    %c0_15 = arith.constant 0 : index
    %c0_16 = arith.constant 0 : index
    %18 = vector.load %arg8[%c0_15, %c0_16] : memref<2x128xf32, #tpu.memory_space<vmem>>, vector<2x128xf32>
    tpu.vector_store %arg8[%c0_15, %c0_16], %17 {strides = array<i32>} : memref<2x128xf32, #tpu.memory_space<vmem>>, vector<2x128xf32>,
    return
  }
  func.func @transform_0(%arg0: i32) -> (i32, i32) {
    %c0_i32 = arith.constant 0 : i32
    %c0_i32_0 = arith.constant 0 : i32
    return %arg0, %c0_i32 : i32, i32
  }
  func.func @transform_1(%arg0: i32) -> (i32, i32) {
    %c0_i32 = arith.constant 0 : i32
    %c0_i32_0 = arith.constant 0 : i32
    %c0_i32_1 = arith.constant 0 : i32
    return %c0_i32, %c0_i32_0 : i32, i32
  }
  func.func @transform_2(%arg0: i32) -> (i32, i32) {
    %c0_i32 = arith.constant 0 : i32
    %c0_i32_0 = arith.constant 0 : i32
    %c0_i32_1 = arith.constant 0 : i32
    return %c0_i32, %c0_i32_0 : i32, i32
  }
  func.func @transform_3(%arg0: i32) -> (i32, i32) {
    %c0_i32 = arith.constant 0 : i32
    %c0_i32_0 = arith.constant 0 : i32
    %c0_i32_1 = arith.constant 0 : i32
    return %c0_i32, %c0_i32_0 : i32, i32
  }
  func.func @transform_4(%arg0: i32) -> (i32, i32) {
    %c0_i32 = arith.constant 0 : i32
    %c0_i32_0 = arith.constant 0 : i32
    %c0_i32_1 = arith.constant 0 : i32
    return %c0_i32, %c0_i32_0 : i32, i32
  }
  func.func @transform_5(%arg0: i32) -> (i32, i32) {
    %c0_i32 = arith.constant 0 : i32
    %c0_i32_0 = arith.constant 0 : i32
    %c0_i32_1 = arith.constant 0 : i32
    return %c0_i32, %c0_i32_0 : i32, i32
  }
  func.func @transform_6(%arg0: i32) -> (i32, i32) {
    %c0_i32 = arith.constant 0 : i32
    %c0_i32_0 = arith.constant 0 : i32
    %c0_i32_1 = arith.constant 0 : i32
    return %c0_i32, %c0_i32_0 : i32, i32
  }
  func.func @transform_7(%arg0: i32) -> (i32, i32) {
    %c0_i32 = arith.constant 0 : i32
    %c0_i32_0 = arith.constant 0 : i32
    return %arg0, %c0_i32 : i32, i32
  }
}

</mosaic_0001>

<bundles_post_ra>
// kernel: squeeze.8
= control target key start
LH: loop header
LB: loop body
LE: loop exit
PB: predicated region body
PF: predicated region fallthrough
CT: control target
= control target key end

     0   :  { %vm651_vm0 = vcmask 15360   ;;  %vm819_vm1 = vcmask 48128   ;;  %vm735_vm2 = vcmask 31744   ;;  %s2201_s5 = smov 126   ;;  %s2202_s10 = smov 122   ;;  %vm545_vm3 = vcmask 1041409   ;;  %s2623_s0 = inlined_call_operand.vmem [shape: bf16[2,14,1,14,1,9], index: 0, kind: input, shape index: {}]   ;;  %s2624_s1 = inlined_call_operand.vmem [shape: bf16[392,9], index: 1, kind: output, shape index: {}]  }
   0x1   :  { %v2020_v0 = vld [vmem:[%s2623_s0 + $0x80] sm:$0xff]   ;;  %v2019_v1 = vld [vmem:[%s2623_s0 + $0x88] sm:$0xff]   ;;  %v2247_v5 = vld [vmem:[%s2623_s0 + $0x70] sm:$0xff]   ;;  %s2203_s13 = smov 124   ;;  %vm549_vm4 = vcmask 1042434   ;;  %vm553_vm5 = vcmask 1043459  }
   0x2   :  { %v1934_v2 = vunpack.c.h.bf16 %v2020_v0  ;;  %v1933_v3 = vunpack.c.l.bf16 %v2020_v0  ;;  %v1930_v4 = vunpack.c.h.bf16 %v2019_v1  ;;  %v2252_v6 = vld [vmem:[%s2623_s0 + $0x60] sm:$0xff]   ;;  %v1929_v7 = vunpack.c.l.bf16 %v2019_v1  ;;  %v2257_v8 = vld [vmem:[%s2623_s0 + $0x50] sm:$0xff]   ;;  %v2293_v20 = vld [vmem:[%s2623_s0 + $0x78] sm:$0xff]   ;;  %s2205_s16 = smov 108   ;;  %s2206_s17 = smov 110  }
   0x3   :  { %v1942_v9 = vunpack.c.h.bf16 %v2247_v5  ;;  %v2263_v10 = vld [vmem:[%s2623_s0 + $0x40] sm:$0xff]   ;;  %v1950_v11 = vunpack.c.h.bf16 %v2252_v6  ;;  %v2269_v12 = vld [vmem:[%s2623_s0 + $0x30] sm:$0xff]   ;;  %v1958_v13 = vunpack.c.h.bf16 %v2257_v8  ;;  %v2299_v22 = vld [vmem:[%s2623_s0 + $0x68] sm:$0xff]   ;;  %v1938_v28 = vunpack.c.h.bf16 %v2293_v20  ;;  %s2207_s18 = smov 94   ;;  %s2208_s19 = smov 96  }
   0x4   :  { %48 = vst [vmem:[#allocation1 + $0x108] sm:$0xff] %v1934_v2  ;;  %v2275_v14 = vld [vmem:[%s2623_s0 + $0x20] sm:$0xff]   ;;  %v1966_v15 = vunpack.c.h.bf16 %v2263_v10  ;;  %v2281_v16 = vld [vmem:[%s2623_s0 + $0x10] sm:$0xff]   ;;  %v1974_v17 = vunpack.c.h.bf16 %v2269_v12  ;;  %v2305_v26 = vld [vmem:[%s2623_s0 + $0x58] sm:$0xff]   ;;  %v1946_v32 = vunpack.c.h.bf16 %v2299_v22  ;;  %v1937_v51 = vunpack.c.l.bf16 %v2293_v20  ;;  %s2209_s20 = smov 98   ;;  %s2210_s21 = smov 80  }
   0x5   :  { %63 = vst [vmem:[#allocation1 + $0x100] sm:$0xff] %v1933_v3  ;;  %v2287_v18 = vld [vmem:[%s2623_s0] sm:$0xff]   ;;  %v1982_v19 = vunpack.c.h.bf16 %v2275_v14  ;;  %v1990_v21 = vunpack.c.h.bf16 %v2281_v16  ;;  %v2311_v29 = vld [vmem:[%s2623_s0 + $0x48] sm:$0xff]   ;;  %v2318_v33 = vld [vmem:[%s2623_s0 + $0x38] sm:$0xff]   ;;  %v1954_v37 = vunpack.c.h.bf16 %v2305_v26  ;;  %v1945_v54 = vunpack.c.l.bf16 %v2299_v22  ;;  %s2211_s22 = smov 82   ;;  %s2212_s23 = smov 84  }
   0x6   :  { %18 = vst [vmem:[#allocation1 + $0x118] sm:$0xff] %v1930_v4  ;;  %v1998_v25 = vunpack.c.h.bf16 %v2287_v18  ;;  %v2325_v38 = vld [vmem:[%s2623_s0 + $0x28] sm:$0xff]   ;;  %v1962_v40 = vunpack.c.h.bf16 %v2311_v29  ;;  %v2333_v41 = vld [vmem:[%s2623_s0 + $0x18] sm:$0xff]   ;;  %v1970_v42 = vunpack.c.h.bf16 %v2318_v33  ;;  %v1953_v57 = vunpack.c.l.bf16 %v2305_v26  ;;  %s2213_s24 = smov 66   ;;  %s2214_s25 = smov 68  }
   0x7   :  { %33 = vst [vmem:[#allocation1 + $0x110] sm:$0xff] %v1929_v7  ;;  %v2340_v43 = vld [vmem:[%s2623_s0 + $0x8] sm:$0xff]   ;;  %v1978_v44 = vunpack.c.h.bf16 %v2325_v38  ;;  %v1986_v45 = vunpack.c.h.bf16 %v2333_v41  ;;  %vm557_vm6 = vcmask 1044484   ;;  %v1961_v62 = vunpack.c.l.bf16 %v2311_v29  ;;  %s2204_s0 = smov 112   ;;  %s2215_s26 = smov 70  }
   0x8   :  { %108 = vst [vmem:[#allocation1 + $0xe8] sm:$0xff] %v1942_v9  ;;  %v1994_v46 = vunpack.c.h.bf16 %v2340_v43  ;;  %vm561_vm7 = vcmask 1045509   ;;  %v1969_v3 = vunpack.c.l.bf16 %v2318_v33  ;;  %vm565_vm8 = vcmask 1046534   ;;  %s2216_s27 = smov 52   ;;  %s2217_s28 = smov 54  }
   0x9   :  { %168 = vst [vmem:[#allocation1 + $0xc8] sm:$0xff] %v1950_v11  ;;  %vm569_vm9 = vcmask 1047559   ;;  %v1941_v5 = vunpack.c.l.bf16 %v2247_v5  ;;  %v1949_v6 = vunpack.c.l.bf16 %v2252_v6  ;;  %v1957_v8 = vunpack.c.l.bf16 %v2257_v8  ;;  %s2218_s29 = smov 56   ;;  %s2219_s30 = smov 38  }
   0xa   :  { %228 = vst [vmem:[#allocation1 + $0xa8] sm:$0xff] %v1958_v13  ;;  %v1977_v13 = vunpack.c.l.bf16 %v2325_v38  ;;  %v1981_v14 = vunpack.c.l.bf16 %v2275_v14  ;;  %v1989_v16 = vunpack.c.l.bf16 %v2281_v16  ;;  %s2220_s2 = smov 40   ;;  %s2221_s3 = smov 42   ;;  %vm777_vm10 = vcmask 64512  }
   0xb   :  { %v648_v23 = vld [vmem:[#allocation1 + $0x109] sm:$0x1]   ;;  %288 = vst [vmem:[#allocation1 + $0x88] sm:$0xff] %v1966_v15  ;;  %s2222_s4 = smov 24   ;;  %s2224_s6 = smov 26   ;;  %vm571_vm11 = vcmask 113664  }
   0xc   :  { %v650_v24 = vld [vmem:[#allocation1 + $0x109] sm:$0x1]   ;;  %348 = vst [vmem:[#allocation1 + $0x68] sm:$0xff] %v1974_v17  ;;  %s2225_s7 = smov 10   ;;  %s2226_s8 = smov 14   ;;  %vm610_vm12 = vcmask 97280  }
   0xd   :  { %v652_v27 = vsel %vm651_vm0, %v650_v24, %v648_v23  ;;  %v816_v30 = vld [vmem:[#allocation1 + $0x11d] sm:$0x1]   ;;  %408 = vst [vmem:[#allocation1 + $0x48] sm:$0xff] %v1982_v19  ;;  %v1993_v24 = vunpack.c.l.bf16 %v2340_v43  ;;  %s2227_s9 = smov 12   ;;  %vm645_vm13 = vcmask 1048560   ;;  %vm693_vm14 = vcmask 80896  }
   0xe   :  { %653 = vrot.lane.b32.xlu0 %v652_v27, %s2201_s5  ;;  %v818_v31 = vld [vmem:[#allocation1 + $0x11d] sm:$0x1]   ;;  %v732_v35 = vld [vmem:[#allocation1 + $0x114] sm:$0x1]   ;;  %468 = vst [vmem:[#allocation1 + $0x28] sm:$0xff] %v1990_v21  ;;  %v1985_v21 = vunpack.c.l.bf16 %v2333_v41  ;;  %vm728_vm15 = vcmask 1048544  }
   0xf   :  { %v820_v34 = vsel %vm819_vm1, %v818_v31, %v816_v30  ;;  %v734_v36 = vld [vmem:[#allocation1 + $0x114] sm:$0x1]   ;;  %528 = vst [vmem:[#allocation1 + $0x8] sm:$0xff] %v1998_v25  ;;  %v605_v17 = vld [vmem:[#allocation1 + $0xe2] sm:$0x80]   ;;  %vm812_vm0 = vcmask 1048528  }
  0x10   :  { %821 = vrot.lane.b32.xlu2 %v820_v34, %s2202_s10  ;;  %v736_v39 = vsel %vm735_vm2, %v734_v36, %v732_v35  ;;  %78 = vst [vmem:[#allocation1 + $0xf8] sm:$0xff] %v1938_v28  ;;  %v601_v7 = vld [vmem:[#allocation1 + $0xc3] sm:$0x40]   ;;  %vm944_vm1 = vcmask 999264   ;;  %vm1069_vm2 = vcmask 884464  }
  0x11   :  { %737 = vrot.lane.b32.xlu1 %v736_v39, %s2203_s13  ;;  %138 = vst [vmem:[#allocation1 + $0xd8] sm:$0xff] %v1946_v32  ;;  %v597_v0 = vld [vmem:[#allocation1 + $0xa4] sm:$0x20]  }
  0x12   :  { %198 = vst [vmem:[#allocation1 + $0xb8] sm:$0xff] %v1954_v37  ;;  %v593_v59 = vld [vmem:[#allocation1 + $0x85] sm:$0x10]  }
  0x13   :  { %258 = vst [vmem:[#allocation1 + $0x98] sm:$0xff] %v1962_v40  ;;  %v589_v48 = vld [vmem:[#allocation1 + $0x66] sm:$0x8]  }
  0x14   :  { %v585_v47 = vld [vmem:[#allocation1 + $0x47] sm:$0x4]   ;;  %318 = vst [vmem:[#allocation1 + $0x78] sm:$0xff] %v1970_v42 }
  0x15   :  { %v620_v49 = vld [vmem:[#allocation1 + $0x47] sm:$0x4]   ;;  %378 = vst [vmem:[#allocation1 + $0x58] sm:$0xff] %v1978_v44 }
  0x16   :  { %v624_v50 = vld [vmem:[#allocation1 + $0x66] sm:$0x8]   ;;  %438 = vst [vmem:[#allocation1 + $0x38] sm:$0xff] %v1986_v45 }
  0x17   :  { %v581_v52 = vld [vmem:[#allocation1 + $0x28] sm:$0x2]   ;;  %498 = vst [vmem:[#allocation1 + $0x18] sm:$0xff] %v1994_v46  ;;  %v830_v46 = vld [vmem:[#allocation1 + $0x8] sm:$0x1]  }
  0x18   :  { %v616_v53 = vld [vmem:[#allocation1 + $0x28] sm:$0x2]   ;;  %93 = vst [vmem:[#allocation1 + $0xf0] sm:$0xff] %v1937_v51  ;;  %v832_v51 = vld [vmem:[#allocation1 + $0x27] sm:$0x2]  }
  0x19   :  { %v579_v55 = vld [vmem:[#allocation1 + $0x9] sm:$0x1]   ;;  %153 = vst [vmem:[#allocation1 + $0xd0] sm:$0xff] %v1945_v54  ;;  %v764_v43 = vld [vmem:[#allocation1 + $0xb8] sm:$0x20]  }
  0x1a   :  { %v614_v56 = vld [vmem:[#allocation1 + $0x9] sm:$0x1]   ;;  %v583_v58 = vsel %vm545_vm3, %v581_v52, %v579_v55  ;;  %213 = vst [vmem:[#allocation1 + $0xb0] sm:$0xff] %v1953_v57  ;;  %v760_v39 = vld [vmem:[#allocation1 + $0x99] sm:$0x10]  }
  0x1b   :  { %v618_v60 = vsel %vm545_vm3, %v616_v53, %v614_v56  ;;  %v628_v61 = vld [vmem:[#allocation1 + $0x85] sm:$0x10]   ;;  %v587_v63 = vsel %vm549_vm4, %v585_v47, %v583_v58  ;;  %273 = vst [vmem:[#allocation1 + $0x90] sm:$0xff] %v1961_v62  ;;  %v756_v28 = vld [vmem:[#allocation1 + $0x7a] sm:$0x8]   ;;  %v834_v56 = vsel %vm545_vm3, %v832_v51, %v830_v46 }
  0x1c   :  { %v622_v1 = vsel %vm549_vm4, %v620_v49, %v618_v60  ;;  %v632_v2 = vld [vmem:[#allocation1 + $0xa4] sm:$0x20]   ;;  %v591_v4 = vsel %vm553_vm5, %v589_v48, %v587_v63  ;;  %v752_v27 = vld [vmem:[#allocation1 + $0x5b] sm:$0x4]   ;;  %333 = vst [vmem:[#allocation1 + $0x70] sm:$0xff] %v1969_v3 }
  0x1d   :  { %v626_v9 = vsel %vm553_vm5, %v624_v50, %v622_v1  ;;  %v636_v11 = vld [vmem:[#allocation1 + $0xc3] sm:$0x40]   ;;  %v595_v15 = vsel %vm557_vm6, %v593_v59, %v591_v4  ;;  %v787_v29 = vld [vmem:[#allocation1 + $0x5b] sm:$0x4]   ;;  %393 = vst [vmem:[#allocation1 + $0x50] sm:$0xff] %v1977_v13 }
  0x1e   :  { %v630_v19 = vsel %vm557_vm6, %v628_v61, %v626_v9  ;;  %v640_v20 = vld [vmem:[#allocation1 + $0xe2] sm:$0x80]   ;;  %v599_v22 = vsel %vm561_vm7, %v597_v0, %v595_v15  ;;  %v791_v30 = vld [vmem:[#allocation1 + $0x7a] sm:$0x8]   ;;  %453 = vst [vmem:[#allocation1 + $0x30] sm:$0xff] %v1985_v21 }
  0x1f   :  { %v634_v23 = vsel %vm561_vm7, %v632_v2, %v630_v19  ;;  %v603_v25 = vsel %vm565_vm8, %v601_v7, %v599_v22  ;;  %v748_v33 = vld [vmem:[#allocation1 + $0x3c] sm:$0x2]   ;;  %513 = vst [vmem:[#allocation1 + $0x10] sm:$0xff] %v1993_v24  ;;  %v836_v57 = vld [vmem:[#allocation1 + $0x46] sm:$0x4]  }
  0x20   :  { %v638_v26 = vsel %vm565_vm8, %v636_v11, %v634_v23  ;;  %v607_v31 = vsel %vm569_vm9, %v605_v17, %v603_v25  ;;  %v783_v34 = vld [vmem:[#allocation1 + $0x3c] sm:$0x2]   ;;  %v838_v60 = vsel %vm549_vm4, %v836_v57, %v834_v56  ;;  %v840_v61 = vld [vmem:[#allocation1 + $0x65] sm:$0x8]   ;;  %v684_v46 = vld [vmem:[#allocation1 + $0xce] sm:$0x40]  }
  0x21   :  { %v642_v32 = vsel %vm569_vm9, %v640_v20, %v638_v26  ;;  %v746_v36 = vld [vmem:[#allocation1 + $0x1d] sm:$0x1]   ;;  %v842_v4 = vsel %vm553_vm5, %v840_v61, %v838_v60  ;;  %v844_v7 = vld [vmem:[#allocation1 + $0x84] sm:$0x10]   ;;  %v680_v24 = vld [vmem:[#allocation1 + $0xaf] sm:$0x20]  }
  0x22   :  { %v2066_v35 = vpack.i.bf16 %v642_v32, %v607_v31  ;;  %v781_v37 = vld [vmem:[#allocation1 + $0x1d] sm:$0x1]   ;;  %v750_v38 = vsel %vm545_vm3, %v748_v33, %v746_v36  ;;  %v676_v15 = vld [vmem:[#allocation1 + $0x90] sm:$0x10]   ;;  %v846_v20 = vsel %vm557_vm6, %v844_v7, %v842_v4  ;;  %v848_v21 = vld [vmem:[#allocation1 + $0xa3] sm:$0x20]   ;;  %v1965_v36 = vunpack.c.l.bf16 %v2263_v10 }
  0x23   :  { %v785_v40 = vsel %vm545_vm3, %v783_v34, %v781_v37  ;;  %v795_v41 = vld [vmem:[#allocation1 + $0x99] sm:$0x10]   ;;  %v754_v42 = vsel %vm549_vm4, %v752_v27, %v750_v38  ;;  %v672_v1 = vld [vmem:[#allocation1 + $0x71] sm:$0x8]   ;;  %v850_v27 = vsel %vm561_vm7, %v848_v21, %v846_v20  ;;  %v856_v33 = vld [vmem:[#allocation1 + $0xe1] sm:$0x80]   ;;  %v1997_v10 = vunpack.c.l.bf16 %v2287_v18 }
  0x24   :  { %2067 = vrot.lane.b32.xlu0 %v2066_v35, %s2201_s5  ;;  %v789_v44 = vsel %vm549_vm4, %v787_v29, %v785_v40  ;;  %v799_v45 = vld [vmem:[#allocation1 + $0xb8] sm:$0x20]   ;;  %v758_v47 = vsel %vm553_vm5, %v756_v28, %v754_v42  ;;  %v668_v0 = vld [vmem:[#allocation1 + $0x52] sm:$0x4]   ;;  %v852_v28 = vld [vmem:[#allocation1 + $0xc2] sm:$0x40]   ;;  %v1973_v29 = vunpack.c.l.bf16 %v2269_v12 }
  0x25   :  { %v768_v48 = vld [vmem:[#allocation1 + $0xd7] sm:$0x40]   ;;  %v793_v49 = vsel %vm553_vm5, %v791_v30, %v789_v44  ;;  %v762_v52 = vsel %vm557_vm6, %v760_v39, %v758_v47  ;;  %v703_v2 = vld [vmem:[#allocation1 + $0x52] sm:$0x4]   ;;  %v854_v32 = vsel %vm565_vm8, %v852_v28, %v850_v27  ;;  %v864_v34 = vld [vmem:[#allocation1 + $0x108] sm:$0x1]  }
  0x26   :  { %v803_v50 = vld [vmem:[#allocation1 + $0xd7] sm:$0x40]   ;;  %v797_v54 = vsel %vm557_vm6, %v795_v41, %v793_v49  ;;  %v766_v58 = vsel %vm561_vm7, %v764_v43, %v762_v52  ;;  %v707_v3 = vld [vmem:[#allocation1 + $0x71] sm:$0x8]   ;;  %v913_v35 = vld [vmem:[#allocation1 + $0x1c] sm:$0x1]   ;;  %v858_v41 = vsel %vm569_vm9, %v856_v33, %v854_v32 }
  0x27   :  { %v772_v53 = vld [vmem:[#allocation1 + $0xf6] sm:$0x80]   ;;  %v801_v59 = vsel %vm561_vm7, %v799_v45, %v797_v54  ;;  %v770_v62 = vsel %vm565_vm8, %v768_v48, %v766_v58  ;;  %v664_v13 = vld [vmem:[#allocation1 + $0x33] sm:$0x2]   ;;  %v915_v42 = vld [vmem:[#allocation1 + $0x3b] sm:$0x2]   ;;  %v2081_v49 = vpack.i.bf16 %v864_v34, %v858_v41 }
  0x28   :  { %v807_v55 = vld [vmem:[#allocation1 + $0xf6] sm:$0x80]   ;;  %v805_v63 = vsel %vm565_vm8, %v803_v50, %v801_v59  ;;  %v774_v9 = vsel %vm569_vm9, %v772_v53, %v770_v62  ;;  %v699_v17 = vld [vmem:[#allocation1 + $0x33] sm:$0x2]   ;;  %v919_v43 = vld [vmem:[#allocation1 + $0x5a] sm:$0x4]   ;;  %v917_v50 = vsel %vm545_vm3, %v915_v42, %v913_v35 }
  0x29   :  { %v809_v11 = vsel %vm569_vm9, %v807_v55, %v805_v63  ;;  %v711_v19 = vld [vmem:[#allocation1 + $0x90] sm:$0x10]   ;;  %v923_v44 = vld [vmem:[#allocation1 + $0x79] sm:$0x8]   ;;  %v921_v54 = vsel %vm549_vm4, %v919_v43, %v917_v50  ;;  %v871_v57 = vld [vmem:[#allocation1 + $0x13] sm:$0x1]  }
  0x2a   :  { %v2076_v22 = vpack.i.bf16 %v809_v11, %v774_v9  ;;  %v662_v23 = vld [vmem:[#allocation1 + $0x14] sm:$0x1]   ;;  %v927_v51 = vld [vmem:[#allocation1 + $0x98] sm:$0x10]   ;;  %v925_v60 = vsel %vm553_vm5, %v923_v44, %v921_v54  ;;  %v873_v61 = vld [vmem:[#allocation1 + $0x32] sm:$0x2]  }
  0x2b   :  { %v697_v25 = vld [vmem:[#allocation1 + $0x14] sm:$0x1]   ;;  %v666_v30 = vsel %vm545_vm3, %v664_v13, %v662_v23  ;;  %v931_v55 = vld [vmem:[#allocation1 + $0xb7] sm:$0x20]   ;;  %v877_v62 = vld [vmem:[#allocation1 + $0x51] sm:$0x4]   ;;  %v875_v7 = vsel %vm545_vm3, %v873_v61, %v871_v57 }
  0x2c   :  { %v715_v26 = vld [vmem:[#allocation1 + $0xaf] sm:$0x20]   ;;  %v701_v31 = vsel %vm545_vm3, %v699_v17, %v697_v25  ;;  %2077 = vrot.lane.b32.xlu2 %v2076_v22, %s2202_s10  ;;  %v670_v37 = vsel %vm549_vm4, %v668_v0, %v666_v30  ;;  %v935_v56 = vld [vmem:[#allocation1 + $0xd6] sm:$0x40]   ;;  %2082 = vrot.lane.b32.xlu0 %v2081_v49, %s2204_s0  ;;  %v881_v63 = vld [vmem:[#allocation1 + $0x70] sm:$0x8]   ;;  %v879_v17 = vsel %vm549_vm4, %v877_v62, %v875_v7 }
  0x2d   :  { %v688_v38 = vld [vmem:[#allocation1 + $0xed] sm:$0x80]   ;;  %v705_v39 = vsel %vm549_vm4, %v703_v2, %v701_v31  ;;  %v674_v45 = vsel %vm553_vm5, %v672_v1, %v670_v37  ;;  %v929_v2 = vsel %vm557_vm6, %v927_v51, %v925_v60  ;;  %v948_v4 = vld [vmem:[#allocation1 + $0x11c] sm:$0x1]   ;;  %v885_v9 = vld [vmem:[#allocation1 + $0x8f] sm:$0x10]   ;;  %v883_v23 = vsel %vm553_vm5, %v881_v63, %v879_v17 }
  0x2e   :  { %v723_v40 = vld [vmem:[#allocation1 + $0xed] sm:$0x80]   ;;  %v709_v47 = vsel %vm553_vm5, %v707_v3, %v705_v39  ;;  %v678_v52 = vsel %vm557_vm6, %v676_v15, %v674_v45  ;;  %v939_v3 = vld [vmem:[#allocation1 + $0xf5] sm:$0x80]   ;;  %v933_v15 = vsel %vm561_vm7, %v931_v55, %v929_v2  ;;  %v893_v20 = vld [vmem:[#allocation1 + $0xcd] sm:$0x40]   ;;  %v887_v27 = vsel %vm557_vm6, %v885_v9, %v883_v23 }
  0x2f   :  { %v719_v48 = vld [vmem:[#allocation1 + $0xce] sm:$0x40]   ;;  %v713_v53 = vsel %vm557_vm6, %v711_v19, %v709_v47  ;;  %v682_v58 = vsel %vm561_vm7, %v680_v24, %v678_v52  ;;  %v889_v19 = vld [vmem:[#allocation1 + $0xae] sm:$0x20]   ;;  %123 = vst [vmem:[#allocation1 + $0xe0] sm:$0xff] %v1941_v5  ;;  %v937_v22 = vsel %vm565_vm8, %v935_v56, %v933_v15  ;;  %s2223_s5 = smov 28  }
  0x30   :  { %v717_v59 = vsel %vm561_vm7, %v715_v26, %v713_v53  ;;  %v686_v0 = vsel %vm565_vm8, %v684_v46, %v682_v58  ;;  %v897_v24 = vld [vmem:[#allocation1 + $0xec] sm:$0x80]   ;;  %183 = vst [vmem:[#allocation1 + $0xc0] sm:$0xff] %v1949_v6  ;;  %v1038_v25 = vld [vmem:[#allocation1 + $0x1b] sm:$0x1]   ;;  %v941_v26 = vsel %vm569_vm9, %v939_v3, %v937_v22  ;;  %v891_v32 = vsel %vm561_vm7, %v889_v19, %v887_v27 }
  0x31   :  { %v721_v1 = vsel %vm565_vm8, %v719_v48, %v717_v59  ;;  %v690_v11 = vsel %vm569_vm9, %v688_v38, %v686_v0  ;;  %243 = vst [vmem:[#allocation1 + $0xa0] sm:$0xff] %v1957_v8  ;;  %v1040_v28 = vld [vmem:[#allocation1 + $0x3a] sm:$0x2]   ;;  %v2091_v31 = vpack.i.bf16 %v948_v4, %v941_v26  ;;  %v895_v35 = vsel %vm565_vm8, %v893_v20, %v891_v32  ;;  %v996_v42 = vld [vmem:[#allocation1 + $0x12] sm:$0x1]  }
  0x32   :  { %v725_v13 = vsel %vm569_vm9, %v723_v40, %v721_v1  ;;  %v1044_v30 = vld [vmem:[#allocation1 + $0x59] sm:$0x4]   ;;  %303 = vst [vmem:[#allocation1 + $0x80] sm:$0xff] %v1965_v36  ;;  %v1042_v18 = vsel %vm545_vm3, %v1040_v28, %v1038_v25  ;;  %v906_v36 = vld [vmem:[#allocation1 + $0x113] sm:$0x1]   ;;  %v899_v37 = vsel %vm569_vm9, %v897_v24, %v895_v35 }
  0x33   :  { %v2071_v21 = vpack.i.bf16 %v725_v13, %v690_v11  ;;  %v1048_v33 = vld [vmem:[#allocation1 + $0x78] sm:$0x8]   ;;  %363 = vst [vmem:[#allocation1 + $0x60] sm:$0xff] %v1973_v29  ;;  %v1046_v12 = vsel %vm549_vm4, %v1044_v30, %v1042_v18  ;;  %v998_v43 = vld [vmem:[#allocation1 + $0x31] sm:$0x2]   ;;  %v2086_v44 = vpack.i.bf16 %v906_v36, %v899_v37 }
  0x34   :  { %v1052_v34 = vld [vmem:[#allocation1 + $0x97] sm:$0x10]   ;;  %2092 = vrot.lane.b32.xlu2 %v2091_v31, %s2205_s16  ;;  %423 = vst [vmem:[#allocation1 + $0x40] sm:$0xff] %v1981_v14  ;;  %v1050_v38 = vsel %vm553_vm5, %v1048_v33, %v1046_v12  ;;  %v1000_v46 = vsel %vm545_vm3, %v998_v43, %v996_v42  ;;  %v1002_v47 = vld [vmem:[#allocation1 + $0x50] sm:$0x4]  }
  0x35   :  { %2072 = vrot.lane.b32.xlu1 %v2071_v21, %s2203_s13  ;;  %v1056_v29 = vld [vmem:[#allocation1 + $0xb6] sm:$0x20]   ;;  %483 = vst [vmem:[#allocation1 + $0x20] sm:$0xff] %v1989_v16  ;;  %v1054_v41 = vsel %vm557_vm6, %v1052_v34, %v1050_v38  ;;  %v1004_v49 = vsel %vm549_vm4, %v1002_v47, %v1000_v46  ;;  %v1006_v50 = vld [vmem:[#allocation1 + $0x6f] sm:$0x8]  }
  0x36   :  { %v1060_v39 = vld [vmem:[#allocation1 + $0xd5] sm:$0x40]   ;;  %541 = vst [vmem:[#allocation1] sm:$0xff] %v1997_v10  ;;  %v1058_v5 = vsel %vm561_vm7, %v1056_v29, %v1054_v41  ;;  %v1010_v51 = vld [vmem:[#allocation1 + $0x8e] sm:$0x10]   ;;  %v1008_v53 = vsel %vm553_vm5, %v1006_v50, %v1004_v49 }
  0x37   :  { %v1064_v40 = vld [vmem:[#allocation1 + $0xf4] sm:$0x80]   ;;  %v1062_v48 = vsel %vm565_vm8, %v1060_v39, %v1058_v5  ;;  %v1014_v54 = vld [vmem:[#allocation1 + $0xad] sm:$0x20]   ;;  %v1012_v57 = vsel %vm557_vm6, %v1010_v51, %v1008_v53  ;;  %v977_v15 = vld [vmem:[#allocation1 + $0xc1] sm:$0x40]  }
  0x38   :  { %v1073_v45 = vld [vmem:[#allocation1 + $0x11b] sm:$0x1]   ;;  %v1066_v52 = vsel %vm569_vm9, %v1064_v40, %v1062_v48  ;;  %v1018_v55 = vld [vmem:[#allocation1 + $0xcc] sm:$0x40]   ;;  %v1016_v58 = vsel %vm561_vm7, %v1014_v54, %v1012_v57  ;;  %v973_v7 = vld [vmem:[#allocation1 + $0xa2] sm:$0x20]  }
  0x39   :  { %v2106_v56 = vpack.i.bf16 %v1073_v45, %v1066_v52  ;;  %v1022_v6 = vld [vmem:[#allocation1 + $0xeb] sm:$0x80]   ;;  %v1020_v62 = vsel %vm565_vm8, %v1018_v55, %v1016_v58  ;;  %v969_v0 = vld [vmem:[#allocation1 + $0x83] sm:$0x10]   ;;  %v1094_v11 = vld [vmem:[#allocation1 + $0x82] sm:$0x10]  }
  0x3a   :  { %v1031_v59 = vld [vmem:[#allocation1 + $0x112] sm:$0x1]   ;;  %v965_v61 = vld [vmem:[#allocation1 + $0x64] sm:$0x8]   ;;  %v1090_v63 = vld [vmem:[#allocation1 + $0x63] sm:$0x8]   ;;  %v1024_v1 = vsel %vm569_vm9, %v1022_v6, %v1020_v62 }
  0x3b   :  { %v961_v60 = vld [vmem:[#allocation1 + $0x45] sm:$0x4]   ;;  %v1086_v3 = vld [vmem:[#allocation1 + $0x44] sm:$0x4]   ;;  %v2101_v17 = vpack.i.bf16 %v1031_v59, %v1024_v1  ;;  %v1163_v21 = vld [vmem:[#allocation1 + $0x1a] sm:$0x1]  }
  0x3c   :  { %v957_v8 = vld [vmem:[#allocation1 + $0x26] sm:$0x2]   ;;  %2107 = vrot.lane.b32.xlu2 %v2106_v56, %s2207_s18  ;;  %v1082_v2 = vld [vmem:[#allocation1 + $0x25] sm:$0x2]   ;;  %v1165_v22 = vld [vmem:[#allocation1 + $0x39] sm:$0x2]  }
  0x3d   :  { %2087 = vrot.lane.b32.xlu1 %v2086_v44, %s2206_s17  ;;  %v955_v4 = vld [vmem:[#allocation1 + $0x7] sm:$0x1]   ;;  %v1080_v9 = vld [vmem:[#allocation1 + $0x6] sm:$0x1]   ;;  %v1167_v25 = vsel %vm545_vm3, %v1165_v22, %v1163_v21  ;;  %v1169_v26 = vld [vmem:[#allocation1 + $0x58] sm:$0x4]  }
  0x3e   :  { %v959_v13 = vsel %vm545_vm3, %v957_v8, %v955_v4  ;;  %v1084_v19 = vsel %vm545_vm3, %v1082_v2, %v1080_v9  ;;  %v1098_v20 = vld [vmem:[#allocation1 + $0xa1] sm:$0x20]   ;;  %v981_v24 = vld [vmem:[#allocation1 + $0xe0] sm:$0x80]   ;;  %v1173_v27 = vld [vmem:[#allocation1 + $0x77] sm:$0x8]   ;;  %v1171_v10 = vsel %vm549_vm4, %v1169_v26, %v1167_v25 }
  0x3f   :  { %v963_v23 = vsel %vm549_vm4, %v961_v60, %v959_v13  ;;  %v1088_v14 = vsel %vm549_vm4, %v1086_v3, %v1084_v19  ;;  %v1177_v16 = vld [vmem:[#allocation1 + $0x96] sm:$0x10]   ;;  %v989_v30 = vld [vmem:[#allocation1 + $0x107] sm:$0x1]   ;;  %v1102_v32 = vld [vmem:[#allocation1 + $0xc0] sm:$0x40]   ;;  %v1175_v36 = vsel %vm553_vm5, %v1173_v27, %v1171_v10 }
  0x40   :  { %v967_v28 = vsel %vm553_vm5, %v965_v61, %v963_v23  ;;  %v1092_v31 = vsel %vm553_vm5, %v1090_v63, %v1088_v14  ;;  %v1181_v18 = vld [vmem:[#allocation1 + $0xb5] sm:$0x20]   ;;  %v1121_v29 = vld [vmem:[#allocation1 + $0x11] sm:$0x1]   ;;  %v1179_v40 = vsel %vm557_vm6, %v1177_v16, %v1175_v36  ;;  %v1106_v45 = vld [vmem:[#allocation1 + $0xdf] sm:$0x80]  }
  0x41   :  { %v1185_v33 = vld [vmem:[#allocation1 + $0xd4] sm:$0x40]   ;;  %v971_v34 = vsel %vm557_vm6, %v969_v0, %v967_v28  ;;  %v1096_v35 = vsel %vm557_vm6, %v1094_v11, %v1092_v31  ;;  %v1123_v37 = vld [vmem:[#allocation1 + $0x30] sm:$0x2]   ;;  %v1183_v46 = vsel %vm561_vm7, %v1181_v18, %v1179_v40  ;;  %v1205_v54 = vld [vmem:[#allocation1 + $0x5] sm:$0x1]  }
  0x42   :  { %v1189_v12 = vld [vmem:[#allocation1 + $0xf3] sm:$0x80]   ;;  %v975_v38 = vsel %vm561_vm7, %v973_v7, %v971_v34  ;;  %v1100_v39 = vsel %vm561_vm7, %v1098_v20, %v1096_v35  ;;  %v1125_v41 = vsel %vm545_vm3, %v1123_v37, %v1121_v29  ;;  %v1127_v42 = vld [vmem:[#allocation1 + $0x4f] sm:$0x4]   ;;  %v1187_v51 = vsel %vm565_vm8, %v1185_v33, %v1183_v46  ;;  %v1207_v55 = vld [vmem:[#allocation1 + $0x24] sm:$0x2]  }
  0x43   :  { %v1131_v43 = vld [vmem:[#allocation1 + $0x6e] sm:$0x8]   ;;  %v979_v5 = vsel %vm565_vm8, %v977_v15, %v975_v38  ;;  %v1198_v47 = vld [vmem:[#allocation1 + $0x11a] sm:$0x1]   ;;  %v1129_v48 = vsel %vm549_vm4, %v1127_v42, %v1125_v41  ;;  %v1104_v57 = vsel %vm565_vm8, %v1102_v32, %v1100_v39  ;;  %v1191_v6 = vsel %vm569_vm9, %v1189_v12, %v1187_v51  ;;  %v1211_v60 = vld [vmem:[#allocation1 + $0x43] sm:$0x4]  }
  0x44   :  { %v1135_v44 = vld [vmem:[#allocation1 + $0x8d] sm:$0x10]   ;;  %v983_v50 = vsel %vm569_vm9, %v981_v24, %v979_v5  ;;  %v1133_v52 = vsel %vm553_vm5, %v1131_v43, %v1129_v48  ;;  %v1215_v61 = vld [vmem:[#allocation1 + $0x62] sm:$0x8]   ;;  %v1114_v62 = vld [vmem:[#allocation1 + $0x106] sm:$0x1]   ;;  %v2121_v63 = vpack.i.bf16 %v1198_v47, %v1191_v6  ;;  %v1209_v1 = vsel %vm545_vm3, %v1207_v55, %v1205_v54 }
  0x45   :  { %2102 = vrot.lane.b32.xlu1 %v2101_v17, %s2208_s19  ;;  %v1139_v49 = vld [vmem:[#allocation1 + $0xac] sm:$0x20]   ;;  %v2096_v56 = vpack.i.bf16 %v989_v30, %v983_v50  ;;  %v1137_v58 = vsel %vm557_vm6, %v1135_v44, %v1133_v52  ;;  %v1219_v2 = vld [vmem:[#allocation1 + $0x81] sm:$0x10]   ;;  %v1213_v4 = vsel %vm549_vm4, %v1211_v60, %v1209_v1  ;;  %v1288_v9 = vld [vmem:[#allocation1 + $0x19] sm:$0x1]   ;;  %v1108_v13 = vsel %vm569_vm9, %v1106_v45, %v1104_v57 }
  0x46   :  { %v1143_v53 = vld [vmem:[#allocation1 + $0xcb] sm:$0x40]   ;;  %v1141_v8 = vsel %vm561_vm7, %v1139_v49, %v1137_v58  ;;  %v1223_v7 = vld [vmem:[#allocation1 + $0xa0] sm:$0x20]   ;;  %v1290_v11 = vld [vmem:[#allocation1 + $0x38] sm:$0x2]   ;;  %2122 = vrot.lane.b32.xlu2 %v2121_v63, %s2210_s21  ;;  %v1217_v17 = vsel %vm553_vm5, %v1215_v61, %v1213_v4  ;;  %v2111_v10 = vpack.i.bf16 %v1114_v62, %v1108_v13 }
  0x47   :  { %v1147_v59 = vld [vmem:[#allocation1 + $0xea] sm:$0x80]   ;;  %2097 = vrot.lane.b32.xlu0 %v2096_v56, %s2209_s20  ;;  %v1145_v3 = vsel %vm565_vm8, %v1143_v53, %v1141_v8  ;;  %v1292_v19 = vsel %vm545_vm3, %v1290_v11, %v1288_v9  ;;  %v1294_v20 = vld [vmem:[#allocation1 + $0x57] sm:$0x4]   ;;  %v1221_v24 = vsel %vm557_vm6, %v1219_v2, %v1217_v17  ;;  %v1227_v14 = vld [vmem:[#allocation1 + $0xbf] sm:$0x40]  }
  0x48   :  { %v1156_v0 = vld [vmem:[#allocation1 + $0x111] sm:$0x1]   ;;  %v1149_v15 = vsel %vm569_vm9, %v1147_v59, %v1145_v3  ;;  %v1298_v21 = vld [vmem:[#allocation1 + $0x76] sm:$0x8]   ;;  %v1296_v25 = vsel %vm549_vm4, %v1294_v20, %v1292_v19  ;;  %v1225_v16 = vsel %vm561_vm7, %v1223_v7, %v1221_v24  ;;  %v1246_v31 = vld [vmem:[#allocation1 + $0x10] sm:$0x1]  }
  0x49   :  { %v1302_v22 = vld [vmem:[#allocation1 + $0x95] sm:$0x10]   ;;  %v2116_v23 = vpack.i.bf16 %v1156_v0, %v1149_v15  ;;  %v1300_v28 = vsel %vm553_vm5, %v1298_v21, %v1296_v25  ;;  %v1248_v32 = vld [vmem:[#allocation1 + $0x2f] sm:$0x2]   ;;  %v1231_v18 = vld [vmem:[#allocation1 + $0xde] sm:$0x80]   ;;  %v1229_v41 = vsel %vm565_vm8, %v1227_v14, %v1225_v16 }
  0x4a   :  { %v1306_v26 = vld [vmem:[#allocation1 + $0xb4] sm:$0x20]   ;;  %v1304_v33 = vsel %vm557_vm6, %v1302_v22, %v1300_v28  ;;  %v1250_v34 = vsel %vm545_vm3, %v1248_v32, %v1246_v31  ;;  %v1252_v35 = vld [vmem:[#allocation1 + $0x4e] sm:$0x4]   ;;  %v1330_v5 = vld [vmem:[#allocation1 + $0x4] sm:$0x1]   ;;  %v1233_v57 = vsel %vm569_vm9, %v1231_v18, %v1229_v41 }
  0x4b   :  { %v1310_v27 = vld [vmem:[#allocation1 + $0xd3] sm:$0x40]   ;;  %v1256_v36 = vld [vmem:[#allocation1 + $0x6d] sm:$0x8]   ;;  %v1308_v29 = vsel %vm561_vm7, %v1306_v26, %v1304_v33  ;;  %v1254_v38 = vsel %vm549_vm4, %v1252_v35, %v1250_v34  ;;  %v1332_v45 = vld [vmem:[#allocation1 + $0x23] sm:$0x2]  }
  0x4c   :  { %v1314_v30 = vld [vmem:[#allocation1 + $0xf2] sm:$0x80]   ;;  %v1260_v12 = vld [vmem:[#allocation1 + $0x8c] sm:$0x10]   ;;  %v1312_v42 = vsel %vm565_vm8, %v1310_v27, %v1308_v29  ;;  %v1258_v43 = vsel %vm553_vm5, %v1256_v36, %v1254_v38  ;;  %v1334_v48 = vsel %vm545_vm3, %v1332_v45, %v1330_v5  ;;  %v1336_v49 = vld [vmem:[#allocation1 + $0x42] sm:$0x4]  }
  0x4d   :  { %2117 = vrot.lane.b32.xlu1 %v2116_v23, %s2211_s22  ;;  %v1323_v37 = vld [vmem:[#allocation1 + $0x119] sm:$0x1]   ;;  %v1264_v39 = vld [vmem:[#allocation1 + $0xab] sm:$0x20]   ;;  %v1316_v46 = vsel %vm569_vm9, %v1314_v30, %v1312_v42  ;;  %v1262_v47 = vsel %vm557_vm6, %v1260_v12, %v1258_v43  ;;  %v1340_v50 = vld [vmem:[#allocation1 + $0x61] sm:$0x8]   ;;  %v1338_v55 = vsel %vm549_vm4, %v1336_v49, %v1334_v48 }
  0x4e   :  { %v1268_v40 = vld [vmem:[#allocation1 + $0xca] sm:$0x40]   ;;  %v1344_v51 = vld [vmem:[#allocation1 + $0x80] sm:$0x10]   ;;  %v2136_v52 = vpack.i.bf16 %v1323_v37, %v1316_v46  ;;  %v1266_v53 = vsel %vm561_vm7, %v1264_v39, %v1262_v47  ;;  %v1239_v6 = vld [vmem:[#allocation1 + $0x105] sm:$0x1]   ;;  %v1342_v59 = vsel %vm553_vm5, %v1340_v50, %v1338_v55 }
  0x4f   :  { %v1272_v44 = vld [vmem:[#allocation1 + $0xe9] sm:$0x80]   ;;  %2112 = vrot.lane.b32.xlu0 %v2111_v10, %s2212_s23  ;;  %v1348_v56 = vld [vmem:[#allocation1 + $0x9f] sm:$0x20]   ;;  %v1270_v58 = vsel %vm565_vm8, %v1268_v40, %v1266_v53  ;;  %v1413_v60 = vld [vmem:[#allocation1 + $0x18] sm:$0x1]   ;;  %v1346_v63 = vsel %vm557_vm6, %v1344_v51, %v1342_v59  ;;  %v2126_v15 = vpack.i.bf16 %v1239_v6, %v1233_v57 }
  0x50   :  { %v1281_v54 = vld [vmem:[#allocation1 + $0x110] sm:$0x1]   ;;  %v1415_v61 = vld [vmem:[#allocation1 + $0x37] sm:$0x2]   ;;  %2137 = vrot.lane.b32.xlu2 %v2136_v52, %s2213_s24  ;;  %v1274_v62 = vsel %vm569_vm9, %v1272_v44, %v1270_v58  ;;  %v1350_v4 = vsel %vm561_vm7, %v1348_v56, %v1346_v63  ;;  %v1352_v7 = vld [vmem:[#allocation1 + $0xbe] sm:$0x40]  }
  0x51   :  { %v1417_v8 = vsel %vm545_vm3, %v1415_v61, %v1413_v60  ;;  %v1419_v0 = vld [vmem:[#allocation1 + $0x56] sm:$0x4]   ;;  %v2131_v3 = vpack.i.bf16 %v1281_v54, %v1274_v62  ;;  %v1356_v17 = vld [vmem:[#allocation1 + $0xdd] sm:$0x80]   ;;  %v1371_v21 = vld [vmem:[#allocation1 + $0xd] sm:$0x1]   ;;  %v1354_v27 = vsel %vm565_vm8, %v1352_v7, %v1350_v4 }
  0x52   :  { %v1423_v1 = vld [vmem:[#allocation1 + $0x75] sm:$0x8]   ;;  %v1421_v9 = vsel %vm549_vm4, %v1419_v0, %v1417_v8  ;;  %v1373_v22 = vld [vmem:[#allocation1 + $0x2c] sm:$0x2]   ;;  %v1455_v34 = vld [vmem:[#allocation1 + $0x3] sm:$0x1]   ;;  %v1358_v40 = vsel %vm569_vm9, %v1356_v17, %v1354_v27 }
  0x53   :  { %v1427_v2 = vld [vmem:[#allocation1 + $0x94] sm:$0x10]   ;;  %v1425_v19 = vsel %vm553_vm5, %v1423_v1, %v1421_v9  ;;  %v1375_v24 = vsel %vm545_vm3, %v1373_v22, %v1371_v21  ;;  %v1377_v14 = vld [vmem:[#allocation1 + $0x4b] sm:$0x4]   ;;  %v1457_v35 = vld [vmem:[#allocation1 + $0x22] sm:$0x2]  }
  0x54   :  { %v1431_v11 = vld [vmem:[#allocation1 + $0xb3] sm:$0x20]   ;;  %v1429_v23 = vsel %vm557_vm6, %v1427_v2, %v1425_v19  ;;  %v1381_v25 = vld [vmem:[#allocation1 + $0x6a] sm:$0x8]   ;;  %v1379_v30 = vsel %vm549_vm4, %v1377_v14, %v1375_v24  ;;  %v1459_v29 = vsel %vm545_vm3, %v1457_v35, %v1455_v34  ;;  %v1461_v37 = vld [vmem:[#allocation1 + $0x41] sm:$0x4]  }
  0x55   :  { %v1435_v13 = vld [vmem:[#allocation1 + $0xd2] sm:$0x40]   ;;  %2132 = vrot.lane.b32.xlu1 %v2131_v3, %s2214_s25  ;;  %v1385_v26 = vld [vmem:[#allocation1 + $0x89] sm:$0x10]   ;;  %v1433_v16 = vsel %vm561_vm7, %v1431_v11, %v1429_v23  ;;  %v1383_v18 = vsel %vm553_vm5, %v1381_v25, %v1379_v30  ;;  %v1465_v38 = vld [vmem:[#allocation1 + $0x60] sm:$0x8]   ;;  %v1463_v5 = vsel %vm549_vm4, %v1461_v37, %v1459_v29 }
  0x56   :  { %v1439_v20 = vld [vmem:[#allocation1 + $0xf1] sm:$0x80]   ;;  %v1389_v31 = vld [vmem:[#allocation1 + $0xa8] sm:$0x20]   ;;  %v1437_v10 = vsel %vm565_vm8, %v1435_v13, %v1433_v16  ;;  %v1387_v12 = vsel %vm557_vm6, %v1385_v26, %v1383_v18  ;;  %v1469_v39 = vld [vmem:[#allocation1 + $0x7f] sm:$0x10]   ;;  %v1467_v47 = vsel %vm553_vm5, %v1465_v38, %v1463_v5 }
  0x57   :  { %v1448_v28 = vld [vmem:[#allocation1 + $0x118] sm:$0x1]   ;;  %v1393_v32 = vld [vmem:[#allocation1 + $0xc7] sm:$0x40]   ;;  %2127 = vrot.lane.b32.xlu0 %v2126_v15, %s2215_s26  ;;  %v1441_v36 = vsel %vm569_vm9, %v1439_v20, %v1437_v10  ;;  %v1364_v41 = vld [vmem:[#allocation1 + $0x104] sm:$0x1]   ;;  %v1391_v43 = vsel %vm561_vm7, %v1389_v31, %v1387_v12  ;;  %v1471_v52 = vsel %vm557_vm6, %v1469_v39, %v1467_v47 }
  0x58   :  { %v1397_v33 = vld [vmem:[#allocation1 + $0xe6] sm:$0x80]   ;;  %v2151_v42 = vpack.i.bf16 %v1448_v28, %v1441_v36  ;;  %v1473_v45 = vld [vmem:[#allocation1 + $0x9e] sm:$0x20]   ;;  %v1395_v46 = vsel %vm565_vm8, %v1393_v32, %v1391_v43  ;;  %v1538_v49 = vld [vmem:[#allocation1 + $0x17] sm:$0x1]   ;;  %v2141_v57 = vpack.i.bf16 %v1364_v41, %v1358_v40 }
  0x59   :  { %v1406_v44 = vld [vmem:[#allocation1 + $0x10d] sm:$0x1]   ;;  %v1477_v48 = vld [vmem:[#allocation1 + $0xbd] sm:$0x40]   ;;  %v1540_v50 = vld [vmem:[#allocation1 + $0x36] sm:$0x2]   ;;  %v1399_v51 = vsel %vm569_vm9, %v1397_v33, %v1395_v46  ;;  %v1475_v58 = vsel %vm561_vm7, %v1473_v45, %v1471_v52 }
  0x5a   :  { %2152 = vrot.lane.b32.xlu2 %v2151_v42, %s2216_s27  ;;  %v1542_v53 = vsel %vm545_vm3, %v1540_v50, %v1538_v49  ;;  %v1544_v54 = vld [vmem:[#allocation1 + $0x55] sm:$0x4]   ;;  %v2146_v6 = vpack.i.bf16 %v1406_v44, %v1399_v51  ;;  %v1481_v59 = vld [vmem:[#allocation1 + $0xdc] sm:$0x80]   ;;  %v1496_v0 = vld [vmem:[#allocation1 + $0xc] sm:$0x1]   ;;  %v1479_v2 = vsel %vm565_vm8, %v1477_v48, %v1475_v58 }
  0x5b   :  { %v1548_v55 = vld [vmem:[#allocation1 + $0x74] sm:$0x8]   ;;  %v1546_v60 = vsel %vm549_vm4, %v1544_v54, %v1542_v53  ;;  %v1498_v1 = vld [vmem:[#allocation1 + $0x2b] sm:$0x2]   ;;  %v1489_v13 = vld [vmem:[#allocation1 + $0x103] sm:$0x1]   ;;  %v1483_v26 = vsel %vm569_vm9, %v1481_v59, %v1479_v2 }
  0x5c   :  { %v1552_v56 = vld [vmem:[#allocation1 + $0x93] sm:$0x10]   ;;  %v1550_v63 = vsel %vm553_vm5, %v1548_v55, %v1546_v60  ;;  %v1500_v4 = vsel %vm545_vm3, %v1498_v1, %v1496_v0  ;;  %v1502_v7 = vld [vmem:[#allocation1 + $0x4a] sm:$0x4]   ;;  %v1580_v14 = vld [vmem:[#allocation1 + $0x2] sm:$0x1]   ;;  %v2156_v39 = vpack.i.bf16 %v1489_v13, %v1483_v26 }
  0x5d   :  { %v1556_v61 = vld [vmem:[#allocation1 + $0xb2] sm:$0x20]   ;;  %2147 = vrot.lane.b32.xlu1 %v2146_v6, %s2217_s28  ;;  %v1554_v3 = vsel %vm557_vm6, %v1552_v56, %v1550_v63  ;;  %v1506_v9 = vld [vmem:[#allocation1 + $0x69] sm:$0x8]   ;;  %v1504_v19 = vsel %vm549_vm4, %v1502_v7, %v1500_v4  ;;  %v1582_v25 = vld [vmem:[#allocation1 + $0x21] sm:$0x2]  }
  0x5e   :  { %v1560_v62 = vld [vmem:[#allocation1 + $0xd1] sm:$0x40]   ;;  %v1510_v11 = vld [vmem:[#allocation1 + $0x88] sm:$0x10]   ;;  %v1558_v15 = vsel %vm561_vm7, %v1556_v61, %v1554_v3  ;;  %v1508_v23 = vsel %vm553_vm5, %v1506_v9, %v1504_v19  ;;  %v1584_v28 = vsel %vm545_vm3, %v1582_v25, %v1580_v14  ;;  %v1586_v30 = vld [vmem:[#allocation1 + $0x40] sm:$0x4]  }
  0x5f   :  { %v1564_v8 = vld [vmem:[#allocation1 + $0xf0] sm:$0x80]   ;;  %v1514_v20 = vld [vmem:[#allocation1 + $0xa7] sm:$0x20]   ;;  %2142 = vrot.lane.b32.xlu0 %v2141_v57, %s2218_s29  ;;  %v1562_v22 = vsel %vm565_vm8, %v1560_v62, %v1558_v15  ;;  %v1512_v16 = vsel %vm557_vm6, %v1510_v11, %v1508_v23  ;;  %v1590_v31 = vld [vmem:[#allocation1 + $0x5f] sm:$0x8]   ;;  %v1588_v34 = vsel %vm549_vm4, %v1586_v30, %v1584_v28 }
  0x60   :  { %v1573_v17 = vld [vmem:[#allocation1 + $0x117] sm:$0x1]   ;;  %v1518_v21 = vld [vmem:[#allocation1 + $0xc6] sm:$0x40]   ;;  %v1566_v27 = vsel %vm569_vm9, %v1564_v8, %v1562_v22  ;;  %v1594_v32 = vld [vmem:[#allocation1 + $0x7e] sm:$0x10]   ;;  %v1516_v18 = vsel %vm561_vm7, %v1514_v20, %v1512_v16  ;;  %v1592_v12 = vsel %vm553_vm5, %v1590_v31, %v1588_v34 }
  0x61   :  { %v1522_v24 = vld [vmem:[#allocation1 + $0xe5] sm:$0x80]   ;;  %v2166_v10 = vpack.i.bf16 %v1573_v17, %v1566_v27  ;;  %v1598_v35 = vld [vmem:[#allocation1 + $0x9d] sm:$0x20]   ;;  %v1520_v36 = vsel %vm565_vm8, %v1518_v21, %v1516_v18  ;;  %v1663_v37 = vld [vmem:[#allocation1 + $0x16] sm:$0x1]   ;;  %v1596_v41 = vsel %vm557_vm6, %v1594_v32, %v1592_v12 }
  0x62   :  { %v1531_v33 = vld [vmem:[#allocation1 + $0x10c] sm:$0x1]   ;;  %v1602_v29 = vld [vmem:[#allocation1 + $0xbc] sm:$0x40]   ;;  %v1665_v38 = vld [vmem:[#allocation1 + $0x35] sm:$0x2]   ;;  %v1524_v40 = vsel %vm569_vm9, %v1522_v24, %v1520_v36  ;;  %v1600_v46 = vsel %vm561_vm7, %v1598_v35, %v1596_v41 }
  0x63   :  { %2167 = vrot.lane.b32.xlu2 %v2166_v10, %s2219_s30  ;;  %v1667_v42 = vsel %vm545_vm3, %v1665_v38, %v1663_v37  ;;  %v1669_v43 = vld [vmem:[#allocation1 + $0x54] sm:$0x4]   ;;  %v2161_v45 = vpack.i.bf16 %v1531_v33, %v1524_v40  ;;  %v1606_v47 = vld [vmem:[#allocation1 + $0xdb] sm:$0x80]   ;;  %v1604_v51 = vsel %vm565_vm8, %v1602_v29, %v1600_v46  ;;  %v1621_v54 = vld [vmem:[#allocation1 + $0xb] sm:$0x1]  }
  0x64   :  { %v1673_v44 = vld [vmem:[#allocation1 + $0x73] sm:$0x8]   ;;  %v1671_v48 = vsel %vm549_vm4, %v1669_v43, %v1667_v42  ;;  %v1623_v55 = vld [vmem:[#allocation1 + $0x2a] sm:$0x2]   ;;  %v1614_v56 = vld [vmem:[#allocation1 + $0x102] sm:$0x1]   ;;  %v1608_v1 = vsel %vm569_vm9, %v1606_v47, %v1604_v51 }
  0x65   :  { %v1677_v5 = vld [vmem:[#allocation1 + $0x92] sm:$0x10]   ;;  %v1675_v52 = vsel %vm553_vm5, %v1673_v44, %v1671_v48  ;;  %2162 = vrot.lane.b32.xlu1 %v2161_v45, %s2220_s2  ;;  %v1625_v6 = vsel %vm545_vm3, %v1623_v55, %v1621_v54  ;;  %v1627_v58 = vld [vmem:[#allocation1 + $0x49] sm:$0x4]   ;;  %v1705_v7 = vld [vmem:[#allocation1 + $0x1] sm:$0x1]   ;;  %v2171_v26 = vpack.i.bf16 %v1614_v56, %v1608_v1 }
  0x66   :  { %v1681_v49 = vld [vmem:[#allocation1 + $0xb1] sm:$0x20]   ;;  %v1679_v57 = vsel %vm557_vm6, %v1677_v5, %v1675_v52  ;;  %v1631_v59 = vld [vmem:[#allocation1 + $0x68] sm:$0x8]   ;;  %v1629_v63 = vsel %vm549_vm4, %v1627_v58, %v1625_v6  ;;  %v1707_v9 = vld [vmem:[#allocation1 + $0x20] sm:$0x2]  }
  0x67   :  { %v1685_v50 = vld [vmem:[#allocation1 + $0xd0] sm:$0x40]   ;;  %v1635_v60 = vld [vmem:[#allocation1 + $0x87] sm:$0x10]   ;;  %2157 = vrot.lane.b32.xlu0 %v2156_v39, %s2221_s3  ;;  %v1683_v61 = vsel %vm561_vm7, %v1681_v49, %v1679_v57  ;;  %v1633_v3 = vsel %vm553_vm5, %v1631_v59, %v1629_v63  ;;  %v1709_v15 = vsel %vm545_vm3, %v1707_v9, %v1705_v7  ;;  %v1711_v17 = vld [vmem:[#allocation1 + $0x3f] sm:$0x4]  }
  0x68   :  { %v1689_v53 = vld [vmem:[#allocation1 + $0xef] sm:$0x80]   ;;  %v1639_v8 = vld [vmem:[#allocation1 + $0xa6] sm:$0x20]   ;;  %v1687_v2 = vsel %vm565_vm8, %v1685_v50, %v1683_v61  ;;  %v1637_v13 = vsel %vm557_vm6, %v1635_v60, %v1633_v3  ;;  %v1715_v19 = vld [vmem:[#allocation1 + $0x5e] sm:$0x8]   ;;  %v1713_v24 = vsel %vm549_vm4, %v1711_v17, %v1709_v15 }
  0x69   :  { %v1698_v62 = vld [vmem:[#allocation1 + $0x116] sm:$0x1]   ;;  %v1643_v0 = vld [vmem:[#allocation1 + $0xc5] sm:$0x40]   ;;  %v1691_v11 = vsel %vm569_vm9, %v1689_v53, %v1687_v2  ;;  %v1719_v20 = vld [vmem:[#allocation1 + $0x7d] sm:$0x10]   ;;  %v1641_v22 = vsel %vm561_vm7, %v1639_v8, %v1637_v13  ;;  %v1717_v16 = vsel %vm553_vm5, %v1715_v19, %v1713_v24 }
  0x6a   :  { %v1647_v4 = vld [vmem:[#allocation1 + $0xe4] sm:$0x80]   ;;  %v2181_v21 = vpack.i.bf16 %v1698_v62, %v1691_v11  ;;  %v1723_v14 = vld [vmem:[#allocation1 + $0x9c] sm:$0x20]   ;;  %v1645_v27 = vsel %vm565_vm8, %v1643_v0, %v1641_v22  ;;  %v1788_v30 = vld [vmem:[#allocation1 + $0x15] sm:$0x1]   ;;  %v2559_v32 = vpop.permute.xlu2 %821   ;;  %v1721_v18 = vsel %vm557_vm6, %v1719_v20, %v1717_v16 }
  0x6b   :  { %v1656_v23 = vld [vmem:[#allocation1 + $0x10b] sm:$0x1]   ;;  %v1727_v25 = vld [vmem:[#allocation1 + $0xbb] sm:$0x40]   ;;  %v1790_v31 = vld [vmem:[#allocation1 + $0x34] sm:$0x2]   ;;  %v1649_v10 = vsel %vm569_vm9, %v1647_v4, %v1645_v27  ;;  %v1725_v29 = vsel %vm561_vm7, %v1723_v14, %v1721_v18 }
  0x6c   :  { %v1731_v28 = vld [vmem:[#allocation1 + $0xda] sm:$0x80]   ;;  %2182 = vrot.lane.b32.xlu2 %v2181_v21, %s2222_s4  ;;  %v1792_v33 = vsel %vm545_vm3, %v1790_v31, %v1788_v30  ;;  %v1794_v34 = vld [vmem:[#allocation1 + $0x53] sm:$0x4]   ;;  %v2176_v12 = vpack.i.bf16 %v1656_v23, %v1649_v10  ;;  %v1729_v41 = vsel %vm565_vm8, %v1727_v25, %v1725_v29  ;;  %v1746_v5 = vld [vmem:[#allocation1 + $0xa] sm:$0x1]  }
  0x6d   :  { %v1798_v35 = vld [vmem:[#allocation1 + $0x72] sm:$0x8]   ;;  %v1796_v37 = vsel %vm549_vm4, %v1794_v34, %v1792_v33  ;;  %v1739_v42 = vld [vmem:[#allocation1 + $0x101] sm:$0x1]   ;;  %v1748_v45 = vld [vmem:[#allocation1 + $0x29] sm:$0x2]   ;;  %v1733_v51 = vsel %vm569_vm9, %v1731_v28, %v1729_v41 }
  0x6e   :  { %v1802_v36 = vld [vmem:[#allocation1 + $0x91] sm:$0x10]   ;;  %v1800_v43 = vsel %vm553_vm5, %v1798_v35, %v1796_v37  ;;  %2177 = vrot.lane.b32.xlu1 %v2176_v12, %s2224_s6  ;;  %v1750_v47 = vsel %vm545_vm3, %v1748_v45, %v1746_v5  ;;  %v1752_v48 = vld [vmem:[#allocation1 + $0x48] sm:$0x4]   ;;  %v542_v59 = vld [vmem:[#allocation1] sm:$0x1]   ;;  %v2186_v63 = vpack.i.bf16 %v1739_v42, %v1733_v51 }
  0x6f   :  { %v1806_v38 = vld [vmem:[#allocation1 + $0xb0] sm:$0x20]   ;;  %2172 = vrot.lane.b32.xlu0 %v2171_v26, %s2223_s5  ;;  %v1804_v46 = vsel %vm557_vm6, %v1802_v36, %v1800_v43  ;;  %v1756_v49 = vld [vmem:[#allocation1 + $0x67] sm:$0x8]   ;;  %v1754_v53 = vsel %vm549_vm4, %v1752_v48, %v1750_v47  ;;  %825 = vst.msk [vmem:[#allocation0 + $0x38] sm:$0x1] %vm777_vm10, %v2559_v32  }
  0x70   :  { %v1810_v39 = vld [vmem:[#allocation1 + $0xcf] sm:$0x40]   ;;  %v1760_v50 = vld [vmem:[#allocation1 + $0x86] sm:$0x10]   ;;  %v1808_v52 = vsel %vm561_vm7, %v1806_v38, %v1804_v46  ;;  %v1758_v6 = vsel %vm553_vm5, %v1756_v49, %v1754_v53  ;;  %v544_v62 = vld [vmem:[#allocation1 + $0x1f] sm:$0x2]  }
  0x71   :  { %v1814_v40 = vld [vmem:[#allocation1 + $0xee] sm:$0x80]   ;;  %v1764_v54 = vld [vmem:[#allocation1 + $0xa5] sm:$0x20]   ;;  %v1812_v57 = vsel %vm565_vm8, %v1810_v39, %v1808_v52  ;;  %v1762_v61 = vsel %vm557_vm6, %v1760_v50, %v1758_v6  ;;  %v546_v1 = vsel %vm545_vm3, %v544_v62, %v542_v59  ;;  %v548_v2 = vld [vmem:[#allocation1 + $0x3e] sm:$0x4]  }
  0x72   :  { %v1823_v44 = vld [vmem:[#allocation1 + $0x115] sm:$0x1]   ;;  %v1768_v55 = vld [vmem:[#allocation1 + $0xc4] sm:$0x40]   ;;  %v1816_v60 = vsel %vm569_vm9, %v1814_v40, %v1812_v57  ;;  %v1766_v0 = vsel %vm561_vm7, %v1764_v54, %v1762_v61  ;;  %v552_v3 = vld [vmem:[#allocation1 + $0x5d] sm:$0x8]   ;;  %v550_v9 = vsel %vm549_vm4, %v548_v2, %v546_v1 }
  0x73   :  { %v1772_v56 = vld [vmem:[#allocation1 + $0xe3] sm:$0x80]   ;;  %v2196_v8 = vpack.i.bf16 %v1823_v44, %v1816_v60  ;;  %v556_v4 = vld [vmem:[#allocation1 + $0x7c] sm:$0x10]   ;;  %v1770_v7 = vsel %vm565_vm8, %v1768_v55, %v1766_v0  ;;  %v554_v15 = vsel %vm553_vm5, %v552_v3, %v550_v9  ;;  %vm861_vm3 = vcmask 1032064  }
  0x74   :  { %v1781_v58 = vld [vmem:[#allocation1 + $0x10a] sm:$0x1]   ;;  %v560_v11 = vld [vmem:[#allocation1 + $0x9b] sm:$0x20]   ;;  %v1774_v13 = vsel %vm569_vm9, %v1772_v56, %v1770_v7  ;;  %v558_v21 = vsel %vm557_vm6, %v556_v4, %v554_v15  ;;  %vm1194_vm4 = vcmask 769664   ;;  %vm1319_vm5 = vcmask 654864  }
  0x75   :  { %2197 = vrot.lane.b32.xlu2 %v2196_v8, %s2225_s7  ;;  %v564_v17 = vld [vmem:[#allocation1 + $0xba] sm:$0x40]   ;;  %v2191_v20 = vpack.i.bf16 %v1781_v58, %v1774_v13  ;;  %v562_v23 = vsel %vm561_vm7, %v560_v11, %v558_v21  ;;  %vm902_vm6 = vcmask 1015664   ;;  %vm1444_vm7 = vcmask 540064  }
  0x76   :  { %v574_v19 = vld [vmem:[#allocation1 + $0x100] sm:$0x1]   ;;  %v566_v24 = vsel %vm565_vm8, %v564_v17, %v562_v23  ;;  %vm1027_vm8 = vcmask 900864  }
  0x77   :  { %v568_v22 = vld [vmem:[#allocation1 + $0xd9] sm:$0x80]   ;;  %577 = vst.msk [vmem:[#allocation0 + $0x20] sm:$0x1] %vm571_vm11, %v574_v19   ;;  %2187 = vrot.lane.b32.xlu0 %v2186_v63, %s2226_s8  ;;  %2192 = vrot.lane.b32.xlu1 %v2191_v20, %s2227_s9 }
  0x78   :  { %v570_v14 = vsel %vm569_vm9, %v568_v22, %v566_v24  ;;  %vm986_vm9 = vcmask 917264  }
  0x79   :  { %572 = vst.msk [vmem:[#allocation0] sm:$0xff] %vm571_vm11, %v570_v14   ;;  %vm1152_vm11 = vcmask 786064  }
  0x80   :  { %v654_v25 = vpop.permute.xlu0 %653  }
  0x81   :  { %657 = vst.msk [vmem:[#allocation0 + $0x28] sm:$0x1] %vm610_vm12, %v654_v25  }
  0x82   :  { %660 = vst.msk [vmem:[#allocation0 + $0x20] sm:$0x1] %vm645_vm13, %v654_v25  }
  0x83   :  { %v738_v27 = vpop.permute.xlu1 %737  }
  0x84   :  { %741 = vst.msk [vmem:[#allocation0 + $0x30] sm:$0x1] %vm693_vm14, %v738_v27  }
  0x85   :  { %744 = vst.msk [vmem:[#allocation0 + $0x28] sm:$0x1] %vm728_vm15, %v738_v27  }
  0x86   :  { %v2078_v26 = vpop.permute.xlu2 %2077  ;;  %828 = vst.msk [vmem:[#allocation0 + $0x30] sm:$0x1] %vm812_vm0, %v2559_v32  }
  0x87   :  { %v2079_v16 = vunpack.i.l.bf16 %v2078_v26  ;;  %v2080_v37 = vunpack.i.h.bf16 %v2078_v26 }
  0x89   :  { %779 = vst.msk [vmem:[#allocation0 + $0x18] sm:$0xff] %vm777_vm10, %v2079_v16   ;;  %vm1569_vm10 = vcmask 425264  }
  0x8e   :  { %v2093_v28 = vpop.permute.xlu2 %2092 }
  0x8f   :  { %v2095_v30 = vunpack.i.h.bf16 %v2093_v28  ;;  %v2094_v41 = vunpack.i.l.bf16 %v2093_v28 }
  0x90   :  { %v1851_v27 = vld [vmem:[#allocation0 + $0x18] sm:$0xff] }
  0x91   :  { %953 = vst.msk [vmem:[#allocation0 + $0x30] sm:$0x1] %vm944_vm1, %v2095_v30  }
  0x96   :  { %v2068_v31 = vpop.permute.xlu0 %2067  ;;  %v2108_v18 = vpop.permute.xlu2 %2107 }
  0x97   :  { %v2070_v32 = vunpack.i.h.bf16 %v2068_v31  ;;  %v2069_v10 = vunpack.i.l.bf16 %v2068_v31  ;;  %v2110_v33 = vunpack.i.h.bf16 %v2108_v18  ;;  %v2109_v42 = vunpack.i.l.bf16 %v2108_v18  ;;  %v1879_v31 = vld [vmem:[#allocation0 + $0x38] sm:$0xff] }
  0x99   :  { %646 = vst.msk [vmem:[#allocation0] sm:$0xff] %vm645_vm13, %v2070_v32   ;;  %vm1694_vm13 = vcmask 310464  }
  0x9a   :  { %612 = vst.msk [vmem:[#allocation0 + $0x8] sm:$0xff] %vm610_vm12, %v2069_v10   ;;  %vm1111_vm12 = vcmask 802464  }
  0x9b   :  { %1078 = vst.msk [vmem:[#allocation0 + $0x30] sm:$0x1] %vm1069_vm2, %v2110_v33  }
  0x9e   :  { %v2083_v34 = vpop.permute.xlu0 %2082 }
  0x9f   :  { %v2085_v35 = vunpack.i.h.bf16 %v2083_v34  ;;  %v2084_v36 = vunpack.i.l.bf16 %v2083_v34 }
  0xa0   :  { %v2123_v12 = vpop.permute.xlu2 %2122 }
  0xa1   :  { %862 = vst.msk [vmem:[#allocation0] sm:$0xff] %vm861_vm3, %v2084_v36   ;;  %v2125_v29 = vunpack.i.h.bf16 %v2123_v12  ;;  %v2124_v43 = vunpack.i.l.bf16 %v2123_v12 }
  0xa2   :  { %869 = vst.msk [vmem:[#allocation0 + $0x20] sm:$0x1] %vm861_vm3, %v2085_v35   ;;  %vm1527_vm3 = vcmask 441664  }
  0xa3   :  { %1203 = vst.msk [vmem:[#allocation0 + $0x30] sm:$0x1] %vm1194_vm4, %v2125_v29  }
  0xa7   :  { %v2073_v38 = vpop.permute.xlu1 %2072 }
  0xa8   :  { %v2075_v39 = vunpack.i.h.bf16 %v2073_v38  ;;  %v2074_v40 = vunpack.i.l.bf16 %v2073_v38 }
  0xaa   :  { %695 = vst.msk [vmem:[#allocation0 + $0x10] sm:$0xff] %vm693_vm14, %v2074_v40   ;;  %v2138_v44 = vpop.permute.xlu2 %2137  ;;  %vm1277_vm14 = vcmask 671264  }
  0xab   :  { %814 = vst.msk [vmem:[#allocation0 + $0x10] sm:$0xff] %vm812_vm0, %v2080_v37   ;;  %v2140_v5 = vunpack.i.h.bf16 %v2138_v44  ;;  %v2139_v45 = vunpack.i.l.bf16 %v2138_v44  ;;  %vm1819_vm0 = vcmask 195664  }
  0xac   :  { %730 = vst.msk [vmem:[#allocation0 + $0x8] sm:$0xff] %vm728_vm15, %v2075_v39   ;;  %vm1236_vm15 = vcmask 687664  }
  0xad   :  { %946 = vst.msk [vmem:[#allocation0 + $0x10] sm:$0xff] %vm944_vm1, %v2094_v41   ;;  %vm1361_vm1 = vcmask 572864  }
  0xae   :  { %1071 = vst.msk [vmem:[#allocation0 + $0x10] sm:$0xff] %vm1069_vm2, %v2109_v42   ;;  %vm1402_vm2 = vcmask 556464  }
  0xaf   :  { %1196 = vst.msk [vmem:[#allocation0 + $0x10] sm:$0xff] %vm1194_vm4, %v2124_v43   ;;  %v2088_v46 = vpop.permute.xlu1 %2087  ;;  %vm1486_vm4 = vcmask 458064  }
  0xb0   :  { %v2090_v47 = vunpack.i.h.bf16 %v2088_v46  ;;  %v2089_v48 = vunpack.i.l.bf16 %v2088_v46  ;;  %1321 = vst.msk [vmem:[#allocation0 + $0x10] sm:$0xff] %vm1319_vm5, %v2139_v45  }
  0xb1   :  { %1328 = vst.msk [vmem:[#allocation0 + $0x30] sm:$0x1] %vm1319_vm5, %v2140_v5   ;;  %vm1611_vm5 = vcmask 343264  }
  0xb2   :  { %904 = vst.msk [vmem:[#allocation0 + $0x8] sm:$0xff] %vm902_vm6, %v2089_v48  }
  0xb3   :  { %911 = vst.msk [vmem:[#allocation0 + $0x28] sm:$0x1] %vm902_vm6, %v2090_v47   ;;  %vm1652_vm6 = vcmask 326864  }
  0xb4   :  { %v2153_v49 = vpop.permute.xlu2 %2152 }
  0xb5   :  { %v2155_v51 = vunpack.i.h.bf16 %v2153_v49  ;;  %v2154_v52 = vunpack.i.l.bf16 %v2153_v49 }
  0xb7   :  { %v2103_v50 = vpop.permute.xlu1 %2102  ;;  %1446 = vst.msk [vmem:[#allocation0 + $0x10] sm:$0xff] %vm1444_vm7, %v2154_v52  }
  0xb8   :  { %v2104_v53 = vunpack.i.l.bf16 %v2103_v50  ;;  %v2105_v54 = vunpack.i.h.bf16 %v2103_v50  ;;  %1453 = vst.msk [vmem:[#allocation0 + $0x30] sm:$0x1] %vm1444_vm7, %v2155_v51   ;;  %vm1736_vm7 = vcmask 228464  }
  0xb9   :  { %v2098_v55 = vpop.permute.xlu0 %2097 }
  0xba   :  { %1029 = vst.msk [vmem:[#allocation0 + $0x8] sm:$0xff] %vm1027_vm8, %v2104_v53   ;;  %v2100_v56 = vunpack.i.h.bf16 %v2098_v55  ;;  %v2099_v57 = vunpack.i.l.bf16 %v2098_v55 }
  0xbb   :  { %1036 = vst.msk [vmem:[#allocation0 + $0x28] sm:$0x1] %vm1027_vm8, %v2105_v54   ;;  %vm1777_vm8 = vcmask 212064  }
  0xbc   :  { %987 = vst.msk [vmem:[#allocation0] sm:$0xff] %vm986_vm9, %v2099_v57  }
  0xbd   :  { %994 = vst.msk [vmem:[#allocation0 + $0x20] sm:$0x1] %vm986_vm9, %v2100_v56   ;;  %v2168_v6 = vpop.permute.xlu2 %2167 }
  0xbe   :  { %v2170_v59 = vunpack.i.h.bf16 %v2168_v6  ;;  %v2169_v60 = vunpack.i.l.bf16 %v2168_v6 }
  0xbf   :  { %v2118_v58 = vpop.permute.xlu1 %2117 }
  0xc0   :  { %v2119_v61 = vunpack.i.l.bf16 %v2118_v58  ;;  %v2120_v62 = vunpack.i.h.bf16 %v2118_v58  ;;  %1571 = vst.msk [vmem:[#allocation0 + $0x10] sm:$0xff] %vm1569_vm10, %v2169_v60  }
  0xc1   :  { %v2113_v63 = vpop.permute.xlu0 %2112  ;;  %1578 = vst.msk [vmem:[#allocation0 + $0x30] sm:$0x1] %vm1569_vm10, %v2170_v59  }
  0xc2   :  { %v2115_v8 = vunpack.i.h.bf16 %v2113_v63  ;;  %v2114_v0 = vunpack.i.l.bf16 %v2113_v63  ;;  %1154 = vst.msk [vmem:[#allocation0 + $0x8] sm:$0xff] %vm1152_vm11, %v2119_v61  }
  0xc3   :  { %1161 = vst.msk [vmem:[#allocation0 + $0x28] sm:$0x1] %vm1152_vm11, %v2120_v62  }
  0xc4   :  { %1112 = vst.msk [vmem:[#allocation0] sm:$0xff] %vm1111_vm12, %v2114_v0  }
  0xc5   :  { %1119 = vst.msk [vmem:[#allocation0 + $0x20] sm:$0x1] %vm1111_vm12, %v2115_v8  }
  0xc6   :  { %v2183_v1 = vpop.permute.xlu2 %2182 }
  0xc7   :  { %v2133_v2 = vpop.permute.xlu1 %2132  ;;  %v2185_v3 = vunpack.i.h.bf16 %v2183_v1  ;;  %v2184_v4 = vunpack.i.l.bf16 %v2183_v1 }
  0xc8   :  { %v2134_v7 = vunpack.i.l.bf16 %v2133_v2  ;;  %v2135_v15 = vunpack.i.h.bf16 %v2133_v2 }
  0xc9   :  { %v2128_v9 = vpop.permute.xlu0 %2127  ;;  %1696 = vst.msk [vmem:[#allocation0 + $0x10] sm:$0xff] %vm1694_vm13, %v2184_v4  }
  0xca   :  { %v2130_v11 = vunpack.i.h.bf16 %v2128_v9  ;;  %v2129_v13 = vunpack.i.l.bf16 %v2128_v9  ;;  %1703 = vst.msk [vmem:[#allocation0 + $0x30] sm:$0x1] %vm1694_vm13, %v2185_v3  }
  0xcb   :  { %1279 = vst.msk [vmem:[#allocation0 + $0x8] sm:$0xff] %vm1277_vm14, %v2134_v7  }
  0xcc   :  { %1237 = vst.msk [vmem:[#allocation0] sm:$0xff] %vm1236_vm15, %v2129_v13  }
  0xcd   :  { %1244 = vst.msk [vmem:[#allocation0 + $0x20] sm:$0x1] %vm1236_vm15, %v2130_v11  }
  0xce   :  { %1286 = vst.msk [vmem:[#allocation0 + $0x28] sm:$0x1] %vm1277_vm14, %v2135_v15  }
  0xcf   :  { %v2198_v17 = vpop.permute.xlu2 %2197  ;;  %v2148_v19 = vpop.permute.xlu1 %2147 }
  0xd0   :  { %v2200_v20 = vunpack.i.h.bf16 %v2198_v17  ;;  %v2199_v21 = vunpack.i.l.bf16 %v2198_v17  ;;  %v2149_v14 = vunpack.i.l.bf16 %v2148_v19  ;;  %v2150_v25 = vunpack.i.h.bf16 %v2148_v19 }
  0xd1   :  { %v2143_v22 = vpop.permute.xlu0 %2142 }
  0xd2   :  { %v2145_v23 = vunpack.i.h.bf16 %v2143_v22  ;;  %v2144_v24 = vunpack.i.l.bf16 %v2143_v22  ;;  %1821 = vst.msk [vmem:[#allocation0 + $0x10] sm:$0xff] %vm1819_vm0, %v2199_v21  }
  0xd3   :  { %1828 = vst.msk [vmem:[#allocation0 + $0x30] sm:$0x1] %vm1819_vm0, %v2200_v20  }
  0xd4   :  { %1362 = vst.msk [vmem:[#allocation0] sm:$0xff] %vm1361_vm1, %v2144_v24  }
  0xd5   :  { %1369 = vst.msk [vmem:[#allocation0 + $0x20] sm:$0x1] %vm1361_vm1, %v2145_v23  }
  0xd6   :  { %1404 = vst.msk [vmem:[#allocation0 + $0x8] sm:$0xff] %vm1402_vm2, %v2149_v14  }
  0xd7   :  { %1411 = vst.msk [vmem:[#allocation0 + $0x28] sm:$0x1] %vm1402_vm2, %v2150_v25   ;;  %v2163_v26 = vpop.permute.xlu1 %2162 }
  0xd8   :  { %v2164_v30 = vunpack.i.l.bf16 %v2163_v26  ;;  %v2165_v35 = vunpack.i.h.bf16 %v2163_v26 }
  0xd9   :  { %v1844_v16 = vld [vmem:[#allocation0 + $0x10] sm:$0xff]  ;;  %v2158_v28 = vpop.permute.xlu0 %2157 }
  0xda   :  { %v2007_v32 = vpack.c.bf16 %v1851_v27, %v1844_v16  ;;  %v1872_v10 = vld [vmem:[#allocation0 + $0x30] sm:$0xff]  ;;  %v2160_v18 = vunpack.i.h.bf16 %v2158_v28  ;;  %v2159_v33 = vunpack.i.l.bf16 %v2158_v28  ;;  %1529 = vst.msk [vmem:[#allocation0 + $0x8] sm:$0xff] %vm1527_vm3, %v2164_v30  }
  0xdb   :  { %v2017_v34 = vpack.c.bf16 %v1879_v31, %v1872_v10  ;;  %1536 = vst.msk [vmem:[#allocation0 + $0x28] sm:$0x1] %vm1527_vm3, %v2165_v35  }
  0xdc   :  { %2036 = vst [vmem:[%s2624_s1 + $0x8] sm:$0xff] %v2007_v32  }
  0xdd   :  { %1487 = vst.msk [vmem:[#allocation0] sm:$0xff] %vm1486_vm4, %v2159_v33  }
  0xde   :  { %1494 = vst.msk [vmem:[#allocation0 + $0x20] sm:$0x1] %vm1486_vm4, %v2160_v18  }
  0xdf   :  { %2038 = vst [vmem:[%s2624_s1 + $0x18] sm:$0xff] %v2017_v34  }
  0xe0   :  { %v2178_v12 = vpop.permute.xlu1 %2177 }
  0xe1   :  { %v2173_v36 = vpop.permute.xlu0 %2172  ;;  %v2179_v38 = vunpack.i.l.bf16 %v2178_v12  ;;  %v2180_v39 = vunpack.i.h.bf16 %v2178_v12 }
  0xe2   :  { %v2175_v29 = vunpack.i.h.bf16 %v2173_v36  ;;  %v2174_v37 = vunpack.i.l.bf16 %v2173_v36 }
  0xe3   :  { %1654 = vst.msk [vmem:[#allocation0 + $0x8] sm:$0xff] %vm1652_vm6, %v2179_v38  }
  0xe4   :  { %1612 = vst.msk [vmem:[#allocation0] sm:$0xff] %vm1611_vm5, %v2174_v37  }
  0xe5   :  { %1619 = vst.msk [vmem:[#allocation0 + $0x20] sm:$0x1] %vm1611_vm5, %v2175_v29  }
  0xe6   :  { %1661 = vst.msk [vmem:[#allocation0 + $0x28] sm:$0x1] %vm1652_vm6, %v2180_v39  }
  0xe9   :  { %v2188_v40 = vpop.permute.xlu0 %2187  ;;  %v2193_v43 = vpop.permute.xlu1 %2192 }
  0xea   :  { %v2190_v41 = vunpack.i.h.bf16 %v2188_v40  ;;  %v2189_v42 = vunpack.i.l.bf16 %v2188_v40  ;;  %v2195_v44 = vunpack.i.h.bf16 %v2193_v43  ;;  %v2194_v5 = vunpack.i.l.bf16 %v2193_v43 }
  0xec   :  { %1737 = vst.msk [vmem:[#allocation0] sm:$0xff] %vm1736_vm7, %v2189_v42  }
  0xed   :  { %1744 = vst.msk [vmem:[#allocation0 + $0x20] sm:$0x1] %vm1736_vm7, %v2190_v41  }
  0xee   :  { %1779 = vst.msk [vmem:[#allocation0 + $0x8] sm:$0xff] %vm1777_vm8, %v2194_v5  }
  0xef   :  { %1786 = vst.msk [vmem:[#allocation0 + $0x28] sm:$0x1] %vm1777_vm8, %v2195_v44  }
  0xf3   :  { %v1831_v45 = vld [vmem:[#allocation0] sm:$0xff] }
  0xf4   :  { %v1858_v46 = vld [vmem:[#allocation0 + $0x20] sm:$0xff] }
  0xf5   :  { %v1837_v47 = vld [vmem:[#allocation0 + $0x8] sm:$0xff] }
  0xf6   :  { %v2002_v48 = vpack.c.bf16 %v1837_v47, %v1831_v45  ;;  %v1865_v49 = vld [vmem:[#allocation0 + $0x28] sm:$0xff] }
  0xf7   :  { %v2012_v50 = vpack.c.bf16 %v1865_v49, %v1858_v46 }
  0xf8   :  { %2003 = vst [vmem:[%s2624_s1] sm:$0xff] %v2002_v48  }
  0xf9   :  { %2037 = vst [vmem:[%s2624_s1 + $0x10] sm:$0xff] %v2012_v50  }

// kernel: fashion_cnn_forward.3
= control target key start
LH: loop header
LB: loop body
LE: loop exit
PB: predicated region body
PF: predicated region fallthrough
CT: control target
= control target key end

     0   :  { %s2285_s21 = smov 0   ;;  %s2287_s22 = smov 0   ;;  %s2656_s0 = inlined_call_operand.vmem [shape: bf16[392,9], index: 0, kind: input, shape index: {}]   ;;  %s2657_s1 = inlined_call_operand.vmem [shape: bf16[392,9], index: 1, kind: input, shape index: {}]   ;;  %s2658_s2 = inlined_call_operand.vmem [shape: bf16[392,9], index: 2, kind: input, shape index: {}]   ;;  %s2659_s3 = inlined_call_operand.vmem [shape: bf16[392,9], index: 3, kind: input, shape index: {}]   ;;  %s2660_s4 = inlined_call_operand.vmem [shape: bf16[9,32], index: 4, kind: input, shape index: {}]   ;;  %s2661_s5 = inlined_call_operand.vmem [shape: f32[1,32], index: 5, kind: input, shape index: {}]   ;;  %s2662_s6 = inlined_call_operand.vmem [shape: bf16[392,32], index: 6, kind: output, shape index: {}]  }
   0x1   :  { %s2289_s23 = smov 0  }
   0x2 LB: > { %s2298_s24 = sadd.s32 4294967295, %s2215_s23   ;;  %s2300_s25 = sadd.s32 1, %s2215_s23   ;;  %s2215_s23 = sphi %s2289_s23, %s2671_s23   ;;  %s2211_s22 = sphi %s2287_s22, %s2670_s22   ;;  %s2207_s21 = sphi %s2285_s21, %s2669_s21  }
   0x3   : > { %s166_s26 = ssub.s32 %s2215_s23, %s2300_s25  ;;  %s169_s27 = sadd.s32 1, %s2211_s22 }
   0x4   : > { %p167_p0 = scmp.eq.s32.totalorder %s166_s26, 0  ;;  %p179_p1 = scmp.ne.s32.totalorder %s2211_s22, %s2207_s21 }
   0x5   : > { %p180_p2 = scmp.eq.s32.totalorder %s2298_s24, 1  ;;  %p1748_p3 = scmp.ge.s32.totalorder %s2215_s23, 1 }
   0x6   : > { %s2308_s28 = scalar_select %p167_p0, %s2211_s22, %s169_s27  }
   0x7   : > { %p2310_p4 = por %p180_p2, %p179_p1  ;;  %p278_p5 = scmp.lt.s32.totalorder %s2215_s23, 3 }
   0x9   : > { %p279_p6 = pnand %p1748_p3, %p278_p5 }
   0xa   : > { %s2321_s10 = smul.u32 (!%p279_p6), 25, %s2298_s24  ;;  %s335_s7 = sand.u32 (!%p279_p6), 1, %s2207_s21  }
   0xb   : > { %282 = sbr.rel (%p279_p6) target bundleno = 433 (0x1b1), region = 44 }
   0xc   : > { %p343_p7 = scmp.lt.s32.totalorder (!%p279_p6), %s2321_s10, 48 }
  0x10   : > { %v1803_v0 = vld [vmem:[%s2660_s4] sm:$0xf]  ;;  %v2013_v1 = vld [vmem:[%s2660_s4] sm:$0x10]  ;;  %vm535_vm0 = vcmask 1043456   ;;  %vm536_vm1 = vcmask 1044480  }
  0x11   : > { %v1804_v2 = vor.u32 %v2013_v1, %v1803_v0  ;;  %v2249_v3 = vmov 65535   ;;  %s344_s11 = scalar_select %p343_p7, %s2321_s10, 48  ;;  %vm495_vm2 = vcmask 72704   ;;  %v2421_v49 = vld [vmem:[%s2661_s5] ss:$0 sm:$0xff]  ;;  %vm1369_vm3 = vcmask 257024  }
  0x12   : > { %v537_v4 = vsel %vm535_vm0, 4294967295, %v2249_v3  ;;  %s2062_s13 = smul.u32 (%p2310_p4), 100, %s2298_s24 }
  0x13   : > { %v538_v5 = vsel %vm536_vm1, %v537_v4, 0  ;;  %s1749_s12 = sshll.u32 %s344_s11, 2  ;;  %s2063_s11 = smul.u32 100, %s335_s7 }
  0x14   : > { %v540_v6 = vand.u32 %v1804_v2, %v538_v5  ;;  %s2328_s15 = scalar_lea.vmem %s2656_s0, %s1749_s12  ;;  %s2333_s18 = scalar_lea.vmem %s2657_s1, %s1749_s12 }
  0x15   : > { %v2014_v7 = vld [vmem:[%s2328_s15] sm:$0xff]  ;;  %s2340_s23 = scalar_lea.vmem %s2658_s2, %s1749_s12  ;;  %s2345_s30 = scalar_lea.vmem %s2659_s3, %s1749_s12  ;;  %v2015_v11 = vld [vmem:[%s2328_s15 + $0x8] sm:$0xff]  ;;  %v2016_v15 = vld [vmem:[%s2328_s15 + $0x10] sm:$0xff] }
  0x16   : > { %549 = vmatpush.bf16.msra.mxu0 %v540_v6  ;;  %749 = vmatpush.bf16.msra.mxu1 %v540_v6  ;;  %v2026_v8 = vld [vmem:[%s2333_s18] sm:$0xff]  ;;  %v2027_v12 = vld [vmem:[%s2333_s18 + $0x8] sm:$0xff]  ;;  %v2028_v16 = vld [vmem:[%s2333_s18 + $0x10] sm:$0xff]  ;;  %s2428_s21 = scalar_lea.vmem [#allocation2], %s2063_s11   ;;  %s1403_s12 = ssub.s32 (%p2310_p4), 49, %s2321_s10 }
  0x17   : > { %974 = vmatpush.bf16.msra.mxu2 %v540_v6  ;;  %1174 = vmatpush.bf16.msra.mxu3 %v540_v6  ;;  %v2038_v9 = vld [vmem:[%s2340_s23] sm:$0xff]  ;;  %v2039_v13 = vld [vmem:[%s2340_s23 + $0x8] sm:$0xff]  ;;  %v2040_v17 = vld [vmem:[%s2340_s23 + $0x10] sm:$0xff]  ;;  %p1404_p8 = scmp.lt.s32.totalorder (%p2310_p4), %s1403_s12, 25  ;;  %s2539_s16 = scalar_lea.vmem (%p2310_p4), %s2662_s6, %s2062_s13  }
  0x18   : > { %v2050_v10 = vld [vmem:[%s2345_s30] sm:$0xff]  ;;  %v2051_v14 = vld [vmem:[%s2345_s30 + $0x8] sm:$0xff]  ;;  %v2052_v18 = vld [vmem:[%s2345_s30 + $0x10] sm:$0xff] }
  0x19   : > { %1805 = vmatmul.msk.bf16.vlgmr.msra.gmra.mxu0 %vm495_vm2, %v2014_v7  ;;  %1866 = vmatmul.msk.bf16.vlgmr.msra.gmra.mxu1 %vm495_vm2, %v2026_v8  ;;  %v2017_v19 = vld [vmem:[%s2328_s15 + $0x18] sm:$0xff]  ;;  %v2018_v23 = vld [vmem:[%s2328_s15 + $0x20] sm:$0xff]  ;;  %v2019_v27 = vld [vmem:[%s2328_s15 + $0x28] sm:$0xff] }
  0x1a   : > { %1927 = vmatmul.msk.bf16.vlgmr.msra.gmra.mxu2 %vm495_vm2, %v2038_v9  ;;  %1988 = vmatmul.msk.bf16.vlgmr.msra.gmra.mxu3 %vm495_vm2, %v2050_v10  ;;  %v2029_v20 = vld [vmem:[%s2333_s18 + $0x18] sm:$0xff]  ;;  %v2030_v24 = vld [vmem:[%s2333_s18 + $0x20] sm:$0xff]  ;;  %v2031_v28 = vld [vmem:[%s2333_s18 + $0x28] sm:$0xff] }
  0x1b   : > { %v2041_v21 = vld [vmem:[%s2340_s23 + $0x18] sm:$0xff]  ;;  %v2042_v25 = vld [vmem:[%s2340_s23 + $0x20] sm:$0xff]  ;;  %v2043_v29 = vld [vmem:[%s2340_s23 + $0x28] sm:$0xff] }
  0x1c   : > { %v2053_v22 = vld [vmem:[%s2345_s30 + $0x18] sm:$0xff]  ;;  %v2054_v26 = vld [vmem:[%s2345_s30 + $0x20] sm:$0xff]  ;;  %v2055_v30 = vld [vmem:[%s2345_s30 + $0x28] sm:$0xff] }
  0x1d   : > { %v2020_v31 = vld [vmem:[%s2328_s15 + $0x30] sm:$0xff]  ;;  %v2021_v35 = vld [vmem:[%s2328_s15 + $0x38] sm:$0xff]  ;;  %v2022_v39 = vld [vmem:[%s2328_s15 + $0x40] sm:$0xff] }
  0x1e   : > { %v2032_v32 = vld [vmem:[%s2333_s18 + $0x30] sm:$0xff]  ;;  %v2033_v36 = vld [vmem:[%s2333_s18 + $0x38] sm:$0xff]  ;;  %v2034_v40 = vld [vmem:[%s2333_s18 + $0x40] sm:$0xff] }
  0x1f   : > { %v2044_v33 = vld [vmem:[%s2340_s23 + $0x30] sm:$0xff]  ;;  %v2045_v37 = vld [vmem:[%s2340_s23 + $0x38] sm:$0xff]  ;;  %v2046_v43 = vld [vmem:[%s2340_s23 + $0x40] sm:$0xff] }
  0x20   : > { %v2056_v34 = vld [vmem:[%s2345_s30 + $0x30] sm:$0xff]  ;;  %v2057_v38 = vld [vmem:[%s2345_s30 + $0x38] sm:$0xff]  ;;  %v2058_v44 = vld [vmem:[%s2345_s30 + $0x40] sm:$0xff] }
  0x21   : > { %v2023_v57 = vld [vmem:[%s2328_s15 + $0x48] sm:$0xff] }
  0x22   : > { %v2035_v58 = vld [vmem:[%s2333_s18 + $0x48] sm:$0xff] }
  0x23   : > { %v2047_v0 = vld [vmem:[%s2340_s23 + $0x48] sm:$0xff] }
  0x24   : > { %v2059_v1 = vld [vmem:[%s2345_s30 + $0x48] sm:$0xff] }
  0x29   : > { %1806 = vmatmul.msk.bf16.gmra.mxu0 %vm495_vm2, %v2015_v11  ;;  %1867 = vmatmul.msk.bf16.gmra.mxu1 %vm495_vm2, %v2027_v12 }
  0x2a   : > { %1928 = vmatmul.msk.bf16.gmra.mxu2 %vm495_vm2, %v2039_v13  ;;  %1989 = vmatmul.msk.bf16.gmra.mxu3 %vm495_vm2, %v2051_v14 }
  0x39   : > { %1807 = vmatmul.msk.bf16.gmra.mxu0 %vm495_vm2, %v2016_v15  ;;  %1868 = vmatmul.msk.bf16.gmra.mxu1 %vm495_vm2, %v2028_v16 }
  0x3a   : > { %1929 = vmatmul.msk.bf16.gmra.mxu2 %vm495_vm2, %v2040_v17  ;;  %1990 = vmatmul.msk.bf16.gmra.mxu3 %vm495_vm2, %v2052_v18  ;;  %v2024_v17 = vld [vmem:[%s2328_s15 + $0x50] sm:$0xff] }
  0x3b   : > { %v2036_v18 = vld [vmem:[%s2333_s18 + $0x50] sm:$0xff] }
  0x49   : > { %1808 = vmatmul.msk.bf16.gmra.mxu0 %vm495_vm2, %v2017_v19  ;;  %1869 = vmatmul.msk.bf16.gmra.mxu1 %vm495_vm2, %v2029_v20 }
  0x4a   : > { %1930 = vmatmul.msk.bf16.gmra.mxu2 %vm495_vm2, %v2041_v21  ;;  %1991 = vmatmul.msk.bf16.gmra.mxu3 %vm495_vm2, %v2053_v22 }
  0x59   : > { %1809 = vmatmul.msk.bf16.gmra.mxu0 %vm495_vm2, %v2018_v23  ;;  %1870 = vmatmul.msk.bf16.gmra.mxu1 %vm495_vm2, %v2030_v24  ;;  %v2048_v24 = vld [vmem:[%s2340_s23 + $0x50] sm:$0xff] }
  0x5a   : > { %1931 = vmatmul.msk.bf16.gmra.mxu2 %vm495_vm2, %v2042_v25  ;;  %1992 = vmatmul.msk.bf16.gmra.mxu3 %vm495_vm2, %v2054_v26  ;;  %v2060_v25 = vld [vmem:[%s2345_s30 + $0x50] sm:$0xff] }
  0x69   : > { %1810 = vmatmul.msk.bf16.gmra.mxu0 %vm495_vm2, %v2019_v27  ;;  %1871 = vmatmul.msk.bf16.gmra.mxu1 %vm495_vm2, %v2031_v28 }
  0x6a   : > { %1932 = vmatmul.msk.bf16.gmra.mxu2 %vm495_vm2, %v2043_v29  ;;  %1993 = vmatmul.msk.bf16.gmra.mxu3 %vm495_vm2, %v2055_v30 }
  0x79   : > { %1811 = vmatmul.msk.bf16.gmra.mxu0 %vm495_vm2, %v2020_v31  ;;  %1872 = vmatmul.msk.bf16.gmra.mxu1 %vm495_vm2, %v2032_v32 }
  0x7a   : > { %1933 = vmatmul.msk.bf16.gmra.mxu2 %vm495_vm2, %v2044_v33  ;;  %1994 = vmatmul.msk.bf16.gmra.mxu3 %vm495_vm2, %v2056_v34 }
  0x89   : > { %1812 = vmatmul.msk.bf16.gmra.mxu0 %vm495_vm2, %v2021_v35  ;;  %1873 = vmatmul.msk.bf16.gmra.mxu1 %vm495_vm2, %v2033_v36 }
  0x8a   : > { %1934 = vmatmul.msk.bf16.gmra.mxu2 %vm495_vm2, %v2045_v37  ;;  %1995 = vmatmul.msk.bf16.gmra.mxu3 %vm495_vm2, %v2057_v38 }
  0x96   : > { %v551_v41 = vpop.f32.mrf.mxu0  ;;  %v751_v42 = vpop.f32.mrf.mxu1 }
  0x97   : > { %v815_v45 = vmax.f32 %v551_v41, %v751_v42  ;;  %v2025_v41 = vld [vmem:[%s2328_s15 + $0x58] sm:$0xff] }
  0x98   : > { %v2037_v42 = vld [vmem:[%s2333_s18 + $0x58] sm:$0xff] }
  0x99   : > { %1813 = vmatmul.msk.bf16.gmra.mxu0 %vm495_vm2, %v2022_v39  ;;  %1874 = vmatmul.msk.bf16.gmra.mxu1 %vm495_vm2, %v2034_v40 }
  0x9a   : > { %1935 = vmatmul.msk.bf16.gmra.mxu2 %vm495_vm2, %v2046_v43  ;;  %1996 = vmatmul.msk.bf16.gmra.mxu3 %vm495_vm2, %v2058_v44 }
  0x9d   : > { %v976_v46 = vpop.f32.mrf.mxu2  ;;  %v1176_v47 = vpop.f32.mrf.mxu3 }
  0x9e   : > { %v1240_v48 = vmax.f32 %v976_v46, %v1176_v47  ;;  %v553_v50 = vpop.f32.mrf.mxu0  ;;  %v753_v51 = vpop.f32.mrf.mxu1 }
  0x9f   : > { %v816_v60 = vmax.f32 %v553_v50, %v753_v51  ;;  %v2061_v50 = vld [vmem:[%s2345_s30 + $0x58] sm:$0xff] }
  0xa0   : > { %v1265_v52 = vmax.f32 %v815_v45, %v1240_v48  ;;  %v2049_v48 = vld [vmem:[%s2340_s23 + $0x58] sm:$0xff] }
  0xa2   : > { %v1294_v53 = vadd.f32 %v2421_v49, %v1265_v52 }
  0xa4   : > { %v1319_v54 = vmax.f32 %v1294_v53, 0.0 }
  0xa5   : > { %v978_v55 = vpop.f32.mrf.mxu2  ;;  %v1178_v56 = vpop.f32.mrf.mxu3 }
  0xa6   : > { %v1344_v59 = vpack.c.bf16 %v1319_v54, %v1319_v54  ;;  %v1241_v61 = vmax.f32 %v978_v55, %v1178_v56  ;;  %v556_v62 = vpop.f32.mrf.mxu0  ;;  %v756_v63 = vpop.f32.mrf.mxu1 }
  0xa7   : > { %v817_v5 = vmax.f32 %v556_v62, %v756_v63  ;;  %v639_v62 = vld [vmem:[%s2333_s18 + $0x60] sm:$0xf] }
  0xa8   : > { %1370 = vst.msk [vmem:[%s2428_s21] sm:$0xf] %vm1369_vm3, %v1344_v59  ;;  %v1266_v2 = vmax.f32 %v816_v60, %v1241_v61  ;;  %v426_v61 = vld [vmem:[%s2328_s15 + $0x60] sm:$0xf] }
  0xa9   : > { %1814 = vmatmul.msk.bf16.gmra.mxu0 %vm495_vm2, %v2023_v57  ;;  %1875 = vmatmul.msk.bf16.gmra.mxu1 %vm495_vm2, %v2035_v58  ;;  %v864_v63 = vld [vmem:[%s2340_s23 + $0x60] sm:$0xf] }
  0xaa   : > { %v1295_v3 = vadd.f32 %v2421_v49, %v1266_v2  ;;  %1936 = vmatmul.msk.bf16.gmra.mxu2 %vm495_vm2, %v2047_v0  ;;  %1997 = vmatmul.msk.bf16.gmra.mxu3 %vm495_vm2, %v2059_v1  ;;  %v1064_v0 = vld [vmem:[%s2345_s30 + $0x60] sm:$0xf]  ;;  %v476_v2 = vunpack.c.l.b16 %v426_v61 }
  0xac   : > { %v1320_v4 = vmax.f32 %v1295_v3, 0.0  ;;  %v689_v3 = vunpack.c.l.b16 %v639_v62 }
  0xad   : > { %v981_v6 = vpop.f32.mrf.mxu2  ;;  %v1181_v7 = vpop.f32.mrf.mxu3 }
  0xae   : > { %v1345_v8 = vpack.c.bf16 %v1320_v4, %v1320_v4  ;;  %v1242_v9 = vmax.f32 %v981_v6, %v1181_v7  ;;  %v558_v10 = vpop.f32.mrf.mxu0  ;;  %v758_v11 = vpop.f32.mrf.mxu1  ;;  %v914_v4 = vunpack.c.l.b16 %v864_v63  ;;  %v1114_v6 = vunpack.c.l.b16 %v1064_v0 }
  0xaf   : > { %v818_v20 = vmax.f32 %v558_v10, %v758_v11  ;;  %v489_v10 = vpack.c.b16 %v476_v2, %v476_v2  ;;  %v702_v11 = vpack.c.b16 %v689_v3, %v689_v3 }
  0xb0   : > { %1371 = vst.msk [vmem:[%s2428_s21 + $0x4] sm:$0xf] %vm1369_vm3, %v1345_v8  ;;  %v1267_v12 = vmax.f32 %v817_v5, %v1242_v9 }
  0xb2   : > { %v1296_v13 = vadd.f32 %v2421_v49, %v1267_v12  ;;  %v927_v12 = vpack.c.b16 %v914_v4, %v914_v4 }
  0xb4   : > { %v1321_v14 = vmax.f32 %v1296_v13, 0.0 }
  0xb5   : > { %v983_v15 = vpop.f32.mrf.mxu2  ;;  %v1183_v16 = vpop.f32.mrf.mxu3 }
  0xb6   : > { %v1346_v19 = vpack.c.bf16 %v1321_v14, %v1321_v14  ;;  %v1243_v21 = vmax.f32 %v983_v15, %v1183_v16  ;;  %v561_v22 = vpop.f32.mrf.mxu0  ;;  %v761_v23 = vpop.f32.mrf.mxu1 }
  0xb7   : > { %v819_v29 = vmax.f32 %v561_v22, %v761_v23 }
  0xb8   : > { %1372 = vst.msk [vmem:[%s2428_s21 + $0x8] sm:$0xf] %vm1369_vm3, %v1346_v19  ;;  %v1268_v26 = vmax.f32 %v818_v20, %v1243_v21 }
  0xb9   : > { %1815 = vmatmul.msk.bf16.gmra.mxu0 %vm495_vm2, %v2024_v17  ;;  %1876 = vmatmul.msk.bf16.gmra.mxu1 %vm495_vm2, %v2036_v18  ;;  %v1127_v18 = vpack.c.b16 %v1114_v6, %v1114_v6 }
  0xba   : > { %v1297_v27 = vadd.f32 %v2421_v49, %v1268_v26  ;;  %1937 = vmatmul.msk.bf16.gmra.mxu2 %vm495_vm2, %v2048_v24  ;;  %1998 = vmatmul.msk.bf16.gmra.mxu3 %vm495_vm2, %v2060_v25 }
  0xbc   : > { %v1322_v28 = vmax.f32 %v1297_v27, 0.0 }
  0xbd   : > { %v986_v30 = vpop.f32.mrf.mxu2  ;;  %v1186_v31 = vpop.f32.mrf.mxu3 }
  0xbe   : > { %v1347_v32 = vpack.c.bf16 %v1322_v28, %v1322_v28  ;;  %v1244_v33 = vmax.f32 %v986_v30, %v1186_v31  ;;  %v563_v34 = vpop.f32.mrf.mxu0  ;;  %v763_v35 = vpop.f32.mrf.mxu1 }
  0xbf   : > { %v820_v44 = vmax.f32 %v563_v34, %v763_v35 }
  0xc0   : > { %1373 = vst.msk [vmem:[%s2428_s21 + $0xc] sm:$0xf] %vm1369_vm3, %v1347_v32  ;;  %v1269_v36 = vmax.f32 %v819_v29, %v1244_v33 }
  0xc2   : > { %v1298_v37 = vadd.f32 %v2421_v49, %v1269_v36 }
  0xc4   : > { %v1323_v38 = vmax.f32 %v1298_v37, 0.0 }
  0xc5   : > { %v988_v39 = vpop.f32.mrf.mxu2  ;;  %v1188_v40 = vpop.f32.mrf.mxu3 }
  0xc6   : > { %v1348_v43 = vpack.c.bf16 %v1323_v38, %v1323_v38  ;;  %v1245_v45 = vmax.f32 %v988_v39, %v1188_v40  ;;  %v566_v46 = vpop.f32.mrf.mxu0  ;;  %v766_v47 = vpop.f32.mrf.mxu1 }
  0xc7   : > { %v821_v54 = vmax.f32 %v566_v46, %v766_v47 }
  0xc8   : > { %1374 = vst.msk [vmem:[%s2428_s21 + $0x10] sm:$0xf] %vm1369_vm3, %v1348_v43  ;;  %v1270_v51 = vmax.f32 %v820_v44, %v1245_v45 }
  0xc9   : > { %1816 = vmatmul.msk.bf16.gmra.mxu0 %vm495_vm2, %v2025_v41  ;;  %1877 = vmatmul.msk.bf16.gmra.mxu1 %vm495_vm2, %v2037_v42 }
  0xca   : > { %v1299_v52 = vadd.f32 %v2421_v49, %v1270_v51  ;;  %1938 = vmatmul.msk.bf16.gmra.mxu2 %vm495_vm2, %v2049_v48  ;;  %1999 = vmatmul.msk.bf16.gmra.mxu3 %vm495_vm2, %v2061_v50 }
  0xcc   : > { %v1324_v53 = vmax.f32 %v1299_v52, 0.0 }
  0xcd   : > { %v991_v55 = vpop.f32.mrf.mxu2  ;;  %v1191_v56 = vpop.f32.mrf.mxu3 }
  0xce   : > { %v1349_v57 = vpack.c.bf16 %v1324_v53, %v1324_v53  ;;  %v1246_v58 = vmax.f32 %v991_v55, %v1191_v56  ;;  %v568_v59 = vpop.f32.mrf.mxu0  ;;  %v768_v60 = vpop.f32.mrf.mxu1 }
  0xcf   : > { %v822_v14 = vmax.f32 %v568_v59, %v768_v60 }
  0xd0   : > { %1375 = vst.msk [vmem:[%s2428_s21 + $0x14] sm:$0xf] %vm1369_vm3, %v1349_v57  ;;  %v1271_v1 = vmax.f32 %v821_v54, %v1246_v58 }
  0xd2   : > { %v1300_v5 = vadd.f32 %v2421_v49, %v1271_v1 }
  0xd4   : > { %v1325_v7 = vmax.f32 %v1300_v5, 0.0 }
  0xd5   : > { %v993_v8 = vpop.f32.mrf.mxu2  ;;  %v1193_v9 = vpop.f32.mrf.mxu3 }
  0xd6   : > { %v1350_v13 = vpack.c.bf16 %v1325_v7, %v1325_v7  ;;  %v1247_v15 = vmax.f32 %v993_v8, %v1193_v9  ;;  %v571_v16 = vpop.f32.mrf.mxu0  ;;  %v771_v17 = vpop.f32.mrf.mxu1 }
  0xd7   : > { %v823_v22 = vmax.f32 %v571_v16, %v771_v17 }
  0xd8   : > { %1376 = vst.msk [vmem:[%s2428_s21 + $0x18] sm:$0xf] %vm1369_vm3, %v1350_v13  ;;  %v1272_v19 = vmax.f32 %v822_v14, %v1247_v15 }
  0xd9   : > { %1817 = vmatmul.msk.bf16.gmra.mxu0 %vm495_vm2, %v489_v10  ;;  %1878 = vmatmul.msk.bf16.gmra.mxu1 %vm495_vm2, %v702_v11 }
  0xda   : > { %v1301_v20 = vadd.f32 %v2421_v49, %v1272_v19  ;;  %1939 = vmatmul.msk.bf16.gmra.mxu2 %vm495_vm2, %v927_v12  ;;  %2000 = vmatmul.msk.bf16.gmra.mxu3 %vm495_vm2, %v1127_v18 }
  0xdc   : > { %v1326_v21 = vmax.f32 %v1301_v20, 0.0 }
  0xdd   : > { %v996_v23 = vpop.f32.mrf.mxu2  ;;  %v1196_v24 = vpop.f32.mrf.mxu3 }
  0xde   : > { %v1351_v25 = vpack.c.bf16 %v1326_v21, %v1326_v21  ;;  %v1248_v26 = vmax.f32 %v996_v23, %v1196_v24  ;;  %v573_v27 = vpop.f32.mrf.mxu0  ;;  %v773_v28 = vpop.f32.mrf.mxu1 }
  0xdf   : > { %v824_v35 = vmax.f32 %v573_v27, %v773_v28 }
  0xe0   : > { %1377 = vst.msk [vmem:[%s2428_s21 + $0x1c] sm:$0xf] %vm1369_vm3, %v1351_v25  ;;  %v1273_v29 = vmax.f32 %v823_v22, %v1248_v26 }
  0xe2   : > { %v1302_v30 = vadd.f32 %v2421_v49, %v1273_v29 }
  0xe4   : > { %v1327_v31 = vmax.f32 %v1302_v30, 0.0 }
  0xe5   : > { %v998_v32 = vpop.f32.mrf.mxu2  ;;  %v1198_v33 = vpop.f32.mrf.mxu3 }
  0xe6   : > { %v1352_v34 = vpack.c.bf16 %v1327_v31, %v1327_v31  ;;  %v1249_v36 = vmax.f32 %v998_v32, %v1198_v33  ;;  %v576_v37 = vpop.f32.mrf.mxu0  ;;  %v776_v38 = vpop.f32.mrf.mxu1 }
  0xe7   : > { %v825_v42 = vmax.f32 %v576_v37, %v776_v38 }
  0xe8   : > { %1378 = vst.msk [vmem:[%s2428_s21 + $0x20] sm:$0xf] %vm1369_vm3, %v1352_v34  ;;  %v1274_v39 = vmax.f32 %v824_v35, %v1249_v36 }
  0xea   : > { %v1303_v40 = vadd.f32 %v2421_v49, %v1274_v39 }
  0xec   : > { %v1328_v41 = vmax.f32 %v1303_v40, 0.0 }
  0xed   : > { %v1001_v43 = vpop.f32.mrf.mxu2  ;;  %v1201_v44 = vpop.f32.mrf.mxu3 }
  0xee   : > { %v1353_v45 = vpack.c.bf16 %v1328_v41, %v1328_v41  ;;  %v1250_v46 = vmax.f32 %v1001_v43, %v1201_v44  ;;  %v578_v47 = vpop.f32.mrf.mxu0  ;;  %v778_v48 = vpop.f32.mrf.mxu1 }
  0xef   : > { %v826_v56 = vmax.f32 %v578_v47, %v778_v48 }
  0xf0   : > { %1379 = vst.msk [vmem:[%s2428_s21 + $0x24] sm:$0xf] %vm1369_vm3, %v1353_v45  ;;  %v1275_v50 = vmax.f32 %v825_v42, %v1250_v46 }
  0xf2   : > { %v1304_v51 = vadd.f32 %v2421_v49, %v1275_v50 }
  0xf4   : > { %v1329_v52 = vmax.f32 %v1304_v51, 0.0 }
  0xf5   : > { %v1003_v53 = vpop.f32.mrf.mxu2  ;;  %v1203_v54 = vpop.f32.mrf.mxu3 }
  0xf6   : > { %v1354_v55 = vpack.c.bf16 %v1329_v52, %v1329_v52  ;;  %v1251_v57 = vmax.f32 %v1003_v53, %v1203_v54  ;;  %v581_v58 = vpop.f32.mrf.mxu0  ;;  %v781_v59 = vpop.f32.mrf.mxu1 }
  0xf7   : > { %v827_v63 = vmax.f32 %v581_v58, %v781_v59 }
  0xf8   : > { %1380 = vst.msk [vmem:[%s2428_s21 + $0x28] sm:$0xf] %vm1369_vm3, %v1354_v55  ;;  %v1276_v60 = vmax.f32 %v826_v56, %v1251_v57 }
  0xfa   : > { %v1305_v61 = vadd.f32 %v2421_v49, %v1276_v60 }
  0xfc   : > { %v1330_v62 = vmax.f32 %v1305_v61, 0.0 }
  0xfd   : > { %v1006_v0 = vpop.f32.mrf.mxu2  ;;  %v1206_v1 = vpop.f32.mrf.mxu3 }
  0xfe   : > { %v1355_v2 = vpack.c.bf16 %v1330_v62, %v1330_v62  ;;  %v1252_v3 = vmax.f32 %v1006_v0, %v1206_v1  ;;  %v583_v4 = vpop.f32.mrf.mxu0  ;;  %v783_v5 = vpop.f32.mrf.mxu1 }
  0xff   : > { %v828_v12 = vmax.f32 %v583_v4, %v783_v5 }
 0x100   : > { %1381 = vst.msk [vmem:[%s2428_s21 + $0x2c] sm:$0xf] %vm1369_vm3, %v1355_v2  ;;  %v1277_v6 = vmax.f32 %v827_v63, %v1252_v3 }
 0x102   : > { %v1306_v7 = vadd.f32 %v2421_v49, %v1277_v6 }
 0x104   : > { %v1331_v8 = vmax.f32 %v1306_v7, 0.0 }
 0x105   : > { %v1008_v9 = vpop.f32.mrf.mxu2  ;;  %v1208_v10 = vpop.f32.mrf.mxu3 }
 0x106   : > { %v1356_v11 = vpack.c.bf16 %v1331_v8, %v1331_v8  ;;  %v1253_v13 = vmax.f32 %v1008_v9, %v1208_v10  ;;  %v586_v14 = vpop.f32.mrf.mxu0  ;;  %v786_v15 = vpop.f32.mrf.mxu1 }
 0x107   : > { %v829_v19 = vmax.f32 %v586_v14, %v786_v15 }
 0x108   : > { %1382 = vst.msk [vmem:[%s2428_s21 + $0x30] sm:$0xf] %vm1369_vm3, %v1356_v11  ;;  %v1278_v16 = vmax.f32 %v828_v12, %v1253_v13 }
 0x10a   : > { %v1307_v17 = vadd.f32 %v2421_v49, %v1278_v16 }
 0x10c   : > { %v1332_v18 = vmax.f32 %v1307_v17, 0.0 }
 0x10d   : > { %v1011_v20 = vpop.f32.mrf.mxu2  ;;  %v1211_v21 = vpop.f32.mrf.mxu3 }
 0x10e   : > { %v1357_v22 = vpack.c.bf16 %v1332_v18, %v1332_v18  ;;  %v1254_v23 = vmax.f32 %v1011_v20, %v1211_v21  ;;  %v588_v24 = vpop.f32.mrf.mxu0  ;;  %v788_v25 = vpop.f32.mrf.mxu1 }
 0x10f   : > { %v830_v32 = vmax.f32 %v588_v24, %v788_v25 }
 0x110   : > { %1383 = vst.msk [vmem:[%s2428_s21 + $0x34] sm:$0xf] %vm1369_vm3, %v1357_v22  ;;  %v1279_v26 = vmax.f32 %v829_v19, %v1254_v23 }
 0x112   : > { %v1308_v27 = vadd.f32 %v2421_v49, %v1279_v26 }
 0x114   : > { %v1333_v28 = vmax.f32 %v1308_v27, 0.0 }
 0x115   : > { %v1013_v29 = vpop.f32.mrf.mxu2  ;;  %v1213_v30 = vpop.f32.mrf.mxu3 }
 0x116   : > { %v1358_v31 = vpack.c.bf16 %v1333_v28, %v1333_v28  ;;  %v1255_v33 = vmax.f32 %v1013_v29, %v1213_v30  ;;  %v591_v34 = vpop.f32.mrf.mxu0  ;;  %v791_v35 = vpop.f32.mrf.mxu1 }
 0x117   : > { %v831_v39 = vmax.f32 %v591_v34, %v791_v35 }
 0x118   : > { %1384 = vst.msk [vmem:[%s2428_s21 + $0x38] sm:$0xf] %vm1369_vm3, %v1358_v31  ;;  %v1280_v36 = vmax.f32 %v830_v32, %v1255_v33 }
 0x11a   : > { %v1309_v37 = vadd.f32 %v2421_v49, %v1280_v36 }
 0x11c   : > { %v1334_v38 = vmax.f32 %v1309_v37, 0.0 }
 0x11d   : > { %v1016_v40 = vpop.f32.mrf.mxu2  ;;  %v1216_v41 = vpop.f32.mrf.mxu3 }
 0x11e   : > { %v1359_v42 = vpack.c.bf16 %v1334_v38, %v1334_v38  ;;  %v1256_v43 = vmax.f32 %v1016_v40, %v1216_v41  ;;  %v593_v44 = vpop.f32.mrf.mxu0  ;;  %v793_v45 = vpop.f32.mrf.mxu1 }
 0x11f   : > { %v832_v53 = vmax.f32 %v593_v44, %v793_v45 }
 0x120   : > { %1385 = vst.msk [vmem:[%s2428_s21 + $0x3c] sm:$0xf] %vm1369_vm3, %v1359_v42  ;;  %v1281_v46 = vmax.f32 %v831_v39, %v1256_v43 }
 0x122   : > { %v1310_v47 = vadd.f32 %v2421_v49, %v1281_v46 }
 0x124   : > { %v1335_v48 = vmax.f32 %v1310_v47, 0.0 }
 0x125   : > { %v1018_v50 = vpop.f32.mrf.mxu2  ;;  %v1218_v51 = vpop.f32.mrf.mxu3 }
 0x126   : > { %v1360_v52 = vpack.c.bf16 %v1335_v48, %v1335_v48  ;;  %v1257_v54 = vmax.f32 %v1018_v50, %v1218_v51  ;;  %v596_v55 = vpop.f32.mrf.mxu0  ;;  %v796_v56 = vpop.f32.mrf.mxu1 }
 0x127   : > { %v833_v60 = vmax.f32 %v596_v55, %v796_v56 }
 0x128   : > { %1386 = vst.msk [vmem:[%s2428_s21 + $0x40] sm:$0xf] %vm1369_vm3, %v1360_v52  ;;  %v1282_v57 = vmax.f32 %v832_v53, %v1257_v54 }
 0x12a   : > { %v1311_v58 = vadd.f32 %v2421_v49, %v1282_v57 }
 0x12c   : > { %v1336_v59 = vmax.f32 %v1311_v58, 0.0 }
 0x12d   : > { %v1021_v61 = vpop.f32.mrf.mxu2  ;;  %v1221_v62 = vpop.f32.mrf.mxu3 }
 0x12e   : > { %v1361_v63 = vpack.c.bf16 %v1336_v59, %v1336_v59  ;;  %v1258_v0 = vmax.f32 %v1021_v61, %v1221_v62  ;;  %v598_v1 = vpop.f32.mrf.mxu0  ;;  %v798_v2 = vpop.f32.mrf.mxu1 }
 0x12f   : > { %v834_v9 = vmax.f32 %v598_v1, %v798_v2 }
 0x130   : > { %1387 = vst.msk [vmem:[%s2428_s21 + $0x44] sm:$0xf] %vm1369_vm3, %v1361_v63  ;;  %v1283_v3 = vmax.f32 %v833_v60, %v1258_v0 }
 0x132   : > { %v1312_v4 = vadd.f32 %v2421_v49, %v1283_v3 }
 0x134   : > { %v1337_v5 = vmax.f32 %v1312_v4, 0.0 }
 0x135   : > { %v1023_v6 = vpop.f32.mrf.mxu2  ;;  %v1223_v7 = vpop.f32.mrf.mxu3 }
 0x136   : > { %v1362_v8 = vpack.c.bf16 %v1337_v5, %v1337_v5  ;;  %v1259_v10 = vmax.f32 %v1023_v6, %v1223_v7  ;;  %v601_v11 = vpop.f32.mrf.mxu0  ;;  %v801_v12 = vpop.f32.mrf.mxu1 }
 0x137   : > { %v835_v16 = vmax.f32 %v601_v11, %v801_v12 }
 0x138   : > { %1388 = vst.msk [vmem:[%s2428_s21 + $0x48] sm:$0xf] %vm1369_vm3, %v1362_v8  ;;  %v1284_v13 = vmax.f32 %v834_v9, %v1259_v10 }
 0x13a   : > { %v1313_v14 = vadd.f32 %v2421_v49, %v1284_v13 }
 0x13c   : > { %v1338_v15 = vmax.f32 %v1313_v14, 0.0 }
 0x13d   : > { %v1026_v17 = vpop.f32.mrf.mxu2  ;;  %v1226_v18 = vpop.f32.mrf.mxu3 }
 0x13e   : > { %v1363_v19 = vpack.c.bf16 %v1338_v15, %v1338_v15  ;;  %v1260_v20 = vmax.f32 %v1026_v17, %v1226_v18  ;;  %v603_v21 = vpop.f32.mrf.mxu0  ;;  %v803_v22 = vpop.f32.mrf.mxu1 }
 0x13f   : > { %v836_v29 = vmax.f32 %v603_v21, %v803_v22 }
 0x140   : > { %1389 = vst.msk [vmem:[%s2428_s21 + $0x4c] sm:$0xf] %vm1369_vm3, %v1363_v19  ;;  %v1285_v23 = vmax.f32 %v835_v16, %v1260_v20 }
 0x142   : > { %v1314_v24 = vadd.f32 %v2421_v49, %v1285_v23 }
 0x144   : > { %v1339_v25 = vmax.f32 %v1314_v24, 0.0 }
 0x145   : > { %v1028_v26 = vpop.f32.mrf.mxu2  ;;  %v1228_v27 = vpop.f32.mrf.mxu3 }
 0x146   : > { %v1364_v28 = vpack.c.bf16 %v1339_v25, %v1339_v25  ;;  %v1261_v30 = vmax.f32 %v1028_v26, %v1228_v27  ;;  %v606_v31 = vpop.f32.mrf.mxu0  ;;  %v806_v32 = vpop.f32.mrf.mxu1 }
 0x147   : > { %v837_v36 = vmax.f32 %v606_v31, %v806_v32 }
 0x148   : > { %1390 = vst.msk [vmem:[%s2428_s21 + $0x50] sm:$0xf] %vm1369_vm3, %v1364_v28  ;;  %v1286_v33 = vmax.f32 %v836_v29, %v1261_v30 }
 0x14a   : > { %v1315_v34 = vadd.f32 %v2421_v49, %v1286_v33 }
 0x14c   : > { %v1340_v35 = vmax.f32 %v1315_v34, 0.0 }
 0x14d   : > { %v1031_v37 = vpop.f32.mrf.mxu2  ;;  %v1231_v38 = vpop.f32.mrf.mxu3 }
 0x14e   : > { %v1365_v39 = vpack.c.bf16 %v1340_v35, %v1340_v35  ;;  %v1262_v40 = vmax.f32 %v1031_v37, %v1231_v38  ;;  %v608_v41 = vpop.f32.mrf.mxu0  ;;  %v808_v42 = vpop.f32.mrf.mxu1 }
 0x14f   : > { %v838_v50 = vmax.f32 %v608_v41, %v808_v42 }
 0x150   : > { %1391 = vst.msk [vmem:[%s2428_s21 + $0x54] sm:$0xf] %vm1369_vm3, %v1365_v39  ;;  %v1287_v43 = vmax.f32 %v837_v36, %v1262_v40 }
 0x152   : > { %v1316_v44 = vadd.f32 %v2421_v49, %v1287_v43 }
 0x154   : > { %v1341_v45 = vmax.f32 %v1316_v44, 0.0 }
 0x155   : > { %v1033_v46 = vpop.f32.mrf.mxu2  ;;  %v1233_v47 = vpop.f32.mrf.mxu3 }
 0x156   : > { %v1366_v48 = vpack.c.bf16 %v1341_v45, %v1341_v45  ;;  %v1263_v51 = vmax.f32 %v1033_v46, %v1233_v47  ;;  %v611_v52 = vpop.f32.mrf.mxu0  ;;  %v811_v53 = vpop.f32.mrf.mxu1 }
 0x157   : > { %v839_v57 = vmax.f32 %v611_v52, %v811_v53 }
 0x158   : > { %1392 = vst.msk [vmem:[%s2428_s21 + $0x58] sm:$0xf] %vm1369_vm3, %v1366_v48  ;;  %v1288_v54 = vmax.f32 %v838_v50, %v1263_v51 }
 0x15a   : > { %v1317_v55 = vadd.f32 %v2421_v49, %v1288_v54 }
 0x15c   : > { %v1342_v56 = vmax.f32 %v1317_v55, 0.0 }
 0x15d   : > { %v1036_v58 = vpop.f32.mrf.mxu2  ;;  %v1236_v59 = vpop.f32.mrf.mxu3 }
 0x15e   : > { %v1367_v60 = vpack.c.bf16 %v1342_v56, %v1342_v56  ;;  %v1264_v61 = vmax.f32 %v1036_v58, %v1236_v59  ;;  %v613_v62 = vpop.f32.mrf.mxu0  ;;  %v813_v63 = vpop.f32.mrf.mxu1 }
 0x160   : > { %1393 = vst.msk [vmem:[%s2428_s21 + $0x5c] sm:$0xf] %vm1369_vm3, %v1367_v60  ;;  %v1289_v0 = vmax.f32 %v839_v57, %v1264_v61 }
 0x162   : > { %v1318_v1 = vadd.f32 %v2421_v49, %v1289_v0 }
 0x164   : > { %v1343_v2 = vmax.f32 %v1318_v1, 0.0  ;;  %1401 = sbr.rel (!%p2310_p4) target bundleno = 433 (0x1b1), region = 48 }
 0x165   : > { %v1038_v3 = vpop.f32.mrf.mxu2  ;;  %v1238_v4 = vpop.f32.mrf.mxu3 }
 0x166   : > { %v1368_v5 = vpack.c.bf16 %v1343_v2, %v1343_v2 }
 0x168   : > { %1394 = vst.msk [vmem:[%s2428_s21 + $0x60] sm:$0xf] %vm1369_vm3, %v1368_v5 }
 0x169   : > { %s2673_s12 = smov (!%p1404_p8, %s1403_s12), 25 }
 0x16a   : > { %s2001_s17 = sshll.u32 %s2673_s12, 2 }
 0x16b   : > { %p2004_p9 = scmp.eq.s32.totalorder %s2001_s17, 0 }
 0x16c   : > { %2155 = sdivrem.u32 (!%p2004_p9), %s2673_s12, 25 }
 0x16d   : > { %1412 = sbr.rel (%p2004_p9) target bundleno = 433 (0x1b1), region = 52 }
 0x175   : > { %s2545_s29 = spop.drf %2155 }
 0x176   : > { %s2157_s18 = spop.drf %2155  ;;  %p2005_p10 = scmp.le.s32.totalorder %s2545_s29, 0 }
 0x177   : > { %s2664_s24 = smov (!%p2005_p10), %s2539_s16  ;;  %s2665_s10 = smov (!%p2005_p10), %s2428_s21 }
 0x178   : > { %1683 = sbr.rel (%p2005_p10) target bundleno = 407 (0x197), region = 133  ;;  %s2554_s19 = smov (!%p2005_p10), 0  }
 0x179   : > { %s2556_s20 = smov (!%p2005_p10), 0  }
 0x17d LB: >> { %v1430_v49 = vld [vmem:[%s2223_s10] sm:$0xf]  ;;  %v1432_v6 = vld [vmem:[%s2223_s10 + $0x4] sm:$0xf]  ;;  %v1434_v7 = vld [vmem:[%s2223_s10 + $0x8] sm:$0xf]  ;;  %s2231_s20 = sphi %s2556_s20, %s1424_s20   ;;  %s2227_s19 = sphi %s2554_s19, %s2668_s19   ;;  %s2223_s10 = sphi %s2665_s10, %s2667_s10   ;;  %s2219_s24 = sphi %s2664_s24, %s2666_s24  }
 0x17e   : >> { %1431 = vst [vmem:[%s2219_s24] sm:$0xf] %v1430_v49  ;;  %v1436_v8 = vld [vmem:[%s2223_s10 + $0xc] sm:$0xf]  ;;  %v1438_v9 = vld [vmem:[%s2223_s10 + $0x10] sm:$0xf]  ;;  %s1480_s23 = sadd.s32 1, %s2227_s19 }
 0x17f   : >> { %1433 = vst [vmem:[%s2219_s24 + $0x4] sm:$0xf] %v1432_v6  ;;  %v1440_v10 = vld [vmem:[%s2223_s10 + $0x14] sm:$0xf]  ;;  %v1442_v11 = vld [vmem:[%s2223_s10 + $0x18] sm:$0xf]  ;;  %p1481_p11 = scmp.ge.s32.totalorder %s1480_s23, %s2545_s29 }
 0x180   : >> { %1435 = vst [vmem:[%s2219_s24 + $0x8] sm:$0xf] %v1434_v7  ;;  %v1444_v12 = vld [vmem:[%s2223_s10 + $0x1c] sm:$0xf]  ;;  %v1446_v13 = vld [vmem:[%s2223_s10 + $0x20] sm:$0xf] }
 0x181   : >> { %1437 = vst [vmem:[%s2219_s24 + $0xc] sm:$0xf] %v1436_v8  ;;  %v1448_v14 = vld [vmem:[%s2223_s10 + $0x24] sm:$0xf]  ;;  %v1450_v15 = vld [vmem:[%s2223_s10 + $0x28] sm:$0xf] }
 0x182   : >> { %1439 = vst [vmem:[%s2219_s24 + $0x10] sm:$0xf] %v1438_v9  ;;  %v1452_v16 = vld [vmem:[%s2223_s10 + $0x2c] sm:$0xf]  ;;  %v1454_v17 = vld [vmem:[%s2223_s10 + $0x30] sm:$0xf] }
 0x183   : >> { %1441 = vst [vmem:[%s2219_s24 + $0x14] sm:$0xf] %v1440_v10  ;;  %v1456_v18 = vld [vmem:[%s2223_s10 + $0x34] sm:$0xf]  ;;  %v1458_v19 = vld [vmem:[%s2223_s10 + $0x38] sm:$0xf] }
 0x184   : >> { %1443 = vst [vmem:[%s2219_s24 + $0x18] sm:$0xf] %v1442_v11  ;;  %s2675_s23 = smov (%p1481_p11, %s1480_s23), 0  ;;  %v1460_v20 = vld [vmem:[%s2223_s10 + $0x3c] sm:$0xf]  ;;  %s1424_s20 = sadd.s32 1, %s2231_s20  }
 0x185   : >> { %1445 = vst [vmem:[%s2219_s24 + $0x1c] sm:$0xf] %v1444_v12  ;;  %v1462_v21 = vld [vmem:[%s2223_s10 + $0x40] sm:$0xf]  ;;  %s1483_s26 = smul.u32 100, %s2675_s23  ;;  %p1423_p12 = scmp.ge.s32.totalorder %s1424_s20, %s2545_s29 }
 0x186   : >> { %1447 = vst [vmem:[%s2219_s24 + $0x20] sm:$0xf] %v1446_v13  ;;  %v1464_v22 = vld [vmem:[%s2223_s10 + $0x44] sm:$0xf]  ;;  %v1466_v23 = vld [vmem:[%s2223_s10 + $0x48] sm:$0xf]  ;;  %s2668_s19 = smov %s2675_s23 }
 0x187   : >> { %1449 = vst [vmem:[%s2219_s24 + $0x24] sm:$0xf] %v1448_v14  ;;  %s1485_s27 = scalar_lea.vmem %s2428_s21, %s1483_s26 [#allocation2]   ;;  %s1486_s30 = scalar_lea.vmem %s2539_s16, %s1483_s26   ;;  %v1468_v24 = vld [vmem:[%s2223_s10 + $0x4c] sm:$0xf]  ;;  %v1470_v25 = vld [vmem:[%s2223_s10 + $0x50] sm:$0xf] }
 0x188   : >> { %1451 = vst [vmem:[%s2219_s24 + $0x28] sm:$0xf] %v1450_v15  ;;  %v1472_v26 = vld [vmem:[%s2223_s10 + $0x54] sm:$0xf]  ;;  %v1474_v27 = vld [vmem:[%s2223_s10 + $0x58] sm:$0xf] }
 0x189   : >> { %1453 = vst [vmem:[%s2219_s24 + $0x2c] sm:$0xf] %v1452_v16  ;;  %v1476_v28 = vld [vmem:[%s2223_s10 + $0x5c] sm:$0xf]  ;;  %v1478_v29 = vld [vmem:[%s2223_s10 + $0x60] sm:$0xf]  ;;  %s2667_s10 = smov %s1485_s27 }
 0x18a   : >> { %1455 = vst [vmem:[%s2219_s24 + $0x30] sm:$0xf] %v1454_v17 }
 0x18b   : >> { %1457 = vst [vmem:[%s2219_s24 + $0x34] sm:$0xf] %v1456_v18 }
 0x18c   : >> { %1459 = vst [vmem:[%s2219_s24 + $0x38] sm:$0xf] %v1458_v19 }
 0x18d   : >> { %1461 = vst [vmem:[%s2219_s24 + $0x3c] sm:$0xf] %v1460_v20 }
 0x18e   : >> { %1463 = vst [vmem:[%s2219_s24 + $0x40] sm:$0xf] %v1462_v21 }
 0x18f   : >> { %1465 = vst [vmem:[%s2219_s24 + $0x44] sm:$0xf] %v1464_v22 }
 0x190   : >> { %1467 = vst [vmem:[%s2219_s24 + $0x48] sm:$0xf] %v1466_v23 }
 0x191   : >> { %1469 = vst [vmem:[%s2219_s24 + $0x4c] sm:$0xf] %v1468_v24 }
 0x192   : >> { %1471 = vst [vmem:[%s2219_s24 + $0x50] sm:$0xf] %v1470_v25  ;;  %1426 = sbr.rel (!%p1423_p12) target bundleno = 381 (0x17d), region = 139 }
 0x193   : >> { %1473 = vst [vmem:[%s2219_s24 + $0x54] sm:$0xf] %v1472_v26 }
 0x194   : >> { %1475 = vst [vmem:[%s2219_s24 + $0x58] sm:$0xf] %v1474_v27 }
 0x195   : >> { %1477 = vst [vmem:[%s2219_s24 + $0x5c] sm:$0xf] %v1476_v28 }
 0x196   : >> { %1479 = vst [vmem:[%s2219_s24 + $0x60] sm:$0xf] %v1478_v29  ;;  %s2666_s24 = smov %s1486_s30 }
 0x197 PF: > { %2158 = sdivrem.u32 %s2673_s12, 25 }
 0x198   : > { %s2006_s7 = smul.u32 100, %s2545_s29 }
 0x19a   : > { %s2641_s8 = scalar_lea.vmem %s2428_s21, %s2006_s7 [#allocation2]   ;;  %s1493_s9 = scalar_lea.vmem %s2539_s16, %s2006_s7  }
 0x1a0   : > { %s2159_s11 = spop.drf %2158 }
 0x1a1   : > { %s2160_s13 = spop.drf %2158 }
 0x1a2   : > { %p2008_p13 = scmp.le.s32.totalorder %s2160_s13, 0 }
 0x1a3   : > { %s2233_s14 = smov (!%p2008_p13), %s1493_s9   ;;  %s2237_s15 = smov (!%p2008_p13), %s2641_s8  }
 0x1a4   : > { %1697 = sbr.rel (%p2008_p13) target bundleno = 433 (0x1b1), region = 144  ;;  %s2241_s17 = smov (!%p2008_p13), 0  }
 0x1a5   : > { %s2245_s18 = smov (!%p2008_p13), 0  }
 0x1a9 LB: >> { %v1503_v30 = vld [vmem:[%s2239_s15] sm:$0xf]  ;;  %s1505_s21 = sadd.s32 1, %s2243_s17  ;;  %s1497_s18 = sadd.s32 1, %s2247_s18   ;;  %s2247_s18 = sphi %s2245_s18, %s1497_s18   ;;  %s2243_s17 = sphi %s2241_s17, %s2242_s17   ;;  %s2239_s15 = sphi %s2237_s15, %s1510_s15   ;;  %s2235_s14 = sphi %s2233_s14, %s1511_s14  }
 0x1aa   : >> { %1504 = vst [vmem:[%s2235_s14] sm:$0xf] %v1503_v30  ;;  %p1506_p0 = scmp.ge.s32.totalorder %s1505_s21, %s2160_s13  ;;  %p1496_p1 = scmp.ge.s32.totalorder %s1497_s18, %s2160_s13 }
 0x1ac   : >> { %s2677_s21 = smov (%p1506_p0, %s1505_s21), 0  ;;  %1499 = sbr.rel (!%p1496_p1) target bundleno = 425 (0x1a9), region = 150 }
 0x1ad   : >> { %s2009_s12 = sshll.u32 %s2677_s21, 2  ;;  %s2242_s17 = smov %s2677_s21  }
 0x1ae   : >> { %s1510_s15 = scalar_lea.vmem %s2641_s8, %s2009_s12 [#allocation2]   ;;  %s1511_s14 = scalar_lea.vmem %s1493_s9, %s2009_s12  }
 0x1b1 PF: > { %p13_p2 = scmp.ge.s32.totalorder %s2300_s25, 4   ;;  %s2669_s21 = smov %s2211_s22 }
 0x1b2   : > { %s2670_s22 = smov %s2308_s28  ;;  %s2671_s23 = smov %s2300_s25 }
 0x1b3   :  { %15 = sbr.rel (!%p13_p2) target bundleno = 2 (0x2), region = 161 }

// kernel: squeeze.12
= control target key start
LH: loop header
LB: loop body
LE: loop exit
PB: predicated region body
PF: predicated region fallthrough
CT: control target
= control target key end

     0   :  { %vm544_vm0 = vcmask 261120   ;;  %s1272_s0 = inlined_call_operand.vmem [shape: bf16[2,6,1,6,1,288], index: 0, kind: input, shape index: {}]   ;;  %s1273_s1 = inlined_call_operand.vmem [shape: bf16[72,288], index: 1, kind: output, shape index: {}]  }
   0x1   :  { %v1119_v0 = vld [vmem:[%s1272_s0 + $0x88] sm:$0xff]   ;;  %v1120_v1 = vld [vmem:[%s1272_s0 + $0x80] sm:$0xff]   ;;  %v1121_v2 = vld [vmem:[%s1272_s0 + $0x78] sm:$0xff]  }
   0x2   :  { %v984_v3 = vunpack.c.l.bf16 %v1119_v0  ;;  %v985_v4 = vunpack.c.h.bf16 %v1119_v0  ;;  %v989_v5 = vunpack.c.h.bf16 %v1120_v1  ;;  %v988_v6 = vunpack.c.l.bf16 %v1120_v1  ;;  %v1122_v7 = vld [vmem:[%s1272_s0 + $0x70] sm:$0xff]   ;;  %v1123_v10 = vld [vmem:[%s1272_s0 + $0x68] sm:$0xff]   ;;  %v1124_v13 = vld [vmem:[%s1272_s0 + $0x60] sm:$0xff]  }
   0x3   :  { %v993_v8 = vunpack.c.h.bf16 %v1121_v2  ;;  %v992_v9 = vunpack.c.l.bf16 %v1121_v2  ;;  %v997_v11 = vunpack.c.h.bf16 %v1122_v7  ;;  %v996_v12 = vunpack.c.l.bf16 %v1122_v7  ;;  %v1125_v16 = vld [vmem:[%s1272_s0 + $0x58] sm:$0xff]   ;;  %v1126_v19 = vld [vmem:[%s1272_s0 + $0x50] sm:$0xff]   ;;  %v1127_v22 = vld [vmem:[%s1272_s0 + $0x48] sm:$0xff]  }
   0x4   :  { %18 = vst [vmem:[#allocation1 + $0x68] sm:$0xff] %v985_v4  ;;  %v1001_v14 = vunpack.c.h.bf16 %v1123_v10  ;;  %v1000_v15 = vunpack.c.l.bf16 %v1123_v10  ;;  %v1005_v17 = vunpack.c.h.bf16 %v1124_v13  ;;  %v1004_v18 = vunpack.c.l.bf16 %v1124_v13  ;;  %v1128_v25 = vld [vmem:[%s1272_s0 + $0x40] sm:$0xff]   ;;  %v1129_v28 = vld [vmem:[%s1272_s0 + $0x38] sm:$0xff]   ;;  %v1130_v31 = vld [vmem:[%s1272_s0 + $0x30] sm:$0xff]  }
   0x5   :  { %33 = vst [vmem:[#allocation1 + $0x48] sm:$0xff] %v984_v3  ;;  %v1009_v20 = vunpack.c.h.bf16 %v1125_v16  ;;  %v1008_v21 = vunpack.c.l.bf16 %v1125_v16  ;;  %v1013_v23 = vunpack.c.h.bf16 %v1126_v19  ;;  %v1012_v24 = vunpack.c.l.bf16 %v1126_v19  ;;  %v1131_v34 = vld [vmem:[%s1272_s0 + $0x28] sm:$0xff]   ;;  %v1132_v37 = vld [vmem:[%s1272_s0 + $0x20] sm:$0xff]   ;;  %v1133_v40 = vld [vmem:[%s1272_s0 + $0x18] sm:$0xff]  }
   0x6   :  { %48 = vst [vmem:[#allocation1 + $0x108] sm:$0xff] %v989_v5  ;;  %v1017_v26 = vunpack.c.h.bf16 %v1127_v22  ;;  %v1016_v27 = vunpack.c.l.bf16 %v1127_v22  ;;  %v1021_v29 = vunpack.c.h.bf16 %v1128_v25  ;;  %v1020_v30 = vunpack.c.l.bf16 %v1128_v25  ;;  %v1134_v43 = vld [vmem:[%s1272_s0 + $0x10] sm:$0xff]   ;;  %v1135_v46 = vld [vmem:[%s1272_s0 + $0x8] sm:$0xff]   ;;  %v1051_v49 = vld [vmem:[%s1272_s0] sm:$0xff]  }
   0x7   :  { %63 = vst [vmem:[#allocation1 + $0xd0] sm:$0xff] %v988_v6  ;;  %v1025_v32 = vunpack.c.h.bf16 %v1129_v28  ;;  %v1024_v33 = vunpack.c.l.bf16 %v1129_v28  ;;  %v1029_v35 = vunpack.c.h.bf16 %v1130_v31  ;;  %v1028_v36 = vunpack.c.l.bf16 %v1130_v31 }
   0x8   :  { %78 = vst [vmem:[#allocation1 + $0x10] sm:$0xff] %v993_v8  ;;  %v1033_v38 = vunpack.c.h.bf16 %v1131_v34  ;;  %v1032_v39 = vunpack.c.l.bf16 %v1131_v34  ;;  %v1037_v41 = vunpack.c.h.bf16 %v1132_v37  ;;  %v1036_v42 = vunpack.c.l.bf16 %v1132_v37 }
   0x9   :  { %93 = vst [vmem:[#allocation1 + $0xb0] sm:$0xff] %v992_v9  ;;  %v1041_v44 = vunpack.c.h.bf16 %v1133_v40  ;;  %v1040_v45 = vunpack.c.l.bf16 %v1133_v40  ;;  %v1045_v47 = vunpack.c.h.bf16 %v1134_v43  ;;  %v1044_v48 = vunpack.c.l.bf16 %v1134_v43 }
   0xa   :  { %108 = vst [vmem:[#allocation1 + $0xe8] sm:$0xff] %v997_v11  ;;  %v1049_v50 = vunpack.c.h.bf16 %v1135_v46  ;;  %v1048_v51 = vunpack.c.l.bf16 %v1135_v46  ;;  %v1053_v52 = vunpack.c.h.bf16 %v1051_v49  ;;  %v1052_v53 = vunpack.c.l.bf16 %v1051_v49 }
   0xb   :  { %123 = vst [vmem:[#allocation1 + $0x100] sm:$0xff] %v996_v12  ;;  %v610_v1 = vld [vmem:[#allocation1 + $0x68] sm:$0x3f]  }
   0xc   :  { %138 = vst [vmem:[#allocation1 + $0x98] sm:$0xff] %v1001_v14  ;;  %v729_v31 = vld [vmem:[#allocation1 + $0x48] sm:$0x3f]  }
   0xd   :  { %153 = vst [vmem:[#allocation1 + $0x8] sm:$0xff] %v1000_v15  ;;  %v725_v28 = vld [vmem:[#allocation1 + $0x108] sm:$0x3f]  }
   0xe   :  { %168 = vst [vmem:[#allocation1] sm:$0xff] %v1005_v17  ;;  %v603_v0 = vld [vmem:[#allocation1 + $0xd0] sm:$0x3f]  }
   0xf   :  { %183 = vst [vmem:[#allocation1 + $0x80] sm:$0xff] %v1004_v18 }
  0x10   :  { %198 = vst [vmem:[#allocation1 + $0x20] sm:$0xff] %v1009_v20  ;;  %v713_v22 = vld [vmem:[#allocation1 + $0xb0] sm:$0x3f]  }
  0x11   :  { %213 = vst [vmem:[#allocation1 + $0xe0] sm:$0xff] %v1008_v21  ;;  %v596_v63 = vld [vmem:[#allocation1 + $0xe8] sm:$0x3f]  }
  0x12   :  { %228 = vst [vmem:[#allocation1 + $0x110] sm:$0xff] %v1013_v23  ;;  %v707_v21 = vld [vmem:[#allocation1 + $0x100] sm:$0x3f]   ;;  %v719_v23 = vld [vmem:[#allocation1 + $0x10] sm:$0x3f]  }
  0x13   :  { %243 = vst [vmem:[#allocation1 + $0xa0] sm:$0xff] %v1012_v24  ;;  %v701_v20 = vld [vmem:[#allocation1 + $0x98] sm:$0x3f]  }
  0x14   :  { %258 = vst [vmem:[#allocation1 + $0xf8] sm:$0xff] %v1017_v26  ;;  %v591_v62 = vld [vmem:[#allocation1 + $0x8] sm:$0x3f]  }
  0x15   :  { %273 = vst [vmem:[#allocation1 + $0x50] sm:$0xff] %v1016_v27  ;;  %v697_v19 = vld [vmem:[#allocation1] sm:$0x3f]  }
  0x16   :  { %288 = vst [vmem:[#allocation1 + $0x88] sm:$0xff] %v1021_v29  ;;  %v693_v18 = vld [vmem:[#allocation1 + $0x80] sm:$0x3f]  }
  0x17   :  { %303 = vst [vmem:[#allocation1 + $0x78] sm:$0xff] %v1020_v30  ;;  %v586_v61 = vld [vmem:[#allocation1 + $0x20] sm:$0x3f]  }
  0x18   :  { %318 = vst [vmem:[#allocation1 + $0xa8] sm:$0xff] %v1025_v32  ;;  %v689_v17 = vld [vmem:[#allocation1 + $0xe0] sm:$0x3f]  }
  0x19   :  { %333 = vst [vmem:[#allocation1 + $0xc0] sm:$0xff] %v1024_v33  ;;  %v685_v16 = vld [vmem:[#allocation1 + $0x110] sm:$0x3f]  }
  0x1a   :  { %348 = vst [vmem:[#allocation1 + $0x38] sm:$0xff] %v1029_v35  ;;  %v579_v60 = vld [vmem:[#allocation1 + $0xa0] sm:$0x3f]  }
  0x1b   :  { %363 = vst [vmem:[#allocation1 + $0xb8] sm:$0xff] %v1028_v36  ;;  %v679_v15 = vld [vmem:[#allocation1 + $0xf8] sm:$0x3f]  }
  0x1c   :  { %378 = vst [vmem:[#allocation1 + $0x70] sm:$0xff] %v1033_v38  ;;  %v673_v14 = vld [vmem:[#allocation1 + $0x50] sm:$0x3f]  }
  0x1d   :  { %393 = vst [vmem:[#allocation1 + $0x90] sm:$0xff] %v1032_v39  ;;  %v572_v59 = vld [vmem:[#allocation1 + $0x88] sm:$0x3f]  }
  0x1e   :  { %408 = vst [vmem:[#allocation1 + $0x40] sm:$0xff] %v1037_v41  ;;  %v667_v13 = vld [vmem:[#allocation1 + $0x78] sm:$0x3f]  }
  0x1f   :  { %423 = vst [vmem:[#allocation1 + $0x58] sm:$0xff] %v1036_v42  ;;  %v661_v12 = vld [vmem:[#allocation1 + $0xa8] sm:$0x3f]  }
  0x20   :  { %438 = vst [vmem:[#allocation1 + $0xc8] sm:$0xff] %v1041_v44  ;;  %v567_v57 = vld [vmem:[#allocation1 + $0xc0] sm:$0x3f]  }
  0x21   :  { %453 = vst [vmem:[#allocation1 + $0x28] sm:$0xff] %v1040_v45  ;;  %v657_v11 = vld [vmem:[#allocation1 + $0x38] sm:$0x3f]  }
  0x22   :  { %468 = vst [vmem:[#allocation1 + $0x60] sm:$0xff] %v1045_v47  ;;  %v653_v10 = vld [vmem:[#allocation1 + $0xb8] sm:$0x3f]  }
  0x23   :  { %483 = vst [vmem:[#allocation1 + $0xf0] sm:$0xff] %v1044_v48  ;;  %v562_v56 = vld [vmem:[#allocation1 + $0x70] sm:$0x3f]  }
  0x24   :  { %498 = vst [vmem:[#allocation1 + $0x18] sm:$0xff] %v1049_v50  ;;  %v649_v9 = vld [vmem:[#allocation1 + $0x90] sm:$0x3f]  }
  0x25   :  { %513 = vst [vmem:[#allocation1 + $0x118] sm:$0xff] %v1048_v51  ;;  %v645_v8 = vld [vmem:[#allocation1 + $0x40] sm:$0x3f]  }
  0x26   :  { %528 = vst [vmem:[#allocation1 + $0xd8] sm:$0xff] %v1053_v52  ;;  %v555_v54 = vld [vmem:[#allocation1 + $0x58] sm:$0x3f]  }
  0x27   :  { %541 = vst [vmem:[#allocation1 + $0x30] sm:$0xff] %v1052_v53  ;;  %v639_v7 = vld [vmem:[#allocation1 + $0xc8] sm:$0x3f]  }
  0x28   :  { %558 = vst.msk [vmem:[#allocation0 + $0x2c] sm:$0xf] %vm544_vm0, %v555_v54   ;;  %v633_v6 = vld [vmem:[#allocation1 + $0x28] sm:$0x3f]  }
  0x29   :  { %v548_v55 = vld [vmem:[#allocation1 + $0x60] sm:$0x3f]   ;;  %560 = vst.msk [vmem:[#allocation0 + $0x3c] sm:$0x30] %vm544_vm0, %v555_v54  }
  0x2a   :  { %551 = vst.msk [vmem:[#allocation0 + $0x16] sm:$0x3] %vm544_vm0, %v548_v55   ;;  %v627_v5 = vld [vmem:[#allocation1 + $0xf0] sm:$0x3f]  }
  0x2b   :  { %553 = vst.msk [vmem:[#allocation0 + $0x26] sm:$0x3c] %vm544_vm0, %v548_v55   ;;  %v621_v4 = vld [vmem:[#allocation1 + $0x18] sm:$0x3f]  }
  0x2c   :  { %v543_v58 = vld [vmem:[#allocation1 + $0x118] sm:$0x3f]   ;;  %565 = vst.msk [vmem:[#allocation0 + $0x42] sm:$0x3f] %vm544_vm0, %v562_v56  }
  0x2d   :  { %546 = vst.msk [vmem:[#allocation0 + $0x10] sm:$0x3f] %vm544_vm0, %v543_v58   ;;  %v617_v3 = vld [vmem:[#allocation1 + $0xd8] sm:$0x3f]  }
  0x2e   :  { %570 = vst.msk [vmem:[#allocation0 + $0x58] sm:$0x3f] %vm544_vm0, %v567_v57   ;;  %v614_v2 = vld [vmem:[#allocation1 + $0x30] sm:$0x3f]  }
  0x2f   :  { %575 = vst.msk [vmem:[#allocation0 + $0x5e] sm:$0x3] %vm544_vm0, %v572_v59  }
  0x30   :  { %577 = vst.msk [vmem:[#allocation0 + $0x6e] sm:$0x3c] %vm544_vm0, %v572_v59  }
  0x31   :  { %582 = vst.msk [vmem:[#allocation0 + $0x74] sm:$0xf] %vm544_vm0, %v579_v60  }
  0x32   :  { %584 = vst.msk [vmem:[#allocation0 + $0x84] sm:$0x30] %vm544_vm0, %v579_v60   ;;  %v768_v30 = vld [vmem:[#allocation0 + $0x28] sm:$0xff] }
  0x33   :  { %589 = vst.msk [vmem:[#allocation0 + $0x8a] sm:$0x3f] %vm544_vm0, %v586_v61   ;;  %v789_v36 = vld [vmem:[#allocation0 + $0x40] sm:$0xff] }
  0x34   :  { %594 = vst.msk [vmem:[#allocation0 + $0xa0] sm:$0x3f] %vm544_vm0, %v591_v62   ;;  %v747_v26 = vld [vmem:[#allocation0 + $0x10] sm:$0xff] }
  0x35   :  { %599 = vst.msk [vmem:[#allocation0 + $0xa6] sm:$0x3] %vm544_vm0, %v596_v63  }
  0x36   :  { %601 = vst.msk [vmem:[#allocation0 + $0xb6] sm:$0x3c] %vm544_vm0, %v596_v63   ;;  %v810_v40 = vld [vmem:[#allocation0 + $0x58] sm:$0xff] }
  0x37   :  { %606 = vst.msk [vmem:[#allocation0 + $0xbc] sm:$0xf] %vm544_vm0, %v603_v0  }
  0x38   :  { %608 = vst.msk [vmem:[#allocation0 + $0xcc] sm:$0x30] %vm544_vm0, %v603_v0   ;;  %v831_v45 = vld [vmem:[#allocation0 + $0x70] sm:$0xff] }
  0x39   :  { %613 = vst.msk [vmem:[#allocation0 + $0xd2] sm:$0x3f] %vm544_vm0, %v610_v1  }
  0x3a   :  { %615 = vst [vmem:[#allocation0] sm:$0x3f] %v614_v2   ;;  %v852_v49 = vld [vmem:[#allocation0 + $0x88] sm:$0xff] }
  0x3b   :  { %619 = vst [vmem:[#allocation0 + $0x8] sm:$0x3f] %v617_v3  }
  0x3c   :  { %623 = vst [vmem:[#allocation0 + $0x6] sm:$0x3] %v621_v4   ;;  %v873_v54 = vld [vmem:[#allocation0 + $0xa0] sm:$0xff] }
  0x3d   :  { %625 = vst [vmem:[#allocation0 + $0x16] sm:$0x3c] %v621_v4  }
  0x3e   :  { %629 = vst [vmem:[#allocation0 + $0xe] sm:$0x3] %v627_v5   ;;  %v894_v58 = vld [vmem:[#allocation0 + $0xb8] sm:$0xff] }
  0x3f   :  { %631 = vst [vmem:[#allocation0 + $0x1e] sm:$0x3c] %v627_v5  }
  0x40   :  { %635 = vst [vmem:[#allocation0 + $0x1c] sm:$0xf] %v633_v6   ;;  %v915_v63 = vld [vmem:[#allocation0 + $0xd0] sm:$0xff] }
  0x41   :  { %637 = vst [vmem:[#allocation0 + $0x2c] sm:$0x30] %v633_v6   ;;  %v916_v2 = vpack.c.bf16 0.0, %v915_v63 }
  0x42   :  { %641 = vst [vmem:[#allocation0 + $0x24] sm:$0xf] %v639_v7  }
  0x43   :  { %643 = vst [vmem:[#allocation0 + $0x34] sm:$0x30] %v639_v7   ;;  %v734_v24 = vld [vmem:[#allocation0] sm:$0xff] }
  0x44   :  { %647 = vst [vmem:[#allocation0 + $0x32] sm:$0x3f] %v645_v8  }
  0x45   :  { %651 = vst [vmem:[#allocation0 + $0x3a] sm:$0x3f] %v649_v9   ;;  %v740_v25 = vld [vmem:[#allocation0 + $0x8] sm:$0xff] }
  0x46   :  { %655 = vst [vmem:[#allocation0 + $0x48] sm:$0x3f] %v653_v10   ;;  %v1057_v32 = vpack.c.bf16 %v740_v25, %v734_v24 }
  0x47   :  { %659 = vst [vmem:[#allocation0 + $0x50] sm:$0x3f] %v657_v11   ;;  %v754_v27 = vld [vmem:[#allocation0 + $0x18] sm:$0xff] }
  0x48   :  { %663 = vst [vmem:[#allocation0 + $0x4e] sm:$0x3] %v661_v12   ;;  %v1062_v35 = vpack.c.bf16 %v754_v27, %v747_v26 }
  0x49   :  { %665 = vst [vmem:[#allocation0 + $0x5e] sm:$0x3c] %v661_v12   ;;  %v761_v29 = vld [vmem:[#allocation0 + $0x20] sm:$0xff] }
  0x4a   :  { %669 = vst [vmem:[#allocation0 + $0x56] sm:$0x3] %v667_v13   ;;  %v1067_v38 = vpack.c.bf16 %v768_v30, %v761_v29 }
  0x4b   :  { %671 = vst [vmem:[#allocation0 + $0x66] sm:$0x3c] %v667_v13   ;;  %v775_v33 = vld [vmem:[#allocation0 + $0x30] sm:$0xff] }
  0x4c   :  { %675 = vst [vmem:[#allocation0 + $0x64] sm:$0xf] %v673_v14   ;;  %v782_v34 = vld [vmem:[#allocation0 + $0x38] sm:$0xff] }
  0x4d   :  { %677 = vst [vmem:[#allocation0 + $0x74] sm:$0x30] %v673_v14   ;;  %v1072_v41 = vpack.c.bf16 %v782_v34, %v775_v33 }
  0x4e   :  { %681 = vst [vmem:[#allocation0 + $0x6c] sm:$0xf] %v679_v15  }
  0x4f   :  { %683 = vst [vmem:[#allocation0 + $0x7c] sm:$0x30] %v679_v15   ;;  %v796_v37 = vld [vmem:[#allocation0 + $0x48] sm:$0xff] }
  0x50   :  { %687 = vst [vmem:[#allocation0 + $0x7a] sm:$0x3f] %v685_v16   ;;  %v1077_v44 = vpack.c.bf16 %v796_v37, %v789_v36 }
  0x51   :  { %691 = vst [vmem:[#allocation0 + $0x82] sm:$0x3f] %v689_v17   ;;  %v803_v39 = vld [vmem:[#allocation0 + $0x50] sm:$0xff] }
  0x52   :  { %695 = vst [vmem:[#allocation0 + $0x90] sm:$0x3f] %v693_v18   ;;  %v1082_v47 = vpack.c.bf16 %v810_v40, %v803_v39 }
  0x53   :  { %699 = vst [vmem:[#allocation0 + $0x98] sm:$0x3f] %v697_v19   ;;  %v817_v42 = vld [vmem:[#allocation0 + $0x60] sm:$0xff] }
  0x54   :  { %703 = vst [vmem:[#allocation0 + $0x96] sm:$0x3] %v701_v20  }
  0x55   :  { %705 = vst [vmem:[#allocation0 + $0xa6] sm:$0x3c] %v701_v20   ;;  %v824_v43 = vld [vmem:[#allocation0 + $0x68] sm:$0xff] }
  0x56   :  { %709 = vst [vmem:[#allocation0 + $0x9e] sm:$0x3] %v707_v21   ;;  %v1087_v50 = vpack.c.bf16 %v824_v43, %v817_v42 }
  0x57   :  { %711 = vst [vmem:[#allocation0 + $0xae] sm:$0x3c] %v707_v21   ;;  %v838_v46 = vld [vmem:[#allocation0 + $0x78] sm:$0xff] }
  0x58   :  { %715 = vst [vmem:[#allocation0 + $0xac] sm:$0xf] %v713_v22   ;;  %v845_v48 = vld [vmem:[#allocation0 + $0x80] sm:$0xff]  ;;  %v1092_v53 = vpack.c.bf16 %v838_v46, %v831_v45 }
  0x59   :  { %717 = vst [vmem:[#allocation0 + $0xbc] sm:$0x30] %v713_v22   ;;  %v1097_v56 = vpack.c.bf16 %v852_v49, %v845_v48 }
  0x5a   :  { %721 = vst [vmem:[#allocation0 + $0xb4] sm:$0xf] %v719_v23  }
  0x5b   :  { %723 = vst [vmem:[#allocation0 + $0xc4] sm:$0x30] %v719_v23   ;;  %v859_v51 = vld [vmem:[#allocation0 + $0x90] sm:$0xff] }
  0x5c   :  { %727 = vst [vmem:[#allocation0 + $0xc2] sm:$0x3f] %v725_v28  }
  0x5d   :  { %731 = vst [vmem:[#allocation0 + $0xca] sm:$0x3f] %v729_v31   ;;  %v866_v52 = vld [vmem:[#allocation0 + $0x98] sm:$0xff] }
  0x5e   :  { %1058 = vst [vmem:[%s1273_s1] sm:$0xff] %v1057_v32   ;;  %v1102_v59 = vpack.c.bf16 %v866_v52, %v859_v51 }
  0x5f   :  { %1136 = vst [vmem:[%s1273_s1 + $0x8] sm:$0xff] %v1062_v35   ;;  %v880_v55 = vld [vmem:[#allocation0 + $0xa8] sm:$0xff] }
  0x60   :  { %1137 = vst [vmem:[%s1273_s1 + $0x10] sm:$0xff] %v1067_v38   ;;  %v1107_v61 = vpack.c.bf16 %v880_v55, %v873_v54 }
  0x61   :  { %1138 = vst [vmem:[%s1273_s1 + $0x18] sm:$0xff] %v1072_v41   ;;  %v887_v57 = vld [vmem:[#allocation0 + $0xb0] sm:$0xff] }
  0x62   :  { %1139 = vst [vmem:[%s1273_s1 + $0x20] sm:$0xff] %v1077_v44   ;;  %v1112_v0 = vpack.c.bf16 %v894_v58, %v887_v57 }
  0x63   :  { %1140 = vst [vmem:[%s1273_s1 + $0x28] sm:$0xff] %v1082_v47   ;;  %v901_v60 = vld [vmem:[#allocation0 + $0xc0] sm:$0xff] }
  0x64   :  { %1141 = vst [vmem:[%s1273_s1 + $0x30] sm:$0xff] %v1087_v50   ;;  %v908_v62 = vld [vmem:[#allocation0 + $0xc8] sm:$0xff] }
  0x65   :  { %1142 = vst [vmem:[%s1273_s1 + $0x38] sm:$0xff] %v1092_v53   ;;  %v1117_v1 = vpack.c.bf16 %v908_v62, %v901_v60 }
  0x66   :  { %1143 = vst [vmem:[%s1273_s1 + $0x40] sm:$0xff] %v1097_v56  }
  0x67   :  { %1144 = vst [vmem:[%s1273_s1 + $0x48] sm:$0xff] %v1102_v59  }
  0x68   :  { %1145 = vst [vmem:[%s1273_s1 + $0x50] sm:$0xff] %v1107_v61  }
  0x69   :  { %1146 = vst [vmem:[%s1273_s1 + $0x58] sm:$0xff] %v1112_v0  }
  0x6a   :  { %1147 = vst [vmem:[%s1273_s1 + $0x60] sm:$0xff] %v1117_v1  }
  0x6b   :  { %981 = vst [vmem:[%s1273_s1 + $0x68] sm:$0xf] %v916_v2 }

// kernel: fashion_cnn_forward.4
= control target key start
LH: loop header
LB: loop body
LE: loop exit
PB: predicated region body
PF: predicated region fallthrough
CT: control target
= control target key end

     0   :  { %s1865_s21 = smov 0   ;;  %s1867_s22 = smov 0   ;;  %s2272_s0 = inlined_call_operand.vmem [shape: bf16[72,288], index: 0, kind: input, shape index: {}]   ;;  %s2273_s1 = inlined_call_operand.vmem [shape: bf16[72,288], index: 1, kind: input, shape index: {}]   ;;  %s2274_s2 = inlined_call_operand.vmem [shape: bf16[72,288], index: 2, kind: input, shape index: {}]   ;;  %s2275_s3 = inlined_call_operand.vmem [shape: bf16[72,288], index: 3, kind: input, shape index: {}]   ;;  %s2276_s4 = inlined_call_operand.vmem [shape: bf16[288,64], index: 4, kind: input, shape index: {}]   ;;  %s2277_s5 = inlined_call_operand.vmem [shape: f32[1,64], index: 5, kind: input, shape index: {}]   ;;  %s2278_s6 = inlined_call_operand.vmem [shape: bf16[72,64], index: 6, kind: output, shape index: {}]  }
   0x1   :  { %s1869_s23 = smov 0  }
   0x2 LB: > { %s1878_s24 = sadd.s32 4294967295, %s1796_s23   ;;  %s1880_s25 = sadd.s32 1, %s1796_s23   ;;  %s1796_s23 = sphi %s1869_s23, %s2285_s23   ;;  %s1792_s22 = sphi %s1867_s22, %s2284_s22   ;;  %s1788_s21 = sphi %s1865_s21, %s2283_s21  }
   0x3   : > { %s166_s26 = ssub.s32 %s1796_s23, %s1880_s25  ;;  %s169_s27 = sadd.s32 1, %s1792_s22 }
   0x4   : > { %p167_p0 = scmp.eq.s32.totalorder %s166_s26, 0  ;;  %p179_p1 = scmp.ne.s32.totalorder %s1792_s22, %s1788_s21 }
   0x5   : > { %p180_p2 = scmp.eq.s32.totalorder %s1878_s24, 1  ;;  %p1402_p3 = scmp.ge.s32.totalorder %s1796_s23, 1 }
   0x6   : > { %s1888_s28 = scalar_select %p167_p0, %s1792_s22, %s169_s27  }
   0x7   : > { %p1890_p4 = por %p180_p2, %p179_p1  ;;  %p290_p5 = scmp.lt.s32.totalorder %s1796_s23, 3 }
   0x9   : > { %p291_p6 = pnand %p1402_p3, %p290_p5 }
   0xa   : > { %s1910_s12 = smul.u32 (!%p291_p6), 5, %s1878_s24 }
   0xb   : > { %294 = sbr.rel (%p291_p6) target bundleno = 378 (0x17a), region = 44 }
   0xc   : > { %p364_p7 = scmp.lt.s32.totalorder (!%p291_p6), %s1910_s12, 8 }
  0x10   : > { %v1897_v0 = vld [vmem:[%s2276_s4 + $0x38] sm:$0xff]  ;;  %v1907_v2 = vld [vmem:[%s2276_s4 + $0x88] sm:$0xff]  ;;  %v1917_v3 = vld [vmem:[%s2276_s4 + $0x30] sm:$0xff]  ;;  %s365_s19 = scalar_select %p364_p7, %s1910_s12, 8  ;;  %vm626_vm0 = vcmask 261120   ;;  %vm1123_vm1 = vcmask 519168  }
  0x11   : > { %v1902_v1 = vld [vmem:[%s2276_s4 + $0x78] sm:$0xff]  ;;  %636 = vmatpush.bf16.msra.mxu0 %v1897_v0  ;;  %v1922_v4 = vld [vmem:[%s2276_s4 + $0x70] sm:$0xff]  ;;  %764 = vmatpush.bf16.msra.mxu3 %v1897_v0  ;;  %v1930_v5 = vld [vmem:[%s2276_s4 + $0x80] sm:$0xff]  ;;  %s1137_s11 = ssub.s32 (%p1890_p4), 9, %s1910_s12  ;;  %s1641_s13 = smul.u32 (%p1890_p4), 20, %s1878_s24 }
  0x12   : > { %659 = vmatpush.bf16.msra.mxu1 %v1902_v1  ;;  %688 = vmatpush.bf16.msra.mxu2 %v1907_v2  ;;  %v1938_v6 = vld [vmem:[%s2276_s4 + $0x28] sm:$0xff]  ;;  %s1945_s30 = smul.u32 12, %s365_s19  ;;  %v1963_v11 = vld [vmem:[%s2276_s4 + $0x20] sm:$0xff]  ;;  %v1978_v13 = vld [vmem:[%s2276_s4 + $0x18] sm:$0xff]  ;;  %p1138_p8 = scmp.lt.s32.totalorder (%p1890_p4), %s1137_s11, 5 }
  0x13   : > { %v1943_v7 = vld [vmem:[%s2276_s4 + $0x68] sm:$0xff]  ;;  %v1968_v12 = vld [vmem:[%s2276_s4 + $0x60] sm:$0xff]  ;;  %v1983_v14 = vld [vmem:[%s2276_s4 + $0x58] sm:$0xff]  ;;  %s2219_s16 = scalar_lea.vmem (%p1890_p4), %s2278_s6, %s1641_s13  }
  0x14   : > { %s1953_s9 = scalar_lea.vmem %s2272_s0, %s1945_s30  ;;  %v1992_v15 = vld [vmem:[%s2276_s4 + $0x10] sm:$0xff]  ;;  %v2008_v19 = vld [vmem:[%s2276_s4 + $0x8] sm:$0xff]  ;;  %s2020_s14 = scalar_lea.vmem %s2273_s1, %s1945_s30  ;;  %v2025_v22 = vld [vmem:[%s2276_s4] sm:$0xff] }
  0x15   : > { %637 = vmatpush.bf16.msra.mxu0 %v1917_v3  ;;  %765 = vmatpush.bf16.msra.mxu3 %v1917_v3  ;;  %v1417_v8 = vld [vmem:[%s1953_s9 + $0x8] sm:$0xf]  ;;  %v1619_v9 = vld [vmem:[%s1953_s9 + $0x10] sm:$0xf0]  ;;  %v1429_v17 = vld [vmem:[%s1953_s9 + $0x20] sm:$0xf]  ;;  %s2102_s20 = scalar_lea.vmem %s2274_s2, %s1945_s30  ;;  %s2129_s27 = scalar_lea.vmem %s2275_s3, %s1945_s30 }
  0x16   : > { %660 = vmatpush.bf16.msra.mxu1 %v1922_v4  ;;  %689 = vmatpush.bf16.msra.mxu2 %v1930_v5  ;;  %v1418_v10 = vor.u32 %v1619_v9, %v1417_v8  ;;  %v1997_v16 = vld [vmem:[%s2276_s4 + $0x50] sm:$0xff]  ;;  %v1622_v18 = vld [vmem:[%s1953_s9 + $0x28] sm:$0xf0]  ;;  %v2030_v23 = vld [vmem:[%s2276_s4 + $0x40] sm:$0xff]  ;;  %s355_s30 = sand.u32 1, %s1788_s21  }
  0x17   : > { %v2013_v20 = vld [vmem:[%s2276_s4 + $0x48] sm:$0xff]  ;;  %v1430_v21 = vor.u32 %v1622_v18, %v1429_v17  ;;  %v1409_v24 = vld [vmem:[%s1953_s9] sm:$0xf]  ;;  %v1617_v26 = vld [vmem:[%s1953_s9 + $0x4] sm:$0xf]  ;;  %s1644_s10 = smul.u32 20, %s355_s30 }
  0x18   : > { %v1618_v25 = vld [vmem:[%s1953_s9 + $0x8] sm:$0xf0]  ;;  %v1411_v27 = vld [vmem:[%s1953_s9 + $0xc] sm:$0xf0]  ;;  %v1508_v28 = vld [vmem:[%s2020_s14] sm:$0xf] }
  0x19   : > { %638 = vmatpush.bf16.msra.mxu0 %v1938_v6  ;;  %766 = vmatpush.bf16.msra.mxu3 %v1938_v6  ;;  %v1624_v29 = vld [vmem:[%s2020_s14 + $0x8] sm:$0xf0]  ;;  %v1410_v30 = vor.u32 %v1618_v25, %v1409_v24  ;;  %v1414_v31 = vor.u32 %v1617_v26, %v1411_v27  ;;  %v477_v33 = vld [vmem:[%s1953_s9 + $0x38] sm:$0xf]  ;;  %v1621_v37 = vld [vmem:[%s1953_s9 + $0x20] sm:$0xf0] }
  0x1a   : > { %787 = vmatpush.bf16.msrb.mxu2 %v1902_v1  ;;  %661 = vmatpush.bf16.msra.mxu1 %v1943_v7  ;;  %v1509_v32 = vor.u32 %v1624_v29, %v1508_v28  ;;  %v502_v34 = vunpack.c.l.b16 %v477_v33  ;;  %v1421_v36 = vld [vmem:[%s1953_s9 + $0x18] sm:$0xf]  ;;  %v1620_v38 = vld [vmem:[%s1953_s9 + $0x1c] sm:$0xf]  ;;  %v1423_v39 = vld [vmem:[%s1953_s9 + $0x24] sm:$0xf0] }
  0x1b   : > { %1503 = vmatmul.msk.bf16.vlgmr.msra.gmra.mxu2 %vm626_vm0, %v1418_v10  ;;  %v1520_v40 = vld [vmem:[%s2020_s14 + $0x18] sm:$0xf]  ;;  %v1627_v41 = vld [vmem:[%s2020_s14 + $0x20] sm:$0xf0]  ;;  %v1422_v42 = vor.u32 %v1621_v37, %v1421_v36  ;;  %v1426_v43 = vor.u32 %v1620_v38, %v1423_v39  ;;  %v1510_v46 = vld [vmem:[%s2020_s14 + $0xc] sm:$0xf0] }
  0x1c   : > { %v511_v35 = vpack.c.b16 %v502_v34, %v502_v34  ;;  %v1521_v44 = vor.u32 %v1627_v41, %v1520_v40  ;;  %v1623_v45 = vld [vmem:[%s2020_s14 + $0x4] sm:$0xf]  ;;  %v476_v47 = vld [vmem:[%s1953_s9 + $0x30] sm:$0xff]  ;;  %v1626_v56 = vld [vmem:[%s2020_s14 + $0x1c] sm:$0xf]  ;;  %s2189_s21 = scalar_lea.vmem [#allocation2], %s1644_s10  }
  0x1d   : > { %639 = vmatpush.bf16.msra.mxu0 %v1963_v11  ;;  %767 = vmatpush.bf16.msra.mxu3 %v1963_v11  ;;  %v713_v48 = vld [vmem:[%s2020_s14 + $0x30] sm:$0xff]  ;;  %v1513_v49 = vor.u32 %v1623_v45, %v1510_v46  ;;  %v500_v50 = vunpack.c.l.b16 %v476_v47  ;;  %v501_v51 = vunpack.c.h.b16 %v476_v47  ;;  %v1522_v57 = vld [vmem:[%s2020_s14 + $0x24] sm:$0xf0]  ;;  %v1535_v61 = vld [vmem:[%s2102_s20] sm:$0xf] }
  0x1e   : > { %788 = vmatpush.bf16.msrb.mxu2 %v1922_v4  ;;  %662 = vmatpush.bf16.msra.mxu1 %v1968_v12  ;;  %v737_v52 = vunpack.c.l.b16 %v713_v48  ;;  %v1525_v58 = vor.u32 %v1626_v56, %v1522_v57  ;;  %v1516_v59 = vld [vmem:[%s2020_s14 + $0x8] sm:$0xf]  ;;  %v1625_v60 = vld [vmem:[%s2020_s14 + $0x10] sm:$0xf0]  ;;  %v1630_v62 = vld [vmem:[%s2102_s20 + $0x8] sm:$0xf0] }
  0x1f   : > { %v509_v53 = vpack.c.b16 %v500_v50, %v500_v50  ;;  %v510_v54 = vpack.c.b16 %v501_v51, %v501_v51  ;;  %v1629_v63 = vld [vmem:[%s2102_s20 + $0x4] sm:$0xf]  ;;  %v1547_v8 = vld [vmem:[%s2102_s20 + $0x18] sm:$0xf]  ;;  %v1632_v10 = vld [vmem:[%s2102_s20 + $0x1c] sm:$0xf] }
  0x20   : > { %v746_v55 = vpack.c.b16 %v737_v52, %v737_v52  ;;  %v1633_v9 = vld [vmem:[%s2102_s20 + $0x20] sm:$0xf0]  ;;  %v846_v17 = vld [vmem:[%s2102_s20 + $0x30] sm:$0xff]  ;;  %v1543_v26 = vld [vmem:[%s2102_s20 + $0x8] sm:$0xf] }
  0x21   : > { %640 = vmatpush.bf16.msra.mxu0 %v1978_v13  ;;  %768 = vmatpush.bf16.msra.mxu3 %v1978_v13  ;;  %v1631_v27 = vld [vmem:[%s2102_s20 + $0x10] sm:$0xf0]  ;;  %v1635_v29 = vld [vmem:[%s2129_s27 + $0x4] sm:$0xf]  ;;  %v1570_v33 = vld [vmem:[%s2129_s27 + $0x8] sm:$0xf] }
  0x22   : > { %789 = vmatpush.bf16.msrb.mxu2 %v1943_v7  ;;  %663 = vmatpush.bf16.msra.mxu1 %v1983_v14  ;;  %v1544_v28 = vor.u32 %v1631_v27, %v1543_v26  ;;  %v1637_v34 = vld [vmem:[%s2129_s27 + $0x10] sm:$0xf0]  ;;  %v1555_v38 = vld [vmem:[%s2102_s20 + $0x20] sm:$0xf]  ;;  %v1634_v39 = vld [vmem:[%s2102_s20 + $0x28] sm:$0xf0] }
  0x23   : > { %v1571_v37 = vor.u32 %v1637_v34, %v1570_v33  ;;  %v974_v40 = vld [vmem:[%s2129_s27 + $0x30] sm:$0xff]  ;;  %v1556_v41 = vor.u32 %v1634_v39, %v1555_v38  ;;  %v1582_v45 = vld [vmem:[%s2129_s27 + $0x20] sm:$0xf]  ;;  %v1640_v46 = vld [vmem:[%s2129_s27 + $0x28] sm:$0xf0] }
  0x24   : > { %v847_v51 = vld [vmem:[%s2102_s20 + $0x38] sm:$0xf]  ;;  %v999_v56 = vunpack.c.h.b16 %v974_v40 }
  0x25   : > { %641 = vmatpush.bf16.msra.mxu0 %v1992_v15  ;;  %769 = vmatpush.bf16.msra.mxu3 %v1992_v15  ;;  %v872_v52 = vunpack.c.l.b16 %v847_v51 }
  0x26   : > { %790 = vmatpush.bf16.msrb.mxu2 %v1968_v12  ;;  %664 = vmatpush.bf16.msra.mxu1 %v1997_v16 }
  0x29   : > { %642 = vmatpush.bf16.msra.mxu0 %v2008_v19  ;;  %770 = vmatpush.bf16.msra.mxu3 %v2008_v19 }
  0x2a   : > { %791 = vmatpush.bf16.msrb.mxu2 %v1983_v14  ;;  %665 = vmatpush.bf16.msra.mxu1 %v2013_v20 }
  0x2b   : > { %1504 = vmatmul.msk.bf16.gmra.mxu2 %vm626_vm0, %v1430_v21  ;;  %v1562_v21 = vld [vmem:[%s2129_s27] sm:$0xf] }
  0x2d   : > { %643 = vmatpush.bf16.msra.mxu0 %v2025_v22  ;;  %771 = vmatpush.bf16.msra.mxu3 %v2025_v22 }
  0x2e   : > { %792 = vmatpush.bf16.msrb.mxu2 %v1997_v16  ;;  %666 = vmatpush.bf16.msra.mxu1 %v2030_v23 }
  0x30   : > { %644 = vmatmul.bf16.vlgmr.msra.gmra.mxu0 %v1410_v30  ;;  %772 = vmatmul.bf16.vlgmr.msra.gmra.mxu3 %v1509_v32  ;;  %v1564_v30 = vld [vmem:[%s2129_s27 + $0xc] sm:$0xf0]  ;;  %v1639_v32 = vld [vmem:[%s2129_s27 + $0x20] sm:$0xf0] }
  0x31   : > { %920 = vmatpush.bf16.msrb.mxu3 %v1902_v1  ;;  %816 = vmatpush.bf16.msrb.mxu0 %v1907_v2 }
  0x32   : > { %897 = vmatpush.bf16.msrb.mxu1 %v1897_v0  ;;  %793 = vmatpush.bf16.msrb.mxu2 %v2013_v20 }
  0x33   : > { %667 = vmatmul.bf16.vlgmr.msra.gmra.mxu1 %v1414_v31  ;;  %v1574_v31 = vld [vmem:[%s2129_s27 + $0x18] sm:$0xf] }
  0x34   : > { %v1575_v36 = vor.u32 %v1639_v32, %v1574_v31 }
  0x35   : > { %921 = vmatpush.bf16.msrb.mxu3 %v1922_v4  ;;  %817 = vmatpush.bf16.msrb.mxu0 %v1930_v5 }
  0x36   : > { %898 = vmatpush.bf16.msrb.mxu1 %v1917_v3  ;;  %794 = vmatpush.bf16.msrb.mxu2 %v2030_v23 }
  0x39   : > { %1025 = vmatpush.bf16.msra.mxu0 %v1897_v0  ;;  %922 = vmatpush.bf16.msrb.mxu3 %v1943_v7  ;;  %v1537_v0 = vld [vmem:[%s2102_s20 + $0xc] sm:$0xf0] }
  0x3a   : > { %899 = vmatpush.bf16.msrb.mxu1 %v1938_v6  ;;  %1642 = vmatpush.bf16.msra.mxu2 %v1907_v2 }
  0x3b   : > { %1505 = vmatmul.msk.bf16.gmra.mxu2 %vm626_vm0, %v511_v35  ;;  %v1567_v35 = vor.u32 %v1635_v29, %v1564_v30 }
  0x3d   : > { %1026 = vmatpush.bf16.msra.mxu0 %v1917_v3  ;;  %923 = vmatpush.bf16.msrb.mxu3 %v1968_v12  ;;  %v1540_v3 = vor.u32 %v1629_v63, %v1537_v0 }
  0x3e   : > { %900 = vmatpush.bf16.msrb.mxu1 %v1963_v11  ;;  %1643 = vmatpush.bf16.msra.mxu2 %v1930_v5 }
  0x40   : > { %649 = vmatmul.bf16.gmra.mxu0 %v1422_v42  ;;  %777 = vmatmul.bf16.gmra.mxu3 %v1521_v44  ;;  %v998_v42 = vunpack.c.l.b16 %v974_v40  ;;  %v1576_v44 = vld [vmem:[%s2129_s27 + $0x24] sm:$0xf0] }
  0x41   : > { %1027 = vmatpush.bf16.msra.mxu0 %v1938_v6  ;;  %924 = vmatpush.bf16.msrb.mxu3 %v1983_v14  ;;  %v1528_v6 = vld [vmem:[%s2020_s14 + $0x20] sm:$0xf] }
  0x42   : > { %901 = vmatpush.bf16.msrb.mxu1 %v1978_v13 }
  0x43   : > { %672 = vmatmul.bf16.gmra.mxu1 %v1426_v43  ;;  %v1638_v43 = vld [vmem:[%s2129_s27 + $0x1c] sm:$0xf] }
  0x44   : > { %v1579_v47 = vor.u32 %v1638_v43, %v1576_v44 }
  0x45   : > { %1028 = vmatpush.bf16.msra.mxu0 %v1963_v11  ;;  %925 = vmatpush.bf16.msrb.mxu3 %v1997_v16  ;;  %v1549_v11 = vld [vmem:[%s2102_s20 + $0x24] sm:$0xf0] }
  0x46   : > { %902 = vmatpush.bf16.msrb.mxu1 %v1992_v15 }
  0x49   : > { %1029 = vmatpush.bf16.msra.mxu0 %v1978_v13  ;;  %926 = vmatpush.bf16.msrb.mxu3 %v2013_v20  ;;  %v1548_v13 = vor.u32 %v1633_v9, %v1547_v8 }
  0x4a   : > { %903 = vmatpush.bf16.msrb.mxu1 %v2008_v19 }
  0x4b   : > { %795 = vmatmul.bf16.vlgmr.msrb.gmra.mxu2 %v1513_v49  ;;  %v1583_v49 = vor.u32 %v1640_v46, %v1582_v45 }
  0x4c   : > { %949 = vmatpush.bf16.msrb.mxu2 %v1907_v2 }
  0x4d   : > { %1030 = vmatpush.bf16.msra.mxu0 %v1992_v15  ;;  %927 = vmatpush.bf16.msrb.mxu3 %v2030_v23  ;;  %v714_v15 = vld [vmem:[%s2020_s14 + $0x38] sm:$0xf] }
  0x4e   : > { %904 = vmatpush.bf16.msrb.mxu1 %v2025_v22 }
  0x50   : > { %654 = vmatmul.bf16.gmra.mxu0 %v509_v53  ;;  %782 = vmatmul.bf16.gmra.mxu3 %v746_v55  ;;  %v881_v55 = vpack.c.b16 %v872_v52, %v872_v52 }
  0x51   : > { %1077 = vmatpush.bf16.msra.mxu3 %v1907_v2  ;;  %1031 = vmatpush.bf16.msra.mxu0 %v2008_v19  ;;  %v1536_v2 = vor.u32 %v1630_v62, %v1535_v61  ;;  %v870_v19 = vunpack.c.l.b16 %v846_v17 }
  0x52   : > { %1048 = vmatpush.bf16.msra.mxu1 %v1902_v1  ;;  %950 = vmatpush.bf16.msrb.mxu2 %v1930_v5  ;;  %v1517_v1 = vor.u32 %v1625_v60, %v1516_v59 }
  0x53   : > { %677 = vmatmul.bf16.gmra.mxu1 %v510_v54  ;;  %v975_v54 = vld [vmem:[%s2129_s27 + $0x38] sm:$0xf] }
  0x54   : > { %v1000_v57 = vunpack.c.l.b16 %v975_v54 }
  0x55   : > { %1078 = vmatpush.bf16.msra.mxu3 %v1930_v5  ;;  %1032 = vmatpush.bf16.msra.mxu0 %v2025_v22  ;;  %v1636_v22 = vld [vmem:[%s2129_s27 + $0x8] sm:$0xf0] }
  0x56   : > { %1049 = vmatpush.bf16.msra.mxu1 %v1922_v4  ;;  %v738_v4 = vunpack.c.h.b16 %v713_v48  ;;  %v1563_v24 = vor.u32 %v1636_v22, %v1562_v21  ;;  %v1007_v48 = vpack.c.b16 %v998_v42, %v998_v42  ;;  %v1009_v61 = vpack.c.b16 %v1000_v57, %v1000_v57 }
  0x58   : > { %v747_v5 = vpack.c.b16 %v738_v4, %v738_v4 }
  0x5a   : > { %1050 = vmatpush.bf16.msra.mxu1 %v1943_v7  ;;  %v1628_v7 = vld [vmem:[%s2020_s14 + $0x28] sm:$0xf0] }
  0x5b   : > { %800 = vmatmul.bf16.gmra.mxu2 %v1525_v58  ;;  %v1008_v58 = vpack.c.b16 %v999_v56, %v999_v56 }
  0x5e   : > { %1051 = vmatpush.bf16.msra.mxu1 %v1968_v12  ;;  %v1529_v12 = vor.u32 %v1628_v7, %v1528_v6 }
  0x60   : > { %1530 = vmatmul.msk.bf16.vlgmr.msrb.gmra.mxu0 %vm626_vm0, %v1517_v1  ;;  %928 = vmatmul.bf16.vlgmr.msrb.gmra.mxu3 %v1540_v3 }
  0x62   : > { %1052 = vmatpush.bf16.msra.mxu1 %v1983_v14  ;;  %v1552_v14 = vor.u32 %v1632_v10, %v1549_v11 }
  0x63   : > { %905 = vmatmul.bf16.vlgmr.msrb.gmra.mxu1 %v1536_v2 }
  0x66   : > { %1053 = vmatpush.bf16.msra.mxu1 %v1997_v16  ;;  %v739_v16 = vunpack.c.l.b16 %v714_v15 }
  0x68   : > { %v748_v18 = vpack.c.b16 %v739_v16, %v739_v16 }
  0x6a   : > { %1054 = vmatpush.bf16.msra.mxu1 %v2013_v20  ;;  %v871_v20 = vunpack.c.h.b16 %v846_v17 }
  0x6b   : > { %805 = vmatmul.bf16.gmra.mxu2 %v747_v5 }
  0x6c   : > { %v880_v25 = vpack.c.b16 %v871_v20, %v871_v20 }
  0x6e   : > { %1055 = vmatpush.bf16.msra.mxu1 %v2030_v23  ;;  %v879_v23 = vpack.c.b16 %v870_v19, %v870_v19 }
  0x70   : > { %1531 = vmatmul.msk.bf16.gmra.mxu0 %vm626_vm0, %v1529_v12  ;;  %933 = vmatmul.bf16.gmra.mxu3 %v1552_v14 }
  0x73   : > { %910 = vmatmul.bf16.gmra.mxu1 %v1548_v13 }
  0x7b   : > { %1532 = vmatmul.msk.bf16.vlgmr.msra.gmra.mxu2 %vm626_vm0, %v748_v18 }
  0x80   : > { %1033 = vmatmul.bf16.vlgmr.msra.gmra.mxu0 %v1563_v24  ;;  %938 = vmatmul.bf16.gmra.mxu3 %v880_v25 }
  0x83   : > { %915 = vmatmul.bf16.gmra.mxu1 %v879_v23 }
  0x8b   : > { %1557 = vmatmul.msk.bf16.vlgmr.msrb.gmra.mxu2 %vm626_vm0, %v1544_v28 }
  0x90   : > { %1038 = vmatmul.bf16.gmra.mxu0 %v1575_v36  ;;  %1584 = vmatmul.msk.bf16.vlgmr.msra.gmra.mxu3 %vm626_vm0, %v1571_v37 }
  0x93   : > { %1056 = vmatmul.bf16.vlgmr.msra.gmra.mxu1 %v1567_v35 }
  0x9b   : > { %1558 = vmatmul.msk.bf16.gmra.mxu2 %vm626_vm0, %v1556_v41 }
  0x9e   : > { %v691_v50 = vpop.f32.mrf.mxu2 }
  0xa0   : > { %1043 = vmatmul.bf16.gmra.mxu0 %v1007_v48  ;;  %1585 = vmatmul.msk.bf16.gmra.mxu3 %vm626_vm0, %v1583_v49 }
  0xa3   : > { %1061 = vmatmul.bf16.gmra.mxu1 %v1579_v47 }
  0xa6   : > { %v693_v53 = vpop.f32.mrf.mxu2 }
  0xab   : > { %1559 = vmatmul.msk.bf16.gmra.mxu2 %vm626_vm0, %v881_v55 }
  0xad   : > { %v645_v59 = vpop.f32.mrf.mxu0 }
  0xae   : > { %v696_v63 = vpop.f32.mrf.mxu2 }
  0xb0   : > { %v668_v60 = vpop.f32.mrf.mxu1  ;;  %1586 = vmatmul.msk.bf16.gmra.mxu3 %vm626_vm0, %v1009_v61 }
  0xb1   : > { %v669_v62 = vadd.f32 %v668_v60, %v645_v59 }
  0xb3   : > { %v2156_v0 = vadd.f32 %v691_v50, %v669_v62  ;;  %1066 = vmatmul.bf16.gmra.mxu1 %v1008_v58  ;;  %v773_v1 = vpop.f32.mrf.mxu3 }
  0xb5   : > { %v647_v2 = vpop.f32.mrf.mxu0 }
  0xb6   : > { %v698_v5 = vpop.f32.mrf.mxu2 }
  0xb8   : > { %v670_v3 = vpop.f32.mrf.mxu1 }
  0xb9   : > { %v671_v4 = vadd.f32 %v670_v3, %v647_v2 }
  0xbb   : > { %v2159_v6 = vadd.f32 %v693_v53, %v671_v4  ;;  %v775_v7 = vpop.f32.mrf.mxu3 }
  0xbd   : > { %v650_v8 = vpop.f32.mrf.mxu0 }
  0xbe   : > { %v701_v11 = vpop.f32.mrf.mxu2 }
  0xc0   : > { %v673_v9 = vpop.f32.mrf.mxu1 }
  0xc1   : > { %v674_v10 = vadd.f32 %v673_v9, %v650_v8 }
  0xc3   : > { %v2161_v12 = vadd.f32 %v696_v63, %v674_v10  ;;  %v778_v13 = vpop.f32.mrf.mxu3 }
  0xc5   : > { %v652_v14 = vpop.f32.mrf.mxu0 }
  0xc6   : > { %v703_v17 = vpop.f32.mrf.mxu2 }
  0xc8   : > { %v675_v15 = vpop.f32.mrf.mxu1 }
  0xc9   : > { %v676_v16 = vadd.f32 %v675_v15, %v652_v14 }
  0xcb   : > { %v2163_v18 = vadd.f32 %v698_v5, %v676_v16  ;;  %v780_v19 = vpop.f32.mrf.mxu3 }
  0xcd   : > { %v655_v20 = vpop.f32.mrf.mxu0 }
  0xce   : > { %v796_v23 = vpop.f32.mrf.mxu2 }
  0xcf   : > { %v797_v24 = vadd.f32 %v796_v23, %v773_v1 }
  0xd0   : > { %v678_v21 = vpop.f32.mrf.mxu1 }
  0xd1   : > { %v679_v22 = vadd.f32 %v678_v21, %v655_v20 }
  0xd3   : > { %v2165_v25 = vadd.f32 %v701_v11, %v679_v22  ;;  %v783_v26 = vpop.f32.mrf.mxu3 }
  0xd5   : > { %v657_v27 = vpop.f32.mrf.mxu0 }
  0xd6   : > { %v798_v29 = vpop.f32.mrf.mxu2 }
  0xd7   : > { %v799_v30 = vadd.f32 %v798_v29, %v775_v7 }
  0xd8   : > { %v680_v28 = vpop.f32.mrf.mxu1 }
  0xdb   : > { %v785_v31 = vpop.f32.mrf.mxu3 }
  0xdd   : > { %v819_v32 = vpop.f32.mrf.mxu0 }
  0xde   : > { %v801_v34 = vpop.f32.mrf.mxu2  ;;  %v820_v35 = vadd.f32 %v819_v32, %v797_v24 }
  0xdf   : > { %v802_v36 = vadd.f32 %v801_v34, %v778_v13 }
  0xe0   : > { %v906_v33 = vpop.f32.mrf.mxu1  ;;  %v833_v37 = vmax.f32 %v2156_v0, %v820_v35 }
  0xe3   : > { %v929_v38 = vpop.f32.mrf.mxu3 }
  0xe4   : > { %v930_v9 = vadd.f32 %v929_v38, %v906_v33 }
  0xe5   : > { %v821_v39 = vpop.f32.mrf.mxu0 }
  0xe6   : > { %v803_v41 = vpop.f32.mrf.mxu2  ;;  %v822_v42 = vadd.f32 %v821_v39, %v799_v30 }
  0xe7   : > { %v804_v43 = vadd.f32 %v803_v41, %v780_v19  ;;  %v1735_v19 = vld [vmem:[%s2277_s5] ss:$0 sm:$0xff] }
  0xe8   : > { %v908_v40 = vpop.f32.mrf.mxu1  ;;  %v834_v44 = vmax.f32 %v2159_v6, %v822_v42 }
  0xeb   : > { %v931_v45 = vpop.f32.mrf.mxu3 }
  0xec   : > { %v932_v21 = vadd.f32 %v931_v45, %v908_v40 }
  0xed   : > { %v824_v46 = vpop.f32.mrf.mxu0 }
  0xee   : > { %v806_v48 = vpop.f32.mrf.mxu2  ;;  %v2169_v49 = vadd.f32 %v824_v46, %v802_v36 }
  0xef   : > { %v807_v50 = vadd.f32 %v806_v48, %v783_v26 }
  0xf0   : > { %v911_v47 = vpop.f32.mrf.mxu1  ;;  %v835_v51 = vmax.f32 %v2161_v12, %v2169_v49 }
  0xf3   : > { %v934_v52 = vpop.f32.mrf.mxu3 }
  0xf4   : > { %v935_v36 = vadd.f32 %v934_v52, %v911_v47 }
  0xf5   : > { %v826_v53 = vpop.f32.mrf.mxu0 }
  0xf6   : > { %v808_v55 = vpop.f32.mrf.mxu2  ;;  %v2173_v56 = vadd.f32 %v826_v53, %v804_v43 }
  0xf8   : > { %v913_v54 = vpop.f32.mrf.mxu1  ;;  %v836_v57 = vmax.f32 %v2163_v18, %v2173_v56 }
  0xfb   : > { %v936_v58 = vpop.f32.mrf.mxu3 }
  0xfd   : > { %v1034_v60 = vpop.f32.mrf.mxu0 }
  0xfe   : > { %v829_v61 = vpop.f32.mrf.mxu2 }
  0xff   : > { %v2179_v62 = vadd.f32 %v829_v61, %v807_v50 }
 0x100   : > { %v2177_v59 = vpop.f32.mrf.mxu1 }
 0x101   : > { %v837_v63 = vmax.f32 %v2165_v25, %v2179_v62 }
 0x103   : > { %v2183_v0 = vpop.f32.mrf.mxu3 }
 0x104   : > { %v940_v49 = vadd.f32 %v2183_v0, %v2177_v59 }
 0x105   : > { %v1036_v2 = vpop.f32.mrf.mxu0 }
 0x106   : > { %v831_v3 = vpop.f32.mrf.mxu2 }
 0x108   : > { %v918_v1 = vpop.f32.mrf.mxu1 }
 0x10b   : > { %v941_v4 = vpop.f32.mrf.mxu3 }
 0x10d   : > { %v1039_v6 = vpop.f32.mrf.mxu0 }
 0x10e   : > { %v952_v7 = vpop.f32.mrf.mxu2 }
 0x10f   : > { %v953_v11 = vadd.f32 %v952_v7, %v930_v9 }
 0x110   : > { %v1057_v5 = vpop.f32.mrf.mxu1 }
 0x111   : > { %v1058_v8 = vadd.f32 %v1057_v5, %v1034_v60 }
 0x113   : > { %v1080_v10 = vpop.f32.mrf.mxu3 }
 0x114   : > { %v1081_v13 = vadd.f32 %v1080_v10, %v1058_v8 }
 0x115   : > { %v1041_v15 = vpop.f32.mrf.mxu0 }
 0x116   : > { %v954_v16 = vpop.f32.mrf.mxu2  ;;  %v1094_v17 = vmax.f32 %v953_v11, %v1081_v13 }
 0x117   : > { %v955_v27 = vadd.f32 %v954_v16, %v932_v21 }
 0x118   : > { %v1059_v14 = vpop.f32.mrf.mxu1  ;;  %v1099_v20 = vmax.f32 %v833_v37, %v1094_v17 }
 0x119   : > { %v1060_v23 = vadd.f32 %v1059_v14, %v1036_v2 }
 0x11a   : > { %v1108_v22 = vadd.f32 %v1735_v19, %v1099_v20 }
 0x11b   : > { %v1082_v24 = vpop.f32.mrf.mxu3 }
 0x11c   : > { %v1113_v26 = vmax.f32 %v1108_v22, 0.0  ;;  %v1083_v28 = vadd.f32 %v1082_v24, %v1060_v23 }
 0x11d   : > { %v1044_v30 = vpop.f32.mrf.mxu0 }
 0x11e   : > { %v957_v31 = vpop.f32.mrf.mxu2  ;;  %v1118_v32 = vpack.c.bf16 %v1113_v26, %v1113_v26  ;;  %v1095_v33 = vmax.f32 %v955_v27, %v1083_v28 }
 0x11f   : > { %v958_v40 = vadd.f32 %v957_v31, %v935_v36 }
 0x120   : > { %v1062_v29 = vpop.f32.mrf.mxu1  ;;  %1124 = vst.msk [vmem:[%s2189_s21] sm:$0xf] %vm1123_vm1, %v1118_v32  ;;  %v1100_v34 = vmax.f32 %v834_v44, %v1095_v33  ;;  %v937_v44 = vadd.f32 %v936_v58, %v913_v54 }
 0x121   : > { %v1063_v35 = vadd.f32 %v1062_v29, %v1039_v6 }
 0x122   : > { %v1109_v37 = vadd.f32 %v1735_v19, %v1100_v34 }
 0x123   : > { %v1085_v38 = vpop.f32.mrf.mxu3 }
 0x124   : > { %v1114_v39 = vmax.f32 %v1109_v37, 0.0  ;;  %v1086_v41 = vadd.f32 %v1085_v38, %v1063_v35 }
 0x125   : > { %v1046_v43 = vpop.f32.mrf.mxu0 }
 0x126   : > { %v959_v45 = vpop.f32.mrf.mxu2  ;;  %v1119_v46 = vpack.c.bf16 %v1114_v39, %v1114_v39  ;;  %v1096_v48 = vmax.f32 %v958_v40, %v1086_v41 }
 0x127   : > { %v960_v60 = vadd.f32 %v959_v45, %v937_v44 }
 0x128   : > { %v1064_v42 = vpop.f32.mrf.mxu1  ;;  %1125 = vst.msk [vmem:[%s2189_s21 + $0x4] sm:$0xf] %vm1123_vm1, %v1119_v46  ;;  %v1101_v50 = vmax.f32 %v835_v51, %v1096_v48 }
 0x129   : > { %v1065_v47 = vadd.f32 %v1064_v42, %v1041_v15 }
 0x12a   : > { %v1110_v53 = vadd.f32 %v1735_v19, %v1101_v50 }
 0x12b   : > { %v1087_v52 = vpop.f32.mrf.mxu3 }
 0x12c   : > { %v1115_v55 = vmax.f32 %v1110_v53, 0.0  ;;  %v1088_v61 = vadd.f32 %v1087_v52, %v1065_v47 }
 0x12e   : > { %v962_v2 = vpop.f32.mrf.mxu2  ;;  %v1120_v3 = vpack.c.bf16 %v1115_v55, %v1115_v55  ;;  %v1097_v4 = vmax.f32 %v960_v60, %v1088_v61 }
 0x12f   : > { %v963_v6 = vadd.f32 %v962_v2, %v940_v49 }
 0x130   : > { %v1067_v1 = vpop.f32.mrf.mxu1  ;;  %1126 = vst.msk [vmem:[%s2189_s21 + $0x8] sm:$0xf] %vm1123_vm1, %v1120_v3  ;;  %v1102_v5 = vmax.f32 %v836_v57, %v1097_v4 }
 0x131   : > { %v1068_v12 = vadd.f32 %v1067_v1, %v1044_v30 }
 0x132   : > { %v1111_v51 = vadd.f32 %v1735_v19, %v1102_v5 }
 0x133   : > { %v1090_v54 = vpop.f32.mrf.mxu3 }
 0x134   : > { %v1116_v58 = vmax.f32 %v1111_v51, 0.0  ;;  %v1091_v7 = vadd.f32 %v1090_v54, %v1068_v12 }
 0x136   : > { %v964_v9 = vpop.f32.mrf.mxu2  ;;  %v1121_v10 = vpack.c.bf16 %v1116_v58, %v1116_v58  ;;  %v1098_v11 = vmax.f32 %v963_v6, %v1091_v7 }
 0x138   : > { %v1069_v8 = vpop.f32.mrf.mxu1  ;;  %1127 = vst.msk [vmem:[%s2189_s21 + $0xc] sm:$0xf] %vm1123_vm1, %v1121_v10  ;;  %v1103_v18 = vmax.f32 %v837_v63, %v1098_v11 }
 0x13a   : > { %v1112_v56 = vadd.f32 %v1735_v19, %v1103_v18 }
 0x13b   : > { %v1092_v57 = vpop.f32.mrf.mxu3 }
 0x13c   : > { %v1117_v13 = vmax.f32 %v1112_v56, 0.0  ;;  %1135 = sbr.rel (!%p1890_p4) target bundleno = 378 (0x17a), region = 48 }
 0x13e   : > { %v1122_v59 = vpack.c.bf16 %v1117_v13, %v1117_v13 }
 0x140   : > { %1128 = vst.msk [vmem:[%s2189_s21 + $0x10] sm:$0xf] %vm1123_vm1, %v1122_v59 }
 0x141   : > { %s2287_s11 = smov (!%p1138_p8, %s1137_s11), 5 }
 0x142   : > { %s1587_s17 = sshll.u32 %s2287_s11, 2 }
 0x143   : > { %p1590_p9 = scmp.eq.s32.totalorder %s1587_s17, 0 }
 0x144   : > { %1736 = sdivrem.u32 (!%p1590_p9), %s2287_s11, 5 }
 0x145   : > { %1146 = sbr.rel (%p1590_p9) target bundleno = 378 (0x17a), region = 52 }
 0x14d   : > { %s2225_s29 = spop.drf %1736 }
 0x14e   : > { %s1738_s18 = spop.drf %1736  ;;  %p1591_p10 = scmp.le.s32.totalorder %s2225_s29, 0 }
 0x14f   : > { %s2280_s24 = smov (!%p1591_p10), %s2219_s16  ;;  %s2281_s12 = smov (!%p1591_p10), %s2189_s21 }
 0x150   : > { %1337 = sbr.rel (%p1591_p10) target bundleno = 352 (0x160), region = 133  ;;  %s2234_s9 = smov (!%p1591_p10), 0  }
 0x151   : > { %s2236_s19 = smov (!%p1591_p10), 0  }
 0x155 LB: >> { %v1164_v25 = vld [vmem:[%s1804_s12] sm:$0xf]  ;;  %v1166_v62 = vld [vmem:[%s1804_s12 + $0x4] sm:$0xf]  ;;  %v1168_v63 = vld [vmem:[%s1804_s12 + $0x8] sm:$0xf]  ;;  %s1812_s19 = sphi %s2236_s19, %s1158_s19   ;;  %s1808_s9 = sphi %s2234_s9, %s2282_s9   ;;  %s1804_s12 = sphi %s2281_s12, %s1179_s12   ;;  %s1800_s24 = sphi %s2280_s24, %s1180_s24  }
 0x156   : >> { %1165 = vst [vmem:[%s1800_s24] sm:$0xf] %v1164_v25  ;;  %v1170_v0 = vld [vmem:[%s1804_s12 + $0xc] sm:$0xf]  ;;  %s1174_s20 = sadd.s32 1, %s1808_s9  ;;  %v1172_v14 = vld [vmem:[%s1804_s12 + $0x10] sm:$0xf] }
 0x157   : >> { %1167 = vst [vmem:[%s1800_s24 + $0x4] sm:$0xf] %v1166_v62  ;;  %p1175_p11 = scmp.ge.s32.totalorder %s1174_s20, %s2225_s29  ;;  %s1158_s19 = sadd.s32 1, %s1812_s19  }
 0x158   : >> { %1169 = vst [vmem:[%s1800_s24 + $0x8] sm:$0xf] %v1168_v63  ;;  %p1157_p12 = scmp.ge.s32.totalorder %s1158_s19, %s2225_s29 }
 0x159   : >> { %1171 = vst [vmem:[%s1800_s24 + $0xc] sm:$0xf] %v1170_v0  ;;  %s2289_s20 = smov (%p1175_p11, %s1174_s20), 0 }
 0x15a   : >> { %1173 = vst [vmem:[%s1800_s24 + $0x10] sm:$0xf] %v1172_v14  ;;  %s1177_s23 = smul.u32 20, %s2289_s20  ;;  %s2282_s9 = smov %s2289_s20 }
 0x15b   : > { %1160 = sbr.rel (!%p1157_p12) target bundleno = 341 (0x155), region = 139 }
 0x15c   : >> { %s1179_s12 = scalar_lea.vmem %s2189_s21, %s1177_s23 [#allocation2]   ;;  %s1180_s24 = scalar_lea.vmem %s2219_s16, %s1177_s23  }
 0x160 PF: > { %1739 = sdivrem.u32 %s2287_s11, 5 }
 0x161   : > { %s1592_s26 = smul.u32 20, %s2225_s29 }
 0x163   : > { %s2257_s27 = scalar_lea.vmem %s2189_s21, %s1592_s26 [#allocation2]   ;;  %s1187_s30 = scalar_lea.vmem %s2219_s16, %s1592_s26  }
 0x169   : > { %s1740_s7 = spop.drf %1739 }
 0x16a   : > { %s1741_s8 = spop.drf %1739 }
 0x16b   : > { %p1594_p13 = scmp.le.s32.totalorder %s1741_s8, 0 }
 0x16c   : > { %s1814_s10 = smov (!%p1594_p13), %s1187_s30   ;;  %s1818_s13 = smov (!%p1594_p13), %s2257_s27  }
 0x16d   : > { %1351 = sbr.rel (%p1594_p13) target bundleno = 378 (0x17a), region = 144  ;;  %s1822_s14 = smov (!%p1594_p13), 0  }
 0x16e   : > { %s1826_s15 = smov (!%p1594_p13), 0  }
 0x172 LB: >> { %v1197_v15 = vld [vmem:[%s1820_s13] sm:$0xf]  ;;  %s1199_s21 = sadd.s32 1, %s1824_s14  ;;  %s1191_s15 = sadd.s32 1, %s1828_s15   ;;  %s1828_s15 = sphi %s1826_s15, %s1191_s15   ;;  %s1824_s14 = sphi %s1822_s14, %s1823_s14   ;;  %s1820_s13 = sphi %s1818_s13, %s1204_s13   ;;  %s1816_s10 = sphi %s1814_s10, %s1205_s10  }
 0x173   : >> { %1198 = vst [vmem:[%s1816_s10] sm:$0xf] %v1197_v15  ;;  %p1200_p0 = scmp.ge.s32.totalorder %s1199_s21, %s1741_s8  ;;  %p1190_p1 = scmp.ge.s32.totalorder %s1191_s15, %s1741_s8 }
 0x175   : >> { %s2291_s21 = smov (%p1200_p0, %s1199_s21), 0  ;;  %1193 = sbr.rel (!%p1190_p1) target bundleno = 370 (0x172), region = 150 }
 0x176   : >> { %s1595_s11 = sshll.u32 %s2291_s21, 2  ;;  %s1823_s14 = smov %s2291_s21  }
 0x177   : >> { %s1204_s13 = scalar_lea.vmem %s2257_s27, %s1595_s11 [#allocation2]   ;;  %s1205_s10 = scalar_lea.vmem %s1187_s30, %s1595_s11  }
 0x17a PF: > { %p13_p2 = scmp.ge.s32.totalorder %s1880_s25, 4   ;;  %s2283_s21 = smov %s1792_s22 }
 0x17b   : > { %s2284_s22 = smov %s1888_s28  ;;  %s2285_s23 = smov %s1880_s25 }
 0x17c   :  { %15 = sbr.rel (!%p13_p2) target bundleno = 2 (0x2), region = 161 }

// kernel: fashion_cnn_forward.5
= control target key start
LH: loop header
LB: loop body
LE: loop exit
PB: predicated region body
PF: predicated region fallthrough
CT: control target
= control target key end

     0   :  { %s14958_s0 = inlined_call_operand.vmem [shape: bf16[2,2304], index: 0, kind: input, shape index: {}]   ;;  %s14959_s1 = inlined_call_operand.vmem [shape: bf16[2304,640], index: 1, kind: input, shape index: {}]   ;;  %s14960_s2 = inlined_call_operand.vmem [shape: f32[1,640], index: 2, kind: input, shape index: {}]   ;;  %s14961_s3 = inlined_call_operand.vmem [shape: bf16[640,128], index: 3, kind: input, shape index: {}]   ;;  %s14962_s4 = inlined_call_operand.vmem [shape: f32[1,128], index: 4, kind: input, shape index: {}]   ;;  %s14963_s5 = inlined_call_operand.vmem [shape: bf16[128,128], index: 5, kind: input, shape index: {}]   ;;  %s14964_s6 = inlined_call_operand.vmem [shape: f32[1,128], index: 6, kind: input, shape index: {}]   ;;  %s14965_s7 = inlined_call_operand.hbm [shape: f32[2,128], index: 7, kind: output, shape index: {}]  }
   0x1   :  { %v6497_v0 = vld [vmem:[%s14959_s1 + $0x118] sm:$0xf]  ;;  %v9464_v1 = vld [vmem:[%s14959_s1 + $0x128] sm:$0xf0]  ;;  %v6477_v11 = vld [vmem:[%s14959_s1 + $0xf0] sm:$0xf] }
   0x2   :  { %v6657_v2 = vld [vmem:[%s14959_s1 + $0x258] sm:$0xf]  ;;  %v6498_v3 = vor.u32 %v9464_v1, %v6497_v0  ;;  %v9504_v4 = vld [vmem:[%s14959_s1 + $0x268] sm:$0xf0]  ;;  %v9459_v13 = vld [vmem:[%s14959_s1 + $0x100] sm:$0xf0] }
   0x3   :  { %v6817_v5 = vld [vmem:[%s14959_s1 + $0x398] sm:$0xf]  ;;  %v9544_v6 = vld [vmem:[%s14959_s1 + $0x3a8] sm:$0xf0]  ;;  %v6658_v7 = vor.u32 %v9504_v4, %v6657_v2  ;;  %v6637_v14 = vld [vmem:[%s14959_s1 + $0x230] sm:$0xf]  ;;  %v6478_v16 = vor.u32 %v9459_v13, %v6477_v11 }
   0x4   :  { %v6818_v8 = vor.u32 %v9544_v6, %v6817_v5  ;;  %v6977_v9 = vld [vmem:[%s14959_s1 + $0x4d8] sm:$0xf]  ;;  %v9584_v10 = vld [vmem:[%s14959_s1 + $0x4e8] sm:$0xf0]  ;;  %4692 = vmatpush.bf16.msra.mxu0 %v6498_v3  ;;  %v9499_v15 = vld [vmem:[%s14959_s1 + $0x240] sm:$0xf0] }
   0x5   :  { %v6978_v12 = vor.u32 %v9584_v10, %v6977_v9  ;;  %4705 = vmatpush.bf16.msra.mxu1 %v6658_v7  ;;  %v6638_v17 = vor.u32 %v9499_v15, %v6637_v14  ;;  %v6797_v18 = vld [vmem:[%s14959_s1 + $0x370] sm:$0xf]  ;;  %v9539_v19 = vld [vmem:[%s14959_s1 + $0x380] sm:$0xf0]  ;;  %v6457_v23 = vld [vmem:[%s14959_s1 + $0xc8] sm:$0xf] }
   0x6   :  { %4718 = vmatpush.bf16.msra.mxu2 %v6818_v8  ;;  %v6957_v20 = vld [vmem:[%s14959_s1 + $0x4b0] sm:$0xf]  ;;  %v6798_v21 = vor.u32 %v9539_v19, %v6797_v18  ;;  %v9579_v22 = vld [vmem:[%s14959_s1 + $0x4c0] sm:$0xf0]  ;;  %v9454_v24 = vld [vmem:[%s14959_s1 + $0xd8] sm:$0xf0] }
   0x7   :  { %4731 = vmatpush.bf16.msra.mxu3 %v6978_v12  ;;  %v6958_v25 = vor.u32 %v9579_v22, %v6957_v20  ;;  %v6617_v26 = vld [vmem:[%s14959_s1 + $0x208] sm:$0xf]  ;;  %v9494_v27 = vld [vmem:[%s14959_s1 + $0x218] sm:$0xf0]  ;;  %v6458_v29 = vor.u32 %v9454_v24, %v6457_v23  ;;  %v6437_v35 = vld [vmem:[%s14959_s1 + $0xa0] sm:$0xf] }
   0x8   :  { %v6777_v28 = vld [vmem:[%s14959_s1 + $0x348] sm:$0xf]  ;;  %4693 = vmatpush.bf16.msra.mxu0 %v6478_v16  ;;  %v9534_v30 = vld [vmem:[%s14959_s1 + $0x358] sm:$0xf0]  ;;  %v6618_v33 = vor.u32 %v9494_v27, %v6617_v26  ;;  %v9449_v36 = vld [vmem:[%s14959_s1 + $0xb0] sm:$0xf0] }
   0x9   :  { %v6937_v31 = vld [vmem:[%s14959_s1 + $0x488] sm:$0xf]  ;;  %v9574_v32 = vld [vmem:[%s14959_s1 + $0x498] sm:$0xf0]  ;;  %4706 = vmatpush.bf16.msra.mxu1 %v6638_v17  ;;  %v6778_v34 = vor.u32 %v9534_v30, %v6777_v28  ;;  %v6597_v37 = vld [vmem:[%s14959_s1 + $0x1e0] sm:$0xf]  ;;  %v6438_v44 = vor.u32 %v9449_v36, %v6437_v35 }
   0xa   :  { %4719 = vmatpush.bf16.msra.mxu2 %v6798_v21  ;;  %v6938_v38 = vor.u32 %v9574_v32, %v6937_v31  ;;  %v9489_v39 = vld [vmem:[%s14959_s1 + $0x1f0] sm:$0xf0]  ;;  %v6757_v40 = vld [vmem:[%s14959_s1 + $0x320] sm:$0xf]  ;;  %v6417_v47 = vld [vmem:[%s14959_s1 + $0x78] sm:$0xf] }
   0xb   :  { %4732 = vmatpush.bf16.msra.mxu3 %v6958_v25  ;;  %v9529_v41 = vld [vmem:[%s14959_s1 + $0x330] sm:$0xf0]  ;;  %v6917_v42 = vld [vmem:[%s14959_s1 + $0x460] sm:$0xf]  ;;  %v6598_v45 = vor.u32 %v9489_v39, %v6597_v37  ;;  %v9444_v48 = vld [vmem:[%s14959_s1 + $0x88] sm:$0xf0] }
   0xc   :  { %v9569_v43 = vld [vmem:[%s14959_s1 + $0x470] sm:$0xf0]  ;;  %4694 = vmatpush.bf16.msra.mxu0 %v6458_v29  ;;  %v6758_v46 = vor.u32 %v9529_v41, %v6757_v40  ;;  %v6577_v49 = vld [vmem:[%s14959_s1 + $0x1b8] sm:$0xf]  ;;  %v9484_v51 = vld [vmem:[%s14959_s1 + $0x1c8] sm:$0xf0]  ;;  %v6418_v56 = vor.u32 %v9444_v48, %v6417_v47 }
   0xd   :  { %4707 = vmatpush.bf16.msra.mxu1 %v6618_v33  ;;  %v6918_v50 = vor.u32 %v9569_v43, %v6917_v42  ;;  %v6737_v52 = vld [vmem:[%s14959_s1 + $0x2f8] sm:$0xf]  ;;  %v9524_v53 = vld [vmem:[%s14959_s1 + $0x308] sm:$0xf0]  ;;  %v6578_v57 = vor.u32 %v9484_v51, %v6577_v49  ;;  %v6397_v59 = vld [vmem:[%s14959_s1 + $0x50] sm:$0xf] }
   0xe   :  { %4720 = vmatpush.bf16.msra.mxu2 %v6778_v34  ;;  %v6897_v54 = vld [vmem:[%s14959_s1 + $0x438] sm:$0xf]  ;;  %v9564_v55 = vld [vmem:[%s14959_s1 + $0x448] sm:$0xf0]  ;;  %v6738_v58 = vor.u32 %v9524_v53, %v6737_v52  ;;  %v9439_v60 = vld [vmem:[%s14959_s1 + $0x60] sm:$0xf0] }
   0xf   :  { %4733 = vmatpush.bf16.msra.mxu3 %v6938_v38  ;;  %v6557_v61 = vld [vmem:[%s14959_s1 + $0x190] sm:$0xf]  ;;  %v6898_v62 = vor.u32 %v9564_v55, %v6897_v54  ;;  %v9479_v63 = vld [vmem:[%s14959_s1 + $0x1a0] sm:$0xf0]  ;;  %v6398_v4 = vor.u32 %v9439_v60, %v6397_v59  ;;  %v6377_v7 = vld [vmem:[%s14959_s1 + $0x28] sm:$0xf] }
  0x10   :  { %4695 = vmatpush.bf16.msra.mxu0 %v6438_v44  ;;  %v6717_v0 = vld [vmem:[%s14959_s1 + $0x2d0] sm:$0xf]  ;;  %v9519_v1 = vld [vmem:[%s14959_s1 + $0x2e0] sm:$0xf0]  ;;  %v6558_v5 = vor.u32 %v9479_v63, %v6557_v61  ;;  %v9434_v8 = vld [vmem:[%s14959_s1 + $0x38] sm:$0xf0] }
  0x11   :  { %4708 = vmatpush.bf16.msra.mxu1 %v6598_v45  ;;  %v6877_v2 = vld [vmem:[%s14959_s1 + $0x410] sm:$0xf]  ;;  %v9559_v3 = vld [vmem:[%s14959_s1 + $0x420] sm:$0xf0]  ;;  %v6718_v6 = vor.u32 %v9519_v1, %v6717_v0  ;;  %v6537_v9 = vld [vmem:[%s14959_s1 + $0x168] sm:$0xf]  ;;  %v6378_v16 = vor.u32 %v9434_v8, %v6377_v7 }
  0x12   :  { %4721 = vmatpush.bf16.msra.mxu2 %v6758_v46  ;;  %v6878_v10 = vor.u32 %v9559_v3, %v6877_v2  ;;  %v9474_v11 = vld [vmem:[%s14959_s1 + $0x178] sm:$0xf0]  ;;  %v6697_v12 = vld [vmem:[%s14959_s1 + $0x2a8] sm:$0xf]  ;;  %v6357_v17 = vld [vmem:[%s14959_s1] sm:$0xf] }
  0x13   :  { %4734 = vmatpush.bf16.msra.mxu3 %v6918_v50  ;;  %v9514_v13 = vld [vmem:[%s14959_s1 + $0x2b8] sm:$0xf0]  ;;  %v6857_v14 = vld [vmem:[%s14959_s1 + $0x3e8] sm:$0xf]  ;;  %v9429_v18 = vld [vmem:[%s14959_s1 + $0x10] sm:$0xf0]  ;;  %v6538_v19 = vor.u32 %v9474_v11, %v6537_v9 }
  0x14   :  { %4696 = vmatpush.bf16.msra.mxu0 %v6418_v56  ;;  %v9554_v15 = vld [vmem:[%s14959_s1 + $0x3f8] sm:$0xf0]  ;;  %v6698_v20 = vor.u32 %v9514_v13, %v6697_v12  ;;  %v6517_v21 = vld [vmem:[%s14959_s1 + $0x140] sm:$0xf]  ;;  %v9469_v22 = vld [vmem:[%s14959_s1 + $0x150] sm:$0xf0]  ;;  %v6358_v31 = vor.u32 %v9429_v18, %v6357_v17 }
  0x15   :  { %4709 = vmatpush.bf16.msra.mxu1 %v6578_v57  ;;  %v6677_v23 = vld [vmem:[%s14959_s1 + $0x280] sm:$0xf]  ;;  %v6858_v24 = vor.u32 %v9554_v15, %v6857_v14  ;;  %v9509_v25 = vld [vmem:[%s14959_s1 + $0x290] sm:$0xf0]  ;;  %v7137_v28 = vld [vmem:[%s14959_s1 + $0x618] sm:$0xf]  ;;  %v6518_v35 = vor.u32 %v9469_v22, %v6517_v21 }
  0x16   :  { %4722 = vmatpush.bf16.msra.mxu2 %v6738_v58  ;;  %v6837_v26 = vld [vmem:[%s14959_s1 + $0x3c0] sm:$0xf]  ;;  %v9549_v27 = vld [vmem:[%s14959_s1 + $0x3d0] sm:$0xf0]  ;;  %v9624_v29 = vld [vmem:[%s14959_s1 + $0x628] sm:$0xf0]  ;;  %v6678_v36 = vor.u32 %v9509_v25, %v6677_v23 }
  0x17   :  { %4735 = vmatpush.bf16.msra.mxu3 %v6898_v62  ;;  %v7297_v30 = vld [vmem:[%s14959_s1 + $0x758] sm:$0xf]  ;;  %v9664_v32 = vld [vmem:[%s14959_s1 + $0x768] sm:$0xf0]  ;;  %v6838_v39 = vor.u32 %v9549_v27, %v6837_v26  ;;  %v7138_v40 = vor.u32 %v9624_v29, %v7137_v28  ;;  %v7117_v43 = vld [vmem:[%s14959_s1 + $0x5f0] sm:$0xf] }
  0x18   :  { %4697 = vmatpush.bf16.msra.mxu0 %v6398_v4  ;;  %v7457_v33 = vld [vmem:[%s14959_s1 + $0x898] sm:$0xf]  ;;  %v9704_v34 = vld [vmem:[%s14959_s1 + $0x8a8] sm:$0xf0]  ;;  %v7298_v41 = vor.u32 %v9664_v32, %v7297_v30  ;;  %v9619_v44 = vld [vmem:[%s14959_s1 + $0x600] sm:$0xf0] }
  0x19   :  { %4710 = vmatpush.bf16.msra.mxu1 %v6558_v5  ;;  %v7617_v37 = vld [vmem:[%s14959_s1 + $0x9d8] sm:$0xf]  ;;  %v9744_v38 = vld [vmem:[%s14959_s1 + $0x9e8] sm:$0xf0]  ;;  %v7458_v42 = vor.u32 %v9704_v34, %v7457_v33  ;;  %v7277_v45 = vld [vmem:[%s14959_s1 + $0x730] sm:$0xf]  ;;  %v7118_v52 = vor.u32 %v9619_v44, %v7117_v43 }
  0x1a   :  { %4723 = vmatpush.bf16.msra.mxu2 %v6718_v6  ;;  %v7618_v46 = vor.u32 %v9744_v38, %v7617_v37  ;;  %v9659_v47 = vld [vmem:[%s14959_s1 + $0x740] sm:$0xf0]  ;;  %v7437_v48 = vld [vmem:[%s14959_s1 + $0x870] sm:$0xf]  ;;  %v7097_v53 = vld [vmem:[%s14959_s1 + $0x5c8] sm:$0xf] }
  0x1b   :  { %4736 = vmatpush.bf16.msra.mxu3 %v6878_v10  ;;  %v9699_v49 = vld [vmem:[%s14959_s1 + $0x880] sm:$0xf0]  ;;  %v7597_v50 = vld [vmem:[%s14959_s1 + $0x9b0] sm:$0xf]  ;;  %v9614_v54 = vld [vmem:[%s14959_s1 + $0x5d8] sm:$0xf0]  ;;  %v7278_v55 = vor.u32 %v9659_v47, %v7277_v45 }
  0x1c   :  { %4698 = vmatpush.bf16.msra.mxu0 %v6378_v16  ;;  %v9739_v51 = vld [vmem:[%s14959_s1 + $0x9c0] sm:$0xf0]  ;;  %v7438_v56 = vor.u32 %v9699_v49, %v7437_v48  ;;  %v7257_v57 = vld [vmem:[%s14959_s1 + $0x708] sm:$0xf]  ;;  %v9654_v58 = vld [vmem:[%s14959_s1 + $0x718] sm:$0xf0]  ;;  %v7098_v1 = vor.u32 %v9614_v54, %v7097_v53 }
  0x1d   :  { %4711 = vmatpush.bf16.msra.mxu1 %v6538_v19  ;;  %v27_v59 = vld [vmem:[%s14958_s0] sm:$0xff]  ;;  %v7598_v60 = vor.u32 %v9739_v51, %v7597_v50  ;;  %v7417_v61 = vld [vmem:[%s14959_s1 + $0x848] sm:$0xf]  ;;  %v9694_v62 = vld [vmem:[%s14959_s1 + $0x858] sm:$0xf0]  ;;  %v7258_v2 = vor.u32 %v9654_v58, %v7257_v57 }
  0x1e   :  { %4724 = vmatpush.bf16.msra.mxu2 %v6698_v20  ;;  %907 = vst [vmem:[#allocation1] ss:$9 sm:$0xff] %v27_v59  ;;  %v7577_v63 = vld [vmem:[%s14959_s1 + $0x988] sm:$0xf]  ;;  %v9734_v0 = vld [vmem:[%s14959_s1 + $0x998] sm:$0xf0]  ;;  %v7418_v3 = vor.u32 %v9694_v62, %v7417_v61 }
  0x1f   :  { %4737 = vmatpush.bf16.msra.mxu3 %v6858_v24  ;;  %v7077_v4 = vld [vmem:[%s14959_s1 + $0x5a0] sm:$0xf]  ;;  %v9609_v5 = vld [vmem:[%s14959_s1 + $0x5b0] sm:$0xf0]  ;;  %v7578_v7 = vor.u32 %v9734_v0, %v7577_v63  ;;  %v7057_v13 = vld [vmem:[%s14959_s1 + $0x578] sm:$0xf] }
  0x20   :  { %4699 = vmatpush.bf16.msra.mxu0 %v6358_v31  ;;  %v7237_v6 = vld [vmem:[%s14959_s1 + $0x6e0] sm:$0xf]  ;;  %v9649_v8 = vld [vmem:[%s14959_s1 + $0x6f0] sm:$0xf0]  ;;  %v7078_v14 = vor.u32 %v9609_v5, %v7077_v4  ;;  %v9604_v15 = vld [vmem:[%s14959_s1 + $0x588] sm:$0xf0] }
  0x21   :  { %4712 = vmatpush.bf16.msra.mxu1 %v6518_v35  ;;  %v7397_v9 = vld [vmem:[%s14959_s1 + $0x820] sm:$0xf]  ;;  %v9689_v10 = vld [vmem:[%s14959_s1 + $0x830] sm:$0xf0]  ;;  %v7217_v16 = vld [vmem:[%s14959_s1 + $0x6b8] sm:$0xf]  ;;  %v7238_v18 = vor.u32 %v9649_v8, %v7237_v6  ;;  %v7058_v29 = vor.u32 %v9604_v15, %v7057_v13 }
  0x22   :  { %4725 = vmatpush.bf16.msra.mxu2 %v6678_v36  ;;  %v7557_v11 = vld [vmem:[%s14959_s1 + $0x960] sm:$0xf]  ;;  %v9729_v12 = vld [vmem:[%s14959_s1 + $0x970] sm:$0xf0]  ;;  %v9644_v17 = vld [vmem:[%s14959_s1 + $0x6c8] sm:$0xf0]  ;;  %v7398_v19 = vor.u32 %v9689_v10, %v7397_v9 }
  0x23   :  { %4738 = vmatpush.bf16.msra.mxu3 %v6838_v39  ;;  %v7558_v23 = vor.u32 %v9729_v12, %v7557_v11  ;;  %v7377_v24 = vld [vmem:[%s14959_s1 + $0x7f8] sm:$0xf]  ;;  %v9684_v25 = vld [vmem:[%s14959_s1 + $0x808] sm:$0xf0]  ;;  %v7218_v30 = vor.u32 %v9644_v17, %v7217_v16  ;;  %v7037_v32 = vld [vmem:[%s14959_s1 + $0x550] sm:$0xf] }
  0x24   :  { %4744 = vmatpush.bf16.msrb.mxu0 %v7138_v40  ;;  %v7537_v27 = vld [vmem:[%s14959_s1 + $0x938] sm:$0xf]  ;;  %v9724_v28 = vld [vmem:[%s14959_s1 + $0x948] sm:$0xf0]  ;;  %v7378_v31 = vor.u32 %v9684_v25, %v7377_v24  ;;  %v9599_v33 = vld [vmem:[%s14959_s1 + $0x560] sm:$0xf0] }
  0x25   :  { %4757 = vmatpush.bf16.msrb.mxu1 %v7298_v41  ;;  %v10580_v20 = vld [vmem:[#allocation1 + $0x12] sm:$0xff]  ;;  %v10582_v21 = vld [vmem:[#allocation1] sm:$0xff]  ;;  %v10593_v26 = vld [vmem:[#allocation1 + $0x9] sm:$0xff]  ;;  %v7538_v35 = vor.u32 %v9724_v28, %v7537_v27  ;;  %v7038_v41 = vor.u32 %v9599_v33, %v7037_v32 }
  0x26   :  { %4770 = vmatpush.bf16.msrb.mxu2 %v7458_v42  ;;  %v10584_v22 = vld [vmem:[#allocation1 + $0x1b] sm:$0xff]  ;;  %4700 = vmatmul.bf16.vlgmr.msra.gmra.mxu0 %v10582_v21  ;;  %v7197_v34 = vld [vmem:[%s14959_s1 + $0x690] sm:$0xf]  ;;  %v9639_v36 = vld [vmem:[%s14959_s1 + $0x6a0] sm:$0xf0] }
  0x27   :  { %4783 = vmatpush.bf16.msrb.mxu3 %v7618_v46  ;;  %4726 = vmatmul.bf16.vlgmr.msra.gmra.mxu2 %v10580_v20  ;;  %v7357_v37 = vld [vmem:[%s14959_s1 + $0x7d0] sm:$0xf]  ;;  %v9679_v38 = vld [vmem:[%s14959_s1 + $0x7e0] sm:$0xf0]  ;;  %v7017_v42 = vld [vmem:[%s14959_s1 + $0x528] sm:$0xf]  ;;  %v7198_v43 = vor.u32 %v9639_v36, %v7197_v34 }
  0x28   :  { %4745 = vmatpush.bf16.msrb.mxu0 %v7118_v52  ;;  %4739 = vmatmul.bf16.vlgmr.msra.gmra.mxu3 %v10584_v22  ;;  %v7517_v39 = vld [vmem:[%s14959_s1 + $0x910] sm:$0xf]  ;;  %v9719_v40 = vld [vmem:[%s14959_s1 + $0x920] sm:$0xf0]  ;;  %v7358_v44 = vor.u32 %v9679_v38, %v7357_v37  ;;  %v9594_v45 = vld [vmem:[%s14959_s1 + $0x538] sm:$0xf0] }
  0x29   :  { %4758 = vmatpush.bf16.msrb.mxu1 %v7278_v55  ;;  %v7177_v46 = vld [vmem:[%s14959_s1 + $0x668] sm:$0xf]  ;;  %v9634_v47 = vld [vmem:[%s14959_s1 + $0x678] sm:$0xf0]  ;;  %v7518_v48 = vor.u32 %v9719_v40, %v7517_v39  ;;  %v6997_v53 = vld [vmem:[%s14959_s1 + $0x500] sm:$0xf]  ;;  %v7018_v55 = vor.u32 %v9594_v45, %v7017_v42 }
  0x2a   :  { %4771 = vmatpush.bf16.msrb.mxu2 %v7438_v56  ;;  %4713 = vmatmul.bf16.vlgmr.msra.gmra.mxu1 %v10593_v26  ;;  %v7337_v49 = vld [vmem:[%s14959_s1 + $0x7a8] sm:$0xf]  ;;  %v9674_v50 = vld [vmem:[%s14959_s1 + $0x7b8] sm:$0xf0]  ;;  %v9589_v54 = vld [vmem:[%s14959_s1 + $0x510] sm:$0xf0]  ;;  %v7178_v62 = vor.u32 %v9634_v47, %v7177_v46 }
  0x2b   :  { %4784 = vmatpush.bf16.msrb.mxu3 %v7598_v60  ;;  %v7497_v51 = vld [vmem:[%s14959_s1 + $0x8e8] sm:$0xf]  ;;  %v9714_v52 = vld [vmem:[%s14959_s1 + $0x8f8] sm:$0xf0]  ;;  %v7157_v56 = vld [vmem:[%s14959_s1 + $0x640] sm:$0xf]  ;;  %v7338_v63 = vor.u32 %v9674_v50, %v7337_v49  ;;  %v6998_v9 = vor.u32 %v9589_v54, %v6997_v53 }
  0x2c   :  { %4746 = vmatpush.bf16.msrb.mxu0 %v7098_v1  ;;  %v9629_v57 = vld [vmem:[%s14959_s1 + $0x650] sm:$0xf0]  ;;  %v7317_v58 = vld [vmem:[%s14959_s1 + $0x780] sm:$0xf]  ;;  %v28_v61 = vld [vmem:[%s14958_s0 + $0x8] sm:$0xff] }
  0x2d   :  { %4759 = vmatpush.bf16.msrb.mxu1 %v7258_v2  ;;  %v9669_v59 = vld [vmem:[%s14959_s1 + $0x790] sm:$0xf0]  ;;  %v10675_v0 = vld [vmem:[#allocation1 + $0x24] sm:$0xff]  ;;  %v7477_v4 = vld [vmem:[%s14959_s1 + $0x8c0] sm:$0xf]  ;;  %v7158_v13 = vor.u32 %v9629_v57, %v7157_v56 }
  0x2e   :  { %4772 = vmatpush.bf16.msrb.mxu2 %v7418_v3  ;;  %v10670_v60 = vld [vmem:[#allocation1 + $0x36] sm:$0xff]  ;;  %v10677_v1 = vld [vmem:[#allocation1 + $0x3f] sm:$0xff]  ;;  %v10679_v2 = vld [vmem:[#allocation1 + $0x2d] sm:$0xff]  ;;  %v7498_v3 = vor.u32 %v9714_v52, %v7497_v51 }
  0x2f   :  { %4785 = vmatpush.bf16.msrb.mxu3 %v7578_v7  ;;  %v9709_v5 = vld [vmem:[%s14959_s1 + $0x8d0] sm:$0xf0]  ;;  %917 = vst [vmem:[#allocation1] ss:$9 sm:$0xff] %v28_v61  ;;  %v7777_v6 = vld [vmem:[%s14959_s1 + $0xb18] sm:$0xf] }
  0x30   :  { %4747 = vmatpush.bf16.msrb.mxu0 %v7078_v14  ;;  %v9784_v7 = vld [vmem:[%s14959_s1 + $0xb28] sm:$0xf0]  ;;  %v7937_v8 = vld [vmem:[%s14959_s1 + $0xc58] sm:$0xf]  ;;  %v7318_v14 = vor.u32 %v9669_v59, %v7317_v58  ;;  %v7478_v17 = vor.u32 %v9709_v5, %v7477_v4  ;;  %v7757_v24 = vld [vmem:[%s14959_s1 + $0xaf0] sm:$0xf] }
  0x31   :  { %4760 = vmatpush.bf16.msrb.mxu1 %v7238_v18  ;;  %v9824_v10 = vld [vmem:[%s14959_s1 + $0xc68] sm:$0xf0]  ;;  %v8097_v11 = vld [vmem:[%s14959_s1 + $0xd98] sm:$0xf]  ;;  %v7778_v18 = vor.u32 %v9784_v7, %v7777_v6  ;;  %v9779_v25 = vld [vmem:[%s14959_s1 + $0xb00] sm:$0xf0] }
  0x32   :  { %4773 = vmatpush.bf16.msrb.mxu2 %v7398_v19  ;;  %v9864_v12 = vld [vmem:[%s14959_s1 + $0xda8] sm:$0xf0]  ;;  %v8257_v15 = vld [vmem:[%s14959_s1 + $0xed8] sm:$0xf]  ;;  %v7938_v19 = vor.u32 %v9824_v10, %v7937_v8  ;;  %v7917_v27 = vld [vmem:[%s14959_s1 + $0xc30] sm:$0xf]  ;;  %v7758_v34 = vor.u32 %v9779_v25, %v7757_v24 }
  0x33   :  { %4786 = vmatpush.bf16.msrb.mxu3 %v7558_v23  ;;  %v9904_v16 = vld [vmem:[%s14959_s1 + $0xee8] sm:$0xf0]  ;;  %v8098_v23 = vor.u32 %v9864_v12, %v8097_v11  ;;  %v8237_v32 = vld [vmem:[%s14959_s1 + $0xeb0] sm:$0xf]  ;;  %v9899_v33 = vld [vmem:[%s14959_s1 + $0xec0] sm:$0xf0] }
  0x34   :  { %4748 = vmatpush.bf16.msrb.mxu0 %v7058_v29  ;;  %v8258_v28 = vor.u32 %v9904_v16, %v8257_v15  ;;  %v9819_v29 = vld [vmem:[%s14959_s1 + $0xc40] sm:$0xf0]  ;;  %v7737_v37 = vld [vmem:[%s14959_s1 + $0xac8] sm:$0xf]  ;;  %v9774_v38 = vld [vmem:[%s14959_s1 + $0xad8] sm:$0xf0]  ;;  %v8238_v40 = vor.u32 %v9899_v33, %v8237_v32 }
  0x35   :  { %4761 = vmatpush.bf16.msrb.mxu1 %v7218_v30  ;;  %v8077_v30 = vld [vmem:[%s14959_s1 + $0xd70] sm:$0xf]  ;;  %v7897_v39 = vld [vmem:[%s14959_s1 + $0xc08] sm:$0xf]  ;;  %v9894_v45 = vld [vmem:[%s14959_s1 + $0xe98] sm:$0xf0]  ;;  %v7738_v46 = vor.u32 %v9774_v38, %v7737_v37 }
  0x36   :  { %4774 = vmatpush.bf16.msrb.mxu2 %v7378_v31  ;;  %v9859_v31 = vld [vmem:[%s14959_s1 + $0xd80] sm:$0xf0]  ;;  %v8057_v42 = vld [vmem:[%s14959_s1 + $0xd48] sm:$0xf]  ;;  %v7717_v49 = vld [vmem:[%s14959_s1 + $0xaa0] sm:$0xf] }
  0x37   :  { %4787 = vmatpush.bf16.msrb.mxu3 %v7538_v35  ;;  %v7918_v35 = vor.u32 %v9819_v29, %v7917_v27  ;;  %v8078_v36 = vor.u32 %v9859_v31, %v8077_v30  ;;  %v9769_v50 = vld [vmem:[%s14959_s1 + $0xab0] sm:$0xf0]  ;;  %v7877_v51 = vld [vmem:[%s14959_s1 + $0xbe0] sm:$0xf]  ;;  %v9804_v5 = vld [vmem:[%s14959_s1 + $0xbc8] sm:$0xf0] }
  0x38   :  { %4749 = vmatpush.bf16.msrb.mxu0 %v7038_v41  ;;  %v9814_v41 = vld [vmem:[%s14959_s1 + $0xc18] sm:$0xf0]  ;;  %v9809_v53 = vld [vmem:[%s14959_s1 + $0xbf0] sm:$0xf0]  ;;  %v8037_v54 = vld [vmem:[%s14959_s1 + $0xd20] sm:$0xf]  ;;  %v7718_v58 = vor.u32 %v9769_v50, %v7717_v49 }
  0x39   :  { %4762 = vmatpush.bf16.msrb.mxu1 %v7198_v43  ;;  %v9854_v43 = vld [vmem:[%s14959_s1 + $0xd58] sm:$0xf0]  ;;  %v7898_v47 = vor.u32 %v9814_v41, %v7897_v39  ;;  %v8197_v56 = vld [vmem:[%s14959_s1 + $0xe60] sm:$0xf]  ;;  %v9889_v57 = vld [vmem:[%s14959_s1 + $0xe70] sm:$0xf0]  ;;  %v7878_v59 = vor.u32 %v9809_v53, %v7877_v51 }
  0x3a   :  { %4775 = vmatpush.bf16.msrb.mxu2 %v7358_v44  ;;  %v8217_v44 = vld [vmem:[%s14959_s1 + $0xe88] sm:$0xf]  ;;  %v8198_v4 = vor.u32 %v9889_v57, %v8197_v56  ;;  %v8017_v6 = vld [vmem:[%s14959_s1 + $0xcf8] sm:$0xf]  ;;  %v9844_v7 = vld [vmem:[%s14959_s1 + $0xd08] sm:$0xf0] }
  0x3b   :  { %4788 = vmatpush.bf16.msrb.mxu3 %v7518_v48  ;;  %v8058_v48 = vor.u32 %v9854_v43, %v8057_v42  ;;  %v8218_v52 = vor.u32 %v9894_v45, %v8217_v44  ;;  %v8177_v8 = vld [vmem:[%s14959_s1 + $0xe38] sm:$0xf]  ;;  %v8018_v12 = vor.u32 %v9844_v7, %v8017_v6  ;;  %v7837_v15 = vld [vmem:[%s14959_s1 + $0xb90] sm:$0xf]  ;;  %v9879_v24 = vld [vmem:[%s14959_s1 + $0xe20] sm:$0xf0] }
  0x3c   :  { %4750 = vmatpush.bf16.msrb.mxu0 %v7018_v55  ;;  %v9849_v55 = vld [vmem:[%s14959_s1 + $0xd30] sm:$0xf0]  ;;  %v7657_v29 = vld [vmem:[%s14959_s1 + $0xa28] sm:$0xf]  ;;  %v9754_v30 = vld [vmem:[%s14959_s1 + $0xa38] sm:$0xf0] }
  0x3d   :  { %4763 = vmatpush.bf16.msrb.mxu1 %v7178_v62  ;;  %v8038_v61 = vor.u32 %v9849_v55, %v8037_v54  ;;  %v7697_v62 = vld [vmem:[%s14959_s1 + $0xa78] sm:$0xf]  ;;  %v7817_v31 = vld [vmem:[%s14959_s1 + $0xb68] sm:$0xf]  ;;  %v9794_v33 = vld [vmem:[%s14959_s1 + $0xb78] sm:$0xf0]  ;;  %v7658_v38 = vor.u32 %v9754_v30, %v7657_v29 }
  0x3e   :  { %4776 = vmatpush.bf16.msrb.mxu2 %v7338_v63  ;;  %v9764_v63 = vld [vmem:[%s14959_s1 + $0xa88] sm:$0xf0]  ;;  %v9874_v37 = vld [vmem:[%s14959_s1 + $0xdf8] sm:$0xf0]  ;;  %v7637_v39 = vld [vmem:[%s14959_s1 + $0xa00] sm:$0xf]  ;;  %v7818_v41 = vor.u32 %v9794_v33, %v7817_v31 }
  0x3f   :  { %4789 = vmatpush.bf16.msrb.mxu3 %v7498_v3  ;;  %v7857_v3 = vld [vmem:[%s14959_s1 + $0xbb8] sm:$0xf]  ;;  %v7698_v10 = vor.u32 %v9764_v63, %v7697_v62  ;;  %v7797_v43 = vld [vmem:[%s14959_s1 + $0xb40] sm:$0xf]  ;;  %v9789_v44 = vld [vmem:[%s14959_s1 + $0xb50] sm:$0xf0] }
  0x40   :  { %4751 = vmatpush.bf16.msrb.mxu0 %v6998_v9  ;;  %v9884_v9 = vld [vmem:[%s14959_s1 + $0xe48] sm:$0xf0]  ;;  %v7858_v11 = vor.u32 %v9804_v5, %v7857_v3  ;;  %v7957_v45 = vld [vmem:[%s14959_s1 + $0xc80] sm:$0xf]  ;;  %v9869_v49 = vld [vmem:[%s14959_s1 + $0xdd0] sm:$0xf0]  ;;  %v7798_v57 = vor.u32 %v9789_v44, %v7797_v43 }
  0x41   :  { %4764 = vmatpush.bf16.msrb.mxu1 %v7158_v13  ;;  %v7677_v13 = vld [vmem:[%s14959_s1 + $0xa50] sm:$0xf]  ;;  %v8178_v16 = vor.u32 %v9884_v9, %v8177_v8  ;;  %v8417_v50 = vld [vmem:[%s14959_s1 + $0x1018] sm:$0xf]  ;;  %v9944_v51 = vld [vmem:[%s14959_s1 + $0x1028] sm:$0xf0] }
  0x42   :  { %4777 = vmatpush.bf16.msrb.mxu2 %v7318_v14  ;;  %v9759_v14 = vld [vmem:[%s14959_s1 + $0xa60] sm:$0xf0]  ;;  %v9984_v54 = vld [vmem:[%s14959_s1 + $0x1168] sm:$0xf0]  ;;  %v8737_v55 = vld [vmem:[%s14959_s1 + $0x1298] sm:$0xf]  ;;  %v8418_v63 = vor.u32 %v9944_v51, %v8417_v50 }
  0x43   :  { %4790 = vmatpush.bf16.msrb.mxu3 %v7478_v17  ;;  %4752 = vmatmul.bf16.vlgmr.msrb.gmra.mxu0 %v10675_v0  ;;  %v9799_v17 = vld [vmem:[%s14959_s1 + $0xba0] sm:$0xf0]  ;;  %v7678_v25 = vor.u32 %v9759_v14, %v7677_v13  ;;  %v10024_v56 = vld [vmem:[%s14959_s1 + $0x12a8] sm:$0xf0]  ;;  %v8397_v5 = vld [vmem:[%s14959_s1 + $0xff0] sm:$0xf] }
  0x44   :  { %4796 = vmatpush.bf16.msra.mxu0 %v7778_v18  ;;  %4765 = vmatmul.bf16.vlgmr.msrb.gmra.mxu1 %v10679_v2  ;;  %v7997_v18 = vld [vmem:[%s14959_s1 + $0xcd0] sm:$0xf]  ;;  %v7838_v27 = vor.u32 %v9799_v17, %v7837_v15  ;;  %v9939_v6 = vld [vmem:[%s14959_s1 + $0x1000] sm:$0xf0]  ;;  %v10937_v17 = vld [vmem:[#allocation1 + $0x1b] sm:$0xff] }
  0x45   :  { %4809 = vmatpush.bf16.msra.mxu1 %v7938_v19  ;;  %4778 = vmatmul.bf16.vlgmr.msrb.gmra.mxu2 %v10670_v60  ;;  %v9839_v19 = vld [vmem:[%s14959_s1 + $0xce0] sm:$0xf0]  ;;  %v8557_v7 = vld [vmem:[%s14959_s1 + $0x1130] sm:$0xf]  ;;  %v9974_v29 = vld [vmem:[%s14959_s1 + $0x1118] sm:$0xf0] }
  0x46   :  { %4822 = vmatpush.bf16.msra.mxu2 %v8098_v23  ;;  %4791 = vmatmul.bf16.vlgmr.msrb.gmra.mxu3 %v10677_v1  ;;  %v8157_v23 = vld [vmem:[%s14959_s1 + $0xe10] sm:$0xf]  ;;  %v9979_v9 = vld [vmem:[%s14959_s1 + $0x1140] sm:$0xf0]  ;;  %v8697_v30 = vld [vmem:[%s14959_s1 + $0x1248] sm:$0xf] }
  0x47   :  { %4835 = vmatpush.bf16.msra.mxu3 %v8258_v28  ;;  %v7998_v28 = vor.u32 %v9839_v19, %v7997_v18  ;;  %v8158_v32 = vor.u32 %v9879_v24, %v8157_v23  ;;  %v8877_v13 = vld [vmem:[%s14959_s1 + $0x13b0] sm:$0xf]  ;;  %v10059_v14 = vld [vmem:[%s14959_s1 + $0x13c0] sm:$0xf0]  ;;  %v8398_v18 = vor.u32 %v9939_v6, %v8397_v5  ;;  %v8558_v19 = vor.u32 %v9979_v9, %v8557_v7  ;;  %v8377_v24 = vld [vmem:[%s14959_s1 + $0xfc8] sm:$0xf] }
  0x48   :  { %4797 = vmatpush.bf16.msra.mxu0 %v7758_v34  ;;  %v7977_v34 = vld [vmem:[%s14959_s1 + $0xca8] sm:$0xf]  ;;  %v10933_v15 = vld [vmem:[#allocation1 + $0x12] sm:$0xff]  ;;  %v10014_v31 = vld [vmem:[%s14959_s1 + $0x1258] sm:$0xf0] }
  0x49   :  { %4810 = vmatpush.bf16.msra.mxu1 %v7918_v35  ;;  %v9834_v35 = vld [vmem:[%s14959_s1 + $0xcb8] sm:$0xf0]  ;;  %v10009_v43 = vld [vmem:[%s14959_s1 + $0x1230] sm:$0xf0]  ;;  %v8837_v44 = vld [vmem:[%s14959_s1 + $0x1360] sm:$0xf] }
  0x4a   :  { %4823 = vmatpush.bf16.msra.mxu2 %v8078_v36  ;;  %v8137_v36 = vld [vmem:[%s14959_s1 + $0xde8] sm:$0xf]  ;;  %v7978_v42 = vor.u32 %v9834_v35, %v7977_v34  ;;  %v10054_v33 = vld [vmem:[%s14959_s1 + $0x1398] sm:$0xf0]  ;;  %v8357_v35 = vld [vmem:[%s14959_s1 + $0xfa0] sm:$0xf] }
  0x4b   :  { %4836 = vmatpush.bf16.msra.mxu3 %v8238_v40  ;;  %v9749_v40 = vld [vmem:[%s14959_s1 + $0xa10] sm:$0xf0] }
  0x4c   :  { %4798 = vmatpush.bf16.msra.mxu0 %v7738_v46  ;;  %v8138_v46 = vor.u32 %v9874_v37, %v8137_v36  ;;  %v7638_v53 = vor.u32 %v9749_v40, %v7637_v39  ;;  %v9929_v36 = vld [vmem:[%s14959_s1 + $0xfb0] sm:$0xf0]  ;;  %v8517_v39 = vld [vmem:[%s14959_s1 + $0x10e0] sm:$0xf] }
  0x4d   :  { %4811 = vmatpush.bf16.msra.mxu1 %v7898_v47  ;;  %v9829_v47 = vld [vmem:[%s14959_s1 + $0xc90] sm:$0xf0] }
  0x4e   :  { %4824 = vmatpush.bf16.msra.mxu2 %v8058_v48  ;;  %v8117_v48 = vld [vmem:[%s14959_s1 + $0xdc0] sm:$0xf]  ;;  %v9969_v40 = vld [vmem:[%s14959_s1 + $0x10f0] sm:$0xf0] }
  0x4f   :  { %4837 = vmatpush.bf16.msra.mxu3 %v8218_v52  ;;  %v8577_v52 = vld [vmem:[%s14959_s1 + $0x1158] sm:$0xf]  ;;  %v8118_v62 = vor.u32 %v9869_v49, %v8117_v48 }
  0x50   :  { %4799 = vmatpush.bf16.msra.mxu0 %v7718_v58  ;;  %v7958_v58 = vor.u32 %v9829_v47, %v7957_v45  ;;  %v8578_v3 = vor.u32 %v9984_v54, %v8577_v52  ;;  %v10049_v45 = vld [vmem:[%s14959_s1 + $0x1370] sm:$0xf0] }
  0x51   :  { %4812 = vmatpush.bf16.msra.mxu1 %v7878_v59  ;;  %v8897_v59 = vld [vmem:[%s14959_s1 + $0x13d8] sm:$0xf] }
  0x52   :  { %4825 = vmatpush.bf16.msra.mxu2 %v8038_v61  ;;  %v10064_v61 = vld [vmem:[%s14959_s1 + $0x13e8] sm:$0xf0] }
  0x53   :  { %4838 = vmatpush.bf16.msra.mxu3 %v8198_v4  ;;  %v8738_v4 = vor.u32 %v10024_v56, %v8737_v55  ;;  %v8898_v8 = vor.u32 %v10064_v61, %v8897_v59 }
  0x54   :  { %4800 = vmatpush.bf16.msra.mxu0 %v7698_v10  ;;  %v8717_v10 = vld [vmem:[%s14959_s1 + $0x1270] sm:$0xf] }
  0x55   :  { %4813 = vmatpush.bf16.msra.mxu1 %v7858_v11  ;;  %v10019_v11 = vld [vmem:[%s14959_s1 + $0x1280] sm:$0xf0] }
  0x56   :  { %4826 = vmatpush.bf16.msra.mxu2 %v8018_v12  ;;  %v10925_v12 = vld [vmem:[#allocation1] sm:$0xff]  ;;  %v8718_v23 = vor.u32 %v10019_v11, %v8717_v10 }
  0x57   :  { %4839 = vmatpush.bf16.msra.mxu3 %v8178_v16  ;;  %v10935_v16 = vld [vmem:[#allocation1 + $0x9] sm:$0xff] }
  0x58   :  { %4801 = vmatpush.bf16.msra.mxu0 %v7678_v25  ;;  %v9934_v25 = vld [vmem:[%s14959_s1 + $0xfd8] sm:$0xf0] }
  0x59   :  { %4814 = vmatpush.bf16.msra.mxu1 %v7838_v27  ;;  %v8537_v27 = vld [vmem:[%s14959_s1 + $0x1108] sm:$0xf]  ;;  %v8378_v34 = vor.u32 %v9934_v25, %v8377_v24 }
  0x5a   :  { %4827 = vmatpush.bf16.msra.mxu2 %v7998_v28  ;;  %v8878_v28 = vor.u32 %v10059_v14, %v8877_v13  ;;  %v8538_v37 = vor.u32 %v9974_v29, %v8537_v27 }
  0x5b   :  { %4840 = vmatpush.bf16.msra.mxu3 %v8158_v32  ;;  %v8857_v32 = vld [vmem:[%s14959_s1 + $0x1388] sm:$0xf] }
  0x5c   :  { %4802 = vmatpush.bf16.msra.mxu0 %v7658_v38  ;;  %v8698_v38 = vor.u32 %v10014_v31, %v8697_v30 }
  0x5d   :  { %4815 = vmatpush.bf16.msra.mxu1 %v7818_v41  ;;  %v8677_v41 = vld [vmem:[%s14959_s1 + $0x1220] sm:$0xf] }
  0x5e   :  { %4828 = vmatpush.bf16.msra.mxu2 %v7978_v42  ;;  %v8858_v42 = vor.u32 %v10054_v33, %v8857_v32 }
  0x5f   :  { %4841 = vmatpush.bf16.msra.mxu3 %v8138_v46 }
  0x60   :  { %4803 = vmatpush.bf16.msra.mxu0 %v7638_v53 }
  0x61   :  { %4816 = vmatpush.bf16.msra.mxu1 %v7798_v57 }
  0x62   :  { %4829 = vmatpush.bf16.msra.mxu2 %v7958_v58 }
  0x63   :  { %4842 = vmatpush.bf16.msra.mxu3 %v8118_v62  ;;  %4804 = vmatmul.bf16.vlgmr.msra.gmra.mxu0 %v10925_v12 }
  0x64   :  { %4848 = vmatpush.bf16.msrb.mxu0 %v8418_v63  ;;  %4817 = vmatmul.bf16.vlgmr.msra.gmra.mxu1 %v10935_v16 }
  0x65   :  { %4861 = vmatpush.bf16.msrb.mxu1 %v8578_v3  ;;  %4830 = vmatmul.bf16.vlgmr.msra.gmra.mxu2 %v10933_v15 }
  0x66   :  { %4874 = vmatpush.bf16.msrb.mxu2 %v8738_v4  ;;  %4843 = vmatmul.bf16.vlgmr.msra.gmra.mxu3 %v10937_v17 }
  0x67   :  { %4887 = vmatpush.bf16.msrb.mxu3 %v8898_v8 }
  0x68   :  { %4849 = vmatpush.bf16.msrb.mxu0 %v8398_v18 }
  0x69   :  { %4862 = vmatpush.bf16.msrb.mxu1 %v8558_v19 }
  0x6a   :  { %4875 = vmatpush.bf16.msrb.mxu2 %v8718_v23 }
  0x6b   :  { %4888 = vmatpush.bf16.msrb.mxu3 %v8878_v28 }
  0x6c   :  { %12 = vsyncpa [#allocation3], 0  ;;  %4850 = vmatpush.bf16.msrb.mxu0 %v8378_v34  ;;  %v8358_v46 = vor.u32 %v9929_v36, %v8357_v35  ;;  %v8518_v47 = vor.u32 %v9969_v40, %v8517_v39  ;;  %v8678_v48 = vor.u32 %v10009_v43, %v8677_v41  ;;  %v8337_v49 = vld [vmem:[%s14959_s1 + $0xf78] sm:$0xf]  ;;  %v9924_v50 = vld [vmem:[%s14959_s1 + $0xf88] sm:$0xf0]  ;;  %v8838_v52 = vor.u32 %v10049_v45, %v8837_v44 }
  0x6d   :  { %4863 = vmatpush.bf16.msrb.mxu1 %v8538_v37  ;;  %v8497_v51 = vld [vmem:[%s14959_s1 + $0x10b8] sm:$0xf]  ;;  %v9964_v53 = vld [vmem:[%s14959_s1 + $0x10c8] sm:$0xf0]  ;;  %v8338_v58 = vor.u32 %v9924_v50, %v8337_v49  ;;  %v8317_v62 = vld [vmem:[%s14959_s1 + $0xf50] sm:$0xf] }
  0x6e   :  { %4876 = vmatpush.bf16.msrb.mxu2 %v8698_v38  ;;  %v8657_v54 = vld [vmem:[%s14959_s1 + $0x11f8] sm:$0xf]  ;;  %v10004_v55 = vld [vmem:[%s14959_s1 + $0x1208] sm:$0xf0]  ;;  %v8498_v59 = vor.u32 %v9964_v53, %v8497_v51  ;;  %v9919_v63 = vld [vmem:[%s14959_s1 + $0xf60] sm:$0xf0] }
  0x6f   :  { %4889 = vmatpush.bf16.msrb.mxu3 %v8858_v42  ;;  %v8817_v56 = vld [vmem:[%s14959_s1 + $0x1338] sm:$0xf]  ;;  %v10044_v57 = vld [vmem:[%s14959_s1 + $0x1348] sm:$0xf0]  ;;  %v8658_v61 = vor.u32 %v10004_v55, %v8657_v54  ;;  %v8477_v3 = vld [vmem:[%s14959_s1 + $0x1090] sm:$0xf]  ;;  %v8318_v10 = vor.u32 %v9919_v63, %v8317_v62 }
  0x70   :  { %4851 = vmatpush.bf16.msrb.mxu0 %v8358_v46  ;;  %v8818_v4 = vor.u32 %v10044_v57, %v8817_v56  ;;  %v9959_v5 = vld [vmem:[%s14959_s1 + $0x10a0] sm:$0xf0]  ;;  %v8637_v6 = vld [vmem:[%s14959_s1 + $0x11d0] sm:$0xf]  ;;  %v8297_v11 = vld [vmem:[%s14959_s1 + $0xf28] sm:$0xf] }
  0x71   :  { %4864 = vmatpush.bf16.msrb.mxu1 %v8518_v47  ;;  %v9999_v7 = vld [vmem:[%s14959_s1 + $0x11e0] sm:$0xf0]  ;;  %v8797_v8 = vld [vmem:[%s14959_s1 + $0x1310] sm:$0xf]  ;;  %v8478_v13 = vor.u32 %v9959_v5, %v8477_v3  ;;  %v9914_v18 = vld [vmem:[%s14959_s1 + $0xf38] sm:$0xf0] }
  0x72   :  { %4877 = vmatpush.bf16.msrb.mxu2 %v8678_v48  ;;  %v10039_v9 = vld [vmem:[%s14959_s1 + $0x1320] sm:$0xf0]  ;;  %v8638_v14 = vor.u32 %v9999_v7, %v8637_v6  ;;  %v8457_v19 = vld [vmem:[%s14959_s1 + $0x1068] sm:$0xf]  ;;  %v9954_v23 = vld [vmem:[%s14959_s1 + $0x1078] sm:$0xf0]  ;;  %v8298_v32 = vor.u32 %v9914_v18, %v8297_v11 }
  0x73   :  { %4890 = vmatpush.bf16.msrb.mxu3 %v8838_v52  ;;  %v8798_v24 = vor.u32 %v10039_v9, %v8797_v8  ;;  %v8617_v25 = vld [vmem:[%s14959_s1 + $0x11a8] sm:$0xf]  ;;  %v9994_v27 = vld [vmem:[%s14959_s1 + $0x11b8] sm:$0xf0]  ;;  %v8277_v30 = vld [vmem:[%s14959_s1 + $0xf00] sm:$0xf]  ;;  %v8458_v37 = vor.u32 %v9954_v23, %v8457_v19 }
  0x74   :  { %4852 = vmatpush.bf16.msrb.mxu0 %v8338_v58  ;;  %v8777_v28 = vld [vmem:[%s14959_s1 + $0x12e8] sm:$0xf]  ;;  %v10034_v29 = vld [vmem:[%s14959_s1 + $0x12f8] sm:$0xf0]  ;;  %v9909_v31 = vld [vmem:[%s14959_s1 + $0xf10] sm:$0xf0]  ;;  %v8618_v38 = vor.u32 %v9994_v27, %v8617_v25 }
  0x75   :  { %4865 = vmatpush.bf16.msrb.mxu1 %v8498_v59  ;;  %v8437_v33 = vld [vmem:[%s14959_s1 + $0x1040] sm:$0xf]  ;;  %v9949_v34 = vld [vmem:[%s14959_s1 + $0x1050] sm:$0xf0]  ;;  %v9057_v41 = vld [vmem:[%s14959_s1 + $0x1518] sm:$0xf]  ;;  %v8778_v43 = vor.u32 %v10034_v29, %v8777_v28  ;;  %v8278_v51 = vor.u32 %v9909_v31, %v8277_v30 }
  0x76   :  { %4878 = vmatpush.bf16.msrb.mxu2 %v8658_v61  ;;  %v8597_v35 = vld [vmem:[%s14959_s1 + $0x1180] sm:$0xf]  ;;  %v9989_v36 = vld [vmem:[%s14959_s1 + $0x1190] sm:$0xf0]  ;;  %v10104_v42 = vld [vmem:[%s14959_s1 + $0x1528] sm:$0xf0]  ;;  %v8438_v54 = vor.u32 %v9949_v34, %v8437_v33 }
  0x77   :  { %4891 = vmatpush.bf16.msrb.mxu3 %v8818_v4  ;;  %v8757_v39 = vld [vmem:[%s14959_s1 + $0x12c0] sm:$0xf]  ;;  %v10029_v40 = vld [vmem:[%s14959_s1 + $0x12d0] sm:$0xf0]  ;;  %v9217_v44 = vld [vmem:[%s14959_s1 + $0x1658] sm:$0xf]  ;;  %v8598_v55 = vor.u32 %v9989_v36, %v8597_v35  ;;  %v9058_v59 = vor.u32 %v10104_v42, %v9057_v41 }
  0x78   :  { %4853 = vmatpush.bf16.msrb.mxu0 %v8318_v10  ;;  %v10144_v45 = vld [vmem:[%s14959_s1 + $0x1668] sm:$0xf0]  ;;  %v11099_v46 = vld [vmem:[#allocation1 + $0x24] sm:$0xff]  ;;  %v11101_v47 = vld [vmem:[#allocation1 + $0x36] sm:$0xff]  ;;  %v8758_v58 = vor.u32 %v10029_v40, %v8757_v39  ;;  %s10236_s12 = smov [#allocation2]  }
  0x79   :  { %4866 = vmatpush.bf16.msrb.mxu1 %v8478_v13  ;;  %v11103_v48 = vld [vmem:[#allocation1 + $0x2d] sm:$0xff]  ;;  %v11105_v49 = vld [vmem:[#allocation1 + $0x3f] sm:$0xff]  ;;  %v9218_v61 = vor.u32 %v10144_v45, %v9217_v44  ;;  %v6479_v8 = vld [vmem:[%s14959_s1 + $0x104] sm:$0xf0]  ;;  %s6344_s13 = sshll.u32 %s10236_s12, 4  ;;  %s6345_s13 = int_to_ptr.vmem [resolvable:$true] %s6344_s13 }
  0x7a   :  { %4879 = vmatpush.bf16.msrb.mxu2 %v8638_v14  ;;  %v29_v50 = vld [vmem:[%s14958_s0 + $0x10] sm:$0x3]  ;;  %v9462_v52 = vld [vmem:[%s14959_s1 + $0x11c] sm:$0xf]  ;;  %v10099_v3 = vld [vmem:[%s14959_s1 + $0x1500] sm:$0xf0] }
  0x7b   :  { %4892 = vmatpush.bf16.msrb.mxu3 %v8798_v24  ;;  %v6499_v53 = vld [vmem:[%s14959_s1 + $0x12c] sm:$0xf0]  ;;  %927 = vst [vmem:[#allocation1] ss:$9 sm:$0xff] %v29_v50  ;;  %v9502_v56 = vld [vmem:[%s14959_s1 + $0x25c] sm:$0xf] }
  0x7c   :  { %4854 = vmatpush.bf16.msrb.mxu0 %v8298_v32  ;;  %v6659_v57 = vld [vmem:[%s14959_s1 + $0x26c] sm:$0xf0]  ;;  %v6502_v62 = vor.u32 %v9462_v52, %v6499_v53  ;;  %v10139_v6 = vld [vmem:[%s14959_s1 + $0x1640] sm:$0xf0]  ;;  %v9457_v7 = vld [vmem:[%s14959_s1 + $0xf4] sm:$0xf] }
  0x7d   :  { %4867 = vmatpush.bf16.msrb.mxu1 %v8458_v37  ;;  %v9037_v63 = vld [vmem:[%s14959_s1 + $0x14f0] sm:$0xf]  ;;  %v6662_v5 = vor.u32 %v9502_v56, %v6659_v57  ;;  %v9497_v9 = vld [vmem:[%s14959_s1 + $0x234] sm:$0xf]  ;;  %v6639_v10 = vld [vmem:[%s14959_s1 + $0x244] sm:$0xf0]  ;;  %v6482_v14 = vor.u32 %v9457_v7, %v6479_v8 }
  0x7e   :  { %4880 = vmatpush.bf16.msrb.mxu2 %v8618_v38  ;;  %v9197_v4 = vld [vmem:[%s14959_s1 + $0x1630] sm:$0xf]  ;;  %v9038_v11 = vor.u32 %v10099_v3, %v9037_v63  ;;  %v9017_v18 = vld [vmem:[%s14959_s1 + $0x14c8] sm:$0xf]  ;;  %v10094_v19 = vld [vmem:[%s14959_s1 + $0x14d8] sm:$0xf0]  ;;  %v6642_v24 = vor.u32 %v9497_v9, %v6639_v10 }
  0x7f   :  { %4893 = vmatpush.bf16.msrb.mxu3 %v8778_v43  ;;  %v9198_v13 = vor.u32 %v10139_v6, %v9197_v4  ;;  %v9177_v23 = vld [vmem:[%s14959_s1 + $0x1608] sm:$0xf]  ;;  %v10134_v25 = vld [vmem:[%s14959_s1 + $0x1618] sm:$0xf0]  ;;  %v9452_v27 = vld [vmem:[%s14959_s1 + $0xcc] sm:$0xf]  ;;  %v9018_v31 = vor.u32 %v10094_v19, %v9017_v18 }
  0x80   :  { %4855 = vmatpush.bf16.msrb.mxu0 %v8278_v51  ;;  %v6459_v28 = vld [vmem:[%s14959_s1 + $0xdc] sm:$0xf0]  ;;  %v9492_v29 = vld [vmem:[%s14959_s1 + $0x20c] sm:$0xf]  ;;  %v9178_v32 = vor.u32 %v10134_v25, %v9177_v23  ;;  %v10089_v35 = vld [vmem:[%s14959_s1 + $0x14b0] sm:$0xf0] }
  0x81   :  { %4868 = vmatpush.bf16.msrb.mxu1 %v8438_v54  ;;  %v6619_v30 = vld [vmem:[%s14959_s1 + $0x21c] sm:$0xf0]  ;;  %v6462_v33 = vor.u32 %v9452_v27, %v6459_v28  ;;  %v10129_v38 = vld [vmem:[%s14959_s1 + $0x15f0] sm:$0xf0]  ;;  %v9447_v39 = vld [vmem:[%s14959_s1 + $0xa4] sm:$0xf] }
  0x82   :  { %4881 = vmatpush.bf16.msrb.mxu2 %v8598_v55  ;;  %v8997_v34 = vld [vmem:[%s14959_s1 + $0x14a0] sm:$0xf]  ;;  %v6622_v37 = vor.u32 %v9492_v29, %v6619_v30  ;;  %v6439_v40 = vld [vmem:[%s14959_s1 + $0xb4] sm:$0xf0]  ;;  %v9487_v41 = vld [vmem:[%s14959_s1 + $0x1e4] sm:$0xf] }
  0x83   :  { %4894 = vmatpush.bf16.msrb.mxu3 %v8758_v58  ;;  %4856 = vmatmul.bf16.vlgmr.msrb.gmra.mxu0 %v11099_v46  ;;  %v9157_v36 = vld [vmem:[%s14959_s1 + $0x15e0] sm:$0xf]  ;;  %v6599_v42 = vld [vmem:[%s14959_s1 + $0x1f4] sm:$0xf0]  ;;  %v8998_v43 = vor.u32 %v10089_v35, %v8997_v34  ;;  %v6442_v45 = vor.u32 %v9447_v39, %v6439_v40  ;;  %v10084_v51 = vld [vmem:[%s14959_s1 + $0x1488] sm:$0xf0] }
  0x84   :  { %4900 = vmatpush.bf16.msra.mxu0 %v9058_v59  ;;  %4869 = vmatmul.bf16.vlgmr.msrb.gmra.mxu1 %v11103_v48  ;;  %v9158_v44 = vor.u32 %v10129_v38, %v9157_v36  ;;  %v8977_v50 = vld [vmem:[%s14959_s1 + $0x1478] sm:$0xf]  ;;  %v6602_v53 = vor.u32 %v9487_v41, %v6599_v42  ;;  %v10124_v54 = vld [vmem:[%s14959_s1 + $0x15c8] sm:$0xf0]  ;;  %v9442_v55 = vld [vmem:[%s14959_s1 + $0x7c] sm:$0xf] }
  0x85   :  { %4913 = vmatpush.bf16.msra.mxu1 %v9218_v61  ;;  %4882 = vmatmul.bf16.vlgmr.msrb.gmra.mxu2 %v11101_v47  ;;  %v9137_v52 = vld [vmem:[%s14959_s1 + $0x15b8] sm:$0xf]  ;;  %v6419_v56 = vld [vmem:[%s14959_s1 + $0x8c] sm:$0xf0]  ;;  %v9482_v57 = vld [vmem:[%s14959_s1 + $0x1bc] sm:$0xf]  ;;  %v8978_v59 = vor.u32 %v10084_v51, %v8977_v50 }
  0x86   :  { %4926 = vmatpush.bf16.msra.mxu2 %v6502_v62  ;;  %4895 = vmatmul.bf16.vlgmr.msrb.gmra.mxu3 %v11105_v49  ;;  %v6579_v58 = vld [vmem:[%s14959_s1 + $0x1cc] sm:$0xf0]  ;;  %v9138_v61 = vor.u32 %v10124_v54, %v9137_v52  ;;  %v6422_v62 = vor.u32 %v9442_v55, %v6419_v56  ;;  %v10079_v3 = vld [vmem:[%s14959_s1 + $0x1460] sm:$0xf0]  ;;  %v9437_v7 = vld [vmem:[%s14959_s1 + $0x54] sm:$0xf] }
  0x87   :  { %4939 = vmatpush.bf16.msra.mxu3 %v6662_v5  ;;  %v8957_v63 = vld [vmem:[%s14959_s1 + $0x1450] sm:$0xf]  ;;  %v6582_v5 = vor.u32 %v9482_v57, %v6579_v58  ;;  %v10119_v6 = vld [vmem:[%s14959_s1 + $0x15a0] sm:$0xf0]  ;;  %v6399_v8 = vld [vmem:[%s14959_s1 + $0x64] sm:$0xf0] }
  0x88   :  { %4901 = vmatpush.bf16.msra.mxu0 %v9038_v11  ;;  %v9117_v4 = vld [vmem:[%s14959_s1 + $0x1590] sm:$0xf]  ;;  %v9477_v9 = vld [vmem:[%s14959_s1 + $0x194] sm:$0xf]  ;;  %v6559_v10 = vld [vmem:[%s14959_s1 + $0x1a4] sm:$0xf0]  ;;  %v8958_v11 = vor.u32 %v10079_v3, %v8957_v63 }
  0x89   :  { %4914 = vmatpush.bf16.msra.mxu1 %v9198_v13  ;;  %v9118_v13 = vor.u32 %v10119_v6, %v9117_v4  ;;  %v8937_v18 = vld [vmem:[%s14959_s1 + $0x1428] sm:$0xf]  ;;  %v10074_v19 = vld [vmem:[%s14959_s1 + $0x1438] sm:$0xf0]  ;;  %v9432_v27 = vld [vmem:[%s14959_s1 + $0x2c] sm:$0xf] }
  0x8a   :  { %4927 = vmatpush.bf16.msra.mxu2 %v6482_v14  ;;  %v6402_v14 = vor.u32 %v9437_v7, %v6399_v8  ;;  %v9097_v23 = vld [vmem:[%s14959_s1 + $0x1568] sm:$0xf]  ;;  %v10114_v25 = vld [vmem:[%s14959_s1 + $0x1578] sm:$0xf0]  ;;  %v6379_v28 = vld [vmem:[%s14959_s1 + $0x3c] sm:$0xf0] }
  0x8b   :  { %4940 = vmatpush.bf16.msra.mxu3 %v6642_v24  ;;  %v6562_v24 = vor.u32 %v9477_v9, %v6559_v10  ;;  %v9472_v29 = vld [vmem:[%s14959_s1 + $0x16c] sm:$0xf]  ;;  %v6539_v30 = vld [vmem:[%s14959_s1 + $0x17c] sm:$0xf0]  ;;  %v9098_v34 = vor.u32 %v10114_v25, %v9097_v23  ;;  %v6382_v35 = vor.u32 %v9432_v27, %v6379_v28  ;;  %v9427_v38 = vld [vmem:[%s14959_s1 + $0x4] sm:$0xf] }
  0x8c   :  { %4902 = vmatpush.bf16.msra.mxu0 %v9018_v31  ;;  %v8938_v31 = vor.u32 %v10074_v19, %v8937_v18  ;;  %v9077_v36 = vld [vmem:[%s14959_s1 + $0x1540] sm:$0xf]  ;;  %v6542_v39 = vor.u32 %v9472_v29, %v6539_v30  ;;  %v6359_v40 = vld [vmem:[%s14959_s1 + $0x14] sm:$0xf0]  ;;  %v9467_v41 = vld [vmem:[%s14959_s1 + $0x144] sm:$0xf] }
  0x8d   :  { %4915 = vmatpush.bf16.msra.mxu1 %v9178_v32  ;;  %v8917_v32 = vld [vmem:[%s14959_s1 + $0x1400] sm:$0xf]  ;;  %v6519_v42 = vld [vmem:[%s14959_s1 + $0x154] sm:$0xf0]  ;;  %v6979_v51 = vld [vmem:[%s14959_s1 + $0x4ec] sm:$0xf0]  ;;  %v6362_v55 = vor.u32 %v9427_v38, %v6359_v40 }
  0x8e   :  { %4928 = vmatpush.bf16.msra.mxu2 %v6462_v33  ;;  %v10069_v33 = vld [vmem:[%s14959_s1 + $0x1410] sm:$0xf0]  ;;  %v9622_v52 = vld [vmem:[%s14959_s1 + $0x61c] sm:$0xf]  ;;  %v7299_v57 = vld [vmem:[%s14959_s1 + $0x76c] sm:$0xf0]  ;;  %v6522_v58 = vor.u32 %v9467_v41, %v6519_v42 }
  0x8f   :  { %4941 = vmatpush.bf16.msra.mxu3 %v6622_v37  ;;  %v10109_v37 = vld [vmem:[%s14959_s1 + $0x1550] sm:$0xf0]  ;;  %v8918_v50 = vor.u32 %v10069_v33, %v8917_v32  ;;  %v9662_v56 = vld [vmem:[%s14959_s1 + $0x75c] sm:$0xf]  ;;  %v6799_v3 = vld [vmem:[%s14959_s1 + $0x384] sm:$0xf0] }
  0x90   :  { %4903 = vmatpush.bf16.msra.mxu0 %v8998_v43  ;;  %v9542_v43 = vld [vmem:[%s14959_s1 + $0x39c] sm:$0xf]  ;;  %v9078_v54 = vor.u32 %v10109_v37, %v9077_v36  ;;  %v9537_v63 = vld [vmem:[%s14959_s1 + $0x374] sm:$0xf]  ;;  %v6959_v6 = vld [vmem:[%s14959_s1 + $0x4c4] sm:$0xf0] }
  0x91   :  { %4916 = vmatpush.bf16.msra.mxu1 %v9158_v44  ;;  %v6819_v44 = vld [vmem:[%s14959_s1 + $0x3ac] sm:$0xf0]  ;;  %v9577_v4 = vld [vmem:[%s14959_s1 + $0x4b4] sm:$0xf]  ;;  %v7119_v8 = vld [vmem:[%s14959_s1 + $0x604] sm:$0xf0] }
  0x92   :  { %4929 = vmatpush.bf16.msra.mxu2 %v6442_v45  ;;  %v9582_v45 = vld [vmem:[%s14959_s1 + $0x4dc] sm:$0xf]  ;;  %v9617_v7 = vld [vmem:[%s14959_s1 + $0x5f4] sm:$0xf]  ;;  %v928_v9 = vld [vmem:[#allocation1] sm:$0xff]  ;;  %v6962_v18 = vor.u32 %v9577_v4, %v6959_v6 }
  0x93   :  { %4942 = vmatpush.bf16.msra.mxu3 %v6602_v53  ;;  %v7139_v53 = vld [vmem:[%s14959_s1 + $0x62c] sm:$0xf0]  ;;  %v9657_v10 = vld [vmem:[%s14959_s1 + $0x734] sm:$0xf]  ;;  %v7122_v19 = vor.u32 %v9617_v7, %v7119_v8  ;;  %v9532_v23 = vld [vmem:[%s14959_s1 + $0x34c] sm:$0xf] }
  0x94   :  { %4904 = vmatpush.bf16.msra.mxu0 %v8978_v59  ;;  %v6822_v59 = vor.u32 %v9542_v43, %v6819_v44  ;;  %v9572_v25 = vld [vmem:[%s14959_s1 + $0x48c] sm:$0xf]  ;;  %v6939_v28 = vld [vmem:[%s14959_s1 + $0x49c] sm:$0xf0]  ;;  %v9527_v36 = vld [vmem:[%s14959_s1 + $0x324] sm:$0xf] }
  0x95   :  { %4917 = vmatpush.bf16.msra.mxu1 %v9138_v61  ;;  %v6982_v61 = vor.u32 %v9582_v45, %v6979_v51  ;;  %v9612_v29 = vld [vmem:[%s14959_s1 + $0x5cc] sm:$0xf]  ;;  %v7099_v30 = vld [vmem:[%s14959_s1 + $0x5dc] sm:$0xf0]  ;;  %v6759_v37 = vld [vmem:[%s14959_s1 + $0x334] sm:$0xf0] }
  0x96   :  { %4930 = vmatpush.bf16.msra.mxu2 %v6422_v62  ;;  %v7142_v62 = vor.u32 %v9622_v52, %v7139_v53  ;;  %v7259_v32 = vld [vmem:[%s14959_s1 + $0x71c] sm:$0xf0]  ;;  %v9567_v38 = vld [vmem:[%s14959_s1 + $0x464] sm:$0xf]  ;;  %v6919_v40 = vld [vmem:[%s14959_s1 + $0x474] sm:$0xf0]  ;;  %v6762_v45 = vor.u32 %v9527_v36, %v6759_v37 }
  0x97   :  { %4943 = vmatpush.bf16.msra.mxu3 %v6582_v5  ;;  %v7302_v5 = vor.u32 %v9662_v56, %v7299_v57  ;;  %v9607_v41 = vld [vmem:[%s14959_s1 + $0x5a4] sm:$0xf]  ;;  %v7079_v42 = vld [vmem:[%s14959_s1 + $0x5b4] sm:$0xf0]  ;;  %v6922_v51 = vor.u32 %v9567_v38, %v6919_v40  ;;  %v6739_v53 = vld [vmem:[%s14959_s1 + $0x30c] sm:$0xf0] }
  0x98   :  { %4905 = vmatpush.bf16.msra.mxu0 %v8958_v11  ;;  %v7279_v11 = vld [vmem:[%s14959_s1 + $0x744] sm:$0xf0]  ;;  %v9647_v43 = vld [vmem:[%s14959_s1 + $0x6e4] sm:$0xf]  ;;  %v7239_v44 = vld [vmem:[%s14959_s1 + $0x6f4] sm:$0xf0]  ;;  %v7082_v52 = vor.u32 %v9607_v41, %v7079_v42 }
  0x99   :  { %4918 = vmatpush.bf16.msra.mxu1 %v9118_v13  ;;  %v929_v13 = vld [vmem:[#allocation1 + $0x9] sm:$0xff]  ;;  %v7282_v27 = vor.u32 %v9657_v10, %v7279_v11  ;;  %v7242_v56 = vor.u32 %v9647_v43, %v7239_v44  ;;  %v9602_v57 = vld [vmem:[%s14959_s1 + $0x57c] sm:$0xf]  ;;  %v9557_v7 = vld [vmem:[%s14959_s1 + $0x414] sm:$0xf] }
  0x9a   :  { %4931 = vmatpush.bf16.msra.mxu2 %v6402_v14  ;;  %v6802_v14 = vor.u32 %v9537_v63, %v6799_v3  ;;  %v9517_v3 = vld [vmem:[%s14959_s1 + $0x2d4] sm:$0xf]  ;;  %v6719_v6 = vld [vmem:[%s14959_s1 + $0x2e4] sm:$0xf0]  ;;  %v9632_v36 = vld [vmem:[%s14959_s1 + $0x66c] sm:$0xf] }
  0x9b   :  { %4944 = vmatpush.bf16.msra.mxu3 %v6562_v24  ;;  %v6779_v24 = vld [vmem:[%s14959_s1 + $0x35c] sm:$0xf0]  ;;  %v6879_v10 = vld [vmem:[%s14959_s1 + $0x424] sm:$0xf0]  ;;  %v9597_v11 = vld [vmem:[%s14959_s1 + $0x554] sm:$0xf] }
  0x9c   :  { %4906 = vmatpush.bf16.msra.mxu0 %v8938_v31  ;;  %v9652_v31 = vld [vmem:[%s14959_s1 + $0x70c] sm:$0xf]  ;;  %v6782_v33 = vor.u32 %v9532_v23, %v6779_v24  ;;  %v6882_v24 = vor.u32 %v9557_v7, %v6879_v10  ;;  %v7179_v37 = vld [vmem:[%s14959_s1 + $0x67c] sm:$0xf0]  ;;  %v9507_v40 = vld [vmem:[%s14959_s1 + $0x284] sm:$0xf] }
  0x9d   :  { %4919 = vmatpush.bf16.msra.mxu1 %v9098_v34  ;;  %v6942_v34 = vor.u32 %v9572_v25, %v6939_v28  ;;  %v6699_v28 = vld [vmem:[%s14959_s1 + $0x2bc] sm:$0xf0]  ;;  %v6679_v41 = vld [vmem:[%s14959_s1 + $0x294] sm:$0xf0]  ;;  %v9547_v44 = vld [vmem:[%s14959_s1 + $0x3c4] sm:$0xf] }
  0x9e   :  { %4932 = vmatpush.bf16.msra.mxu2 %v6382_v35  ;;  %v7102_v35 = vor.u32 %v9612_v29, %v7099_v30  ;;  %v9552_v29 = vld [vmem:[%s14959_s1 + $0x3ec] sm:$0xf]  ;;  %v7939_v10 = vld [vmem:[%s14959_s1 + $0xc6c] sm:$0xf0] }
  0x9f   :  { %4945 = vmatpush.bf16.msra.mxu3 %v6542_v39  ;;  %v7262_v39 = vor.u32 %v9652_v31, %v7259_v32 }
  0xa0   :  { %4907 = vmatpush.bf16.msra.mxu0 %v8918_v50  ;;  %v9522_v50 = vld [vmem:[%s14959_s1 + $0x2fc] sm:$0xf] }
  0xa1   :  { %4920 = vmatpush.bf16.msra.mxu1 %v9078_v54  ;;  %v9562_v54 = vld [vmem:[%s14959_s1 + $0x43c] sm:$0xf]  ;;  %v6742_v63 = vor.u32 %v9522_v50, %v6739_v53  ;;  %v9587_v50 = vld [vmem:[%s14959_s1 + $0x504] sm:$0xf]  ;;  %v6999_v53 = vld [vmem:[%s14959_s1 + $0x514] sm:$0xf0] }
  0xa2   :  { %4933 = vmatpush.bf16.msra.mxu2 %v6362_v55  ;;  %v6899_v55 = vld [vmem:[%s14959_s1 + $0x44c] sm:$0xf0] }
  0xa3   :  { %4946 = vmatpush.bf16.msra.mxu3 %v6522_v58  ;;  %4908 = vmatmul.bf16.vlgmr.msra.gmra.mxu0 %v928_v9  ;;  %v7059_v58 = vld [vmem:[%s14959_s1 + $0x58c] sm:$0xf0]  ;;  %v6902_v4 = vor.u32 %v9562_v54, %v6899_v55  ;;  %v4701_v23 = vpop.f32.mrf.mxu0  ;;  %v9627_v54 = vld [vmem:[%s14959_s1 + $0x644] sm:$0xf]  ;;  %v7159_v55 = vld [vmem:[%s14959_s1 + $0x654] sm:$0xf0] }
  0xa4   :  { %4952 = vmatpush.bf16.msrb.mxu0 %v6822_v59  ;;  %4921 = vmatmul.bf16.vlgmr.msra.gmra.mxu1 %v929_v13  ;;  %v894_v59 = vld [vmem:[%s14960_s2] sm:$0x1f]  ;;  %v7039_v13 = vld [vmem:[%s14959_s1 + $0x564] sm:$0xf0] }
  0xa5   :  { %4965 = vmatpush.bf16.msrb.mxu1 %v6982_v61  ;;  %4934 = vmatmul.bf16.vlgmr.msra.gmra.mxu2 %v10582_v21  ;;  %v9642_v61 = vld [vmem:[%s14959_s1 + $0x6bc] sm:$0xf]  ;;  %v896_v8 = vperm.slane %v894_v59, 0  ;;  %v7042_v25 = vor.u32 %v9597_v11, %v7039_v13  ;;  %v7459_v59 = vld [vmem:[%s14959_s1 + $0x8ac] sm:$0xf0]  ;;  %v7162_v13 = vor.u32 %v9627_v54, %v7159_v55 }
  0xa6   :  { %4978 = vmatpush.bf16.msrb.mxu2 %v7142_v62  ;;  %4947 = vmatmul.bf16.vlgmr.msra.gmra.mxu3 %v10593_v26  ;;  %v7219_v62 = vld [vmem:[%s14959_s1 + $0x6cc] sm:$0xf0]  ;;  %v9687_v54 = vld [vmem:[%s14959_s1 + $0x824] sm:$0xf]  ;;  %v7399_v55 = vld [vmem:[%s14959_s1 + $0x834] sm:$0xf0] }
  0xa7   :  { %4991 = vmatpush.bf16.msrb.mxu3 %v7302_v5  ;;  %v7062_v5 = vor.u32 %v9602_v57, %v7059_v58  ;;  %v7222_v9 = vor.u32 %v9642_v61, %v7219_v62  ;;  %v4702_v30 = vadd.f32 %v4701_v23, %v896_v8  ;;  %v4714_v31 = vpop.f32.mrf.mxu1  ;;  %v9702_v58 = vld [vmem:[%s14959_s1 + $0x89c] sm:$0xf]  ;;  %v6682_v62 = vor.u32 %v9507_v40, %v6679_v41  ;;  %v9697_v23 = vld [vmem:[%s14959_s1 + $0x874] sm:$0xf]  ;;  %v9732_v40 = vld [vmem:[%s14959_s1 + $0x98c] sm:$0xf] }
  0xa8   :  { %4953 = vmatpush.bf16.msrb.mxu0 %v6802_v14  ;;  %v9637_v14 = vld [vmem:[%s14959_s1 + $0x694] sm:$0xf]  ;;  %v9742_v61 = vld [vmem:[%s14959_s1 + $0x9dc] sm:$0xf]  ;;  %v7002_v8 = vor.u32 %v9587_v50, %v6999_v53  ;;  %v7899_v50 = vld [vmem:[%s14959_s1 + $0xc1c] sm:$0xf0] }
  0xa9   :  { %4966 = vmatpush.bf16.msrb.mxu1 %v6962_v18  ;;  %v7199_v18 = vld [vmem:[%s14959_s1 + $0x6a4] sm:$0xf0]  ;;  %v4715_v38 = vadd.f32 %v4714_v31, %v4702_v30  ;;  %v9817_v31 = vld [vmem:[%s14959_s1 + $0xc34] sm:$0xf] }
  0xaa   :  { %4979 = vmatpush.bf16.msrb.mxu2 %v7122_v19  ;;  %v6722_v19 = vor.u32 %v9517_v3, %v6719_v6  ;;  %v7202_v32 = vor.u32 %v9637_v14, %v7199_v18  ;;  %v9782_v3 = vld [vmem:[%s14959_s1 + $0xb1c] sm:$0xf]  ;;  %v7462_v14 = vor.u32 %v9702_v58, %v7459_v59  ;;  %v7759_v30 = vld [vmem:[%s14959_s1 + $0xb04] sm:$0xf0]  ;;  %v7559_v58 = vld [vmem:[%s14959_s1 + $0x974] sm:$0xf0] }
  0xab   :  { %4992 = vmatpush.bf16.msrb.mxu3 %v7282_v27  ;;  %v9512_v27 = vld [vmem:[%s14959_s1 + $0x2ac] sm:$0xf]  ;;  %v4740_v57 = vpop.f32.mrf.mxu3  ;;  %v4703_v6 = vpop.f32.mrf.mxu0  ;;  %v9767_v59 = vld [vmem:[%s14959_s1 + $0xaa4] sm:$0xf] }
  0xac   :  { %4954 = vmatpush.bf16.msrb.mxu0 %v6782_v33  ;;  %v6859_v33 = vld [vmem:[%s14959_s1 + $0x3fc] sm:$0xf0] }
  0xad   :  { %4967 = vmatpush.bf16.msrb.mxu1 %v6942_v34  ;;  %v9592_v34 = vld [vmem:[%s14959_s1 + $0x52c] sm:$0xf]  ;;  %v6862_v42 = vor.u32 %v9552_v29, %v6859_v33  ;;  %v9777_v29 = vld [vmem:[%s14959_s1 + $0xaf4] sm:$0xf] }
  0xae   :  { %4980 = vmatpush.bf16.msrb.mxu2 %v7102_v35  ;;  %v7019_v35 = vld [vmem:[%s14959_s1 + $0x53c] sm:$0xf0] }
  0xaf   :  { %4993 = vmatpush.bf16.msrb.mxu3 %v7262_v39  ;;  %v6702_v39 = vor.u32 %v9512_v27, %v6699_v28  ;;  %v7022_v43 = vor.u32 %v9592_v34, %v7019_v35  ;;  %v4716_v11 = vpop.f32.mrf.mxu1  ;;  %v7599_v28 = vld [vmem:[%s14959_s1 + $0x9c4] sm:$0xf0] }
  0xb0   :  { %4955 = vmatpush.bf16.msrb.mxu0 %v6762_v45  ;;  %v6839_v45 = vld [vmem:[%s14959_s1 + $0x3d4] sm:$0xf0] }
  0xb1   :  { %4968 = vmatpush.bf16.msrb.mxu1 %v6922_v51  ;;  %v4727_v51 = vpop.f32.mrf.mxu2  ;;  %v6842_v7 = vor.u32 %v9547_v44, %v6839_v45  ;;  %v7739_v44 = vld [vmem:[%s14959_s1 + $0xadc] sm:$0xf0]  ;;  %v9812_v45 = vld [vmem:[%s14959_s1 + $0xc0c] sm:$0xf] }
  0xb2   :  { %4981 = vmatpush.bf16.msrb.mxu2 %v7082_v52  ;;  %v7182_v52 = vor.u32 %v9632_v36, %v7179_v37  ;;  %v7762_v37 = vor.u32 %v9777_v29, %v7759_v30  ;;  %v9677_v30 = vld [vmem:[%s14959_s1 + $0x7d4] sm:$0xf] }
  0xb3   :  { %4994 = vmatpush.bf16.msrb.mxu3 %v7242_v56  ;;  %v4728_v56 = vadd.f32 %v4727_v51, %v4715_v38  ;;  %v4742_v35 = vpop.f32.mrf.mxu3  ;;  %v9692_v38 = vld [vmem:[%s14959_s1 + $0x84c] sm:$0xf] }
  0xb4   :  { %4956 = vmatpush.bf16.msrb.mxu0 %v6742_v63  ;;  %v7619_v63 = vld [vmem:[%s14959_s1 + $0x9ec] sm:$0xf0]  ;;  %v7519_v35 = vld [vmem:[%s14959_s1 + $0x924] sm:$0xf0] }
  0xb5   :  { %4969 = vmatpush.bf16.msrb.mxu1 %v6902_v4  ;;  %v7779_v4 = vld [vmem:[%s14959_s1 + $0xb2c] sm:$0xf0]  ;;  %v7622_v18 = vor.u32 %v9742_v61, %v7619_v63  ;;  %v7719_v61 = vld [vmem:[%s14959_s1 + $0xab4] sm:$0xf0] }
  0xb6   :  { %4982 = vmatpush.bf16.msrb.mxu2 %v7062_v5  ;;  %v11509_v5 = vadd.f32 %v4740_v57, %v4728_v56  ;;  %v9727_v56 = vld [vmem:[%s14959_s1 + $0x964] sm:$0xf]  ;;  %v7902_v57 = vor.u32 %v9812_v45, %v7899_v50  ;;  %v7879_v63 = vld [vmem:[%s14959_s1 + $0xbf4] sm:$0xf0] }
  0xb7   :  { %4995 = vmatpush.bf16.msrb.mxu3 %v7222_v9  ;;  %v9822_v9 = vld [vmem:[%s14959_s1 + $0xc5c] sm:$0xf]  ;;  %v7562_v6 = vor.u32 %v9727_v56, %v7559_v58  ;;  %v7499_v56 = vld [vmem:[%s14959_s1 + $0x8fc] sm:$0xf0] }
  0xb8   :  { %4957 = vmatpush.bf16.msrb.mxu0 %v6722_v19  ;;  %v7782_v19 = vor.u32 %v9782_v3, %v7779_v4  ;;  %v7942_v27 = vor.u32 %v9822_v9, %v7939_v10  ;;  %v7402_v3 = vor.u32 %v9687_v54, %v7399_v55  ;;  %v7379_v9 = vld [vmem:[%s14959_s1 + $0x80c] sm:$0xf0]  ;;  %v9722_v10 = vld [vmem:[%s14959_s1 + $0x93c] sm:$0xf]  ;;  %v7659_v58 = vld [vmem:[%s14959_s1 + $0xa3c] sm:$0xf0] }
  0xb9   :  { %4970 = vmatpush.bf16.msrb.mxu1 %v6882_v24  ;;  %v7439_v24 = vld [vmem:[%s14959_s1 + $0x884] sm:$0xf0]  ;;  %v4729_v33 = vpop.f32.mrf.mxu2 }
  0xba   :  { %4983 = vmatpush.bf16.msrb.mxu2 %v7042_v25  ;;  %v9737_v25 = vld [vmem:[%s14959_s1 + $0x9b4] sm:$0xf]  ;;  %v7442_v34 = vor.u32 %v9697_v23, %v7439_v24  ;;  %v7699_v23 = vld [vmem:[%s14959_s1 + $0xa8c] sm:$0xf0]  ;;  %v9802_v24 = vld [vmem:[%s14959_s1 + $0xbbc] sm:$0xf] }
  0xbb   :  { %4996 = vmatpush.bf16.msrb.mxu3 %v7202_v32  ;;  %v7919_v32 = vld [vmem:[%s14959_s1 + $0xc44] sm:$0xf0]  ;;  %v7602_v36 = vor.u32 %v9737_v25, %v7599_v28 }
  0xbc   :  { %4958 = vmatpush.bf16.msrb.mxu0 %v6702_v39  ;;  %v7419_v39 = vld [vmem:[%s14959_s1 + $0x85c] sm:$0xf0]  ;;  %v7922_v41 = vor.u32 %v9817_v31, %v7919_v32  ;;  %v7359_v31 = vld [vmem:[%s14959_s1 + $0x7e4] sm:$0xf0]  ;;  %v9717_v32 = vld [vmem:[%s14959_s1 + $0x914] sm:$0xf] }
  0xbd   :  { %4971 = vmatpush.bf16.msrb.mxu1 %v6862_v42  ;;  %v7579_v42 = vld [vmem:[%s14959_s1 + $0x99c] sm:$0xf0]  ;;  %v7422_v51 = vor.u32 %v9692_v38, %v7419_v39  ;;  %v7522_v45 = vor.u32 %v9717_v32, %v7519_v35  ;;  %v9982_v32 = vld [vmem:[%s14959_s1 + $0x115c] sm:$0xf] }
  0xbe   :  { %4984 = vmatpush.bf16.msrb.mxu2 %v7022_v43  ;;  %v9772_v43 = vld [vmem:[%s14959_s1 + $0xacc] sm:$0xf] }
  0xbf   :  { %4997 = vmatpush.bf16.msrb.mxu3 %v7182_v52  ;;  %v7582_v52 = vor.u32 %v9732_v40, %v7579_v42  ;;  %v7742_v53 = vor.u32 %v9772_v43, %v7739_v44  ;;  %v9797_v40 = vld [vmem:[%s14959_s1 + $0xb94] sm:$0xf]  ;;  %v7362_v42 = vor.u32 %v9677_v30, %v7359_v31 }
  0xc0   :  { %4959 = vmatpush.bf16.msrb.mxu0 %v6682_v62  ;;  %v9807_v62 = vld [vmem:[%s14959_s1 + $0xbe4] sm:$0xf]  ;;  %v4753_v4 = vpop.f32.mrf.mxu0 }
  0xc1   :  { %4972 = vmatpush.bf16.msrb.mxu1 %v6842_v7  ;;  %v7722_v7 = vor.u32 %v9767_v59, %v7719_v61  ;;  %v4754_v11 = vadd.f32 %v4753_v4, %v11509_v5  ;;  %v7859_v5 = vld [vmem:[%s14959_s1 + $0xbcc] sm:$0xf0]  ;;  %v9792_v59 = vld [vmem:[%s14959_s1 + $0xb6c] sm:$0xf]  ;;  %v7819_v61 = vld [vmem:[%s14959_s1 + $0xb7c] sm:$0xf0] }
  0xc2   :  { %4985 = vmatpush.bf16.msrb.mxu2 %v7002_v8  ;;  %v9682_v8 = vld [vmem:[%s14959_s1 + $0x7fc] sm:$0xf] }
  0xc3   :  { %4998 = vmatpush.bf16.msrb.mxu3 %v7162_v13  ;;  %4960 = vmatmul.bf16.vlgmr.msrb.gmra.mxu0 %v10580_v20  ;;  %v4766_v13 = vpop.f32.mrf.mxu1 }
  0xc4   :  { %5004 = vmatpush.bf16.msra.mxu0 %v7462_v14  ;;  %4973 = vmatmul.bf16.vlgmr.msrb.gmra.mxu1 %v10584_v22  ;;  %v7882_v14 = vor.u32 %v9807_v62, %v7879_v63  ;;  %v4767_v25 = vadd.f32 %v4766_v13, %v4754_v11  ;;  %v9667_v63 = vld [vmem:[%s14959_s1 + $0x784] sm:$0xf]  ;;  %v7822_v11 = vor.u32 %v9792_v59, %v7819_v61  ;;  %v7639_v13 = vld [vmem:[%s14959_s1 + $0xa14] sm:$0xf0]  ;;  %v8219_v59 = vld [vmem:[%s14959_s1 + $0xe9c] sm:$0xf0] }
  0xc5   :  { %5017 = vmatpush.bf16.msra.mxu1 %v7622_v18  ;;  %4986 = vmatmul.bf16.vlgmr.msrb.gmra.mxu2 %v10675_v0  ;;  %v7539_v18 = vld [vmem:[%s14959_s1 + $0x94c] sm:$0xf0]  ;;  %v9932_v61 = vld [vmem:[%s14959_s1 + $0xfcc] sm:$0xf] }
  0xc6   :  { %5030 = vmatpush.bf16.msra.mxu2 %v7782_v19  ;;  %4999 = vmatmul.bf16.vlgmr.msrb.gmra.mxu3 %v10679_v2  ;;  %v9762_v19 = vld [vmem:[%s14959_s1 + $0xa7c] sm:$0xf]  ;;  %v7542_v28 = vor.u32 %v9722_v10, %v7539_v18  ;;  %v7799_v18 = vld [vmem:[%s14959_s1 + $0xb54] sm:$0xf0] }
  0xc7   :  { %5043 = vmatpush.bf16.msra.mxu3 %v7942_v27  ;;  %v7382_v27 = vor.u32 %v9682_v8, %v7379_v9  ;;  %v7702_v29 = vor.u32 %v9762_v19, %v7699_v23  ;;  %v7479_v8 = vld [vmem:[%s14959_s1 + $0x8d4] sm:$0xf0]  ;;  %v9747_v9 = vld [vmem:[%s14959_s1 + $0xa04] sm:$0xf]  ;;  %v9862_v23 = vld [vmem:[%s14959_s1 + $0xd9c] sm:$0xf] }
  0xc8   :  { %5005 = vmatpush.bf16.msra.mxu0 %v7442_v34  ;;  %v4779_v33 = vpop.f32.mrf.mxu2  ;;  %v7862_v34 = vor.u32 %v9802_v24, %v7859_v5  ;;  %v4755_v44 = vpop.f32.mrf.mxu0  ;;  %v8099_v24 = vld [vmem:[%s14959_s1 + $0xdac] sm:$0xf0]  ;;  %v9902_v5 = vld [vmem:[%s14959_s1 + $0xedc] sm:$0xf]  ;;  %v7642_v31 = vor.u32 %v9747_v9, %v7639_v13  ;;  %v8039_v9 = vld [vmem:[%s14959_s1 + $0xd34] sm:$0xf0] }
  0xc9   :  { %5018 = vmatpush.bf16.msra.mxu1 %v7602_v36  ;;  %v9757_v36 = vld [vmem:[%s14959_s1 + $0xa54] sm:$0xf]  ;;  %v4780_v38 = vadd.f32 %v4779_v33, %v4767_v25  ;;  %v4792_v39 = vpop.f32.mrf.mxu3  ;;  %v8579_v33 = vld [vmem:[%s14959_s1 + $0x116c] sm:$0xf0]  ;;  %v8102_v35 = vor.u32 %v9862_v23, %v8099_v24  ;;  %v8199_v13 = vld [vmem:[%s14959_s1 + $0xe74] sm:$0xf0] }
  0xca   :  { %5031 = vmatpush.bf16.msra.mxu2 %v7762_v37  ;;  %v7679_v37 = vld [vmem:[%s14959_s1 + $0xa64] sm:$0xf0]  ;;  %v9937_v44 = vld [vmem:[%s14959_s1 + $0xff4] sm:$0xf]  ;;  %v9967_v23 = vld [vmem:[%s14959_s1 + $0x10e4] sm:$0xf] }
  0xcb   :  { %5044 = vmatpush.bf16.msra.mxu3 %v7922_v41  ;;  %v7839_v41 = vld [vmem:[%s14959_s1 + $0xba4] sm:$0xf0]  ;;  %v11642_v43 = vadd.f32 %v4792_v39, %v4780_v38  ;;  %v7682_v50 = vor.u32 %v9757_v36, %v7679_v37  ;;  %v4768_v54 = vpop.f32.mrf.mxu1  ;;  %v9857_v38 = vld [vmem:[%s14959_s1 + $0xd74] sm:$0xf]  ;;  %v8519_v24 = vld [vmem:[%s14959_s1 + $0x10f4] sm:$0xf0] }
  0xcc   :  { %5006 = vmatpush.bf16.msra.mxu0 %v7422_v51  ;;  %v9672_v51 = vld [vmem:[%s14959_s1 + $0x7ac] sm:$0xf]  ;;  %v7842_v55 = vor.u32 %v9797_v40, %v7839_v41  ;;  %v8079_v39 = vld [vmem:[%s14959_s1 + $0xd84] sm:$0xf0]  ;;  %v9897_v40 = vld [vmem:[%s14959_s1 + $0xeb4] sm:$0xf]  ;;  %v8582_v41 = vor.u32 %v9982_v32, %v8579_v33 }
  0xcd   :  { %5019 = vmatpush.bf16.msra.mxu1 %v7582_v52  ;;  %v7339_v52 = vld [vmem:[%s14959_s1 + $0x7bc] sm:$0xf0]  ;;  %v9882_v32 = vld [vmem:[%s14959_s1 + $0xe3c] sm:$0xf] }
  0xce   :  { %5032 = vmatpush.bf16.msra.mxu2 %v7742_v53  ;;  %v9712_v53 = vld [vmem:[%s14959_s1 + $0x8ec] sm:$0xf]  ;;  %v7342_v62 = vor.u32 %v9672_v51, %v7339_v52  ;;  %v8559_v51 = vld [vmem:[%s14959_s1 + $0x1144] sm:$0xf0]  ;;  %v8082_v52 = vor.u32 %v9857_v38, %v8079_v39  ;;  %v8499_v38 = vld [vmem:[%s14959_s1 + $0x10cc] sm:$0xf0] }
  0xcf   :  { %5045 = vmatpush.bf16.msra.mxu3 %v7902_v57  ;;  %v9752_v57 = vld [vmem:[%s14959_s1 + $0xa2c] sm:$0xf]  ;;  %v7502_v4 = vor.u32 %v9712_v53, %v7499_v56  ;;  %v8059_v56 = vld [vmem:[%s14959_s1 + $0xd5c] sm:$0xf0] }
  0xd0   :  { %5007 = vmatpush.bf16.msra.mxu0 %v7402_v3  ;;  %v7319_v3 = vld [vmem:[%s14959_s1 + $0x794] sm:$0xf0]  ;;  %v4781_v10 = vpop.f32.mrf.mxu2 }
  0xd1   :  { %5020 = vmatpush.bf16.msra.mxu1 %v7562_v6  ;;  %v7662_v6 = vor.u32 %v9752_v57, %v7659_v58  ;;  %v4794_v19 = vpop.f32.mrf.mxu3  ;;  %v7322_v25 = vor.u32 %v9667_v63, %v7319_v3  ;;  %v9892_v57 = vld [vmem:[%s14959_s1 + $0xe8c] sm:$0xf]  ;;  %v8539_v3 = vld [vmem:[%s14959_s1 + $0x111c] sm:$0xf0]  ;;  %v9887_v10 = vld [vmem:[%s14959_s1 + $0xe64] sm:$0xf] }
  0xd2   :  { %5033 = vmatpush.bf16.msra.mxu2 %v7722_v7  ;;  %v9707_v7 = vld [vmem:[%s14959_s1 + $0x8c4] sm:$0xf]  ;;  %v9972_v63 = vld [vmem:[%s14959_s1 + $0x110c] sm:$0xf] }
  0xd3   :  { %5046 = vmatpush.bf16.msra.mxu3 %v7882_v14  ;;  %v9787_v14 = vld [vmem:[%s14959_s1 + $0xb44] sm:$0xf]  ;;  %v7482_v30 = vor.u32 %v9707_v7, %v7479_v8 }
  0xd4   :  { %5008 = vmatpush.bf16.msra.mxu0 %v7382_v27  ;;  %v8259_v27 = vld [vmem:[%s14959_s1 + $0xeec] sm:$0xf0]  ;;  %v9847_v8 = vld [vmem:[%s14959_s1 + $0xd24] sm:$0xf] }
  0xd5   :  { %5021 = vmatpush.bf16.msra.mxu1 %v7542_v28  ;;  %v9942_v28 = vld [vmem:[%s14959_s1 + $0x101c] sm:$0xf]  ;;  %v8262_v36 = vor.u32 %v9902_v5, %v8259_v27 }
  0xd6   :  { %5034 = vmatpush.bf16.msra.mxu2 %v7702_v29  ;;  %v8419_v29 = vld [vmem:[%s14959_s1 + $0x102c] sm:$0xf0] }
  0xd7   :  { %5047 = vmatpush.bf16.msra.mxu3 %v7862_v34  ;;  %v7802_v34 = vor.u32 %v9787_v14, %v7799_v18  ;;  %v8422_v37 = vor.u32 %v9942_v28, %v8419_v29  ;;  %v9927_v14 = vld [vmem:[%s14959_s1 + $0xfa4] sm:$0xf]  ;;  %v8359_v18 = vld [vmem:[%s14959_s1 + $0xfb4] sm:$0xf0]  ;;  %v8202_v28 = vor.u32 %v9887_v10, %v8199_v13  ;;  %v8139_v10 = vld [vmem:[%s14959_s1 + $0xdfc] sm:$0xf0] }
  0xd8   :  { %5009 = vmatpush.bf16.msra.mxu0 %v7362_v42  ;;  %v8239_v42 = vld [vmem:[%s14959_s1 + $0xec4] sm:$0xf0]  ;;  %v8362_v29 = vor.u32 %v9927_v14, %v8359_v18  ;;  %v8299_v13 = vld [vmem:[%s14959_s1 + $0xf3c] sm:$0xf0]  ;;  %v9952_v14 = vld [vmem:[%s14959_s1 + $0x106c] sm:$0xf] }
  0xd9   :  { %5022 = vmatpush.bf16.msra.mxu1 %v7522_v45  ;;  %v8399_v45 = vld [vmem:[%s14959_s1 + $0x1004] sm:$0xf0]  ;;  %v8242_v53 = vor.u32 %v9897_v40, %v8239_v42  ;;  %v9837_v42 = vld [vmem:[%s14959_s1 + $0xcd4] sm:$0xf]  ;;  %v8459_v18 = vld [vmem:[%s14959_s1 + $0x107c] sm:$0xf0] }
  0xda   :  { %5035 = vmatpush.bf16.msra.mxu2 %v7682_v50  ;;  %v9977_v50 = vld [vmem:[%s14959_s1 + $0x1134] sm:$0xf]  ;;  %v8402_v54 = vor.u32 %v9937_v44, %v8399_v45  ;;  %v7999_v44 = vld [vmem:[%s14959_s1 + $0xce4] sm:$0xf0] }
  0xdb   :  { %5048 = vmatpush.bf16.msra.mxu3 %v7842_v55  ;;  %v9852_v55 = vld [vmem:[%s14959_s1 + $0xd4c] sm:$0xf]  ;;  %v8562_v58 = vor.u32 %v9977_v50, %v8559_v51  ;;  %v9877_v45 = vld [vmem:[%s14959_s1 + $0xe14] sm:$0xf] }
  0xdc   :  { %5010 = vmatpush.bf16.msra.mxu0 %v7342_v62  ;;  %v8379_v62 = vld [vmem:[%s14959_s1 + $0xfdc] sm:$0xf0] }
  0xdd   :  { %5023 = vmatpush.bf16.msra.mxu1 %v7502_v4  ;;  %v8062_v4 = vor.u32 %v9852_v55, %v8059_v56  ;;  %v8382_v7 = vor.u32 %v9932_v61, %v8379_v62  ;;  %v8002_v61 = vor.u32 %v9837_v42, %v7999_v44 }
  0xde   :  { %5036 = vmatpush.bf16.msra.mxu2 %v7662_v6  ;;  %v8222_v6 = vor.u32 %v9892_v57, %v8219_v59  ;;  %v9957_v57 = vld [vmem:[%s14959_s1 + $0x1094] sm:$0xf] }
  0xdf   :  { %5049 = vmatpush.bf16.msra.mxu3 %v7822_v11  ;;  %v8542_v11 = vor.u32 %v9972_v63, %v8539_v3 }
  0xe0   :  { %5011 = vmatpush.bf16.msra.mxu0 %v7322_v25  ;;  %v4805_v19 = vpop.f32.mrf.mxu0  ;;  %v8042_v25 = vor.u32 %v9847_v8, %v8039_v9  ;;  %v9872_v8 = vld [vmem:[%s14959_s1 + $0xdec] sm:$0xf] }
  0xe1   :  { %5024 = vmatpush.bf16.msra.mxu1 %v7482_v30  ;;  %v4806_v5 = vadd.f32 %v4805_v19, %v11642_v43  ;;  %v4818_v27 = vpop.f32.mrf.mxu1  ;;  %v9842_v30 = vld [vmem:[%s14959_s1 + $0xcfc] sm:$0xf]  ;;  %v8522_v43 = vor.u32 %v9967_v23, %v8519_v24  ;;  %v9827_v23 = vld [vmem:[%s14959_s1 + $0xc84] sm:$0xf]  ;;  %v7959_v24 = vld [vmem:[%s14959_s1 + $0xc94] sm:$0xf0] }
  0xe2   :  { %5037 = vmatpush.bf16.msra.mxu2 %v7642_v31  ;;  %v8019_v31 = vld [vmem:[%s14959_s1 + $0xd0c] sm:$0xf0] }
  0xe3   :  { %5050 = vmatpush.bf16.msra.mxu3 %v7802_v34  ;;  %5012 = vmatmul.bf16.vlgmr.msra.gmra.mxu0 %v10670_v60  ;;  %v4819_v33 = vadd.f32 %v4818_v27, %v4806_v5  ;;  %v8179_v34 = vld [vmem:[%s14959_s1 + $0xe4c] sm:$0xf0]  ;;  %v8022_v39 = vor.u32 %v9842_v30, %v8019_v31  ;;  %v8142_v5 = vor.u32 %v9872_v8, %v8139_v10  ;;  %v9867_v27 = vld [vmem:[%s14959_s1 + $0xdc4] sm:$0xf]  ;;  %v8279_v31 = vld [vmem:[%s14959_s1 + $0xf14] sm:$0xf0] }
  0xe4   :  { %5056 = vmatpush.bf16.msrb.mxu0 %v8102_v35  ;;  %5025 = vmatmul.bf16.vlgmr.msra.gmra.mxu1 %v10677_v1  ;;  %v9922_v35 = vld [vmem:[%s14959_s1 + $0xf7c] sm:$0xf]  ;;  %v8182_v40 = vor.u32 %v9882_v32, %v8179_v34  ;;  %v8462_v30 = vor.u32 %v9952_v14, %v8459_v18  ;;  %v9947_v32 = vld [vmem:[%s14959_s1 + $0x1044] sm:$0xf]  ;;  %v8699_v10 = vld [vmem:[%s14959_s1 + $0x125c] sm:$0xf0] }
  0xe5   :  { %5069 = vmatpush.bf16.msrb.mxu1 %v8262_v36  ;;  %5038 = vmatmul.bf16.vlgmr.msra.gmra.mxu2 %v10925_v12  ;;  %v8339_v36 = vld [vmem:[%s14959_s1 + $0xf8c] sm:$0xf0]  ;;  %v10022_v34 = vld [vmem:[%s14959_s1 + $0x129c] sm:$0xf]  ;;  %v8859_v14 = vld [vmem:[%s14959_s1 + $0x139c] sm:$0xf0] }
  0xe6   :  { %5082 = vmatpush.bf16.msrb.mxu2 %v8422_v37  ;;  %5051 = vmatmul.bf16.vlgmr.msra.gmra.mxu3 %v10935_v16  ;;  %v9962_v37 = vld [vmem:[%s14959_s1 + $0x10bc] sm:$0xf]  ;;  %v10092_v18 = vld [vmem:[%s14959_s1 + $0x14cc] sm:$0xf] }
  0xe7   :  { %5095 = vmatpush.bf16.msrb.mxu3 %v8582_v41  ;;  %v8342_v41 = vor.u32 %v9922_v35, %v8339_v36  ;;  %v8502_v50 = vor.u32 %v9962_v37, %v8499_v38  ;;  %v8739_v35 = vld [vmem:[%s14959_s1 + $0x12ac] sm:$0xf0]  ;;  %v10062_v36 = vld [vmem:[%s14959_s1 + $0x13dc] sm:$0xf]  ;;  %v7962_v38 = vor.u32 %v9827_v23, %v7959_v24  ;;  %v10132_v23 = vld [vmem:[%s14959_s1 + $0x160c] sm:$0xf] }
  0xe8   :  { %5057 = vmatpush.bf16.msrb.mxu0 %v8082_v52  ;;  %v4831_v51 = vpop.f32.mrf.mxu2  ;;  %v8159_v52 = vld [vmem:[%s14959_s1 + $0xe24] sm:$0xf0]  ;;  %v4807_v59 = vpop.f32.mrf.mxu0  ;;  %v9179_v24 = vld [vmem:[%s14959_s1 + $0x161c] sm:$0xf0] }
  0xe9   :  { %5070 = vmatpush.bf16.msrb.mxu1 %v8242_v53  ;;  %v9917_v53 = vld [vmem:[%s14959_s1 + $0xf54] sm:$0xf]  ;;  %v4832_v55 = vadd.f32 %v4831_v51, %v4819_v33  ;;  %v4844_v56 = vpop.f32.mrf.mxu3  ;;  %v4820_v62 = vpop.f32.mrf.mxu1  ;;  %v8162_v3 = vor.u32 %v9877_v45, %v8159_v52  ;;  %v10142_v45 = vld [vmem:[%s14959_s1 + $0x165c] sm:$0xf]  ;;  %v8742_v52 = vor.u32 %v10022_v34, %v8739_v35  ;;  %v8879_v59 = vld [vmem:[%s14959_s1 + $0x13c4] sm:$0xf0] }
  0xea   :  { %5083 = vmatpush.bf16.msrb.mxu2 %v8402_v54  ;;  %v8319_v54 = vld [vmem:[%s14959_s1 + $0xf64] sm:$0xf0]  ;;  %v10127_v35 = vld [vmem:[%s14959_s1 + $0x15e4] sm:$0xf] }
  0xeb   :  { %5096 = vmatpush.bf16.msrb.mxu3 %v8562_v58  ;;  %v8479_v58 = vld [vmem:[%s14959_s1 + $0x10a4] sm:$0xf0]  ;;  %v11841_v63 = vadd.f32 %v4844_v56, %v4832_v55  ;;  %v10017_v55 = vld [vmem:[%s14959_s1 + $0x1274] sm:$0xf] }
  0xec   :  { %5058 = vmatpush.bf16.msrb.mxu0 %v8062_v4  ;;  %v8322_v4 = vor.u32 %v9917_v53, %v8319_v54  ;;  %v8482_v9 = vor.u32 %v9957_v57, %v8479_v58  ;;  %v8719_v56 = vld [vmem:[%s14959_s1 + $0x1284] sm:$0xf0]  ;;  %v10057_v57 = vld [vmem:[%s14959_s1 + $0x13b4] sm:$0xf] }
  0xed   :  { %5071 = vmatpush.bf16.msrb.mxu1 %v8222_v6  ;;  %v9832_v6 = vld [vmem:[%s14959_s1 + $0xcac] sm:$0xf]  ;;  %v9039_v62 = vld [vmem:[%s14959_s1 + $0x1504] sm:$0xf0] }
  0xee   :  { %5084 = vmatpush.bf16.msrb.mxu2 %v8382_v7  ;;  %v7979_v7 = vld [vmem:[%s14959_s1 + $0xcbc] sm:$0xf0] }
  0xef   :  { %5097 = vmatpush.bf16.msrb.mxu3 %v8542_v11  ;;  %v9912_v11 = vld [vmem:[%s14959_s1 + $0xf2c] sm:$0xf]  ;;  %v7982_v19 = vor.u32 %v9832_v6, %v7979_v7  ;;  %v8722_v6 = vor.u32 %v10017_v55, %v8719_v56  ;;  %v8882_v7 = vor.u32 %v10057_v57, %v8879_v59  ;;  %v9139_v55 = vld [vmem:[%s14959_s1 + $0x15cc] sm:$0xf0]  ;;  %v9997_v59 = vld [vmem:[%s14959_s1 + $0x11d4] sm:$0xf] }
  0xf0   :  { %5059 = vmatpush.bf16.msrb.mxu0 %v8042_v25  ;;  %v8302_v25 = vor.u32 %v9912_v11, %v8299_v13  ;;  %v4833_v33 = vpop.f32.mrf.mxu2  ;;  %v10052_v11 = vld [vmem:[%s14959_s1 + $0x138c] sm:$0xf] }
  0xf1   :  { %5072 = vmatpush.bf16.msrb.mxu1 %v8202_v28  ;;  %v8119_v28 = vld [vmem:[%s14959_s1 + $0xdd4] sm:$0xf0]  ;;  %v4846_v37 = vpop.f32.mrf.mxu3 }
  0xf2   :  { %5085 = vmatpush.bf16.msrb.mxu2 %v8362_v29  ;;  %v9907_v29 = vld [vmem:[%s14959_s1 + $0xf04] sm:$0xf]  ;;  %v8122_v42 = vor.u32 %v9867_v27, %v8119_v28  ;;  %v8999_v33 = vld [vmem:[%s14959_s1 + $0x14b4] sm:$0xf0] }
  0xf3   :  { %5098 = vmatpush.bf16.msrb.mxu3 %v8522_v43  ;;  %v8439_v43 = vld [vmem:[%s14959_s1 + $0x1054] sm:$0xf0]  ;;  %v8282_v44 = vor.u32 %v9907_v29, %v8279_v31  ;;  %v10007_v28 = vld [vmem:[%s14959_s1 + $0x1224] sm:$0xf]  ;;  %v9182_v31 = vor.u32 %v10132_v23, %v9179_v24 }
  0xf4   :  { %5060 = vmatpush.bf16.msrb.mxu0 %v8022_v39  ;;  %v8899_v39 = vld [vmem:[%s14959_s1 + $0x13ec] sm:$0xf0]  ;;  %v8442_v51 = vor.u32 %v9947_v32, %v8439_v43  ;;  %v8679_v29 = vld [vmem:[%s14959_s1 + $0x1234] sm:$0xf0]  ;;  %v10087_v43 = vld [vmem:[%s14959_s1 + $0x14a4] sm:$0xf] }
  0xf5   :  { %5073 = vmatpush.bf16.msrb.mxu1 %v8182_v40  ;;  %v10102_v40 = vld [vmem:[%s14959_s1 + $0x151c] sm:$0xf]  ;;  %v8902_v53 = vor.u32 %v10062_v36, %v8899_v39  ;;  %v8839_v32 = vld [vmem:[%s14959_s1 + $0x1374] sm:$0xf0] }
  0xf6   :  { %5086 = vmatpush.bf16.msrb.mxu2 %v8342_v41  ;;  %v9059_v41 = vld [vmem:[%s14959_s1 + $0x152c] sm:$0xf0]  ;;  %v9159_v36 = vld [vmem:[%s14959_s1 + $0x15f4] sm:$0xf0] }
  0xf7   :  { %5099 = vmatpush.bf16.msrb.mxu3 %v8502_v50  ;;  %v9219_v50 = vld [vmem:[%s14959_s1 + $0x166c] sm:$0xf0]  ;;  %v9062_v54 = vor.u32 %v10102_v40, %v9059_v41  ;;  %v9002_v41 = vor.u32 %v10087_v43, %v8999_v33  ;;  %v10112_v43 = vld [vmem:[%s14959_s1 + $0x156c] sm:$0xf]  ;;  %v9099_v33 = vld [vmem:[%s14959_s1 + $0x157c] sm:$0xf0] }
  0xf8   :  { %5061 = vmatpush.bf16.msrb.mxu0 %v8002_v61  ;;  %v9222_v58 = vor.u32 %v10142_v45, %v9219_v50  ;;  %v10097_v61 = vld [vmem:[%s14959_s1 + $0x14f4] sm:$0xf]  ;;  %v10042_v45 = vld [vmem:[%s14959_s1 + $0x133c] sm:$0xf] }
  0xf9   :  { %5074 = vmatpush.bf16.msrb.mxu1 %v8162_v3  ;;  %v10137_v3 = vld [vmem:[%s14959_s1 + $0x1634] sm:$0xf]  ;;  %v9042_v8 = vor.u32 %v10097_v61, %v9039_v62  ;;  %v8639_v61 = vld [vmem:[%s14959_s1 + $0x11e4] sm:$0xf0] }
  0xfa   :  { %5087 = vmatpush.bf16.msrb.mxu2 %v8322_v4  ;;  %v9199_v4 = vld [vmem:[%s14959_s1 + $0x1644] sm:$0xf0]  ;;  %v10037_v62 = vld [vmem:[%s14959_s1 + $0x1314] sm:$0xf] }
  0xfb   :  { %5100 = vmatpush.bf16.msrb.mxu3 %v8482_v9  ;;  %v10012_v9 = vld [vmem:[%s14959_s1 + $0x124c] sm:$0xf]  ;;  %v9202_v13 = vor.u32 %v10137_v3, %v9199_v4 }
  0xfc   :  { %5062 = vmatpush.bf16.msrb.mxu0 %v7982_v19  ;;  %v9019_v19 = vld [vmem:[%s14959_s1 + $0x14dc] sm:$0xf0] }
  0xfd   :  { %5075 = vmatpush.bf16.msrb.mxu1 %v8142_v5  ;;  %v8702_v5 = vor.u32 %v10012_v9, %v8699_v10  ;;  %v9022_v27 = vor.u32 %v10092_v18, %v9019_v19  ;;  %v8642_v18 = vor.u32 %v9997_v59, %v8639_v61 }
  0xfe   :  { %5088 = vmatpush.bf16.msrb.mxu2 %v8302_v25  ;;  %v8862_v25 = vor.u32 %v10052_v11, %v8859_v14  ;;  %v10117_v11 = vld [vmem:[%s14959_s1 + $0x1594] sm:$0xf] }
  0xff   :  { %5101 = vmatpush.bf16.msrb.mxu3 %v8462_v30  ;;  %v10047_v30 = vld [vmem:[%s14959_s1 + $0x1364] sm:$0xf] }
 0x100   :  { %5063 = vmatpush.bf16.msrb.mxu0 %v7962_v38  ;;  %v4857_v34 = vpop.f32.mrf.mxu0  ;;  %v8682_v38 = vor.u32 %v10007_v28, %v8679_v29  ;;  %v8842_v40 = vor.u32 %v10047_v30, %v8839_v32  ;;  %v10032_v28 = vld [vmem:[%s14959_s1 + $0x12ec] sm:$0xf]  ;;  %v8779_v30 = vld [vmem:[%s14959_s1 + $0x12fc] sm:$0xf0] }
 0x101   :  { %5076 = vmatpush.bf16.msrb.mxu1 %v8122_v42  ;;  %v4858_v37 = vadd.f32 %v4857_v34, %v11841_v63  ;;  %v4870_v39 = vpop.f32.mrf.mxu1  ;;  %v10002_v42 = vld [vmem:[%s14959_s1 + $0x11fc] sm:$0xf]  ;;  %v9162_v63 = vor.u32 %v10127_v35, %v9159_v36  ;;  %v8939_v32 = vld [vmem:[%s14959_s1 + $0x143c] sm:$0xf0]  ;;  %v9987_v35 = vld [vmem:[%s14959_s1 + $0x1184] sm:$0xf] }
 0x102   :  { %5089 = vmatpush.bf16.msrb.mxu2 %v8282_v44  ;;  %v8659_v44 = vld [vmem:[%s14959_s1 + $0x120c] sm:$0xf0]  ;;  %v8599_v36 = vld [vmem:[%s14959_s1 + $0x1194] sm:$0xf0] }
 0x103   :  { %5102 = vmatpush.bf16.msrb.mxu3 %v8442_v51  ;;  %5064 = vmatmul.bf16.vlgmr.msrb.gmra.mxu0 %v10933_v15  ;;  %v4871_v50 = vadd.f32 %v4870_v39, %v4858_v37  ;;  %v8819_v51 = vld [vmem:[%s14959_s1 + $0x134c] sm:$0xf0]  ;;  %v8662_v56 = vor.u32 %v10002_v42, %v8659_v44  ;;  %v8782_v37 = vor.u32 %v10032_v28, %v8779_v30  ;;  %v10027_v39 = vld [vmem:[%s14959_s1 + $0x12c4] sm:$0xf]  ;;  %v8919_v44 = vld [vmem:[%s14959_s1 + $0x1414] sm:$0xf0] }
 0x104   :  { %5108 = vmatpush.bf16.msra.mxu0 %v8742_v52  ;;  %5077 = vmatmul.bf16.vlgmr.msrb.gmra.mxu1 %v10937_v17  ;;  %v10082_v52 = vld [vmem:[%s14959_s1 + $0x147c] sm:$0xf]  ;;  %v8822_v57 = vor.u32 %v10042_v45, %v8819_v51  ;;  %v9102_v42 = vor.u32 %v10112_v43, %v9099_v33  ;;  %v10107_v45 = vld [vmem:[%s14959_s1 + $0x1544] sm:$0xf]  ;;  %v6505_v51 = vld [vmem:[%s14959_s1 + $0x120] sm:$0xf] }
 0x105   :  { %5121 = vmatpush.bf16.msra.mxu1 %v8902_v53  ;;  %5090 = vmatmul.bf16.vlgmr.msrb.gmra.mxu2 %v11099_v46  ;;  %v8979_v53 = vld [vmem:[%s14959_s1 + $0x148c] sm:$0xf0]  ;;  %v9455_v30 = vld [vmem:[%s14959_s1 + $0xe0] sm:$0xf0] }
 0x106   :  { %5134 = vmatpush.bf16.msra.mxu2 %v9062_v54  ;;  %5103 = vmatmul.bf16.vlgmr.msrb.gmra.mxu3 %v11103_v48  ;;  %v10122_v54 = vld [vmem:[%s14959_s1 + $0x15bc] sm:$0xf]  ;;  %v9495_v43 = vld [vmem:[%s14959_s1 + $0x220] sm:$0xf0]  ;;  %v6785_v33 = vld [vmem:[%s14959_s1 + $0x350] sm:$0xf] }
 0x107   :  { %5147 = vmatpush.bf16.msra.mxu3 %v9222_v58  ;;  %v8982_v58 = vor.u32 %v10082_v52, %v8979_v53  ;;  %v9142_v3 = vor.u32 %v10122_v54, %v9139_v55  ;;  %v9465_v52 = vld [vmem:[%s14959_s1 + $0x130] sm:$0xf0]  ;;  %v6665_v53 = vld [vmem:[%s14959_s1 + $0x260] sm:$0xf]  ;;  %v8602_v55 = vor.u32 %v9987_v35, %v8599_v36  ;;  %v6945_v36 = vld [vmem:[%s14959_s1 + $0x490] sm:$0xf] }
 0x108   :  { %5109 = vmatpush.bf16.msra.mxu0 %v8722_v6  ;;  %v4883_v4 = vpop.f32.mrf.mxu2  ;;  %v8799_v6 = vld [vmem:[%s14959_s1 + $0x1324] sm:$0xf0]  ;;  %v4859_v14 = vpop.f32.mrf.mxu0  ;;  %v10198_v35 = vld [vmem:[#allocation1] sm:$0xff] }
 0x109   :  { %5122 = vmatpush.bf16.msra.mxu1 %v8882_v7  ;;  %v10077_v7 = vld [vmem:[%s14959_s1 + $0x1454] sm:$0xf]  ;;  %v4884_v9 = vadd.f32 %v4883_v4, %v4871_v50  ;;  %v4896_v10 = vpop.f32.mrf.mxu3  ;;  %v4872_v19 = vpop.f32.mrf.mxu1  ;;  %v8802_v24 = vor.u32 %v10037_v62, %v8799_v6  ;;  %v6985_v62 = vld [vmem:[%s14959_s1 + $0x4e0] sm:$0xf]  ;;  %v6506_v6 = vor.u32 %v9465_v52, %v6505_v51  ;;  %v9500_v14 = vld [vmem:[%s14959_s1 + $0x248] sm:$0xf0] }
 0x10a   :  { %5135 = vmatpush.bf16.msra.mxu2 %v9042_v8  ;;  %v8959_v8 = vld [vmem:[%s14959_s1 + $0x1464] sm:$0xf0]  ;;  %v9540_v19 = vld [vmem:[%s14959_s1 + $0x388] sm:$0xf0]  ;;  %v9530_v52 = vld [vmem:[%s14959_s1 + $0x338] sm:$0xf0] }
 0x10b   :  { %5148 = vmatpush.bf16.msra.mxu3 %v9202_v13  ;;  %v9119_v13 = vld [vmem:[%s14959_s1 + $0x15a4] sm:$0xf0]  ;;  %v12040_v23 = vadd.f32 %v4896_v10, %v4884_v9  ;;  %v6485_v9 = vld [vmem:[%s14959_s1 + $0xf8] sm:$0xf]  ;;  %v9460_v10 = vld [vmem:[%s14959_s1 + $0x108] sm:$0xf0] }
 0x10c   :  { %5110 = vmatpush.bf16.msra.mxu0 %v8702_v5  ;;  %v8962_v5 = vor.u32 %v10077_v7, %v8959_v8  ;;  %v9122_v29 = vor.u32 %v10117_v11, %v9119_v13  ;;  %v6645_v11 = vld [vmem:[%s14959_s1 + $0x238] sm:$0xf]  ;;  %v6765_v51 = vld [vmem:[%s14959_s1 + $0x328] sm:$0xf] }
 0x10d   :  { %5123 = vmatpush.bf16.msra.mxu1 %v8862_v25  ;;  %v9992_v25 = vld [vmem:[%s14959_s1 + $0x11ac] sm:$0xf] }
 0x10e   :  { %5136 = vmatpush.bf16.msra.mxu2 %v9022_v27  ;;  %v8619_v27 = vld [vmem:[%s14959_s1 + $0x11bc] sm:$0xf0] }
 0x10f   :  { %5149 = vmatpush.bf16.msra.mxu3 %v9182_v31  ;;  %v10072_v31 = vld [vmem:[%s14959_s1 + $0x142c] sm:$0xf]  ;;  %v8622_v34 = vor.u32 %v9992_v25, %v8619_v27  ;;  %v6486_v25 = vor.u32 %v9460_v10, %v6485_v9  ;;  %v6646_v27 = vor.u32 %v9500_v14, %v6645_v11  ;;  %v9525_v9 = vld [vmem:[%s14959_s1 + $0x310] sm:$0xf0]  ;;  %v6905_v10 = vld [vmem:[%s14959_s1 + $0x440] sm:$0xf] }
 0x110   :  { %5111 = vmatpush.bf16.msra.mxu0 %v8682_v38  ;;  %v8942_v38 = vor.u32 %v10072_v31, %v8939_v32  ;;  %v4885_v50 = vpop.f32.mrf.mxu2  ;;  %v6625_v31 = vld [vmem:[%s14959_s1 + $0x210] sm:$0xf]  ;;  %v9565_v11 = vld [vmem:[%s14959_s1 + $0x450] sm:$0xf0] }
 0x111   :  { %5124 = vmatpush.bf16.msra.mxu1 %v8842_v40  ;;  %v8759_v40 = vld [vmem:[%s14959_s1 + $0x12d4] sm:$0xf0]  ;;  %v4898_v54 = vpop.f32.mrf.mxu3  ;;  %v9490_v50 = vld [vmem:[%s14959_s1 + $0x1f8] sm:$0xf0] }
 0x112   :  { %5137 = vmatpush.bf16.msra.mxu2 %v9002_v41  ;;  %v10067_v41 = vld [vmem:[%s14959_s1 + $0x1404] sm:$0xf]  ;;  %v8762_v59 = vor.u32 %v10027_v39, %v8759_v40  ;;  %v6626_v40 = vor.u32 %v9495_v43, %v6625_v31  ;;  %v6925_v54 = vld [vmem:[%s14959_s1 + $0x468] sm:$0xf]  ;;  %v9560_v31 = vld [vmem:[%s14959_s1 + $0x428] sm:$0xf0] }
 0x113   :  { %5150 = vmatpush.bf16.msra.mxu3 %v9162_v63  ;;  %v9079_v63 = vld [vmem:[%s14959_s1 + $0x1554] sm:$0xf0]  ;;  %v8922_v61 = vor.u32 %v10067_v41, %v8919_v44  ;;  %v9450_v44 = vld [vmem:[%s14959_s1 + $0xb8] sm:$0xf0] }
 0x114   :  { %5112 = vmatpush.bf16.msra.mxu0 %v8662_v56  ;;  %v9505_v56 = vld [vmem:[%s14959_s1 + $0x270] sm:$0xf0]  ;;  %v9082_v4 = vor.u32 %v10107_v45, %v9079_v63  ;;  %v6605_v45 = vld [vmem:[%s14959_s1 + $0x1e8] sm:$0xf] }
 0x115   :  { %5125 = vmatpush.bf16.msra.mxu1 %v8822_v57  ;;  %v6825_v57 = vld [vmem:[%s14959_s1 + $0x3a0] sm:$0xf]  ;;  %v6666_v7 = vor.u32 %v9505_v56, %v6665_v53 }
 0x116   :  { %5138 = vmatpush.bf16.msra.mxu2 %v8982_v58  ;;  %v9545_v58 = vld [vmem:[%s14959_s1 + $0x3b0] sm:$0xf0] }
 0x117   :  { %5151 = vmatpush.bf16.msra.mxu3 %v9142_v3  ;;  %v9585_v3 = vld [vmem:[%s14959_s1 + $0x4f0] sm:$0xf0]  ;;  %v6826_v8 = vor.u32 %v9545_v58, %v6825_v57 }
 0x118   :  { %5113 = vmatpush.bf16.msra.mxu0 %v8642_v18  ;;  %v6986_v13 = vor.u32 %v9585_v3, %v6985_v62  ;;  %v6805_v18 = vld [vmem:[%s14959_s1 + $0x378] sm:$0xf]  ;;  %v6425_v62 = vld [vmem:[%s14959_s1 + $0x80] sm:$0xf]  ;;  %v9445_v3 = vld [vmem:[%s14959_s1 + $0x90] sm:$0xf0] }
 0x119   :  { %5126 = vmatpush.bf16.msra.mxu1 %v8802_v24  ;;  %v6965_v24 = vld [vmem:[%s14959_s1 + $0x4b8] sm:$0xf]  ;;  %v6806_v28 = vor.u32 %v9540_v19, %v6805_v18 }
 0x11a   :  { %5139 = vmatpush.bf16.msra.mxu2 %v8962_v5  ;;  %v9580_v5 = vld [vmem:[%s14959_s1 + $0x4c8] sm:$0xf0]  ;;  %v6405_v19 = vld [vmem:[%s14959_s1 + $0x58] sm:$0xf] }
 0x11b   :  { %5152 = vmatpush.bf16.msra.mxu3 %v9122_v29  ;;  %v6465_v29 = vld [vmem:[%s14959_s1 + $0xd0] sm:$0xf]  ;;  %v6966_v32 = vor.u32 %v9580_v5, %v6965_v24  ;;  %v9440_v24 = vld [vmem:[%s14959_s1 + $0x68] sm:$0xf0]  ;;  %v6565_v5 = vld [vmem:[%s14959_s1 + $0x198] sm:$0xf] }
 0x11c   :  { %5114 = vmatpush.bf16.msra.mxu0 %v8622_v34  ;;  %v9535_v34 = vld [vmem:[%s14959_s1 + $0x360] sm:$0xf0]  ;;  %v6466_v39 = vor.u32 %v9455_v30, %v6465_v29  ;;  %v9520_v29 = vld [vmem:[%s14959_s1 + $0x2e8] sm:$0xf0]  ;;  %v6885_v30 = vld [vmem:[%s14959_s1 + $0x418] sm:$0xf]  ;;  %v6406_v43 = vor.u32 %v9440_v24, %v6405_v19 }
 0x11d   :  { %5127 = vmatpush.bf16.msra.mxu1 %v8782_v37  ;;  %v9575_v37 = vld [vmem:[%s14959_s1 + $0x4a0] sm:$0xf0]  ;;  %v6786_v41 = vor.u32 %v9535_v34, %v6785_v33  ;;  %v9705_v19 = vld [vmem:[%s14959_s1 + $0x8b0] sm:$0xf0] }
 0x11e   :  { %5140 = vmatpush.bf16.msra.mxu2 %v8942_v38  ;;  %v10199_v38 = vld [vmem:[#allocation1 + $0x9] sm:$0xff]  ;;  %v6946_v63 = vor.u32 %v9575_v37, %v6945_v36  ;;  %v10200_v34 = vld [vmem:[%s14960_s2] sm:$0x1f] }
 0x11f   :  { %5153 = vmatpush.bf16.msra.mxu3 %v9102_v42  ;;  %v6445_v42 = vld [vmem:[%s14959_s1 + $0xa8] sm:$0xf] }
 0x120   :  { %5115 = vmatpush.bf16.msra.mxu0 %v8602_v55  ;;  %v4909_v53 = vpop.f32.mrf.mxu0  ;;  %v9570_v55 = vld [vmem:[%s14959_s1 + $0x478] sm:$0xf0]  ;;  %v6446_v57 = vor.u32 %v9450_v44, %v6445_v42  ;;  %v6886_v44 = vor.u32 %v9560_v31, %v6885_v30 }
 0x121   :  { %5128 = vmatpush.bf16.msra.mxu1 %v8762_v59  ;;  %v4910_v56 = vadd.f32 %v4909_v53, %v12040_v23  ;;  %v4922_v58 = vpop.f32.mrf.mxu1  ;;  %v6606_v59 = vor.u32 %v9490_v50, %v6605_v45  ;;  %v6926_v23 = vor.u32 %v9570_v55, %v6925_v54  ;;  %v9475_v45 = vld [vmem:[%s14959_s1 + $0x180] sm:$0xf0]  ;;  %v6365_v55 = vld [vmem:[%s14959_s1 + $0x8] sm:$0xf] }
 0x122   :  { %5141 = vmatpush.bf16.msra.mxu2 %v8922_v61  ;;  %v6766_v61 = vor.u32 %v9530_v52, %v6765_v51  ;;  %v9515_v50 = vld [vmem:[%s14959_s1 + $0x2c0] sm:$0xf0]  ;;  %v6865_v52 = vld [vmem:[%s14959_s1 + $0x3f0] sm:$0xf] }
 0x123   :  { %5154 = vmatpush.bf16.msra.mxu3 %v9082_v4  ;;  %5116 = vmatmul.bf16.vlgmr.msra.gmra.mxu0 %v11101_v47  ;;  %v6585_v4 = vld [vmem:[%s14959_s1 + $0x1c0] sm:$0xf]  ;;  %v9555_v53 = vld [vmem:[%s14959_s1 + $0x400] sm:$0xf0] }
 0x124   :  { %5160 = vmatpush.bf16.msrb.mxu0 %v6506_v6  ;;  %5129 = vmatmul.bf16.vlgmr.msra.gmra.mxu1 %v11105_v49  ;;  %v12198_v6 = vadd.f32 %v4922_v58, %v4910_v56  ;;  %v9430_v56 = vld [vmem:[%s14959_s1 + $0x18] sm:$0xf0] }
 0x125   :  { %5173 = vmatpush.bf16.msrb.mxu1 %v6666_v7  ;;  %5142 = vmatmul.bf16.vlgmr.msra.gmra.mxu2 %v10198_v35  ;;  %v9485_v7 = vld [vmem:[%s14959_s1 + $0x1d0] sm:$0xf0]  ;;  %v897_v35 = vperm.slane %v10200_v34, 1  ;;  %v9620_v34 = vld [vmem:[%s14959_s1 + $0x608] sm:$0xf0] }
 0x126   :  { %5186 = vmatpush.bf16.msrb.mxu2 %v6826_v8  ;;  %5155 = vmatmul.bf16.vlgmr.msra.gmra.mxu3 %v10199_v38  ;;  %v6745_v8 = vld [vmem:[%s14959_s1 + $0x300] sm:$0xf]  ;;  %v6586_v14 = vor.u32 %v9485_v7, %v6585_v4  ;;  %v6866_v4 = vor.u32 %v9555_v53, %v6865_v52  ;;  %v6845_v7 = vld [vmem:[%s14959_s1 + $0x3c8] sm:$0xf]  ;;  %v9655_v53 = vld [vmem:[%s14959_s1 + $0x720] sm:$0xf0] }
 0x127   :  { %5199 = vmatpush.bf16.msrb.mxu3 %v6986_v13  ;;  %v6426_v13 = vor.u32 %v9445_v3, %v6425_v62  ;;  %v6746_v18 = vor.u32 %v9525_v9, %v6745_v8  ;;  %v9470_v62 = vld [vmem:[%s14959_s1 + $0x158] sm:$0xf0]  ;;  %v6685_v3 = vld [vmem:[%s14959_s1 + $0x288] sm:$0xf]  ;;  %v7145_v9 = vld [vmem:[%s14959_s1 + $0x620] sm:$0xf] }
 0x128   :  { %5161 = vmatpush.bf16.msrb.mxu0 %v6486_v25  ;;  %v6906_v25 = vor.u32 %v9565_v11, %v6905_v10  ;;  %v4935_v36 = vpop.f32.mrf.mxu2  ;;  %v9550_v8 = vld [vmem:[%s14959_s1 + $0x3d8] sm:$0xf0]  ;;  %v9625_v10 = vld [vmem:[%s14959_s1 + $0x630] sm:$0xf0]  ;;  %v7305_v11 = vld [vmem:[%s14959_s1 + $0x760] sm:$0xf] }
 0x129   :  { %5174 = vmatpush.bf16.msrb.mxu1 %v6646_v27  ;;  %v9480_v27 = vld [vmem:[%s14959_s1 + $0x1a8] sm:$0xf0]  ;;  %v4924_v33 = vpop.f32.mrf.mxu1  ;;  %v4948_v42 = vpop.f32.mrf.mxu3  ;;  %v4936_v51 = vadd.f32 %v4935_v36, %v897_v35  ;;  %v6846_v30 = vor.u32 %v9550_v8, %v6845_v7  ;;  %v7146_v31 = vor.u32 %v9625_v10, %v7145_v9  ;;  %v7285_v35 = vld [vmem:[%s14959_s1 + $0x738] sm:$0xf]  ;;  %v9650_v8 = vld [vmem:[%s14959_s1 + $0x6f8] sm:$0xf0] }
 0x12a   :  { %5187 = vmatpush.bf16.msrb.mxu2 %v6806_v28  ;;  %v6725_v28 = vld [vmem:[%s14959_s1 + $0x2d8] sm:$0xf]  ;;  %v6566_v37 = vor.u32 %v9480_v27, %v6565_v5  ;;  %v7625_v27 = vld [vmem:[%s14959_s1 + $0x9e0] sm:$0xf]  ;;  %v7405_v9 = vld [vmem:[%s14959_s1 + $0x828] sm:$0xf] }
 0x12b   :  { %5200 = vmatpush.bf16.msrb.mxu3 %v6966_v32  ;;  %v4911_v32 = vpop.f32.mrf.mxu0  ;;  %v6726_v38 = vor.u32 %v9520_v29, %v6725_v28  ;;  %v9745_v28 = vld [vmem:[%s14959_s1 + $0x9f0] sm:$0xf0]  ;;  %v7125_v33 = vld [vmem:[%s14959_s1 + $0x5f8] sm:$0xf]  ;;  %v9690_v10 = vld [vmem:[%s14959_s1 + $0x838] sm:$0xf0] }
 0x12c   :  { %5162 = vmatpush.bf16.msrb.mxu0 %v6466_v39  ;;  %v6385_v39 = vld [vmem:[%s14959_s1 + $0x30] sm:$0xf]  ;;  %v7626_v36 = vor.u32 %v9745_v28, %v7625_v27  ;;  %v7225_v27 = vld [vmem:[%s14959_s1 + $0x6c0] sm:$0xf] }
 0x12d   :  { %5175 = vmatpush.bf16.msrb.mxu1 %v6626_v40  ;;  %v9435_v40 = vld [vmem:[%s14959_s1 + $0x40] sm:$0xf0] }
 0x12e   :  { %5188 = vmatpush.bf16.msrb.mxu2 %v6786_v41  ;;  %v6545_v41 = vld [vmem:[%s14959_s1 + $0x170] sm:$0xf]  ;;  %v6386_v54 = vor.u32 %v9435_v40, %v6385_v39  ;;  %v9700_v39 = vld [vmem:[%s14959_s1 + $0x888] sm:$0xf0]  ;;  %v7605_v40 = vld [vmem:[%s14959_s1 + $0x9b8] sm:$0xf] }
 0x12f   :  { %5201 = vmatpush.bf16.msrb.mxu3 %v6946_v63  ;;  %v6705_v63 = vld [vmem:[%s14959_s1 + $0x2b0] sm:$0xf]  ;;  %v6546_v58 = vor.u32 %v9475_v45, %v6545_v41  ;;  %v9740_v41 = vld [vmem:[%s14959_s1 + $0x9c8] sm:$0xf0] }
 0x130   :  { %5163 = vmatpush.bf16.msrb.mxu0 %v6446_v57  ;;  %v12272_v57 = vadd.f32 %v4948_v42, %v4936_v51  ;;  %v4937_v24 = vpop.f32.mrf.mxu2  ;;  %v7126_v42 = vor.u32 %v9620_v34, %v7125_v33  ;;  %v7265_v51 = vld [vmem:[%s14959_s1 + $0x710] sm:$0xf]  ;;  %v7606_v52 = vor.u32 %v9740_v41, %v7605_v40  ;;  %v7545_v33 = vld [vmem:[%s14959_s1 + $0x940] sm:$0xf]  ;;  %v7205_v40 = vld [vmem:[%s14959_s1 + $0x698] sm:$0xf] }
 0x131   :  { %5176 = vmatpush.bf16.msrb.mxu1 %v6606_v59  ;;  %v6706_v59 = vor.u32 %v9515_v50, %v6705_v63  ;;  %v4950_v29 = vpop.f32.mrf.mxu3  ;;  %v7105_v63 = vld [vmem:[%s14959_s1 + $0x5d0] sm:$0xf]  ;;  %v9615_v50 = vld [vmem:[%s14959_s1 + $0x5e0] sm:$0xf0]  ;;  %v7406_v24 = vor.u32 %v9690_v10, %v7405_v9 }
 0x132   :  { %5189 = vmatpush.bf16.msrb.mxu2 %v6766_v61  ;;  %v6525_v61 = vld [vmem:[%s14959_s1 + $0x148] sm:$0xf]  ;;  %v9675_v9 = vld [vmem:[%s14959_s1 + $0x7c0] sm:$0xf0]  ;;  %v7505_v10 = vld [vmem:[%s14959_s1 + $0x8f0] sm:$0xf] }
 0x133   :  { %5202 = vmatpush.bf16.msrb.mxu3 %v6926_v23  ;;  %v9510_v23 = vld [vmem:[%s14959_s1 + $0x298] sm:$0xf0]  ;;  %v6526_v5 = vor.u32 %v9470_v62, %v6525_v61  ;;  %v7266_v61 = vor.u32 %v9655_v53, %v7265_v51  ;;  %v9720_v53 = vld [vmem:[%s14959_s1 + $0x928] sm:$0xf0] }
 0x134   :  { %5164 = vmatpush.bf16.msrb.mxu0 %v6426_v13  ;;  %v6366_v13 = vor.u32 %v9430_v56, %v6365_v55  ;;  %v9695_v55 = vld [vmem:[%s14959_s1 + $0x860] sm:$0xf0]  ;;  %v7585_v56 = vld [vmem:[%s14959_s1 + $0x990] sm:$0xf] }
 0x135   :  { %5177 = vmatpush.bf16.msrb.mxu1 %v6586_v14  ;;  %v9665_v14 = vld [vmem:[%s14959_s1 + $0x770] sm:$0xf0] }
 0x136   :  { %5190 = vmatpush.bf16.msrb.mxu2 %v6746_v18  ;;  %v7465_v18 = vld [vmem:[%s14959_s1 + $0x8a0] sm:$0xf]  ;;  %v7306_v32 = vor.u32 %v9665_v14, %v7305_v11  ;;  %v7565_v11 = vld [vmem:[%s14959_s1 + $0x968] sm:$0xf] }
 0x137   :  { %5203 = vmatpush.bf16.msrb.mxu3 %v6906_v25  ;;  %v6686_v25 = vor.u32 %v9510_v23, %v6685_v3  ;;  %v7085_v3 = vld [vmem:[%s14959_s1 + $0x5a8] sm:$0xf] }
 0x138   :  { %5165 = vmatpush.bf16.msrb.mxu0 %v6406_v43  ;;  %v7466_v43 = vor.u32 %v9705_v19, %v7465_v18  ;;  %v7245_v23 = vld [vmem:[%s14959_s1 + $0x6e8] sm:$0xf] }
 0x139   :  { %5178 = vmatpush.bf16.msrb.mxu1 %v6566_v37  ;;  %v9660_v37 = vld [vmem:[%s14959_s1 + $0x748] sm:$0xf0]  ;;  %v7246_v19 = vor.u32 %v9650_v8, %v7245_v23  ;;  %v7345_v8 = vld [vmem:[%s14959_s1 + $0x7b0] sm:$0xf] }
 0x13a   :  { %5191 = vmatpush.bf16.msrb.mxu2 %v6726_v38  ;;  %v7445_v38 = vld [vmem:[%s14959_s1 + $0x878] sm:$0xf] }
 0x13b   :  { %5204 = vmatpush.bf16.msrb.mxu3 %v6886_v44  ;;  %v7286_v44 = vor.u32 %v9660_v37, %v7285_v35  ;;  %v7446_v45 = vor.u32 %v9700_v39, %v7445_v38  ;;  %v7045_v38 = vld [vmem:[%s14959_s1 + $0x558] sm:$0xf]  ;;  %v9600_v39 = vld [vmem:[%s14959_s1 + $0x568] sm:$0xf0] }
 0x13c   :  { %5166 = vmatpush.bf16.msrb.mxu0 %v6386_v54  ;;  %v7425_v54 = vld [vmem:[%s14959_s1 + $0x850] sm:$0xf] }
 0x13d   :  { %5179 = vmatpush.bf16.msrb.mxu1 %v6546_v58  ;;  %v9735_v58 = vld [vmem:[%s14959_s1 + $0x9a0] sm:$0xf0]  ;;  %v7426_v62 = vor.u32 %v9695_v55, %v7425_v54  ;;  %v7046_v54 = vor.u32 %v9600_v39, %v7045_v38  ;;  %v9865_v38 = vld [vmem:[%s14959_s1 + $0xdb0] sm:$0xf0] }
 0x13e   :  { %5192 = vmatpush.bf16.msrb.mxu2 %v6706_v59  ;;  %v7106_v59 = vor.u32 %v9615_v50, %v7105_v63  ;;  %v7586_v7 = vor.u32 %v9735_v58, %v7585_v56  ;;  %v9680_v63 = vld [vmem:[%s14959_s1 + $0x7e8] sm:$0xf0] }
 0x13f   :  { %5205 = vmatpush.bf16.msrb.mxu3 %v6866_v4  ;;  %v9610_v4 = vld [vmem:[%s14959_s1 + $0x5b8] sm:$0xf0] }
 0x140   :  { %5167 = vmatpush.bf16.msrb.mxu0 %v6366_v13  ;;  %v9730_v13 = vld [vmem:[%s14959_s1 + $0x978] sm:$0xf0]  ;;  %v7086_v14 = vor.u32 %v9610_v4, %v7085_v3  ;;  %v4961_v18 = vpop.f32.mrf.mxu0  ;;  %v7185_v3 = vld [vmem:[%s14959_s1 + $0x670] sm:$0xf] }
 0x141   :  { %5180 = vmatpush.bf16.msrb.mxu1 %v6526_v5  ;;  %v7065_v5 = vld [vmem:[%s14959_s1 + $0x580] sm:$0xf]  ;;  %v4962_v28 = vadd.f32 %v4961_v18, %v12272_v57  ;;  %v4974_v29 = vpop.f32.mrf.mxu1  ;;  %v9725_v57 = vld [vmem:[%s14959_s1 + $0x950] sm:$0xf0]  ;;  %v9590_v18 = vld [vmem:[%s14959_s1 + $0x518] sm:$0xf0] }
 0x142   :  { %5193 = vmatpush.bf16.msrb.mxu2 %v6686_v25  ;;  %v9605_v25 = vld [vmem:[%s14959_s1 + $0x590] sm:$0xf0] }
 0x143   :  { %5206 = vmatpush.bf16.msrb.mxu3 %v6846_v30  ;;  %5168 = vmatmul.bf16.vlgmr.msrb.gmra.mxu0 %v10582_v21  ;;  %v7566_v30 = vor.u32 %v9730_v13, %v7565_v11  ;;  %v4975_v34 = vadd.f32 %v4974_v29, %v4962_v28  ;;  %v7066_v35 = vor.u32 %v9605_v25, %v7065_v5  ;;  %v9715_v11 = vld [vmem:[%s14959_s1 + $0x900] sm:$0xf0]  ;;  %v7165_v5 = vld [vmem:[%s14959_s1 + $0x648] sm:$0xf]  ;;  %v9630_v25 = vld [vmem:[%s14959_s1 + $0x658] sm:$0xf0] }
 0x144   :  { %5212 = vmatpush.bf16.msra.mxu0 %v7146_v31  ;;  %5181 = vmatmul.bf16.vlgmr.msrb.gmra.mxu1 %v10593_v26  ;;  %v9645_v31 = vld [vmem:[%s14959_s1 + $0x6d0] sm:$0xf0]  ;;  %v7506_v29 = vor.u32 %v9715_v11, %v7505_v10  ;;  %v7166_v39 = vor.u32 %v9630_v25, %v7165_v5  ;;  %v9815_v11 = vld [vmem:[%s14959_s1 + $0xc20] sm:$0xf0] }
 0x145   :  { %5225 = vmatpush.bf16.msra.mxu1 %v7306_v32  ;;  %5194 = vmatmul.bf16.vlgmr.msrb.gmra.mxu2 %v10580_v20  ;;  %v7385_v32 = vld [vmem:[%s14959_s1 + $0x800] sm:$0xf] }
 0x146   :  { %5238 = vmatpush.bf16.msra.mxu2 %v7466_v43  ;;  %5207 = vmatmul.bf16.vlgmr.msrb.gmra.mxu3 %v10584_v22  ;;  %v9685_v43 = vld [vmem:[%s14959_s1 + $0x810] sm:$0xf0] }
 0x147   :  { %5251 = vmatpush.bf16.msra.mxu3 %v7626_v36  ;;  %v7226_v36 = vor.u32 %v9645_v31, %v7225_v27  ;;  %v7386_v37 = vor.u32 %v9685_v43, %v7385_v32  ;;  %v7325_v27 = vld [vmem:[%s14959_s1 + $0x788] sm:$0xf]  ;;  %v9710_v32 = vld [vmem:[%s14959_s1 + $0x8d8] sm:$0xf0] }
 0x148   :  { %5213 = vmatpush.bf16.msra.mxu0 %v7126_v42  ;;  %v4987_v41 = vpop.f32.mrf.mxu2  ;;  %v7546_v42 = vor.u32 %v9725_v57, %v7545_v33  ;;  %v4963_v56 = vpop.f32.mrf.mxu0  ;;  %v7485_v31 = vld [vmem:[%s14959_s1 + $0x8c8] sm:$0xf]  ;;  %v7785_v33 = vld [vmem:[%s14959_s1 + $0xb20] sm:$0xf]  ;;  %v9785_v57 = vld [vmem:[%s14959_s1 + $0xb30] sm:$0xf0] }
 0x149   :  { %5226 = vmatpush.bf16.msra.mxu1 %v7286_v44  ;;  %v9640_v44 = vld [vmem:[%s14959_s1 + $0x6a8] sm:$0xf0]  ;;  %v4988_v50 = vadd.f32 %v4987_v41, %v4975_v34  ;;  %v5000_v51 = vpop.f32.mrf.mxu3  ;;  %v4976_v4 = vpop.f32.mrf.mxu1  ;;  %v7945_v34 = vld [vmem:[%s14959_s1 + $0xc60] sm:$0xf] }
 0x14a   :  { %5239 = vmatpush.bf16.msra.mxu2 %v7446_v45  ;;  %v7365_v45 = vld [vmem:[%s14959_s1 + $0x7d8] sm:$0xf]  ;;  %v7206_v58 = vor.u32 %v9640_v44, %v7205_v40  ;;  %v8265_v41 = vld [vmem:[%s14959_s1 + $0xee0] sm:$0xf]  ;;  %v7486_v44 = vor.u32 %v9710_v32, %v7485_v31  ;;  %v9820_v56 = vld [vmem:[%s14959_s1 + $0xc48] sm:$0xf0] }
 0x14b   :  { %5252 = vmatpush.bf16.msra.mxu3 %v7606_v52  ;;  %v7525_v52 = vld [vmem:[%s14959_s1 + $0x918] sm:$0xf]  ;;  %v12441_v55 = vadd.f32 %v5000_v51, %v4988_v50  ;;  %v9810_v31 = vld [vmem:[%s14959_s1 + $0xbf8] sm:$0xf0]  ;;  %v8045_v32 = vld [vmem:[%s14959_s1 + $0xd28] sm:$0xf] }
 0x14c   :  { %5214 = vmatpush.bf16.msra.mxu0 %v7106_v59  ;;  %v7366_v59 = vor.u32 %v9680_v63, %v7365_v45  ;;  %v7526_v23 = vor.u32 %v9720_v53, %v7525_v52  ;;  %v7786_v45 = vor.u32 %v9785_v57, %v7785_v33  ;;  %v7765_v51 = vld [vmem:[%s14959_s1 + $0xaf8] sm:$0xf]  ;;  %v9780_v52 = vld [vmem:[%s14959_s1 + $0xb08] sm:$0xf0]  ;;  %v8205_v33 = vld [vmem:[%s14959_s1 + $0xe68] sm:$0xf] }
 0x14d   :  { %5227 = vmatpush.bf16.msra.mxu1 %v7266_v61  ;;  %v7025_v61 = vld [vmem:[%s14959_s1 + $0x530] sm:$0xf]  ;;  %v7925_v53 = vld [vmem:[%s14959_s1 + $0xc38] sm:$0xf]  ;;  %v9890_v57 = vld [vmem:[%s14959_s1 + $0xe78] sm:$0xf0] }
 0x14e   :  { %5240 = vmatpush.bf16.msra.mxu2 %v7426_v62  ;;  %v9595_v62 = vld [vmem:[%s14959_s1 + $0x540] sm:$0xf0]  ;;  %v7926_v4 = vor.u32 %v9820_v56, %v7925_v53 }
 0x14f   :  { %5253 = vmatpush.bf16.msra.mxu3 %v7586_v7  ;;  %v9635_v7 = vld [vmem:[%s14959_s1 + $0x680] sm:$0xf0]  ;;  %v7026_v13 = vor.u32 %v9595_v62, %v7025_v61  ;;  %v8245_v61 = vld [vmem:[%s14959_s1 + $0xeb8] sm:$0xf]  ;;  %v9900_v62 = vld [vmem:[%s14959_s1 + $0xec8] sm:$0xf0] }
 0x150   :  { %5215 = vmatpush.bf16.msra.mxu0 %v7086_v14  ;;  %v7005_v14 = vld [vmem:[%s14959_s1 + $0x508] sm:$0xf]  ;;  %v4989_v28 = vpop.f32.mrf.mxu2  ;;  %v8246_v10 = vor.u32 %v9900_v62, %v8245_v61  ;;  %v7845_v61 = vld [vmem:[%s14959_s1 + $0xb98] sm:$0xf] }
 0x151   :  { %5228 = vmatpush.bf16.msra.mxu1 %v7246_v19  ;;  %v7186_v19 = vor.u32 %v9635_v7, %v7185_v3  ;;  %v5002_v43 = vpop.f32.mrf.mxu3  ;;  %v7766_v3 = vor.u32 %v9780_v52, %v7765_v51  ;;  %v7745_v7 = vld [vmem:[%s14959_s1 + $0xad0] sm:$0xf]  ;;  %v9770_v28 = vld [vmem:[%s14959_s1 + $0xab8] sm:$0xf0]  ;;  %v8185_v51 = vld [vmem:[%s14959_s1 + $0xe40] sm:$0xf] }
 0x152   :  { %5241 = vmatpush.bf16.msra.mxu2 %v7406_v24  ;;  %v7346_v24 = vor.u32 %v9675_v9, %v7345_v8  ;;  %v9775_v8 = vld [vmem:[%s14959_s1 + $0xae0] sm:$0xf0]  ;;  %v7905_v9 = vld [vmem:[%s14959_s1 + $0xc10] sm:$0xf]  ;;  %v9850_v43 = vld [vmem:[%s14959_s1 + $0xd38] sm:$0xf0] }
 0x153   :  { %5254 = vmatpush.bf16.msra.mxu3 %v7566_v30  ;;  %v9670_v30 = vld [vmem:[%s14959_s1 + $0x798] sm:$0xf0]  ;;  %v7906_v5 = vor.u32 %v9815_v11, %v7905_v9  ;;  %v9880_v11 = vld [vmem:[%s14959_s1 + $0xe28] sm:$0xf0] }
 0x154   :  { %5216 = vmatpush.bf16.msra.mxu0 %v7066_v35  ;;  %v7006_v35 = vor.u32 %v9590_v18, %v7005_v14  ;;  %v7326_v40 = vor.u32 %v9670_v30, %v7325_v27  ;;  %v9855_v14 = vld [vmem:[%s14959_s1 + $0xd60] sm:$0xf0]  ;;  %v8225_v18 = vld [vmem:[%s14959_s1 + $0xe90] sm:$0xf]  ;;  %v7725_v27 = vld [vmem:[%s14959_s1 + $0xaa8] sm:$0xf] }
 0x155   :  { %5229 = vmatpush.bf16.msra.mxu1 %v7226_v36  ;;  %v9825_v36 = vld [vmem:[%s14959_s1 + $0xc70] sm:$0xf0] }
 0x156   :  { %5242 = vmatpush.bf16.msra.mxu2 %v7386_v37  ;;  %v8105_v37 = vld [vmem:[%s14959_s1 + $0xda0] sm:$0xf]  ;;  %v7946_v63 = vor.u32 %v9825_v36, %v7945_v34  ;;  %v7726_v34 = vor.u32 %v9770_v28, %v7725_v27  ;;  %v7825_v27 = vld [vmem:[%s14959_s1 + $0xb70] sm:$0xf] }
 0x157   :  { %5255 = vmatpush.bf16.msra.mxu3 %v7546_v42  ;;  %v9905_v42 = vld [vmem:[%s14959_s1 + $0xef0] sm:$0xf0]  ;;  %v8106_v50 = vor.u32 %v9865_v38, %v8105_v37  ;;  %v8046_v37 = vor.u32 %v9850_v43, %v8045_v32  ;;  %v7705_v38 = vld [vmem:[%s14959_s1 + $0xa80] sm:$0xf]  ;;  %v9835_v32 = vld [vmem:[%s14959_s1 + $0xcc0] sm:$0xf0] }
 0x158   :  { %5217 = vmatpush.bf16.msra.mxu0 %v7046_v54  ;;  %v8266_v54 = vor.u32 %v9905_v42, %v8265_v41  ;;  %v8145_v43 = vld [vmem:[%s14959_s1 + $0xdf0] sm:$0xf] }
 0x159   :  { %5230 = vmatpush.bf16.msra.mxu1 %v7206_v58  ;;  %v8085_v58 = vld [vmem:[%s14959_s1 + $0xd78] sm:$0xf] }
 0x15a   :  { %5243 = vmatpush.bf16.msra.mxu2 %v7366_v59  ;;  %v9860_v59 = vld [vmem:[%s14959_s1 + $0xd88] sm:$0xf0] }
 0x15b   :  { %5256 = vmatpush.bf16.msra.mxu3 %v7526_v23  ;;  %v8086_v23 = vor.u32 %v9860_v59, %v8085_v58  ;;  %v7685_v58 = vld [vmem:[%s14959_s1 + $0xa58] sm:$0xf]  ;;  %v9760_v59 = vld [vmem:[%s14959_s1 + $0xa68] sm:$0xf0] }
 0x15c   :  { %5218 = vmatpush.bf16.msra.mxu0 %v7026_v13  ;;  %v8065_v13 = vld [vmem:[%s14959_s1 + $0xd50] sm:$0xf] }
 0x15d   :  { %5231 = vmatpush.bf16.msra.mxu1 %v7186_v19  ;;  %v9895_v19 = vld [vmem:[%s14959_s1 + $0xea0] sm:$0xf0]  ;;  %v8066_v25 = vor.u32 %v9855_v14, %v8065_v13  ;;  %v7686_v13 = vor.u32 %v9760_v59, %v7685_v58  ;;  %v10025_v58 = vld [vmem:[%s14959_s1 + $0x12b0] sm:$0xf0] }
 0x15e   :  { %5244 = vmatpush.bf16.msra.mxu2 %v7346_v24  ;;  %v7746_v24 = vor.u32 %v9775_v8, %v7745_v7  ;;  %v8226_v30 = vor.u32 %v9895_v19, %v8225_v18  ;;  %v9840_v7 = vld [vmem:[%s14959_s1 + $0xce8] sm:$0xf0] }
 0x15f   :  { %5257 = vmatpush.bf16.msra.mxu3 %v7506_v29  ;;  %v7885_v29 = vld [vmem:[%s14959_s1 + $0xbe8] sm:$0xf] }
 0x160   :  { %5219 = vmatpush.bf16.msra.mxu0 %v7006_v35  ;;  %v5013_v35 = vpop.f32.mrf.mxu0  ;;  %v7886_v36 = vor.u32 %v9810_v31, %v7885_v29  ;;  %v7985_v31 = vld [vmem:[%s14959_s1 + $0xcb0] sm:$0xf] }
 0x161   :  { %5232 = vmatpush.bf16.msra.mxu1 %v7166_v39  ;;  %v9765_v39 = vld [vmem:[%s14959_s1 + $0xa90] sm:$0xf0]  ;;  %v5014_v41 = vadd.f32 %v5013_v35, %v12441_v55  ;;  %v5026_v42 = vpop.f32.mrf.mxu1  ;;  %v9750_v35 = vld [vmem:[%s14959_s1 + $0xa18] sm:$0xf0] }
 0x162   :  { %5245 = vmatpush.bf16.msra.mxu2 %v7326_v40  ;;  %v7865_v40 = vld [vmem:[%s14959_s1 + $0xbc0] sm:$0xf]  ;;  %v9885_v55 = vld [vmem:[%s14959_s1 + $0xe50] sm:$0xf0]  ;;  %v7706_v53 = vor.u32 %v9765_v39, %v7705_v38  ;;  %v7805_v38 = vld [vmem:[%s14959_s1 + $0xb48] sm:$0xf] }
 0x163   :  { %5258 = vmatpush.bf16.msra.mxu3 %v7486_v44  ;;  %5220 = vmatmul.bf16.vlgmr.msra.gmra.mxu0 %v10675_v0  ;;  %v8206_v44 = vor.u32 %v9890_v57, %v8205_v33  ;;  %v5027_v52 = vadd.f32 %v5026_v42, %v5014_v41  ;;  %v9875_v33 = vld [vmem:[%s14959_s1 + $0xe00] sm:$0xf0]  ;;  %v9790_v39 = vld [vmem:[%s14959_s1 + $0xb58] sm:$0xf0] }
 0x164   :  { %5264 = vmatpush.bf16.msrb.mxu0 %v7786_v45  ;;  %5233 = vmatmul.bf16.vlgmr.msra.gmra.mxu1 %v10679_v2  ;;  %v9805_v45 = vld [vmem:[%s14959_s1 + $0xbd0] sm:$0xf0]  ;;  %v8146_v42 = vor.u32 %v9875_v33, %v8145_v43  ;;  %v7806_v59 = vor.u32 %v9790_v39, %v7805_v38  ;;  %v9975_v33 = vld [vmem:[%s14959_s1 + $0x1120] sm:$0xf0] }
 0x165   :  { %5277 = vmatpush.bf16.msrb.mxu1 %v7946_v63  ;;  %5246 = vmatmul.bf16.vlgmr.msra.gmra.mxu2 %v10670_v60  ;;  %v8025_v63 = vld [vmem:[%s14959_s1 + $0xd00] sm:$0xf] }
 0x166   :  { %5290 = vmatpush.bf16.msrb.mxu2 %v8106_v50  ;;  %5259 = vmatmul.bf16.vlgmr.msra.gmra.mxu3 %v10677_v1  ;;  %v9845_v50 = vld [vmem:[%s14959_s1 + $0xd10] sm:$0xf0] }
 0x167   :  { %5303 = vmatpush.bf16.msrb.mxu3 %v8266_v54  ;;  %v7866_v54 = vor.u32 %v9805_v45, %v7865_v40  ;;  %v8026_v56 = vor.u32 %v9845_v50, %v8025_v63  ;;  %v7965_v40 = vld [vmem:[%s14959_s1 + $0xc88] sm:$0xf]  ;;  %v9870_v63 = vld [vmem:[%s14959_s1 + $0xdd8] sm:$0xf0] }
 0x168   :  { %5265 = vmatpush.bf16.msrb.mxu0 %v7766_v3  ;;  %v5039_v62 = vpop.f32.mrf.mxu2  ;;  %v8186_v3 = vor.u32 %v9885_v55, %v8185_v51  ;;  %v5015_v18 = vpop.f32.mrf.mxu0  ;;  %v8125_v45 = vld [vmem:[%s14959_s1 + $0xdc8] sm:$0xf]  ;;  %v8425_v51 = vld [vmem:[%s14959_s1 + $0x1020] sm:$0xf]  ;;  %v9945_v55 = vld [vmem:[%s14959_s1 + $0x1030] sm:$0xf0] }
 0x169   :  { %5278 = vmatpush.bf16.msrb.mxu1 %v7926_v4  ;;  %v9800_v4 = vld [vmem:[%s14959_s1 + $0xba8] sm:$0xf0]  ;;  %v5040_v8 = vadd.f32 %v5039_v62, %v5027_v52  ;;  %v5052_v9 = vpop.f32.mrf.mxu3  ;;  %v5028_v28 = vpop.f32.mrf.mxu1  ;;  %v8585_v52 = vld [vmem:[%s14959_s1 + $0x1160] sm:$0xf] }
 0x16a   :  { %5291 = vmatpush.bf16.msrb.mxu2 %v8086_v23  ;;  %v8005_v23 = vld [vmem:[%s14959_s1 + $0xcd8] sm:$0xf]  ;;  %v7846_v19 = vor.u32 %v9800_v4, %v7845_v61  ;;  %v8905_v62 = vld [vmem:[%s14959_s1 + $0x13e0] sm:$0xf]  ;;  %v8126_v4 = vor.u32 %v9870_v63, %v8125_v45  ;;  %v9980_v18 = vld [vmem:[%s14959_s1 + $0x1148] sm:$0xf0] }
 0x16b   :  { %5304 = vmatpush.bf16.msrb.mxu3 %v8246_v10  ;;  %v8165_v10 = vld [vmem:[%s14959_s1 + $0xe18] sm:$0xf]  ;;  %v12640_v14 = vadd.f32 %v5052_v9, %v5040_v8  ;;  %v9970_v45 = vld [vmem:[%s14959_s1 + $0x10f8] sm:$0xf0]  ;;  %v8685_v63 = vld [vmem:[%s14959_s1 + $0x1228] sm:$0xf] }
 0x16c   :  { %5266 = vmatpush.bf16.msrb.mxu0 %v7746_v24  ;;  %v8006_v24 = vor.u32 %v9840_v7, %v8005_v23  ;;  %v8166_v29 = vor.u32 %v9880_v11, %v8165_v10  ;;  %v8426_v23 = vor.u32 %v9945_v55, %v8425_v51  ;;  %v8405_v9 = vld [vmem:[%s14959_s1 + $0xff8] sm:$0xf]  ;;  %v9940_v10 = vld [vmem:[%s14959_s1 + $0x1008] sm:$0xf0]  ;;  %v8845_v55 = vld [vmem:[%s14959_s1 + $0x1368] sm:$0xf] }
 0x16d   :  { %5279 = vmatpush.bf16.msrb.mxu1 %v7906_v5  ;;  %v7665_v5 = vld [vmem:[%s14959_s1 + $0xa30] sm:$0xf]  ;;  %v8565_v11 = vld [vmem:[%s14959_s1 + $0x1138] sm:$0xf] }
 0x16e   :  { %5292 = vmatpush.bf16.msrb.mxu2 %v8066_v25  ;;  %v9755_v25 = vld [vmem:[%s14959_s1 + $0xa40] sm:$0xf0]  ;;  %v8566_v28 = vor.u32 %v9980_v18, %v8565_v11 }
 0x16f   :  { %5305 = vmatpush.bf16.msrb.mxu3 %v8226_v30  ;;  %v9795_v30 = vld [vmem:[%s14959_s1 + $0xb80] sm:$0xf0]  ;;  %v7666_v57 = vor.u32 %v9755_v25, %v7665_v5  ;;  %v8885_v5 = vld [vmem:[%s14959_s1 + $0x13b8] sm:$0xf]  ;;  %v10060_v25 = vld [vmem:[%s14959_s1 + $0x13c8] sm:$0xf0] }
 0x170   :  { %5267 = vmatpush.bf16.msrb.mxu0 %v7726_v34  ;;  %v7645_v34 = vld [vmem:[%s14959_s1 + $0xa08] sm:$0xf]  ;;  %v5041_v41 = vpop.f32.mrf.mxu2  ;;  %v8886_v43 = vor.u32 %v10060_v25, %v8885_v5  ;;  %v8485_v5 = vld [vmem:[%s14959_s1 + $0x1098] sm:$0xf] }
 0x171   :  { %5280 = vmatpush.bf16.msrb.mxu1 %v7886_v36  ;;  %v7826_v36 = vor.u32 %v9795_v30, %v7825_v27  ;;  %v5054_v50 = vpop.f32.mrf.mxu3  ;;  %v8406_v27 = vor.u32 %v9940_v10, %v8405_v9  ;;  %v8385_v30 = vld [vmem:[%s14959_s1 + $0xfd0] sm:$0xf]  ;;  %v9930_v41 = vld [vmem:[%s14959_s1 + $0xfb8] sm:$0xf0]  ;;  %v8825_v9 = vld [vmem:[%s14959_s1 + $0x1340] sm:$0xf] }
 0x172   :  { %5293 = vmatpush.bf16.msrb.mxu2 %v8046_v37  ;;  %v7986_v37 = vor.u32 %v9835_v32, %v7985_v31  ;;  %v9935_v31 = vld [vmem:[%s14959_s1 + $0xfe0] sm:$0xf0]  ;;  %v8545_v32 = vld [vmem:[%s14959_s1 + $0x1110] sm:$0xf]  ;;  %v10010_v50 = vld [vmem:[%s14959_s1 + $0x1238] sm:$0xf0] }
 0x173   :  { %5306 = vmatpush.bf16.msrb.mxu3 %v8206_v44  ;;  %v9830_v44 = vld [vmem:[%s14959_s1 + $0xc98] sm:$0xf0]  ;;  %v8546_v38 = vor.u32 %v9975_v33, %v8545_v32  ;;  %v10045_v10 = vld [vmem:[%s14959_s1 + $0x1350] sm:$0xf0]  ;;  %v10040_v33 = vld [vmem:[%s14959_s1 + $0x1328] sm:$0xf0] }
 0x174   :  { %5268 = vmatpush.bf16.msrb.mxu0 %v7706_v53  ;;  %v7646_v53 = vor.u32 %v9750_v35, %v7645_v34  ;;  %v7966_v61 = vor.u32 %v9830_v44, %v7965_v40  ;;  %v10015_v34 = vld [vmem:[%s14959_s1 + $0x1260] sm:$0xf0]  ;;  %v8865_v35 = vld [vmem:[%s14959_s1 + $0x1390] sm:$0xf]  ;;  %v8365_v40 = vld [vmem:[%s14959_s1 + $0xfa8] sm:$0xf]  ;;  %v8826_v25 = vor.u32 %v10045_v10, %v8825_v9 }
 0x175   :  { %5281 = vmatpush.bf16.msrb.mxu1 %v7866_v54  ;;  %v9985_v54 = vld [vmem:[%s14959_s1 + $0x1170] sm:$0xf0]  ;;  %v9225_v9 = vld [vmem:[%s14959_s1 + $0x1660] sm:$0xf] }
 0x176   :  { %5294 = vmatpush.bf16.msrb.mxu2 %v8026_v56  ;;  %v8745_v56 = vld [vmem:[%s14959_s1 + $0x12a0] sm:$0xf]  ;;  %v8586_v7 = vor.u32 %v9985_v54, %v8585_v52  ;;  %v10050_v52 = vld [vmem:[%s14959_s1 + $0x1378] sm:$0xf0]  ;;  %v8366_v54 = vor.u32 %v9930_v41, %v8365_v40  ;;  %v9915_v40 = vld [vmem:[%s14959_s1 + $0xf40] sm:$0xf0] }
 0x177   :  { %5307 = vmatpush.bf16.msrb.mxu3 %v8186_v3  ;;  %v10065_v3 = vld [vmem:[%s14959_s1 + $0x13f0] sm:$0xf0]  ;;  %v8746_v8 = vor.u32 %v10025_v58, %v8745_v56  ;;  %v8465_v41 = vld [vmem:[%s14959_s1 + $0x1070] sm:$0xf] }
 0x178   :  { %5269 = vmatpush.bf16.msrb.mxu0 %v7686_v13  ;;  %v8906_v13 = vor.u32 %v10065_v3, %v8905_v62  ;;  %v9925_v62 = vld [vmem:[%s14959_s1 + $0xf90] sm:$0xf0]  ;;  %v8505_v3 = vld [vmem:[%s14959_s1 + $0x10c0] sm:$0xf] }
 0x179   :  { %5282 = vmatpush.bf16.msrb.mxu1 %v7846_v19  ;;  %v8725_v19 = vld [vmem:[%s14959_s1 + $0x1278] sm:$0xf] }
 0x17a   :  { %5295 = vmatpush.bf16.msrb.mxu2 %v8006_v24  ;;  %v10020_v24 = vld [vmem:[%s14959_s1 + $0x1288] sm:$0xf0] }
 0x17b   :  { %5308 = vmatpush.bf16.msrb.mxu3 %v8166_v29  ;;  %v8726_v29 = vor.u32 %v10020_v24, %v8725_v19  ;;  %v8325_v19 = vld [vmem:[%s14959_s1 + $0xf58] sm:$0xf]  ;;  %v9920_v24 = vld [vmem:[%s14959_s1 + $0xf68] sm:$0xf0] }
 0x17c   :  { %5270 = vmatpush.bf16.msrb.mxu0 %v7666_v57  ;;  %v8705_v57 = vld [vmem:[%s14959_s1 + $0x1250] sm:$0xf] }
 0x17d   :  { %5283 = vmatpush.bf16.msrb.mxu1 %v7826_v36  ;;  %v10055_v36 = vld [vmem:[%s14959_s1 + $0x13a0] sm:$0xf0]  ;;  %v8706_v39 = vor.u32 %v10015_v34, %v8705_v57  ;;  %v8326_v34 = vor.u32 %v9920_v24, %v8325_v19  ;;  %v6507_v19 = vld [vmem:[%s14959_s1 + $0x134] sm:$0xf0] }
 0x17e   :  { %5296 = vmatpush.bf16.msrb.mxu2 %v7986_v37  ;;  %v8386_v37 = vor.u32 %v9935_v31, %v8385_v30  ;;  %v8866_v44 = vor.u32 %v10055_v36, %v8865_v35  ;;  %v10000_v30 = vld [vmem:[%s14959_s1 + $0x11e8] sm:$0xf0] }
 0x17f   :  { %5309 = vmatpush.bf16.msrb.mxu3 %v8146_v42  ;;  %v8525_v42 = vld [vmem:[%s14959_s1 + $0x10e8] sm:$0xf] }
 0x180   :  { %5271 = vmatpush.bf16.msrb.mxu0 %v7646_v53  ;;  %v5065_v51 = vpop.f32.mrf.mxu0  ;;  %v8526_v58 = vor.u32 %v9970_v45, %v8525_v42  ;;  %v8625_v45 = vld [vmem:[%s14959_s1 + $0x11b0] sm:$0xf] }
 0x181   :  { %5284 = vmatpush.bf16.msrb.mxu1 %v7806_v59  ;;  %v5066_v53 = vadd.f32 %v5065_v51, %v12640_v14  ;;  %v5078_v56 = vpop.f32.mrf.mxu1  ;;  %v8686_v59 = vor.u32 %v10010_v50, %v8685_v63  ;;  %v8846_v14 = vor.u32 %v10050_v52, %v8845_v55  ;;  %v9995_v63 = vld [vmem:[%s14959_s1 + $0x11c0] sm:$0xf0]  ;;  %v8785_v50 = vld [vmem:[%s14959_s1 + $0x12f0] sm:$0xf]  ;;  %v8285_v52 = vld [vmem:[%s14959_s1 + $0xf08] sm:$0xf] }
 0x182   :  { %5297 = vmatpush.bf16.msrb.mxu2 %v7966_v61  ;;  %v8345_v61 = vld [vmem:[%s14959_s1 + $0xf80] sm:$0xf]  ;;  %v10035_v51 = vld [vmem:[%s14959_s1 + $0x1300] sm:$0xf0] }
 0x183   :  { %5310 = vmatpush.bf16.msrb.mxu3 %v8126_v4  ;;  %5272 = vmatmul.bf16.vlgmr.msrb.gmra.mxu0 %v10925_v12  ;;  %v5079_v4 = vadd.f32 %v5078_v56, %v5066_v53  ;;  %v8346_v11 = vor.u32 %v9925_v62, %v8345_v61  ;;  %v9910_v53 = vld [vmem:[%s14959_s1 + $0xf18] sm:$0xf0]  ;;  %v8626_v56 = vor.u32 %v9995_v63, %v8625_v45  ;;  %v8605_v61 = vld [vmem:[%s14959_s1 + $0x1188] sm:$0xf]  ;;  %v10095_v45 = vld [vmem:[%s14959_s1 + $0x14e0] sm:$0xf0] }
 0x184   :  { %5316 = vmatpush.bf16.msra.mxu0 %v8426_v23  ;;  %5285 = vmatmul.bf16.vlgmr.msrb.gmra.mxu1 %v10935_v16  ;;  %v9965_v23 = vld [vmem:[%s14959_s1 + $0x10d0] sm:$0xf0]  ;;  %v8786_v62 = vor.u32 %v10035_v51, %v8785_v50  ;;  %v9185_v63 = vld [vmem:[%s14959_s1 + $0x1610] sm:$0xf]  ;;  %v10135_v51 = vld [vmem:[%s14959_s1 + $0x1620] sm:$0xf0] }
 0x185   :  { %5329 = vmatpush.bf16.msra.mxu1 %v8586_v7  ;;  %5298 = vmatmul.bf16.vlgmr.msrb.gmra.mxu2 %v10933_v15  ;;  %v8665_v7 = vld [vmem:[%s14959_s1 + $0x1200] sm:$0xf] }
 0x186   :  { %5342 = vmatpush.bf16.msra.mxu2 %v8746_v8  ;;  %5311 = vmatmul.bf16.vlgmr.msrb.gmra.mxu3 %v10937_v17  ;;  %v10005_v8 = vld [vmem:[%s14959_s1 + $0x1210] sm:$0xf0] }
 0x187   :  { %5355 = vmatpush.bf16.msra.mxu3 %v8906_v13  ;;  %v8506_v13 = vor.u32 %v9965_v23, %v8505_v3  ;;  %v8666_v18 = vor.u32 %v10005_v8, %v8665_v7  ;;  %v9990_v3 = vld [vmem:[%s14959_s1 + $0x1198] sm:$0xf0]  ;;  %v9065_v7 = vld [vmem:[%s14959_s1 + $0x1520] sm:$0xf]  ;;  %v10105_v8 = vld [vmem:[%s14959_s1 + $0x1530] sm:$0xf0] }
 0x188   :  { %5317 = vmatpush.bf16.msra.mxu0 %v8406_v27  ;;  %v5091_v27 = vpop.f32.mrf.mxu2  ;;  %v5067_v57 = vpop.f32.mrf.mxu0 }
 0x189   :  { %5330 = vmatpush.bf16.msra.mxu1 %v8566_v28  ;;  %v9960_v28 = vld [vmem:[%s14959_s1 + $0x10a8] sm:$0xf0]  ;;  %v5092_v31 = vadd.f32 %v5091_v27, %v5079_v4  ;;  %v5104_v32 = vpop.f32.mrf.mxu3  ;;  %v5080_v35 = vpop.f32.mrf.mxu1  ;;  %v10030_v4 = vld [vmem:[%s14959_s1 + $0x12d8] sm:$0xf0]  ;;  %v6667_v27 = vld [vmem:[%s14959_s1 + $0x274] sm:$0xf0] }
 0x18a   :  { %5343 = vmatpush.bf16.msra.mxu2 %v8726_v29  ;;  %v8645_v29 = vld [vmem:[%s14959_s1 + $0x11d8] sm:$0xf]  ;;  %v9458_v35 = vld [vmem:[%s14959_s1 + $0xfc] sm:$0xf] }
 0x18b   :  { %5356 = vmatpush.bf16.msra.mxu3 %v8886_v43  ;;  %v8805_v43 = vld [vmem:[%s14959_s1 + $0x1318] sm:$0xf]  ;;  %v12839_v36 = vadd.f32 %v5104_v32, %v5092_v31 }
 0x18c   :  { %5318 = vmatpush.bf16.msra.mxu0 %v8386_v37  ;;  %v8486_v37 = vor.u32 %v9960_v28, %v8485_v5  ;;  %v8806_v42 = vor.u32 %v10040_v33, %v8805_v43  ;;  %v8606_v5 = vor.u32 %v9990_v3, %v8605_v61  ;;  %v9045_v32 = vld [vmem:[%s14959_s1 + $0x14f8] sm:$0xf]  ;;  %v10100_v43 = vld [vmem:[%s14959_s1 + $0x1508] sm:$0xf0]  ;;  %v9005_v61 = vld [vmem:[%s14959_s1 + $0x14a8] sm:$0xf] }
 0x18d   :  { %5331 = vmatpush.bf16.msra.mxu1 %v8546_v38  ;;  %v8646_v38 = vor.u32 %v10000_v30, %v8645_v29  ;;  %v9066_v29 = vor.u32 %v10105_v8, %v9065_v7  ;;  %v9205_v33 = vld [vmem:[%s14959_s1 + $0x1638] sm:$0xf]  ;;  %v9165_v3 = vld [vmem:[%s14959_s1 + $0x15e8] sm:$0xf]  ;;  %v6447_v7 = vld [vmem:[%s14959_s1 + $0xbc] sm:$0xf0] }
 0x18e   :  { %5344 = vmatpush.bf16.msra.mxu2 %v8706_v39  ;;  %v8305_v39 = vld [vmem:[%s14959_s1 + $0xf30] sm:$0xf] }
 0x18f   :  { %5357 = vmatpush.bf16.msra.mxu3 %v8866_v44  ;;  %v9955_v44 = vld [vmem:[%s14959_s1 + $0x1080] sm:$0xf0]  ;;  %v8306_v55 = vor.u32 %v9915_v40, %v8305_v39  ;;  %v6647_v39 = vld [vmem:[%s14959_s1 + $0x24c] sm:$0xf0]  ;;  %v9046_v40 = vor.u32 %v10100_v43, %v9045_v32  ;;  %v6587_v43 = vld [vmem:[%s14959_s1 + $0x1d4] sm:$0xf0] }
 0x190   :  { %5319 = vmatpush.bf16.msra.mxu0 %v8366_v54  ;;  %v8466_v54 = vor.u32 %v9955_v44, %v8465_v41  ;;  %v5093_v23 = vpop.f32.mrf.mxu2  ;;  %v9025_v44 = vld [vmem:[%s14959_s1 + $0x14d0] sm:$0xf]  ;;  %v9483_v32 = vld [vmem:[%s14959_s1 + $0x1c4] sm:$0xf] }
 0x191   :  { %5332 = vmatpush.bf16.msra.mxu1 %v8526_v58  ;;  %v8445_v58 = vld [vmem:[%s14959_s1 + $0x1048] sm:$0xf]  ;;  %v5106_v10 = vpop.f32.mrf.mxu3  ;;  %v9448_v23 = vld [vmem:[%s14959_s1 + $0xac] sm:$0xf] }
 0x192   :  { %5345 = vmatpush.bf16.msra.mxu2 %v8686_v59  ;;  %v9950_v59 = vld [vmem:[%s14959_s1 + $0x1058] sm:$0xf0]  ;;  %v6607_v10 = vld [vmem:[%s14959_s1 + $0x1fc] sm:$0xf0] }
 0x193   :  { %5358 = vmatpush.bf16.msra.mxu3 %v8846_v14  ;;  %v8765_v14 = vld [vmem:[%s14959_s1 + $0x12c8] sm:$0xf]  ;;  %v8446_v24 = vor.u32 %v9950_v59, %v8445_v58  ;;  %v9186_v58 = vor.u32 %v10135_v51, %v9185_v63  ;;  %v6567_v51 = vld [vmem:[%s14959_s1 + $0x1ac] sm:$0xf0] }
 0x194   :  { %5320 = vmatpush.bf16.msra.mxu0 %v8346_v11  ;;  %v8286_v11 = vor.u32 %v9910_v53, %v8285_v52  ;;  %v8766_v28 = vor.u32 %v10030_v4, %v8765_v14  ;;  %v6467_v52 = vld [vmem:[%s14959_s1 + $0xe4] sm:$0xf0]  ;;  %v9493_v53 = vld [vmem:[%s14959_s1 + $0x214] sm:$0xf]  ;;  %v10130_v4 = vld [vmem:[%s14959_s1 + $0x15f8] sm:$0xf0] }
 0x195   :  { %5333 = vmatpush.bf16.msra.mxu1 %v8506_v13  ;;  %v10145_v13 = vld [vmem:[%s14959_s1 + $0x1670] sm:$0xf0] }
 0x196   :  { %5346 = vmatpush.bf16.msra.mxu2 %v8666_v18  ;;  %v9463_v18 = vld [vmem:[%s14959_s1 + $0x124] sm:$0xf]  ;;  %v9226_v30 = vor.u32 %v10145_v13, %v9225_v9  ;;  %v9488_v9 = vld [vmem:[%s14959_s1 + $0x1ec] sm:$0xf] }
 0x197   :  { %5359 = vmatpush.bf16.msra.mxu3 %v8826_v25  ;;  %v9503_v25 = vld [vmem:[%s14959_s1 + $0x264] sm:$0xf]  ;;  %v6510_v31 = vor.u32 %v9463_v18, %v6507_v19  ;;  %v9166_v19 = vor.u32 %v10130_v4, %v9165_v3  ;;  %v9433_v4 = vld [vmem:[%s14959_s1 + $0x34] sm:$0xf] }
 0x198   :  { %5321 = vmatpush.bf16.msra.mxu0 %v8326_v34  ;;  %v6670_v57 = vor.u32 %v9503_v25, %v6667_v27  ;;  %v10140_v34 = vld [vmem:[%s14959_s1 + $0x1648] sm:$0xf0]  ;;  %v10085_v25 = vld [vmem:[%s14959_s1 + $0x1490] sm:$0xf0]  ;;  %v9145_v27 = vld [vmem:[%s14959_s1 + $0x15c0] sm:$0xf] }
 0x199   :  { %5334 = vmatpush.bf16.msra.mxu1 %v8486_v37  ;;  %v6487_v37 = vld [vmem:[%s14959_s1 + $0x10c] sm:$0xf0]  ;;  %v9206_v41 = vor.u32 %v10140_v34, %v9205_v33 }
 0x19a   :  { %5347 = vmatpush.bf16.msra.mxu2 %v8646_v38  ;;  %v9498_v38 = vld [vmem:[%s14959_s1 + $0x23c] sm:$0xf] }
 0x19b   :  { %5360 = vmatpush.bf16.msra.mxu3 %v8806_v42  ;;  %v6490_v42 = vor.u32 %v9458_v35, %v6487_v37  ;;  %v6650_v50 = vor.u32 %v9498_v38, %v6647_v39  ;;  %v8965_v35 = vld [vmem:[%s14959_s1 + $0x1458] sm:$0xf]  ;;  %v10080_v37 = vld [vmem:[%s14959_s1 + $0x1468] sm:$0xf0]  ;;  %v6590_v39 = vor.u32 %v9483_v32, %v6587_v43  ;;  %v9583_v32 = vld [vmem:[%s14959_s1 + $0x4e4] sm:$0xf] }
 0x19c   :  { %5322 = vmatpush.bf16.msra.mxu0 %v8306_v55  ;;  %v9453_v55 = vld [vmem:[%s14959_s1 + $0xd4] sm:$0xf]  ;;  %v9125_v38 = vld [vmem:[%s14959_s1 + $0x1598] sm:$0xf] }
 0x19d   :  { %5335 = vmatpush.bf16.msra.mxu1 %v8466_v54  ;;  %v6627_v54 = vld [vmem:[%s14959_s1 + $0x224] sm:$0xf0]  ;;  %v6470_v59 = vor.u32 %v9453_v55, %v6467_v52  ;;  %v8966_v52 = vor.u32 %v10080_v37, %v8965_v35  ;;  %v7147_v35 = vld [vmem:[%s14959_s1 + $0x634] sm:$0xf0] }
 0x19e   :  { %5348 = vmatpush.bf16.msra.mxu2 %v8626_v56  ;;  %v9026_v56 = vor.u32 %v10095_v45, %v9025_v44  ;;  %v6630_v14 = vor.u32 %v9493_v53, %v6627_v54  ;;  %v6407_v44 = vld [vmem:[%s14959_s1 + $0x6c] sm:$0xf0] }
 0x19f   :  { %5361 = vmatpush.bf16.msra.mxu3 %v8786_v62  ;;  %v10090_v62 = vld [vmem:[%s14959_s1 + $0x14b8] sm:$0xf0] }
 0x1a0   :  { %5323 = vmatpush.bf16.msra.mxu0 %v8286_v11  ;;  %v5117_v8 = vpop.f32.mrf.mxu0  ;;  %v9006_v13 = vor.u32 %v10090_v62, %v9005_v61  ;;  %v10075_v61 = vld [vmem:[%s14959_s1 + $0x1440] sm:$0xf0]  ;;  %v9105_v62 = vld [vmem:[%s14959_s1 + $0x1570] sm:$0xf] }
 0x1a1   :  { %5336 = vmatpush.bf16.msra.mxu1 %v8446_v24  ;;  %v5118_v11 = vadd.f32 %v5117_v8, %v12839_v36  ;;  %v5130_v18 = vpop.f32.mrf.mxu1  ;;  %v6450_v24 = vor.u32 %v9448_v23, %v6447_v7  ;;  %v6610_v36 = vor.u32 %v9488_v9, %v6607_v10  ;;  %v6387_v23 = vld [vmem:[%s14959_s1 + $0x44] sm:$0xf0]  ;;  %v9473_v7 = vld [vmem:[%s14959_s1 + $0x174] sm:$0xf] }
 0x1a2   :  { %5349 = vmatpush.bf16.msra.mxu2 %v8606_v5  ;;  %v8985_v5 = vld [vmem:[%s14959_s1 + $0x1480] sm:$0xf]  ;;  %v6547_v8 = vld [vmem:[%s14959_s1 + $0x184] sm:$0xf0] }
 0x1a3   :  { %5362 = vmatpush.bf16.msra.mxu3 %v8766_v28  ;;  %5324 = vmatmul.bf16.vlgmr.msra.gmra.mxu0 %v11099_v46  ;;  %v5131_v28 = vadd.f32 %v5130_v18, %v5118_v11  ;;  %v8986_v33 = vor.u32 %v10085_v25, %v8985_v5  ;;  %v8925_v10 = vld [vmem:[%s14959_s1 + $0x1408] sm:$0xf]  ;;  %v10070_v11 = vld [vmem:[%s14959_s1 + $0x1418] sm:$0xf0]  ;;  %v6390_v18 = vor.u32 %v9433_v4, %v6387_v23  ;;  %v9428_v5 = vld [vmem:[%s14959_s1 + $0xc] sm:$0xf] }
 0x1a4   :  { %5368 = vmatpush.bf16.msrb.mxu0 %v9066_v29  ;;  %5337 = vmatmul.bf16.vlgmr.msra.gmra.mxu1 %v11103_v48  ;;  %v10125_v29 = vld [vmem:[%s14959_s1 + $0x15d0] sm:$0xf0]  ;;  %v6550_v25 = vor.u32 %v9473_v7, %v6547_v8  ;;  %v6787_v4 = vld [vmem:[%s14959_s1 + $0x364] sm:$0xf0]  ;;  %v10201_v7 = vld [vmem:[#allocation1] sm:$0xff] }
 0x1a5   :  { %5381 = vmatpush.bf16.msrb.mxu1 %v9226_v30  ;;  %5350 = vmatmul.bf16.vlgmr.msra.gmra.mxu2 %v11101_v47  ;;  %v9443_v30 = vld [vmem:[%s14959_s1 + $0x84] sm:$0xf]  ;;  %v9573_v23 = vld [vmem:[%s14959_s1 + $0x494] sm:$0xf] }
 0x1a6   :  { %5394 = vmatpush.bf16.msrb.mxu2 %v6510_v31  ;;  %5363 = vmatmul.bf16.vlgmr.msra.gmra.mxu3 %v11105_v49  ;;  %v6427_v31 = vld [vmem:[%s14959_s1 + $0x94] sm:$0xf0] }
 0x1a7   :  { %5407 = vmatpush.bf16.msrb.mxu3 %v6670_v57  ;;  %v9146_v57 = vor.u32 %v10125_v29, %v9145_v27  ;;  %v6430_v34 = vor.u32 %v9443_v30, %v6427_v31  ;;  %v6367_v27 = vld [vmem:[%s14959_s1 + $0x1c] sm:$0xf0]  ;;  %v9543_v30 = vld [vmem:[%s14959_s1 + $0x3a4] sm:$0xf]  ;;  %v6827_v31 = vld [vmem:[%s14959_s1 + $0x3b4] sm:$0xf0] }
 0x1a8   :  { %5369 = vmatpush.bf16.msrb.mxu0 %v9046_v40  ;;  %v5143_v40 = vpop.f32.mrf.mxu2  ;;  %v5119_v55 = vpop.f32.mrf.mxu0 }
 0x1a9   :  { %5382 = vmatpush.bf16.msrb.mxu1 %v9206_v41  ;;  %v10120_v41 = vld [vmem:[%s14959_s1 + $0x15a8] sm:$0xf0]  ;;  %v5144_v45 = vadd.f32 %v5143_v40, %v5131_v28  ;;  %v5156_v63 = vpop.f32.mrf.mxu3  ;;  %v5132_v53 = vpop.f32.mrf.mxu1  ;;  %v6527_v28 = vld [vmem:[%s14959_s1 + $0x15c] sm:$0xf0]  ;;  %v7307_v40 = vld [vmem:[%s14959_s1 + $0x774] sm:$0xf0] }
 0x1aa   :  { %5395 = vmatpush.bf16.msrb.mxu2 %v6490_v42  ;;  %v9438_v42 = vld [vmem:[%s14959_s1 + $0x5c] sm:$0xf] }
 0x1ab   :  { %5408 = vmatpush.bf16.msrb.mxu3 %v6650_v50  ;;  %v9478_v50 = vld [vmem:[%s14959_s1 + $0x19c] sm:$0xf]  ;;  %v13038_v54 = vadd.f32 %v5156_v63, %v5144_v45 }
 0x1ac   :  { %5370 = vmatpush.bf16.msrb.mxu0 %v9026_v56  ;;  %v9126_v56 = vor.u32 %v10120_v41, %v9125_v38  ;;  %v6570_v3 = vor.u32 %v9478_v50, %v6567_v51  ;;  %v6370_v38 = vor.u32 %v9428_v5, %v6367_v27  ;;  %v9538_v63 = vld [vmem:[%s14959_s1 + $0x37c] sm:$0xf]  ;;  %v6807_v50 = vld [vmem:[%s14959_s1 + $0x38c] sm:$0xf0]  ;;  %v9528_v5 = vld [vmem:[%s14959_s1 + $0x32c] sm:$0xf] }
 0x1ad   :  { %5383 = vmatpush.bf16.msrb.mxu1 %v9186_v58  ;;  %v6410_v58 = vor.u32 %v9438_v42, %v6407_v44  ;;  %v6830_v42 = vor.u32 %v9543_v30, %v6827_v31  ;;  %v9578_v51 = vld [vmem:[%s14959_s1 + $0x4bc] sm:$0xf] }
 0x1ae   :  { %5396 = vmatpush.bf16.msrb.mxu2 %v6470_v59  ;;  %v8945_v59 = vld [vmem:[%s14959_s1 + $0x1430] sm:$0xf]  ;;  %v9618_v53 = vld [vmem:[%s14959_s1 + $0x5fc] sm:$0xf] }
 0x1af   :  { %5409 = vmatpush.bf16.msrb.mxu3 %v6630_v14  ;;  %v10115_v14 = vld [vmem:[%s14959_s1 + $0x1580] sm:$0xf0]  ;;  %v8946_v9 = vor.u32 %v10075_v61, %v8945_v59  ;;  %v7287_v59 = vld [vmem:[%s14959_s1 + $0x74c] sm:$0xf0]  ;;  %v6810_v61 = vor.u32 %v9538_v63, %v6807_v50  ;;  %v6907_v50 = vld [vmem:[%s14959_s1 + $0x454] sm:$0xf0] }
 0x1b0   :  { %5371 = vmatpush.bf16.msrb.mxu0 %v9006_v13  ;;  %v9106_v13 = vor.u32 %v10115_v14, %v9105_v62  ;;  %v5145_v29 = vpop.f32.mrf.mxu2  ;;  %v9533_v14 = vld [vmem:[%s14959_s1 + $0x354] sm:$0xf] }
 0x1b1   :  { %5384 = vmatpush.bf16.msrb.mxu1 %v9166_v19  ;;  %v9085_v19 = vld [vmem:[%s14959_s1 + $0x1548] sm:$0xf]  ;;  %v5158_v43 = vpop.f32.mrf.mxu3  ;;  %v10203_v29 = vld [vmem:[%s14960_s2] sm:$0x1f] }
 0x1b2   :  { %5397 = vmatpush.bf16.msrb.mxu2 %v6450_v24  ;;  %v10110_v24 = vld [vmem:[%s14959_s1 + $0x1558] sm:$0xf0]  ;;  %v898_v30 = vperm.slane %v10203_v29, 2  ;;  %v9608_v43 = vld [vmem:[%s14959_s1 + $0x5ac] sm:$0xf] }
 0x1b3   :  { %5410 = vmatpush.bf16.msrb.mxu3 %v6610_v36  ;;  %v9468_v36 = vld [vmem:[%s14959_s1 + $0x14c] sm:$0xf]  ;;  %v9086_v37 = vor.u32 %v10110_v24, %v9085_v19  ;;  %v7267_v19 = vld [vmem:[%s14959_s1 + $0x724] sm:$0xf0]  ;;  %v6790_v24 = vor.u32 %v9533_v14, %v6787_v4  ;;  %v9558_v14 = vld [vmem:[%s14959_s1 + $0x41c] sm:$0xf] }
 0x1b4   :  { %5372 = vmatpush.bf16.msrb.mxu0 %v8986_v33  ;;  %v8926_v33 = vor.u32 %v10070_v11, %v8925_v10  ;;  %v6530_v41 = vor.u32 %v9468_v36, %v6527_v28  ;;  %v9613_v10 = vld [vmem:[%s14959_s1 + $0x5d4] sm:$0xf]  ;;  %v7107_v11 = vld [vmem:[%s14959_s1 + $0x5e4] sm:$0xf0]  ;;  %v6767_v36 = vld [vmem:[%s14959_s1 + $0x33c] sm:$0xf0] }
 0x1b5   :  { %5385 = vmatpush.bf16.msrb.mxu1 %v9146_v57  ;;  %v6987_v57 = vld [vmem:[%s14959_s1 + $0x4f4] sm:$0xf0]  ;;  %v7110_v27 = vor.u32 %v9613_v10, %v7107_v11  ;;  %v9568_v28 = vld [vmem:[%s14959_s1 + $0x46c] sm:$0xf]  ;;  %v9553_v29 = vld [vmem:[%s14959_s1 + $0x3f4] sm:$0xf] }
 0x1b6   :  { %5398 = vmatpush.bf16.msrb.mxu2 %v6430_v34  ;;  %v9623_v34 = vld [vmem:[%s14959_s1 + $0x624] sm:$0xf]  ;;  %v6990_v44 = vor.u32 %v9583_v32, %v6987_v57  ;;  %v6927_v32 = vld [vmem:[%s14959_s1 + $0x47c] sm:$0xf0]  ;;  %v9648_v57 = vld [vmem:[%s14959_s1 + $0x6ec] sm:$0xf] }
 0x1b7   :  { %5411 = vmatpush.bf16.msrb.mxu3 %v6590_v39  ;;  %v9663_v39 = vld [vmem:[%s14959_s1 + $0x764] sm:$0xf]  ;;  %v7150_v45 = vor.u32 %v9623_v34, %v7147_v35  ;;  %v7247_v34 = vld [vmem:[%s14959_s1 + $0x6fc] sm:$0xf0]  ;;  %v6770_v35 = vor.u32 %v9528_v5, %v6767_v36  ;;  %v9513_v36 = vld [vmem:[%s14959_s1 + $0x2b4] sm:$0xf] }
 0x1b8   :  { %5373 = vmatpush.bf16.msrb.mxu0 %v8966_v52  ;;  %v7310_v55 = vor.u32 %v9663_v39, %v7307_v40  ;;  %v6967_v52 = vld [vmem:[%s14959_s1 + $0x4cc] sm:$0xf0]  ;;  %v9523_v40 = vld [vmem:[%s14959_s1 + $0x304] sm:$0xf]  ;;  %v7250_v63 = vor.u32 %v9648_v57, %v7247_v34  ;;  %v9633_v57 = vld [vmem:[%s14959_s1 + $0x674] sm:$0xf] }
 0x1b9   :  { %5386 = vmatpush.bf16.msrb.mxu1 %v9126_v56  ;;  %v7127_v56 = vld [vmem:[%s14959_s1 + $0x60c] sm:$0xf0]  ;;  %v6970_v62 = vor.u32 %v9578_v51, %v6967_v52  ;;  %v9603_v51 = vld [vmem:[%s14959_s1 + $0x584] sm:$0xf]  ;;  %v7187_v34 = vld [vmem:[%s14959_s1 + $0x684] sm:$0xf0] }
 0x1ba   :  { %5399 = vmatpush.bf16.msrb.mxu2 %v6410_v58  ;;  %v9658_v58 = vld [vmem:[%s14959_s1 + $0x73c] sm:$0xf]  ;;  %v9643_v52 = vld [vmem:[%s14959_s1 + $0x6c4] sm:$0xf] }
 0x1bb   :  { %5412 = vmatpush.bf16.msrb.mxu3 %v6570_v3  ;;  %v7130_v3 = vor.u32 %v9618_v53, %v7127_v56  ;;  %v7290_v8 = vor.u32 %v9658_v58, %v7287_v59  ;;  %v7227_v53 = vld [vmem:[%s14959_s1 + $0x6d4] sm:$0xf0] }
 0x1bc   :  { %5374 = vmatpush.bf16.msrb.mxu0 %v8946_v9  ;;  %v6947_v9 = vld [vmem:[%s14959_s1 + $0x4a4] sm:$0xf0] }
 0x1bd   :  { %5387 = vmatpush.bf16.msrb.mxu1 %v9106_v13  ;;  %v10202_v13 = vld [vmem:[#allocation1 + $0x9] sm:$0xff] }
 0x1be   :  { %5400 = vmatpush.bf16.msrb.mxu2 %v6390_v18  ;;  %v9653_v18 = vld [vmem:[%s14959_s1 + $0x714] sm:$0xf] }
 0x1bf   :  { %5413 = vmatpush.bf16.msrb.mxu3 %v6550_v25  ;;  %v6950_v25 = vor.u32 %v9573_v23, %v6947_v9  ;;  %v7270_v31 = vor.u32 %v9653_v18, %v7267_v19  ;;  %v7230_v23 = vor.u32 %v9643_v52, %v7227_v53  ;;  %v7047_v9 = vld [vmem:[%s14959_s1 + $0x56c] sm:$0xf0]  ;;  %v9703_v53 = vld [vmem:[%s14959_s1 + $0x8a4] sm:$0xf] }
 0x1c0   :  { %5375 = vmatpush.bf16.msrb.mxu0 %v8926_v33  ;;  %v7087_v33 = vld [vmem:[%s14959_s1 + $0x5bc] sm:$0xf0]  ;;  %v7207_v18 = vld [vmem:[%s14959_s1 + $0x6ac] sm:$0xf0] }
 0x1c1   :  { %5388 = vmatpush.bf16.msrb.mxu1 %v9086_v37  ;;  %v5169_v37 = vpop.f32.mrf.mxu0  ;;  %v7090_v39 = vor.u32 %v9608_v43, %v7087_v33  ;;  %v9593_v43 = vld [vmem:[%s14959_s1 + $0x534] sm:$0xf]  ;;  %v7027_v33 = vld [vmem:[%s14959_s1 + $0x544] sm:$0xf0] }
 0x1c2   :  { %5401 = vmatpush.bf16.msrb.mxu2 %v6370_v38  ;;  %v6930_v38 = vor.u32 %v9568_v28, %v6927_v32  ;;  %v6707_v28 = vld [vmem:[%s14959_s1 + $0x2c4] sm:$0xf0] }
 0x1c3   :  { %5414 = vmatpush.bf16.msrb.mxu3 %v6530_v41  ;;  %5376 = vmatmul.bf16.vlgmr.msrb.gmra.mxu0 %v10201_v7  ;;  %v6747_v41 = vld [vmem:[%s14959_s1 + $0x314] sm:$0xf0]  ;;  %v6887_v7 = vld [vmem:[%s14959_s1 + $0x42c] sm:$0xf0]  ;;  %v6867_v32 = vld [vmem:[%s14959_s1 + $0x404] sm:$0xf0] }
 0x1c4   :  { %5420 = vmatpush.bf16.msra.mxu0 %v6830_v42  ;;  %5389 = vmatmul.bf16.vlgmr.msrb.gmra.mxu1 %v10202_v13  ;;  %v9563_v42 = vld [vmem:[%s14959_s1 + $0x444] sm:$0xf]  ;;  %v6750_v58 = vor.u32 %v9523_v40, %v6747_v41  ;;  %v9638_v13 = vld [vmem:[%s14959_s1 + $0x69c] sm:$0xf]  ;;  %v7030_v40 = vor.u32 %v9593_v43, %v7027_v33  ;;  %v9548_v41 = vld [vmem:[%s14959_s1 + $0x3cc] sm:$0xf] }
 0x1c5   :  { %5433 = vmatpush.bf16.msra.mxu1 %v6990_v44  ;;  %5402 = vmatmul.bf16.vlgmr.msrb.gmra.mxu2 %v10582_v21  ;;  %v5170_v44 = vadd.f32 %v5169_v37, %v898_v30  ;;  %v6910_v59 = vor.u32 %v9563_v42, %v6907_v50  ;;  %v9508_v37 = vld [vmem:[%s14959_s1 + $0x28c] sm:$0xf]  ;;  %v6847_v42 = vld [vmem:[%s14959_s1 + $0x3dc] sm:$0xf0]  ;;  %v9693_v43 = vld [vmem:[%s14959_s1 + $0x854] sm:$0xf] }
 0x1c6   :  { %5446 = vmatpush.bf16.msra.mxu2 %v7150_v45  ;;  %5415 = vmatmul.bf16.vlgmr.msrb.gmra.mxu3 %v10593_v26  ;;  %v5182_v45 = vpop.f32.mrf.mxu1  ;;  %v7007_v50 = vld [vmem:[%s14959_s1 + $0x51c] sm:$0xf0]  ;;  %v7427_v33 = vld [vmem:[%s14959_s1 + $0x864] sm:$0xf0] }
 0x1c7   :  { %5459 = vmatpush.bf16.msra.mxu3 %v7310_v55  ;;  %v7067_v55 = vld [vmem:[%s14959_s1 + $0x594] sm:$0xf0]  ;;  %v5183_v56 = vadd.f32 %v5182_v45, %v5170_v44  ;;  %v9588_v44 = vld [vmem:[%s14959_s1 + $0x50c] sm:$0xf] }
 0x1c8   :  { %5421 = vmatpush.bf16.msra.mxu0 %v6810_v61  ;;  %v7070_v61 = vor.u32 %v9603_v51, %v7067_v55  ;;  %v5195_v4 = vpop.f32.mrf.mxu2  ;;  %v9628_v51 = vld [vmem:[%s14959_s1 + $0x64c] sm:$0xf]  ;;  %v7167_v55 = vld [vmem:[%s14959_s1 + $0x65c] sm:$0xf0] }
 0x1c9   :  { %5434 = vmatpush.bf16.msra.mxu1 %v6970_v62  ;;  %v9518_v62 = vld [vmem:[%s14959_s1 + $0x2dc] sm:$0xf]  ;;  %v5196_v10 = vadd.f32 %v5195_v4, %v5183_v56  ;;  %v5208_v11 = vpop.f32.mrf.mxu3  ;;  %v5171_v5 = vpop.f32.mrf.mxu0  ;;  %v7467_v56 = vld [vmem:[%s14959_s1 + $0x8b4] sm:$0xf0]  ;;  %v7010_v4 = vor.u32 %v9588_v44, %v7007_v50  ;;  %v9728_v50 = vld [vmem:[%s14959_s1 + $0x96c] sm:$0xf] }
 0x1ca   :  { %5447 = vmatpush.bf16.msra.mxu2 %v7130_v3  ;;  %v6727_v3 = vld [vmem:[%s14959_s1 + $0x2ec] sm:$0xf0] }
 0x1cb   :  { %5460 = vmatpush.bf16.msra.mxu3 %v7290_v8  ;;  %v9598_v8 = vld [vmem:[%s14959_s1 + $0x55c] sm:$0xf]  ;;  %v6730_v19 = vor.u32 %v9518_v62, %v6727_v3  ;;  %v9783_v62 = vld [vmem:[%s14959_s1 + $0xb24] sm:$0xf]  ;;  %v7787_v3 = vld [vmem:[%s14959_s1 + $0xb34] sm:$0xf0] }
 0x1cc   :  { %5422 = vmatpush.bf16.msra.mxu0 %v6790_v24  ;;  %v13237_v24 = vadd.f32 %v5208_v11, %v5196_v10  ;;  %v7790_v11 = vor.u32 %v9783_v62, %v7787_v3 }
 0x1cd   :  { %5435 = vmatpush.bf16.msra.mxu1 %v6950_v25  ;;  %v6890_v25 = vor.u32 %v9558_v14, %v6887_v7  ;;  %v6850_v14 = vor.u32 %v9548_v41, %v6847_v42  ;;  %v7947_v7 = vld [vmem:[%s14959_s1 + $0xc74] sm:$0xf0]  ;;  %v7430_v41 = vor.u32 %v9693_v43, %v7427_v33  ;;  %v9758_v43 = vld [vmem:[%s14959_s1 + $0xa5c] sm:$0xf]  ;;  %v7687_v33 = vld [vmem:[%s14959_s1 + $0xa6c] sm:$0xf0] }
 0x1ce   :  { %5448 = vmatpush.bf16.msra.mxu2 %v7110_v27  ;;  %v7050_v27 = vor.u32 %v9598_v8, %v7047_v9  ;;  %v5184_v30 = vpop.f32.mrf.mxu1  ;;  %v7170_v8 = vor.u32 %v9628_v51, %v7167_v55  ;;  %v7470_v9 = vor.u32 %v9703_v53, %v7467_v56  ;;  %v7567_v55 = vld [vmem:[%s14959_s1 + $0x97c] sm:$0xf0]  ;;  %v9808_v56 = vld [vmem:[%s14959_s1 + $0xbec] sm:$0xf] }
 0x1cf   :  { %5461 = vmatpush.bf16.msra.mxu3 %v7270_v31  ;;  %v7210_v31 = vor.u32 %v9638_v13, %v7207_v18  ;;  %v9698_v13 = vld [vmem:[%s14959_s1 + $0x87c] sm:$0xf]  ;;  %v7447_v18 = vld [vmem:[%s14959_s1 + $0x88c] sm:$0xf0]  ;;  %v7727_v53 = vld [vmem:[%s14959_s1 + $0xabc] sm:$0xf0]  ;;  %v7570_v62 = vor.u32 %v9728_v50, %v7567_v55 }
 0x1d0   :  { %5423 = vmatpush.bf16.msra.mxu0 %v6770_v35  ;;  %v6710_v35 = vor.u32 %v9513_v36, %v6707_v28  ;;  %v5197_v45 = vpop.f32.mrf.mxu2  ;;  %v7767_v36 = vld [vmem:[%s14959_s1 + $0xb0c] sm:$0xf0]  ;;  %v9818_v28 = vld [vmem:[%s14959_s1 + $0xc3c] sm:$0xf]  ;;  %v7450_v30 = vor.u32 %v9698_v13, %v7447_v18  ;;  %v7707_v13 = vld [vmem:[%s14959_s1 + $0xa94] sm:$0xf0] }
 0x1d1   :  { %5436 = vmatpush.bf16.msra.mxu1 %v6930_v38  ;;  %v6687_v38 = vld [vmem:[%s14959_s1 + $0x29c] sm:$0xf0]  ;;  %v5210_v52 = vpop.f32.mrf.mxu3  ;;  %v9688_v45 = vld [vmem:[%s14959_s1 + $0x82c] sm:$0xf]  ;;  %v9803_v18 = vld [vmem:[%s14959_s1 + $0xbc4] sm:$0xf] }
 0x1d2   :  { %5449 = vmatpush.bf16.msra.mxu2 %v7090_v39  ;;  %v6870_v39 = vor.u32 %v9553_v29, %v6867_v32  ;;  %v7927_v29 = vld [vmem:[%s14959_s1 + $0xc4c] sm:$0xf0]  ;;  %v9768_v52 = vld [vmem:[%s14959_s1 + $0xaac] sm:$0xf]  ;;  %v7507_v55 = vld [vmem:[%s14959_s1 + $0x904] sm:$0xf0] }
 0x1d3   :  { %5462 = vmatpush.bf16.msra.mxu3 %v7250_v63  ;;  %v7190_v63 = vor.u32 %v9633_v57, %v7187_v34  ;;  %v9733_v57 = vld [vmem:[%s14959_s1 + $0x994] sm:$0xf]  ;;  %v7930_v34 = vor.u32 %v9818_v28, %v7927_v29  ;;  %v7730_v3 = vor.u32 %v9768_v52, %v7727_v53  ;;  %v7367_v28 = vld [vmem:[%s14959_s1 + $0x7ec] sm:$0xf0]  ;;  %v9718_v29 = vld [vmem:[%s14959_s1 + $0x91c] sm:$0xf] }
 0x1d4   :  { %5424 = vmatpush.bf16.msra.mxu0 %v6750_v58  ;;  %v9743_v58 = vld [vmem:[%s14959_s1 + $0x9e4] sm:$0xf]  ;;  %v9753_v52 = vld [vmem:[%s14959_s1 + $0xa34] sm:$0xf]  ;;  %v7667_v53 = vld [vmem:[%s14959_s1 + $0xa44] sm:$0xf0] }
 0x1d5   :  { %5437 = vmatpush.bf16.msra.mxu1 %v6910_v59  ;;  %v6690_v59 = vor.u32 %v9508_v37, %v6687_v38  ;;  %v9773_v37 = vld [vmem:[%s14959_s1 + $0xad4] sm:$0xf]  ;;  %v7747_v38 = vld [vmem:[%s14959_s1 + $0xae4] sm:$0xf0] }
 0x1d6   :  { %5450 = vmatpush.bf16.msra.mxu2 %v7070_v61  ;;  %v7627_v61 = vld [vmem:[%s14959_s1 + $0x9f4] sm:$0xf0]  ;;  %v7750_v44 = vor.u32 %v9773_v37, %v7747_v38  ;;  %v7847_v37 = vld [vmem:[%s14959_s1 + $0xbac] sm:$0xf0] }
 0x1d7   :  { %5463 = vmatpush.bf16.msra.mxu3 %v7230_v23  ;;  %v9823_v23 = vld [vmem:[%s14959_s1 + $0xc64] sm:$0xf]  ;;  %v7630_v10 = vor.u32 %v9743_v58, %v7627_v61  ;;  %v7887_v58 = vld [vmem:[%s14959_s1 + $0xbfc] sm:$0xf0] }
 0x1d8   :  { %5425 = vmatpush.bf16.msra.mxu0 %v6730_v19  ;;  %v9738_v19 = vld [vmem:[%s14959_s1 + $0x9bc] sm:$0xf]  ;;  %v7950_v5 = vor.u32 %v9823_v23, %v7947_v7  ;;  %v9723_v23 = vld [vmem:[%s14959_s1 + $0x944] sm:$0xf] }
 0x1d9   :  { %5438 = vmatpush.bf16.msra.mxu1 %v6890_v25  ;;  %v7607_v25 = vld [vmem:[%s14959_s1 + $0x9cc] sm:$0xf0] }
 0x1da   :  { %5451 = vmatpush.bf16.msra.mxu2 %v7050_v27  ;;  %v9778_v27 = vld [vmem:[%s14959_s1 + $0xafc] sm:$0xf] }
 0x1db   :  { %5464 = vmatpush.bf16.msra.mxu3 %v7210_v31  ;;  %v7610_v31 = vor.u32 %v9738_v19, %v7607_v25  ;;  %v7770_v32 = vor.u32 %v9778_v27, %v7767_v36  ;;  %v9678_v36 = vld [vmem:[%s14959_s1 + $0x7dc] sm:$0xf] }
 0x1dc   :  { %5426 = vmatpush.bf16.msra.mxu0 %v6710_v35  ;;  %v7587_v35 = vld [vmem:[%s14959_s1 + $0x9a4] sm:$0xf0]  ;;  %v7370_v38 = vor.u32 %v9678_v36, %v7367_v28  ;;  %v9943_v36 = vld [vmem:[%s14959_s1 + $0x1024] sm:$0xf]  ;;  %v8427_v28 = vld [vmem:[%s14959_s1 + $0x1034] sm:$0xf0] }
 0x1dd   :  { %5439 = vmatpush.bf16.msra.mxu1 %v6870_v39  ;;  %v9813_v39 = vld [vmem:[%s14959_s1 + $0xc14] sm:$0xf]  ;;  %v7590_v42 = vor.u32 %v9733_v57, %v7587_v35  ;;  %v9798_v35 = vld [vmem:[%s14959_s1 + $0xb9c] sm:$0xf] }
 0x1de   :  { %5452 = vmatpush.bf16.msra.mxu2 %v7030_v40  ;;  %v7907_v40 = vld [vmem:[%s14959_s1 + $0xc24] sm:$0xf0] }
 0x1df   :  { %5465 = vmatpush.bf16.msra.mxu3 %v7190_v63  ;;  %v7407_v63 = vld [vmem:[%s14959_s1 + $0x83c] sm:$0xf0]  ;;  %v7910_v51 = vor.u32 %v9813_v39, %v7907_v40 }
 0x1e0   :  { %5427 = vmatpush.bf16.msra.mxu0 %v6690_v59  ;;  %v7410_v59 = vor.u32 %v9688_v45, %v7407_v63  ;;  %v5221_v61 = vpop.f32.mrf.mxu0  ;;  %v7347_v45 = vld [vmem:[%s14959_s1 + $0x7c4] sm:$0xf0]  ;;  %v9713_v63 = vld [vmem:[%s14959_s1 + $0x8f4] sm:$0xf] }
 0x1e1   :  { %5440 = vmatpush.bf16.msra.mxu1 %v6850_v14  ;;  %v9683_v14 = vld [vmem:[%s14959_s1 + $0x804] sm:$0xf]  ;;  %v5222_v7 = vadd.f32 %v5221_v61, %v13237_v24  ;;  %v7867_v24 = vld [vmem:[%s14959_s1 + $0xbd4] sm:$0xf0]  ;;  %v9668_v61 = vld [vmem:[%s14959_s1 + $0x78c] sm:$0xf] }
 0x1e2   :  { %5453 = vmatpush.bf16.msra.mxu2 %v7010_v4  ;;  %v7387_v4 = vld [vmem:[%s14959_s1 + $0x814] sm:$0xf0] }
 0x1e3   :  { %5466 = vmatpush.bf16.msra.mxu3 %v7170_v8  ;;  %5428 = vmatmul.bf16.vlgmr.msra.gmra.mxu0 %v10580_v20  ;;  %v5234_v8 = vpop.f32.mrf.mxu1 }
 0x1e4   :  { %5472 = vmatpush.bf16.msrb.mxu0 %v7470_v9  ;;  %5441 = vmatmul.bf16.vlgmr.msra.gmra.mxu1 %v10584_v22  ;;  %v7890_v9 = vor.u32 %v9808_v56, %v7887_v58  ;;  %v5235_v19 = vadd.f32 %v5234_v8, %v5222_v7  ;;  %v9793_v56 = vld [vmem:[%s14959_s1 + $0xb74] sm:$0xf]  ;;  %v7827_v58 = vld [vmem:[%s14959_s1 + $0xb84] sm:$0xf0]  ;;  %v9748_v7 = vld [vmem:[%s14959_s1 + $0xa0c] sm:$0xf] }
 0x1e5   :  { %5485 = vmatpush.bf16.msrb.mxu1 %v7630_v10  ;;  %5454 = vmatmul.bf16.vlgmr.msra.gmra.mxu2 %v10675_v0  ;;  %v7547_v10 = vld [vmem:[%s14959_s1 + $0x954] sm:$0xf0] }
 0x1e6   :  { %5498 = vmatpush.bf16.msrb.mxu2 %v7790_v11  ;;  %5467 = vmatmul.bf16.vlgmr.msra.gmra.mxu3 %v10679_v2  ;;  %v9763_v11 = vld [vmem:[%s14959_s1 + $0xa84] sm:$0xf]  ;;  %v7550_v25 = vor.u32 %v9723_v23, %v7547_v10  ;;  %v7487_v23 = vld [vmem:[%s14959_s1 + $0x8dc] sm:$0xf0] }
 0x1e7   :  { %5511 = vmatpush.bf16.msrb.mxu3 %v7950_v5  ;;  %v7390_v5 = vor.u32 %v9683_v14, %v7387_v4  ;;  %v7710_v27 = vor.u32 %v9763_v11, %v7707_v13  ;;  %v7670_v14 = vor.u32 %v9753_v52, %v7667_v53  ;;  %v9708_v4 = vld [vmem:[%s14959_s1 + $0x8cc] sm:$0xf]  ;;  %v7647_v10 = vld [vmem:[%s14959_s1 + $0xa1c] sm:$0xf0]  ;;  %v9853_v52 = vld [vmem:[%s14959_s1 + $0xd54] sm:$0xf] }
 0x1e8   :  { %5473 = vmatpush.bf16.msrb.mxu0 %v7450_v30  ;;  %v5247_v30 = vpop.f32.mrf.mxu2  ;;  %v5223_v40 = vpop.f32.mrf.mxu0  ;;  %v9788_v11 = vld [vmem:[%s14959_s1 + $0xb4c] sm:$0xf]  ;;  %v7807_v13 = vld [vmem:[%s14959_s1 + $0xb5c] sm:$0xf0]  ;;  %v8067_v53 = vld [vmem:[%s14959_s1 + $0xd64] sm:$0xf0] }
 0x1e9   :  { %5486 = vmatpush.bf16.msrb.mxu1 %v7610_v31  ;;  %v7870_v31 = vor.u32 %v9803_v18, %v7867_v24  ;;  %v5248_v57 = vadd.f32 %v5247_v30, %v5235_v19  ;;  %v9863_v24 = vld [vmem:[%s14959_s1 + $0xda4] sm:$0xf]  ;;  %v8107_v19 = vld [vmem:[%s14959_s1 + $0xdb4] sm:$0xf0]  ;;  %v7650_v30 = vor.u32 %v9748_v7, %v7647_v10  ;;  %v9888_v10 = vld [vmem:[%s14959_s1 + $0xe6c] sm:$0xf] }
 0x1ea   :  { %5499 = vmatpush.bf16.msrb.mxu2 %v7770_v32  ;;  %v7527_v32 = vld [vmem:[%s14959_s1 + $0x92c] sm:$0xf0] }
 0x1eb   :  { %5512 = vmatpush.bf16.msrb.mxu3 %v7930_v34  ;;  %v5260_v34 = vpop.f32.mrf.mxu3  ;;  %v5236_v50 = vpop.f32.mrf.mxu1 }
 0x1ec   :  { %5474 = vmatpush.bf16.msrb.mxu0 %v7430_v41  ;;  %v13436_v39 = vadd.f32 %v5260_v34, %v5248_v57  ;;  %v7530_v41 = vor.u32 %v9718_v29, %v7527_v32  ;;  %v7490_v29 = vor.u32 %v9708_v4, %v7487_v23  ;;  %v8587_v32 = vld [vmem:[%s14959_s1 + $0x1174] sm:$0xf0]  ;;  %v8430_v34 = vor.u32 %v9943_v36, %v8427_v28 }
 0x1ed   :  { %5487 = vmatpush.bf16.msrb.mxu1 %v7590_v42  ;;  %v7690_v42 = vor.u32 %v9758_v43, %v7687_v33  ;;  %v7810_v43 = vor.u32 %v9788_v11, %v7807_v13  ;;  %v8110_v33 = vor.u32 %v9863_v24, %v8107_v19  ;;  %v8070_v4 = vor.u32 %v9853_v52, %v8067_v53  ;;  %v8207_v13 = vld [vmem:[%s14959_s1 + $0xe7c] sm:$0xf0]  ;;  %v9918_v52 = vld [vmem:[%s14959_s1 + $0xf5c] sm:$0xf]  ;;  %v8327_v53 = vld [vmem:[%s14959_s1 + $0xf6c] sm:$0xf0] }
 0x1ee   :  { %5500 = vmatpush.bf16.msrb.mxu2 %v7750_v44  ;;  %v9673_v44 = vld [vmem:[%s14959_s1 + $0x7b4] sm:$0xf]  ;;  %v8367_v24 = vld [vmem:[%s14959_s1 + $0xfbc] sm:$0xf0] }
 0x1ef   :  { %5513 = vmatpush.bf16.msrb.mxu3 %v7910_v51  ;;  %v7850_v51 = vor.u32 %v9798_v35, %v7847_v37  ;;  %v9858_v35 = vld [vmem:[%s14959_s1 + $0xd7c] sm:$0xf]  ;;  %v8087_v37 = vld [vmem:[%s14959_s1 + $0xd8c] sm:$0xf0] }
 0x1f0   :  { %5475 = vmatpush.bf16.msrb.mxu0 %v7410_v59  ;;  %v7350_v59 = vor.u32 %v9673_v44, %v7347_v45  ;;  %v5249_v8 = vpop.f32.mrf.mxu2  ;;  %v8407_v44 = vld [vmem:[%s14959_s1 + $0x100c] sm:$0xf0]  ;;  %v9978_v45 = vld [vmem:[%s14959_s1 + $0x113c] sm:$0xf]  ;;  %v8090_v50 = vor.u32 %v9858_v35, %v8087_v37  ;;  %v8347_v35 = vld [vmem:[%s14959_s1 + $0xf94] sm:$0xf0] }
 0x1f1   :  { %5488 = vmatpush.bf16.msrb.mxu1 %v7570_v62  ;;  %v7327_v62 = vld [vmem:[%s14959_s1 + $0x79c] sm:$0xf0]  ;;  %v9848_v8 = vld [vmem:[%s14959_s1 + $0xd2c] sm:$0xf]  ;;  %v9963_v37 = vld [vmem:[%s14959_s1 + $0x10c4] sm:$0xf] }
 0x1f2   :  { %5501 = vmatpush.bf16.msrb.mxu2 %v7730_v3  ;;  %v7510_v3 = vor.u32 %v9713_v63, %v7507_v55  ;;  %v8567_v63 = vld [vmem:[%s14959_s1 + $0x114c] sm:$0xf0] }
 0x1f3   :  { %5514 = vmatpush.bf16.msrb.mxu3 %v7890_v9  ;;  %v7830_v9 = vor.u32 %v9793_v56, %v7827_v58  ;;  %v5262_v18 = vpop.f32.mrf.mxu3  ;;  %v9893_v56 = vld [vmem:[%s14959_s1 + $0xe94] sm:$0xf]  ;;  %v8570_v58 = vor.u32 %v9978_v45, %v8567_v63  ;;  %v8007_v45 = vld [vmem:[%s14959_s1 + $0xcec] sm:$0xf0]  ;;  %v9878_v63 = vld [vmem:[%s14959_s1 + $0xe1c] sm:$0xf] }
 0x1f4   :  { %5476 = vmatpush.bf16.msrb.mxu0 %v7390_v5  ;;  %v9903_v5 = vld [vmem:[%s14959_s1 + $0xee4] sm:$0xf]  ;;  %v9928_v18 = vld [vmem:[%s14959_s1 + $0xfac] sm:$0xf] }
 0x1f5   :  { %5489 = vmatpush.bf16.msrb.mxu1 %v7550_v25  ;;  %v7330_v25 = vor.u32 %v9668_v61, %v7327_v62  ;;  %v9933_v61 = vld [vmem:[%s14959_s1 + $0xfd4] sm:$0xf]  ;;  %v8387_v62 = vld [vmem:[%s14959_s1 + $0xfe4] sm:$0xf0] }
 0x1f6   :  { %5502 = vmatpush.bf16.msrb.mxu2 %v7710_v27  ;;  %v8267_v27 = vld [vmem:[%s14959_s1 + $0xef4] sm:$0xf0]  ;;  %v8390_v7 = vor.u32 %v9933_v61, %v8387_v62  ;;  %v8487_v61 = vld [vmem:[%s14959_s1 + $0x10ac] sm:$0xf0] }
 0x1f7   :  { %5515 = vmatpush.bf16.msrb.mxu3 %v7870_v31  ;;  %v9983_v31 = vld [vmem:[%s14959_s1 + $0x1164] sm:$0xf]  ;;  %v8270_v57 = vor.u32 %v9903_v5, %v8267_v27  ;;  %v9968_v5 = vld [vmem:[%s14959_s1 + $0x10ec] sm:$0xf] }
 0x1f8   :  { %5477 = vmatpush.bf16.msrb.mxu0 %v7370_v38  ;;  %v9898_v38 = vld [vmem:[%s14959_s1 + $0xebc] sm:$0xf]  ;;  %v8590_v40 = vor.u32 %v9983_v31, %v8587_v32  ;;  %v9843_v31 = vld [vmem:[%s14959_s1 + $0xd04] sm:$0xf]  ;;  %v8027_v32 = vld [vmem:[%s14959_s1 + $0xd14] sm:$0xf0] }
 0x1f9   :  { %5490 = vmatpush.bf16.msrb.mxu1 %v7530_v41  ;;  %v8247_v41 = vld [vmem:[%s14959_s1 + $0xecc] sm:$0xf0] }
 0x1fa   :  { %5503 = vmatpush.bf16.msrb.mxu2 %v7690_v42  ;;  %v9938_v42 = vld [vmem:[%s14959_s1 + $0xffc] sm:$0xf] }
 0x1fb   :  { %5516 = vmatpush.bf16.msrb.mxu3 %v7850_v51  ;;  %v8250_v51 = vor.u32 %v9898_v38, %v8247_v41  ;;  %v8410_v55 = vor.u32 %v9938_v42, %v8407_v44  ;;  %v8507_v38 = vld [vmem:[%s14959_s1 + $0x10d4] sm:$0xf0]  ;;  %v9838_v44 = vld [vmem:[%s14959_s1 + $0xcdc] sm:$0xf] }
 0x1fc   :  { %5478 = vmatpush.bf16.msrb.mxu0 %v7350_v59  ;;  %v8227_v59 = vld [vmem:[%s14959_s1 + $0xea4] sm:$0xf0] }
 0x1fd   :  { %5491 = vmatpush.bf16.msrb.mxu1 %v7510_v3  ;;  %v9973_v3 = vld [vmem:[%s14959_s1 + $0x1114] sm:$0xf]  ;;  %v8230_v23 = vor.u32 %v9893_v56, %v8227_v59  ;;  %v9958_v59 = vld [vmem:[%s14959_s1 + $0x109c] sm:$0xf] }
 0x1fe   :  { %5504 = vmatpush.bf16.msrb.mxu2 %v7670_v14  ;;  %v8547_v14 = vld [vmem:[%s14959_s1 + $0x1124] sm:$0xf0] }
 0x1ff   :  { %5517 = vmatpush.bf16.msrb.mxu3 %v7830_v9  ;;  %v8047_v9 = vld [vmem:[%s14959_s1 + $0xd3c] sm:$0xf0]  ;;  %v8550_v11 = vor.u32 %v9973_v3, %v8547_v14  ;;  %v8010_v3 = vor.u32 %v9838_v44, %v8007_v45  ;;  %v10103_v44 = vld [vmem:[%s14959_s1 + $0x1524] sm:$0xf]  ;;  %v9067_v45 = vld [vmem:[%s14959_s1 + $0x1534] sm:$0xf0] }
 0x200   :  { %5479 = vmatpush.bf16.msrb.mxu0 %v7330_v25  ;;  %v5273_v19 = vpop.f32.mrf.mxu0  ;;  %v8527_v25 = vld [vmem:[%s14959_s1 + $0x10fc] sm:$0xf0]  ;;  %v8050_v36 = vor.u32 %v9848_v8, %v8047_v9  ;;  %v9833_v8 = vld [vmem:[%s14959_s1 + $0xcb4] sm:$0xf]  ;;  %v7987_v9 = vld [vmem:[%s14959_s1 + $0xcc4] sm:$0xf0] }
 0x201   :  { %5492 = vmatpush.bf16.msrb.mxu1 %v7490_v29  ;;  %v5274_v27 = vadd.f32 %v5273_v19, %v13436_v39  ;;  %v5286_v28 = vpop.f32.mrf.mxu1  ;;  %v8210_v29 = vor.u32 %v9888_v10, %v8207_v13  ;;  %v8530_v39 = vor.u32 %v9968_v5, %v8527_v25  ;;  %v9873_v10 = vld [vmem:[%s14959_s1 + $0xdf4] sm:$0xf]  ;;  %v8147_v13 = vld [vmem:[%s14959_s1 + $0xe04] sm:$0xf0]  ;;  %v7990_v25 = vor.u32 %v9833_v8, %v7987_v9  ;;  %v10138_v8 = vld [vmem:[%s14959_s1 + $0x163c] sm:$0xf] }
 0x202   :  { %5505 = vmatpush.bf16.msrb.mxu2 %v7650_v30  ;;  %v8370_v30 = vor.u32 %v9928_v18, %v8367_v24  ;;  %v9913_v18 = vld [vmem:[%s14959_s1 + $0xf34] sm:$0xf]  ;;  %v8307_v24 = vld [vmem:[%s14959_s1 + $0xf44] sm:$0xf0]  ;;  %v9207_v9 = vld [vmem:[%s14959_s1 + $0x164c] sm:$0xf0] }
 0x203   :  { %5518 = vmatpush.bf16.msrb.mxu3 %v7810_v43  ;;  %5480 = vmatmul.bf16.vlgmr.msrb.gmra.mxu0 %v10670_v60  ;;  %v9883_v43 = vld [vmem:[%s14959_s1 + $0xe44] sm:$0xf]  ;;  %v9953_v19 = vld [vmem:[%s14959_s1 + $0x1074] sm:$0xf]  ;;  %v8467_v5 = vld [vmem:[%s14959_s1 + $0x1084] sm:$0xf0] }
 0x204   :  { %5524 = vmatpush.bf16.msra.mxu0 %v8110_v33  ;;  %5493 = vmatmul.bf16.vlgmr.msrb.gmra.mxu1 %v10677_v1  ;;  %v5287_v33 = vadd.f32 %v5286_v28, %v5274_v27  ;;  %v9828_v27 = vld [vmem:[%s14959_s1 + $0xc8c] sm:$0xf]  ;;  %v8150_v28 = vor.u32 %v9873_v10, %v8147_v13 }
 0x205   :  { %5537 = vmatpush.bf16.msra.mxu1 %v8270_v57  ;;  %5506 = vmatmul.bf16.vlgmr.msrb.gmra.mxu2 %v10925_v12  ;;  %v8187_v57 = vld [vmem:[%s14959_s1 + $0xe54] sm:$0xf0] }
 0x206   :  { %5550 = vmatpush.bf16.msra.mxu2 %v8430_v34  ;;  %5519 = vmatmul.bf16.vlgmr.msrb.gmra.mxu3 %v10935_v16  ;;  %v9923_v34 = vld [vmem:[%s14959_s1 + $0xf84] sm:$0xf]  ;;  %v8190_v41 = vor.u32 %v9883_v43, %v8187_v57  ;;  %v8470_v43 = vor.u32 %v9953_v19, %v8467_v5  ;;  %v8447_v57 = vld [vmem:[%s14959_s1 + $0x105c] sm:$0xf0]  ;;  %v10053_v19 = vld [vmem:[%s14959_s1 + $0x1394] sm:$0xf]  ;;  %v9210_v5 = vor.u32 %v10138_v8, %v9207_v9 }
 0x207   :  { %5563 = vmatpush.bf16.msra.mxu3 %v8590_v40  ;;  %v8030_v40 = vor.u32 %v9843_v31, %v8027_v32  ;;  %v8350_v42 = vor.u32 %v9923_v34, %v8347_v35  ;;  %v8127_v31 = vld [vmem:[%s14959_s1 + $0xddc] sm:$0xf0]  ;;  %v9908_v32 = vld [vmem:[%s14959_s1 + $0xf0c] sm:$0xf]  ;;  %v10023_v35 = vld [vmem:[%s14959_s1 + $0x12a4] sm:$0xf] }
 0x208   :  { %5525 = vmatpush.bf16.msra.mxu0 %v8090_v50  ;;  %v8510_v50 = vor.u32 %v9963_v37, %v8507_v38  ;;  %v5275_v62 = vpop.f32.mrf.mxu0  ;;  %v8747_v37 = vld [vmem:[%s14959_s1 + $0x12b4] sm:$0xf0]  ;;  %v10063_v38 = vld [vmem:[%s14959_s1 + $0x13e4] sm:$0xf]  ;;  %v8647_v8 = vld [vmem:[%s14959_s1 + $0x11ec] sm:$0xf0] }
 0x209   :  { %5538 = vmatpush.bf16.msra.mxu1 %v8250_v51  ;;  %v5299_v51 = vpop.f32.mrf.mxu2  ;;  %v5288_v14 = vpop.f32.mrf.mxu1  ;;  %v10058_v62 = vld [vmem:[%s14959_s1 + $0x13bc] sm:$0xf] }
 0x20a   :  { %5551 = vmatpush.bf16.msra.mxu2 %v8410_v55  ;;  %v8167_v55 = vld [vmem:[%s14959_s1 + $0xe2c] sm:$0xf0]  ;;  %v5300_v56 = vadd.f32 %v5299_v51, %v5287_v33  ;;  %v9948_v33 = vld [vmem:[%s14959_s1 + $0x104c] sm:$0xf]  ;;  %v10143_v51 = vld [vmem:[%s14959_s1 + $0x1664] sm:$0xf] }
 0x20b   :  { %5564 = vmatpush.bf16.msra.mxu3 %v8570_v58  ;;  %v5312_v58 = vpop.f32.mrf.mxu3  ;;  %v8887_v14 = vld [vmem:[%s14959_s1 + $0x13cc] sm:$0xf0]  ;;  %v10038_v9 = vld [vmem:[%s14959_s1 + $0x131c] sm:$0xf] }
 0x20c   :  { %5526 = vmatpush.bf16.msra.mxu0 %v8070_v4  ;;  %v13635_v4 = vadd.f32 %v5312_v58, %v5300_v56  ;;  %v9070_v58 = vor.u32 %v10103_v44, %v9067_v45 }
 0x20d   :  { %5539 = vmatpush.bf16.msra.mxu1 %v8230_v23  ;;  %v8170_v23 = vor.u32 %v9878_v63, %v8167_v55  ;;  %v9227_v55 = vld [vmem:[%s14959_s1 + $0x1674] sm:$0xf0] }
 0x20e   :  { %5552 = vmatpush.bf16.msra.mxu2 %v8390_v7  ;;  %v8330_v7 = vor.u32 %v9918_v52, %v8327_v53  ;;  %v8450_v52 = vor.u32 %v9948_v33, %v8447_v57  ;;  %v8750_v53 = vor.u32 %v10023_v35, %v8747_v37  ;;  %v10048_v33 = vld [vmem:[%s14959_s1 + $0x136c] sm:$0xf]  ;;  %v9007_v37 = vld [vmem:[%s14959_s1 + $0x14bc] sm:$0xf0] }
 0x20f   :  { %5565 = vmatpush.bf16.msra.mxu3 %v8550_v11  ;;  %v8490_v11 = vor.u32 %v9958_v59, %v8487_v61  ;;  %v10018_v59 = vld [vmem:[%s14959_s1 + $0x127c] sm:$0xf]  ;;  %v8727_v61 = vld [vmem:[%s14959_s1 + $0x128c] sm:$0xf0]  ;;  %v10088_v35 = vld [vmem:[%s14959_s1 + $0x14ac] sm:$0xf] }
 0x210   :  { %5527 = vmatpush.bf16.msra.mxu0 %v8050_v36  ;;  %v7967_v36 = vld [vmem:[%s14959_s1 + $0xc9c] sm:$0xf0]  ;;  %v8730_v10 = vor.u32 %v10018_v59, %v8727_v61  ;;  %v8987_v59 = vld [vmem:[%s14959_s1 + $0x1494] sm:$0xf0]  ;;  %v10123_v61 = vld [vmem:[%s14959_s1 + $0x15c4] sm:$0xf] }
 0x211   :  { %5540 = vmatpush.bf16.msra.mxu1 %v8210_v29  ;;  %v8310_v29 = vor.u32 %v9913_v18, %v8307_v24  ;;  %v5301_v34 = vpop.f32.mrf.mxu2  ;;  %v10013_v18 = vld [vmem:[%s14959_s1 + $0x1254] sm:$0xf]  ;;  %v8707_v24 = vld [vmem:[%s14959_s1 + $0x1264] sm:$0xf0] }
 0x212   :  { %5553 = vmatpush.bf16.msra.mxu2 %v8370_v30  ;;  %v9868_v30 = vld [vmem:[%s14959_s1 + $0xdcc] sm:$0xf]  ;;  %v8847_v34 = vld [vmem:[%s14959_s1 + $0x137c] sm:$0xf0] }
 0x213   :  { %5566 = vmatpush.bf16.msra.mxu3 %v8530_v39  ;;  %v8287_v39 = vld [vmem:[%s14959_s1 + $0xf1c] sm:$0xf0]  ;;  %v8130_v63 = vor.u32 %v9868_v30, %v8127_v31  ;;  %v8710_v30 = vor.u32 %v10013_v18, %v8707_v24  ;;  %v10078_v18 = vld [vmem:[%s14959_s1 + $0x145c] sm:$0xf]  ;;  %v8967_v24 = vld [vmem:[%s14959_s1 + $0x146c] sm:$0xf0] }
 0x214   :  { %5528 = vmatpush.bf16.msra.mxu0 %v8030_v40  ;;  %v5314_v40 = vpop.f32.mrf.mxu3 }
 0x215   :  { %5541 = vmatpush.bf16.msra.mxu1 %v8190_v41  ;;  %v7970_v41 = vor.u32 %v9828_v27, %v7967_v36  ;;  %v10093_v27 = vld [vmem:[%s14959_s1 + $0x14d4] sm:$0xf]  ;;  %v9027_v36 = vld [vmem:[%s14959_s1 + $0x14e4] sm:$0xf0]  ;;  %v10128_v40 = vld [vmem:[%s14959_s1 + $0x15ec] sm:$0xf] }
 0x216   :  { %5554 = vmatpush.bf16.msra.mxu2 %v8350_v42  ;;  %v8907_v42 = vld [vmem:[%s14959_s1 + $0x13f4] sm:$0xf0] }
 0x217   :  { %5567 = vmatpush.bf16.msra.mxu3 %v8510_v50  ;;  %v8290_v50 = vor.u32 %v9908_v32, %v8287_v39  ;;  %v8910_v56 = vor.u32 %v10063_v38, %v8907_v42  ;;  %v9030_v32 = vor.u32 %v10093_v27, %v9027_v36  ;;  %v8687_v39 = vld [vmem:[%s14959_s1 + $0x123c] sm:$0xf0]  ;;  %v9127_v27 = vld [vmem:[%s14959_s1 + $0x15ac] sm:$0xf0] }
 0x218   :  { %5529 = vmatpush.bf16.msra.mxu0 %v8010_v3  ;;  %v9230_v3 = vor.u32 %v10143_v51, %v9227_v55  ;;  %v10003_v51 = vld [vmem:[%s14959_s1 + $0x1204] sm:$0xf]  ;;  %v8667_v55 = vld [vmem:[%s14959_s1 + $0x1214] sm:$0xf0] }
 0x219   :  { %5542 = vmatpush.bf16.msra.mxu1 %v8170_v23  ;;  %v10098_v23 = vld [vmem:[%s14959_s1 + $0x14fc] sm:$0xf] }
 0x21a   :  { %5555 = vmatpush.bf16.msra.mxu2 %v8330_v7  ;;  %v9047_v7 = vld [vmem:[%s14959_s1 + $0x150c] sm:$0xf0] }
 0x21b   :  { %5568 = vmatpush.bf16.msra.mxu3 %v8490_v11  ;;  %v8890_v11 = vor.u32 %v10058_v62, %v8887_v14  ;;  %v9050_v13 = vor.u32 %v10098_v23, %v9047_v7  ;;  %v9147_v62 = vld [vmem:[%s14959_s1 + $0x15d4] sm:$0xf0]  ;;  %v9998_v7 = vld [vmem:[%s14959_s1 + $0x11dc] sm:$0xf] }
 0x21c   :  { %5530 = vmatpush.bf16.msra.mxu0 %v7990_v25  ;;  %v8867_v25 = vld [vmem:[%s14959_s1 + $0x13a4] sm:$0xf0] }
 0x21d   :  { %5543 = vmatpush.bf16.msra.mxu1 %v8150_v28  ;;  %v10133_v28 = vld [vmem:[%s14959_s1 + $0x1614] sm:$0xf]  ;;  %v8870_v31 = vor.u32 %v10053_v19, %v8867_v25  ;;  %v10118_v25 = vld [vmem:[%s14959_s1 + $0x159c] sm:$0xf] }
 0x21e   :  { %5556 = vmatpush.bf16.msra.mxu2 %v8310_v29  ;;  %v9187_v29 = vld [vmem:[%s14959_s1 + $0x1624] sm:$0xf0] }
 0x21f   :  { %5569 = vmatpush.bf16.msra.mxu3 %v8470_v43  ;;  %v10008_v43 = vld [vmem:[%s14959_s1 + $0x122c] sm:$0xf]  ;;  %v9190_v57 = vor.u32 %v10133_v28, %v9187_v29  ;;  %v8650_v28 = vor.u32 %v9998_v7, %v8647_v8  ;;  %v6833_v7 = vld [vmem:[%s14959_s1 + $0x3a8] sm:$0xf]  ;;  %v9546_v8 = vld [vmem:[%s14959_s1 + $0x3b8] sm:$0xf0] }
 0x220   :  { %5531 = vmatpush.bf16.msra.mxu0 %v7970_v41  ;;  %v5325_v38 = vpop.f32.mrf.mxu0  ;;  %v9167_v41 = vld [vmem:[%s14959_s1 + $0x15fc] sm:$0xf0]  ;;  %v8690_v44 = vor.u32 %v10008_v43, %v8687_v39  ;;  %v9993_v43 = vld [vmem:[%s14959_s1 + $0x11b4] sm:$0xf]  ;;  %v8627_v39 = vld [vmem:[%s14959_s1 + $0x11c4] sm:$0xf0] }
 0x221   :  { %5544 = vmatpush.bf16.msra.mxu1 %v8130_v63  ;;  %v5326_v42 = vadd.f32 %v5325_v38, %v13635_v4  ;;  %v5338_v45 = vpop.f32.mrf.mxu1  ;;  %v8850_v63 = vor.u32 %v10048_v33, %v8847_v34  ;;  %v9170_v4 = vor.u32 %v10128_v40, %v9167_v41  ;;  %v10033_v33 = vld [vmem:[%s14959_s1 + $0x12f4] sm:$0xf]  ;;  %v8787_v34 = vld [vmem:[%s14959_s1 + $0x1304] sm:$0xf0]  ;;  %v8630_v41 = vor.u32 %v9993_v43, %v8627_v39  ;;  %v6973_v43 = vld [vmem:[%s14959_s1 + $0x4c0] sm:$0xf] }
 0x222   :  { %5557 = vmatpush.bf16.msra.mxu2 %v8290_v50  ;;  %v9010_v50 = vor.u32 %v10088_v35, %v9007_v37  ;;  %v10073_v35 = vld [vmem:[%s14959_s1 + $0x1434] sm:$0xf]  ;;  %v8947_v37 = vld [vmem:[%s14959_s1 + $0x1444] sm:$0xf0] }
 0x223   :  { %5570 = vmatpush.bf16.msra.mxu3 %v8450_v52  ;;  %5532 = vmatmul.bf16.vlgmr.msra.gmra.mxu0 %v10933_v15  ;;  %v10043_v52 = vld [vmem:[%s14959_s1 + $0x1344] sm:$0xf]  ;;  %v10113_v38 = vld [vmem:[%s14959_s1 + $0x1574] sm:$0xf]  ;;  %v9107_v40 = vld [vmem:[%s14959_s1 + $0x1584] sm:$0xf0] }
 0x224   :  { %5576 = vmatpush.bf16.msrb.mxu0 %v8750_v53  ;;  %5545 = vmatmul.bf16.vlgmr.msra.gmra.mxu1 %v10937_v17  ;;  %v5339_v53 = vadd.f32 %v5338_v45, %v5326_v42  ;;  %v9988_v42 = vld [vmem:[%s14959_s1 + $0x118c] sm:$0xf]  ;;  %v8790_v45 = vor.u32 %v10033_v33, %v8787_v34  ;;  %v9581_v39 = vld [vmem:[%s14959_s1 + $0x4d0] sm:$0xf0] }
 0x225   :  { %5589 = vmatpush.bf16.msrb.mxu1 %v8910_v56  ;;  %5558 = vmatmul.bf16.vlgmr.msra.gmra.mxu2 %v11099_v46  ;;  %v8827_v56 = vld [vmem:[%s14959_s1 + $0x1354] sm:$0xf0] }
 0x226   :  { %5602 = vmatpush.bf16.msrb.mxu2 %v9070_v58  ;;  %5571 = vmatmul.bf16.vlgmr.msra.gmra.mxu3 %v11103_v48  ;;  %v10083_v58 = vld [vmem:[%s14959_s1 + $0x1484] sm:$0xf]  ;;  %v8830_v14 = vor.u32 %v10043_v52, %v8827_v56  ;;  %v9110_v52 = vor.u32 %v10113_v38, %v9107_v40  ;;  %v9087_v56 = vld [vmem:[%s14959_s1 + $0x155c] sm:$0xf0]  ;;  %v6633_v38 = vld [vmem:[%s14959_s1 + $0x218] sm:$0xf]  ;;  %v6974_v40 = vor.u32 %v9581_v39, %v6973_v43 }
 0x227   :  { %5615 = vmatpush.bf16.msrb.mxu3 %v9230_v3  ;;  %v8670_v3 = vor.u32 %v10003_v51, %v8667_v55  ;;  %v8990_v23 = vor.u32 %v10083_v58, %v8987_v59  ;;  %v8767_v51 = vld [vmem:[%s14959_s1 + $0x12dc] sm:$0xf0]  ;;  %v10068_v55 = vld [vmem:[%s14959_s1 + $0x140c] sm:$0xf]  ;;  %v6513_v59 = vld [vmem:[%s14959_s1 + $0x128] sm:$0xf] }
 0x228   :  { %5577 = vmatpush.bf16.msrb.mxu0 %v8730_v10  ;;  %v9150_v10 = vor.u32 %v10123_v61, %v9147_v62  ;;  %v5327_v36 = vpop.f32.mrf.mxu0  ;;  %v9466_v61 = vld [vmem:[%s14959_s1 + $0x138] sm:$0xf0]  ;;  %v6673_v62 = vld [vmem:[%s14959_s1 + $0x268] sm:$0xf]  ;;  %v6413_v39 = vld [vmem:[%s14959_s1 + $0x60] sm:$0xf] }
 0x229   :  { %5590 = vmatpush.bf16.msrb.mxu1 %v8890_v11  ;;  %v5351_v11 = vpop.f32.mrf.mxu2  ;;  %v5340_v29 = vpop.f32.mrf.mxu1  ;;  %v6653_v36 = vld [vmem:[%s14959_s1 + $0x240] sm:$0xf] }
 0x22a   :  { %5603 = vmatpush.bf16.msrb.mxu2 %v9050_v13  ;;  %v8807_v13 = vld [vmem:[%s14959_s1 + $0x132c] sm:$0xf0]  ;;  %v5352_v19 = vadd.f32 %v5351_v11, %v5339_v53  ;;  %v10108_v53 = vld [vmem:[%s14959_s1 + $0x154c] sm:$0xf]  ;;  %v6993_v11 = vld [vmem:[%s14959_s1 + $0x4e8] sm:$0xf] }
 0x22b   :  { %5616 = vmatpush.bf16.msrb.mxu3 %v9210_v5  ;;  %v5364_v5 = vpop.f32.mrf.mxu3  ;;  %v9501_v29 = vld [vmem:[%s14959_s1 + $0x250] sm:$0xf0] }
 0x22c   :  { %5578 = vmatpush.bf16.msrb.mxu0 %v8710_v30  ;;  %v13834_v30 = vadd.f32 %v5364_v5, %v5352_v19  ;;  %v6834_v5 = vor.u32 %v9546_v8, %v6833_v7  ;;  %v9571_v7 = vld [vmem:[%s14959_s1 + $0x480] sm:$0xf0] }
 0x22d   :  { %5591 = vmatpush.bf16.msrb.mxu1 %v8870_v31  ;;  %v8810_v31 = vor.u32 %v10038_v9, %v8807_v13  ;;  %v9586_v13 = vld [vmem:[%s14959_s1 + $0x4f8] sm:$0xf0] }
 0x22e   :  { %5604 = vmatpush.bf16.msrb.mxu2 %v9030_v32  ;;  %v8970_v32 = vor.u32 %v10078_v18, %v8967_v24  ;;  %v9090_v18 = vor.u32 %v10108_v53, %v9087_v56  ;;  %v6514_v24 = vor.u32 %v9466_v61, %v6513_v59  ;;  %v6453_v53 = vld [vmem:[%s14959_s1 + $0xb0] sm:$0xf]  ;;  %v9451_v56 = vld [vmem:[%s14959_s1 + $0xc0] sm:$0xf0] }
 0x22f   :  { %5617 = vmatpush.bf16.msrb.mxu3 %v9190_v57  ;;  %v9130_v57 = vor.u32 %v10118_v25, %v9127_v27  ;;  %v6493_v25 = vld [vmem:[%s14959_s1 + $0x100] sm:$0xf]  ;;  %v9461_v27 = vld [vmem:[%s14959_s1 + $0x110] sm:$0xf0]  ;;  %v9491_v61 = vld [vmem:[%s14959_s1 + $0x200] sm:$0xf0] }
 0x230   :  { %5579 = vmatpush.bf16.msrb.mxu0 %v8690_v44  ;;  %v8607_v44 = vld [vmem:[%s14959_s1 + $0x119c] sm:$0xf0]  ;;  %v6494_v33 = vor.u32 %v9461_v27, %v6493_v25  ;;  %v9486_v25 = vld [vmem:[%s14959_s1 + $0x1d8] sm:$0xf0]  ;;  %v6753_v27 = vld [vmem:[%s14959_s1 + $0x308] sm:$0xf] }
 0x231   :  { %5592 = vmatpush.bf16.msrb.mxu1 %v8850_v63  ;;  %v8950_v63 = vor.u32 %v10073_v35, %v8947_v37  ;;  %v5353_v58 = vpop.f32.mrf.mxu2  ;;  %v6473_v35 = vld [vmem:[%s14959_s1 + $0xd8] sm:$0xf]  ;;  %v9456_v37 = vld [vmem:[%s14959_s1 + $0xe8] sm:$0xf0] }
 0x232   :  { %5605 = vmatpush.bf16.msrb.mxu2 %v9010_v50  ;;  %v10028_v50 = vld [vmem:[%s14959_s1 + $0x12cc] sm:$0xf]  ;;  %v6613_v58 = vld [vmem:[%s14959_s1 + $0x1f0] sm:$0xf] }
 0x233   :  { %5618 = vmatpush.bf16.msrb.mxu3 %v9170_v4  ;;  %v8927_v4 = vld [vmem:[%s14959_s1 + $0x141c] sm:$0xf0]  ;;  %v8770_v9 = vor.u32 %v10028_v50, %v8767_v51  ;;  %v9576_v50 = vld [vmem:[%s14959_s1 + $0x4a8] sm:$0xf0] }
 0x234   :  { %5580 = vmatpush.bf16.msrb.mxu0 %v8670_v3  ;;  %v5366_v3 = vpop.f32.mrf.mxu3  ;;  %v10205_v51 = vld [vmem:[#allocation1 + $0x9] sm:$0xff] }
 0x235   :  { %5593 = vmatpush.bf16.msrb.mxu1 %v8830_v14  ;;  %v8610_v14 = vor.u32 %v9988_v42, %v8607_v44  ;;  %v6793_v42 = vld [vmem:[%s14959_s1 + $0x358] sm:$0xf]  ;;  %v9536_v44 = vld [vmem:[%s14959_s1 + $0x368] sm:$0xf0]  ;;  %v9531_v3 = vld [vmem:[%s14959_s1 + $0x340] sm:$0xf0] }
 0x236   :  { %5606 = vmatpush.bf16.msrb.mxu2 %v8990_v23  ;;  %v9506_v23 = vld [vmem:[%s14959_s1 + $0x278] sm:$0xf0] }
 0x237   :  { %5619 = vmatpush.bf16.msrb.mxu3 %v9150_v10  ;;  %v8930_v10 = vor.u32 %v10068_v55, %v8927_v4  ;;  %v6674_v19 = vor.u32 %v9506_v23, %v6673_v62  ;;  %v6474_v55 = vor.u32 %v9456_v37, %v6473_v35  ;;  %v6794_v4 = vor.u32 %v9536_v44, %v6793_v42  ;;  %v6773_v62 = vld [vmem:[%s14959_s1 + $0x330] sm:$0xf]  ;;  %v9481_v35 = vld [vmem:[%s14959_s1 + $0x1b0] sm:$0xf0]  ;;  %v6733_v37 = vld [vmem:[%s14959_s1 + $0x2e0] sm:$0xf] }
 0x238   :  { %5581 = vmatpush.bf16.msrb.mxu0 %v8650_v28  ;;  %v6994_v28 = vor.u32 %v9586_v13, %v6993_v11  ;;  %v6933_v23 = vld [vmem:[%s14959_s1 + $0x470] sm:$0xf]  ;;  %v6614_v11 = vor.u32 %v9491_v61, %v6613_v58  ;;  %v6774_v13 = vor.u32 %v9531_v3, %v6773_v62  ;;  %v9476_v61 = vld [vmem:[%s14959_s1 + $0x188] sm:$0xf0]  ;;  %v6713_v62 = vld [vmem:[%s14959_s1 + $0x2b8] sm:$0xf] }
 0x239   :  { %5594 = vmatpush.bf16.msrb.mxu1 %v8810_v31  ;;  %v6813_v31 = vld [vmem:[%s14959_s1 + $0x380] sm:$0xf]  ;;  %v9516_v3 = vld [vmem:[%s14959_s1 + $0x2c8] sm:$0xf0] }
 0x23a   :  { %5607 = vmatpush.bf16.msrb.mxu2 %v8970_v32  ;;  %v9541_v32 = vld [vmem:[%s14959_s1 + $0x390] sm:$0xf0] }
 0x23b   :  { %5620 = vmatpush.bf16.msrb.mxu3 %v9130_v57  ;;  %v6654_v57 = vor.u32 %v9501_v29, %v6653_v36  ;;  %v6814_v34 = vor.u32 %v9541_v32, %v6813_v31  ;;  %v9526_v36 = vld [vmem:[%s14959_s1 + $0x318] sm:$0xf0] }
 0x23c   :  { %5582 = vmatpush.bf16.msrb.mxu0 %v8630_v41  ;;  %v9496_v41 = vld [vmem:[%s14959_s1 + $0x228] sm:$0xf0]  ;;  %v9566_v29 = vld [vmem:[%s14959_s1 + $0x458] sm:$0xf0]  ;;  %v6754_v43 = vor.u32 %v9526_v36, %v6753_v27  ;;  %v9511_v27 = vld [vmem:[%s14959_s1 + $0x2a0] sm:$0xf0] }
 0x23d   :  { %5595 = vmatpush.bf16.msrb.mxu1 %v8790_v45  ;;  %v10204_v45 = vld [vmem:[#allocation1] sm:$0xff]  ;;  %v6853_v36 = vld [vmem:[%s14959_s1 + $0x3d0] sm:$0xf] }
 0x23e   :  { %5608 = vmatpush.bf16.msrb.mxu2 %v8950_v63  ;;  %v6953_v63 = vld [vmem:[%s14959_s1 + $0x498] sm:$0xf] }
 0x23f   :  { %5621 = vmatpush.bf16.msrb.mxu3 %v9110_v52  ;;  %v6634_v52 = vor.u32 %v9496_v41, %v6633_v38  ;;  %v6954_v59 = vor.u32 %v9576_v50, %v6953_v63  ;;  %v9521_v38 = vld [vmem:[%s14959_s1 + $0x2f0] sm:$0xf0]  ;;  %v10206_v63 = vld [vmem:[%s14960_s2] sm:$0x1f] }
 0x240   :  { %5583 = vmatpush.bf16.msrb.mxu0 %v8610_v14  ;;  %v5377_v14 = vpop.f32.mrf.mxu0  ;;  %v9561_v41 = vld [vmem:[%s14959_s1 + $0x430] sm:$0xf0]  ;;  %v899_v50 = vperm.slane %v10206_v63, 3 }
 0x241   :  { %5596 = vmatpush.bf16.msrb.mxu1 %v8770_v9  ;;  %v5378_v8 = vadd.f32 %v5377_v14, %v13834_v30  ;;  %v6454_v9 = vor.u32 %v9451_v56, %v6453_v53  ;;  %v6934_v30 = vor.u32 %v9571_v7, %v6933_v23  ;;  %v9436_v53 = vld [vmem:[%s14959_s1 + $0x48] sm:$0xf0]  ;;  %v6553_v56 = vld [vmem:[%s14959_s1 + $0x178] sm:$0xf] }
 0x242   :  { %5609 = vmatpush.bf16.msrb.mxu2 %v8930_v10  ;;  %v5390_v10 = vpop.f32.mrf.mxu1  ;;  %v6873_v23 = vld [vmem:[%s14959_s1 + $0x3f8] sm:$0xf]  ;;  %v9556_v7 = vld [vmem:[%s14959_s1 + $0x408] sm:$0xf0] }
 0x243   :  { %5622 = vmatpush.bf16.msrb.mxu3 %v9090_v18  ;;  %5584 = vmatmul.bf16.vlgmr.msrb.gmra.mxu0 %v11101_v47  ;;  %v6433_v18 = vld [vmem:[%s14959_s1 + $0x88] sm:$0xf] }
 0x244   :  { %5628 = vmatpush.bf16.msra.mxu0 %v6514_v24  ;;  %5597 = vmatmul.bf16.vlgmr.msrb.gmra.mxu1 %v11105_v49  ;;  %v9446_v24 = vld [vmem:[%s14959_s1 + $0x98] sm:$0xf0] }
 0x245   :  { %5641 = vmatpush.bf16.msra.mxu1 %v6674_v19  ;;  %5610 = vmatmul.bf16.vlgmr.msrb.gmra.mxu2 %v10204_v45  ;;  %v6593_v19 = vld [vmem:[%s14959_s1 + $0x1c8] sm:$0xf]  ;;  %v6434_v31 = vor.u32 %v9446_v24, %v6433_v18  ;;  %v6714_v18 = vor.u32 %v9516_v3, %v6713_v62  ;;  %v6533_v24 = vld [vmem:[%s14959_s1 + $0x150] sm:$0xf] }
 0x246   :  { %5654 = vmatpush.bf16.msra.mxu2 %v6834_v5  ;;  %5623 = vmatmul.bf16.vlgmr.msrb.gmra.mxu3 %v10205_v51  ;;  %v13992_v5 = vadd.f32 %v5390_v10, %v5378_v8  ;;  %v6594_v32 = vor.u32 %v9486_v25, %v6593_v19  ;;  %v9431_v10 = vld [vmem:[%s14959_s1 + $0x20] sm:$0xf0]  ;;  %v6874_v25 = vor.u32 %v9556_v7, %v6873_v23  ;;  %v9616_v23 = vld [vmem:[%s14959_s1 + $0x5e8] sm:$0xf0]  ;;  %v7273_v7 = vld [vmem:[%s14959_s1 + $0x718] sm:$0xf] }
 0x247   :  { %5667 = vmatpush.bf16.msra.mxu3 %v6994_v28  ;;  %v6913_v28 = vld [vmem:[%s14959_s1 + $0x448] sm:$0xf]  ;;  %v9471_v19 = vld [vmem:[%s14959_s1 + $0x160] sm:$0xf0] }
 0x248   :  { %5629 = vmatpush.bf16.msra.mxu0 %v6494_v33  ;;  %v9441_v33 = vld [vmem:[%s14959_s1 + $0x70] sm:$0xf0]  ;;  %v5379_v42 = vpop.f32.mrf.mxu0  ;;  %v5403_v51 = vpop.f32.mrf.mxu2 }
 0x249   :  { %5642 = vmatpush.bf16.msra.mxu1 %v6654_v57  ;;  %v6573_v57 = vld [vmem:[%s14959_s1 + $0x1a0] sm:$0xf]  ;;  %v6414_v44 = vor.u32 %v9441_v33, %v6413_v39  ;;  %v5416_v58 = vpop.f32.mrf.mxu3  ;;  %v5404_v14 = vadd.f32 %v5403_v51, %v899_v50  ;;  %v9666_v39 = vld [vmem:[%s14959_s1 + $0x778] sm:$0xf0]  ;;  %v7473_v33 = vld [vmem:[%s14959_s1 + $0x8a8] sm:$0xf] }
 0x24a   :  { %5655 = vmatpush.bf16.msra.mxu2 %v6814_v34  ;;  %v6914_v34 = vor.u32 %v9566_v29, %v6913_v28  ;;  %v5392_v45 = vpop.f32.mrf.mxu1  ;;  %v9551_v28 = vld [vmem:[%s14959_s1 + $0x3e0] sm:$0xf0]  ;;  %v7153_v29 = vld [vmem:[%s14959_s1 + $0x628] sm:$0xf]  ;;  %v7133_v50 = vld [vmem:[%s14959_s1 + $0x600] sm:$0xf] }
 0x24b   :  { %5668 = vmatpush.bf16.msra.mxu3 %v6974_v40  ;;  %v6893_v40 = vld [vmem:[%s14959_s1 + $0x420] sm:$0xf]  ;;  %v6854_v42 = vor.u32 %v9551_v28, %v6853_v36  ;;  %v9621_v51 = vld [vmem:[%s14959_s1 + $0x610] sm:$0xf0]  ;;  %v7413_v36 = vld [vmem:[%s14959_s1 + $0x830] sm:$0xf] }
 0x24c   :  { %5630 = vmatpush.bf16.msra.mxu0 %v6474_v55  ;;  %v6574_v55 = vor.u32 %v9481_v35, %v6573_v57  ;;  %v9706_v57 = vld [vmem:[%s14959_s1 + $0x8b8] sm:$0xf0]  ;;  %v6534_v35 = vor.u32 %v9471_v19, %v6533_v24  ;;  %v9736_v24 = vld [vmem:[%s14959_s1 + $0x9a8] sm:$0xf0]  ;;  %v9691_v28 = vld [vmem:[%s14959_s1 + $0x840] sm:$0xf0] }
 0x24d   :  { %5643 = vmatpush.bf16.msra.mxu1 %v6634_v52  ;;  %v6734_v52 = vor.u32 %v9521_v38, %v6733_v37  ;;  %v7633_v38 = vld [vmem:[%s14959_s1 + $0x9e8] sm:$0xf]  ;;  %v7474_v63 = vor.u32 %v9706_v57, %v7473_v33  ;;  %v7414_v33 = vor.u32 %v9691_v28, %v7413_v36  ;;  %v9716_v36 = vld [vmem:[%s14959_s1 + $0x908] sm:$0xf0] }
 0x24e   :  { %5656 = vmatpush.bf16.msra.mxu2 %v6794_v4  ;;  %v6393_v4 = vld [vmem:[%s14959_s1 + $0x38] sm:$0xf]  ;;  %v7073_v57 = vld [vmem:[%s14959_s1 + $0x588] sm:$0xf] }
 0x24f   :  { %5669 = vmatpush.bf16.msra.mxu3 %v6954_v59  ;;  %v6894_v59 = vor.u32 %v9561_v41, %v6893_v40  ;;  %v6394_v8 = vor.u32 %v9436_v53, %v6393_v4  ;;  %v9746_v40 = vld [vmem:[%s14959_s1 + $0x9f8] sm:$0xf0]  ;;  %v9661_v4 = vld [vmem:[%s14959_s1 + $0x750] sm:$0xf0]  ;;  %v7453_v53 = vld [vmem:[%s14959_s1 + $0x880] sm:$0xf] }
 0x250   :  { %5631 = vmatpush.bf16.msra.mxu0 %v6454_v9  ;;  %v6373_v9 = vld [vmem:[%s14959_s1 + $0x10] sm:$0xf] }
 0x251   :  { %5644 = vmatpush.bf16.msra.mxu1 %v6614_v11  ;;  %v14066_v11 = vadd.f32 %v5416_v58, %v5404_v14  ;;  %v5418_v41 = vpop.f32.mrf.mxu3  ;;  %v7613_v58 = vld [vmem:[%s14959_s1 + $0x9c0] sm:$0xf]  ;;  %v7113_v14 = vld [vmem:[%s14959_s1 + $0x5d8] sm:$0xf] }
 0x252   :  { %5657 = vmatpush.bf16.msra.mxu2 %v6774_v13  ;;  %v6554_v13 = vor.u32 %v9476_v61, %v6553_v56  ;;  %v9701_v56 = vld [vmem:[%s14959_s1 + $0x890] sm:$0xf0]  ;;  %v7134_v61 = vor.u32 %v9621_v51, %v7133_v50  ;;  %v7114_v19 = vor.u32 %v9616_v23, %v7113_v14  ;;  %v9646_v41 = vld [vmem:[%s14959_s1 + $0x6d8] sm:$0xf0]  ;;  %v7533_v23 = vld [vmem:[%s14959_s1 + $0x920] sm:$0xf] }
 0x253   :  { %5670 = vmatpush.bf16.msra.mxu3 %v6934_v30  ;;  %v6693_v30 = vld [vmem:[%s14959_s1 + $0x290] sm:$0xf]  ;;  %v7454_v3 = vor.u32 %v9701_v56, %v7453_v53  ;;  %v7213_v53 = vld [vmem:[%s14959_s1 + $0x6a0] sm:$0xf] }
 0x254   :  { %5632 = vmatpush.bf16.msra.mxu0 %v6434_v31  ;;  %v9626_v31 = vld [vmem:[%s14959_s1 + $0x638] sm:$0xf0]  ;;  %v6694_v37 = vor.u32 %v9511_v27, %v6693_v30  ;;  %v9611_v27 = vld [vmem:[%s14959_s1 + $0x5c0] sm:$0xf0] }
 0x255   :  { %5645 = vmatpush.bf16.msra.mxu1 %v6594_v32  ;;  %v7313_v32 = vld [vmem:[%s14959_s1 + $0x768] sm:$0xf] }
 0x256   :  { %5658 = vmatpush.bf16.msra.mxu2 %v6754_v43  ;;  %v6374_v43 = vor.u32 %v9431_v10, %v6373_v9  ;;  %v7314_v45 = vor.u32 %v9666_v39, %v7313_v32  ;;  %v9656_v9 = vld [vmem:[%s14959_s1 + $0x728] sm:$0xf0]  ;;  %v7433_v10 = vld [vmem:[%s14959_s1 + $0x858] sm:$0xf] }
 0x257   :  { %5671 = vmatpush.bf16.msra.mxu3 %v6914_v34  ;;  %v5405_v34 = vpop.f32.mrf.mxu2  ;;  %v7274_v30 = vor.u32 %v9656_v9, %v7273_v7  ;;  %v9721_v7 = vld [vmem:[%s14959_s1 + $0x930] sm:$0xf0] }
 0x258   :  { %5633 = vmatpush.bf16.msra.mxu0 %v6414_v44  ;;  %v7154_v44 = vor.u32 %v9626_v31, %v7153_v29  ;;  %v7573_v29 = vld [vmem:[%s14959_s1 + $0x970] sm:$0xf]  ;;  %v9731_v31 = vld [vmem:[%s14959_s1 + $0x980] sm:$0xf0]  ;;  %v9606_v34 = vld [vmem:[%s14959_s1 + $0x598] sm:$0xf0] }
 0x259   :  { %5646 = vmatpush.bf16.msra.mxu1 %v6574_v55  ;;  %v7293_v55 = vld [vmem:[%s14959_s1 + $0x740] sm:$0xf]  ;;  %v7074_v50 = vor.u32 %v9606_v34, %v7073_v57  ;;  %v7333_v57 = vld [vmem:[%s14959_s1 + $0x790] sm:$0xf] }
 0x25a   :  { %5659 = vmatpush.bf16.msra.mxu2 %v6734_v52  ;;  %v7634_v52 = vor.u32 %v9746_v40, %v7633_v38  ;;  %v7294_v62 = vor.u32 %v9661_v4, %v7293_v55  ;;  %v7574_v40 = vor.u32 %v9731_v31, %v7573_v29  ;;  %v9601_v4 = vld [vmem:[%s14959_s1 + $0x570] sm:$0xf0]  ;;  %v7013_v29 = vld [vmem:[%s14959_s1 + $0x510] sm:$0xf]  ;;  %v9591_v31 = vld [vmem:[%s14959_s1 + $0x520] sm:$0xf0] }
 0x25b   :  { %5672 = vmatpush.bf16.msra.mxu3 %v6894_v59  ;;  %v9741_v59 = vld [vmem:[%s14959_s1 + $0x9d0] sm:$0xf0] }
 0x25c   :  { %5634 = vmatpush.bf16.msra.mxu0 %v6394_v8  ;;  %v7614_v8 = vor.u32 %v9741_v59, %v7613_v58  ;;  %v9641_v59 = vld [vmem:[%s14959_s1 + $0x6b0] sm:$0xf0] }
 0x25d   :  { %5647 = vmatpush.bf16.msra.mxu1 %v6554_v13  ;;  %v9696_v13 = vld [vmem:[%s14959_s1 + $0x868] sm:$0xf0] }
 0x25e   :  { %5660 = vmatpush.bf16.msra.mxu2 %v6714_v18  ;;  %v7593_v18 = vld [vmem:[%s14959_s1 + $0x998] sm:$0xf] }
 0x25f   :  { %5673 = vmatpush.bf16.msra.mxu3 %v6874_v25  ;;  %v7093_v25 = vld [vmem:[%s14959_s1 + $0x5b0] sm:$0xf] }
 0x260   :  { %5635 = vmatpush.bf16.msra.mxu0 %v6374_v43  ;;  %v7094_v32 = vor.u32 %v9611_v27, %v7093_v25  ;;  %v5429_v43 = vpop.f32.mrf.mxu0  ;;  %v7534_v25 = vor.u32 %v9721_v7, %v7533_v23  ;;  %v9636_v27 = vld [vmem:[%s14959_s1 + $0x688] sm:$0xf0]  ;;  %v9821_v7 = vld [vmem:[%s14959_s1 + $0xc50] sm:$0xf0] }
 0x261   :  { %5648 = vmatpush.bf16.msra.mxu1 %v6534_v35  ;;  %v7233_v35 = vld [vmem:[%s14959_s1 + $0x6c8] sm:$0xf]  ;;  %v5442_v38 = vpop.f32.mrf.mxu1 }
 0x262   :  { %5661 = vmatpush.bf16.msra.mxu2 %v6694_v37  ;;  %v5430_v37 = vadd.f32 %v5429_v43, %v14066_v11  ;;  %v9726_v11 = vld [vmem:[%s14959_s1 + $0x958] sm:$0xf0]  ;;  %v7234_v51 = vor.u32 %v9646_v41, %v7233_v35 }
 0x263   :  { %5674 = vmatpush.bf16.msra.mxu3 %v6854_v42  ;;  %5636 = vmatmul.bf16.vlgmr.msra.gmra.mxu0 %v10582_v21  ;;  %v7253_v21 = vld [vmem:[%s14959_s1 + $0x6f0] sm:$0xf]  ;;  %v7393_v42 = vld [vmem:[%s14959_s1 + $0x808] sm:$0xf] }
 0x264   :  { %5680 = vmatpush.bf16.msrb.mxu0 %v7154_v44  ;;  %5649 = vmatmul.bf16.vlgmr.msra.gmra.mxu1 %v10593_v26  ;;  %v9651_v26 = vld [vmem:[%s14959_s1 + $0x700] sm:$0xf0]  ;;  %v9686_v44 = vld [vmem:[%s14959_s1 + $0x818] sm:$0xf0] }
 0x265   :  { %5693 = vmatpush.bf16.msrb.mxu1 %v7314_v45  ;;  %5662 = vmatmul.bf16.vlgmr.msra.gmra.mxu2 %v10580_v20  ;;  %v7434_v20 = vor.u32 %v9696_v13, %v7433_v10  ;;  %v7254_v39 = vor.u32 %v9651_v26, %v7253_v21  ;;  %v7553_v45 = vld [vmem:[%s14959_s1 + $0x948] sm:$0xf]  ;;  %v7394_v55 = vor.u32 %v9686_v44, %v7393_v42  ;;  %v7353_v21 = vld [vmem:[%s14959_s1 + $0x7b8] sm:$0xf]  ;;  %v9786_v44 = vld [vmem:[%s14959_s1 + $0xb38] sm:$0xf0] }
 0x266   :  { %5706 = vmatpush.bf16.msrb.mxu2 %v7474_v63  ;;  %5675 = vmatmul.bf16.vlgmr.msra.gmra.mxu3 %v10584_v22  ;;  %v7594_v22 = vor.u32 %v9736_v24, %v7593_v18  ;;  %v5443_v63 = vadd.f32 %v5442_v38, %v5430_v37  ;;  %v7554_v58 = vor.u32 %v9726_v11, %v7553_v45  ;;  %v7033_v24 = vld [vmem:[%s14959_s1 + $0x538] sm:$0xf]  ;;  %v9671_v37 = vld [vmem:[%s14959_s1 + $0x7a0] sm:$0xf0]  ;;  %v7493_v38 = vld [vmem:[%s14959_s1 + $0x8d0] sm:$0xf] }
 0x267   :  { %5719 = vmatpush.bf16.msrb.mxu3 %v7634_v52  ;;  %v7053_v52 = vld [vmem:[%s14959_s1 + $0x560] sm:$0xf]  ;;  %v7214_v13 = vor.u32 %v9641_v59, %v7213_v53  ;;  %v7513_v26 = vld [vmem:[%s14959_s1 + $0x8f8] sm:$0xf]  ;;  %v7793_v42 = vld [vmem:[%s14959_s1 + $0xb28] sm:$0xf]  ;;  %v7014_v11 = vor.u32 %v9591_v31, %v7013_v29 }
 0x268   :  { %5681 = vmatpush.bf16.msrb.mxu0 %v7134_v61  ;;  %v5455_v56 = vpop.f32.mrf.mxu2  ;;  %v7373_v61 = vld [vmem:[%s14959_s1 + $0x7e0] sm:$0xf]  ;;  %v5431_v10 = vpop.f32.mrf.mxu0  ;;  %v7514_v35 = vor.u32 %v9716_v36, %v7513_v26  ;;  %v7953_v45 = vld [vmem:[%s14959_s1 + $0xc68] sm:$0xf]  ;;  %v9906_v53 = vld [vmem:[%s14959_s1 + $0xef8] sm:$0xf0] }
 0x269   :  { %5694 = vmatpush.bf16.msrb.mxu1 %v7294_v62  ;;  %v9681_v62 = vld [vmem:[%s14959_s1 + $0x7f0] sm:$0xf0]  ;;  %v5468_v14 = vpop.f32.mrf.mxu3  ;;  %v8073_v26 = vld [vmem:[%s14959_s1 + $0xd58] sm:$0xf]  ;;  %v9856_v36 = vld [vmem:[%s14959_s1 + $0xd68] sm:$0xf0] }
 0x26a   :  { %5707 = vmatpush.bf16.msrb.mxu2 %v7454_v3  ;;  %v5456_v3 = vadd.f32 %v5455_v56, %v5443_v63  ;;  %v7374_v18 = vor.u32 %v9681_v62, %v7373_v61  ;;  %v9826_v63 = vld [vmem:[%s14959_s1 + $0xc78] sm:$0xf0]  ;;  %v7773_v62 = vld [vmem:[%s14959_s1 + $0xb00] sm:$0xf]  ;;  %v9861_v10 = vld [vmem:[%s14959_s1 + $0xd90] sm:$0xf0] }
 0x26b   :  { %5720 = vmatpush.bf16.msrb.mxu3 %v7614_v8  ;;  %v7054_v8 = vor.u32 %v9601_v4, %v7053_v52  ;;  %v7334_v52 = vor.u32 %v9671_v37, %v7333_v57  ;;  %v8273_v4 = vld [vmem:[%s14959_s1 + $0xee8] sm:$0xf]  ;;  %v7954_v59 = vor.u32 %v9826_v63, %v7953_v45  ;;  %v9851_v57 = vld [vmem:[%s14959_s1 + $0xd40] sm:$0xf0] }
 0x26c   :  { %5682 = vmatpush.bf16.msrb.mxu0 %v7114_v19  ;;  %v14235_v9 = vadd.f32 %v5468_v14, %v5456_v3  ;;  %v9596_v19 = vld [vmem:[%s14959_s1 + $0x548] sm:$0xf0]  ;;  %v9781_v3 = vld [vmem:[%s14959_s1 + $0xb10] sm:$0xf0]  ;;  %v7933_v14 = vld [vmem:[%s14959_s1 + $0xc40] sm:$0xf]  ;;  %v8274_v23 = vor.u32 %v9906_v53, %v8273_v4 }
 0x26d   :  { %5695 = vmatpush.bf16.msrb.mxu1 %v7274_v30  ;;  %v7193_v30 = vld [vmem:[%s14959_s1 + $0x678] sm:$0xf]  ;;  %v7034_v28 = vor.u32 %v9596_v19, %v7033_v24  ;;  %v7774_v24 = vor.u32 %v9781_v3, %v7773_v62  ;;  %v7934_v19 = vor.u32 %v9821_v7, %v7933_v14  ;;  %v7873_v45 = vld [vmem:[%s14959_s1 + $0xbc8] sm:$0xf]  ;;  %v9761_v62 = vld [vmem:[%s14959_s1 + $0xa70] sm:$0xf0] }
 0x26e   :  { %5708 = vmatpush.bf16.msrb.mxu2 %v7434_v20  ;;  %v5444_v20 = vpop.f32.mrf.mxu1  ;;  %v8193_v4 = vld [vmem:[%s14959_s1 + $0xe48] sm:$0xf]  ;;  %v7853_v3 = vld [vmem:[%s14959_s1 + $0xba0] sm:$0xf]  ;;  %v9801_v7 = vld [vmem:[%s14959_s1 + $0xbb0] sm:$0xf0] }
 0x26f   :  { %5721 = vmatpush.bf16.msrb.mxu3 %v7594_v22  ;;  %v9676_v22 = vld [vmem:[%s14959_s1 + $0x7c8] sm:$0xf0]  ;;  %v7753_v20 = vld [vmem:[%s14959_s1 + $0xad8] sm:$0xf] }
 0x270   :  { %5683 = vmatpush.bf16.msrb.mxu0 %v7094_v32  ;;  %v7194_v32 = vor.u32 %v9636_v27, %v7193_v30  ;;  %v7354_v43 = vor.u32 %v9676_v22, %v7353_v21  ;;  %v5457_v34 = vpop.f32.mrf.mxu2  ;;  %v7913_v27 = vld [vmem:[%s14959_s1 + $0xc18] sm:$0xf]  ;;  %v9816_v22 = vld [vmem:[%s14959_s1 + $0xc28] sm:$0xf0] }
 0x271   :  { %5696 = vmatpush.bf16.msrb.mxu1 %v7254_v39  ;;  %v7173_v39 = vld [vmem:[%s14959_s1 + $0x650] sm:$0xf]  ;;  %v5470_v41 = vpop.f32.mrf.mxu3  ;;  %v7914_v31 = vor.u32 %v9816_v22, %v7913_v27  ;;  %v7854_v27 = vor.u32 %v9801_v7, %v7853_v3  ;;  %v7673_v22 = vld [vmem:[%s14959_s1 + $0xa38] sm:$0xf]  ;;  %v8573_v7 = vld [vmem:[%s14959_s1 + $0x1140] sm:$0xf] }
 0x272   :  { %5709 = vmatpush.bf16.msrb.mxu2 %v7414_v33  ;;  %v9631_v33 = vld [vmem:[%s14959_s1 + $0x660] sm:$0xf0]  ;;  %v8213_v34 = vld [vmem:[%s14959_s1 + $0xe70] sm:$0xf] }
 0x273   :  { %5722 = vmatpush.bf16.msrb.mxu3 %v7574_v40  ;;  %v9711_v40 = vld [vmem:[%s14959_s1 + $0x8e0] sm:$0xf0] }
 0x274   :  { %5684 = vmatpush.bf16.msrb.mxu0 %v7074_v50  ;;  %v8113_v50 = vld [vmem:[%s14959_s1 + $0xda8] sm:$0xf]  ;;  %v7494_v56 = vor.u32 %v9711_v40, %v7493_v38 }
 0x275   :  { %5697 = vmatpush.bf16.msrb.mxu1 %v7234_v51  ;;  %v9866_v51 = vld [vmem:[%s14959_s1 + $0xdb8] sm:$0xf0] }
 0x276   :  { %5710 = vmatpush.bf16.msrb.mxu2 %v7394_v55  ;;  %v7174_v55 = vor.u32 %v9631_v33, %v7173_v39  ;;  %v8114_v61 = vor.u32 %v9866_v51, %v8113_v50  ;;  %v8053_v33 = vld [vmem:[%s14959_s1 + $0xd30] sm:$0xf]  ;;  %v9806_v51 = vld [vmem:[%s14959_s1 + $0xbd8] sm:$0xf0] }
 0x277   :  { %5723 = vmatpush.bf16.msrb.mxu3 %v7554_v58  ;;  %v7794_v58 = vor.u32 %v9786_v44, %v7793_v42  ;;  %v8054_v41 = vor.u32 %v9851_v57, %v8053_v33  ;;  %v7713_v42 = vld [vmem:[%s14959_s1 + $0xa88] sm:$0xf]  ;;  %v9766_v44 = vld [vmem:[%s14959_s1 + $0xa98] sm:$0xf0] }
 0x278   :  { %5685 = vmatpush.bf16.msrb.mxu0 %v7054_v8  ;;  %v8093_v8 = vld [vmem:[%s14959_s1 + $0xd80] sm:$0xf] }
 0x279   :  { %5698 = vmatpush.bf16.msrb.mxu1 %v7214_v13  ;;  %v8253_v13 = vld [vmem:[%s14959_s1 + $0xec0] sm:$0xf]  ;;  %v8094_v30 = vor.u32 %v9861_v10, %v8093_v8  ;;  %v9841_v10 = vld [vmem:[%s14959_s1 + $0xcf0] sm:$0xf0] }
 0x27a   :  { %5711 = vmatpush.bf16.msrb.mxu2 %v7374_v18  ;;  %v9901_v18 = vld [vmem:[%s14959_s1 + $0xed0] sm:$0xf0]  ;;  %v8013_v8 = vld [vmem:[%s14959_s1 + $0xce0] sm:$0xf] }
 0x27b   :  { %5724 = vmatpush.bf16.msrb.mxu3 %v7534_v25  ;;  %v9776_v25 = vld [vmem:[%s14959_s1 + $0xae8] sm:$0xf0]  ;;  %v8254_v21 = vor.u32 %v9901_v18, %v8253_v13 }
 0x27c   :  { %5686 = vmatpush.bf16.msrb.mxu0 %v7034_v28  ;;  %v9896_v28 = vld [vmem:[%s14959_s1 + $0xea8] sm:$0xf0]  ;;  %v7754_v29 = vor.u32 %v9776_v25, %v7753_v20 }
 0x27d   :  { %5699 = vmatpush.bf16.msrb.mxu1 %v7194_v32  ;;  %v8074_v32 = vor.u32 %v9856_v36, %v8073_v26  ;;  %v9756_v26 = vld [vmem:[%s14959_s1 + $0xa48] sm:$0xf0]  ;;  %v7833_v36 = vld [vmem:[%s14959_s1 + $0xb78] sm:$0xf] }
 0x27e   :  { %5712 = vmatpush.bf16.msrb.mxu2 %v7354_v43  ;;  %v7893_v43 = vld [vmem:[%s14959_s1 + $0xbf0] sm:$0xf] }
 0x27f   :  { %5725 = vmatpush.bf16.msrb.mxu3 %v7514_v35  ;;  %v9891_v35 = vld [vmem:[%s14959_s1 + $0xe80] sm:$0xf0] }
 0x280   :  { %5687 = vmatpush.bf16.msrb.mxu0 %v7014_v11  ;;  %v5481_v38 = vpop.f32.mrf.mxu0  ;;  %v8214_v50 = vor.u32 %v9891_v35, %v8213_v34  ;;  %v7813_v34 = vld [vmem:[%s14959_s1 + $0xb50] sm:$0xf]  ;;  %v9791_v35 = vld [vmem:[%s14959_s1 + $0xb60] sm:$0xf0] }
 0x281   :  { %5700 = vmatpush.bf16.msrb.mxu1 %v7174_v55  ;;  %v5482_v11 = vadd.f32 %v5481_v38, %v14235_v9  ;;  %v5494_v63 = vpop.f32.mrf.mxu1  ;;  %v8033_v55 = vld [vmem:[%s14959_s1 + $0xd08] sm:$0xf]  ;;  %v9886_v9 = vld [vmem:[%s14959_s1 + $0xe58] sm:$0xf0] }
 0x282   :  { %5713 = vmatpush.bf16.msrb.mxu2 %v7334_v52  ;;  %v9846_v52 = vld [vmem:[%s14959_s1 + $0xd18] sm:$0xf0] }
 0x283   :  { %5726 = vmatpush.bf16.msrb.mxu3 %v7494_v56  ;;  %5688 = vmatmul.bf16.vlgmr.msrb.gmra.mxu0 %v10675_v0  ;;  %v7733_v0 = vld [vmem:[%s14959_s1 + $0xab0] sm:$0xf]  ;;  %v5495_v53 = vadd.f32 %v5494_v63, %v5482_v11  ;;  %v7714_v56 = vor.u32 %v9766_v44, %v7713_v42  ;;  %v9871_v44 = vld [vmem:[%s14959_s1 + $0xde0] sm:$0xf0]  ;;  %v8433_v11 = vld [vmem:[%s14959_s1 + $0x1028] sm:$0xf] }
 0x284   :  { %5732 = vmatpush.bf16.msra.mxu0 %v7794_v58  ;;  %5701 = vmatmul.bf16.vlgmr.msrb.gmra.mxu1 %v10679_v2  ;;  %v9811_v2 = vld [vmem:[%s14959_s1 + $0xc00] sm:$0xf0]  ;;  %v7874_v58 = vor.u32 %v9806_v51, %v7873_v45  ;;  %v8133_v42 = vld [vmem:[%s14959_s1 + $0xdd0] sm:$0xf]  ;;  %v9946_v63 = vld [vmem:[%s14959_s1 + $0x1038] sm:$0xf0] }
 0x285   :  { %5745 = vmatpush.bf16.msra.mxu1 %v7954_v59  ;;  %5714 = vmatmul.bf16.vlgmr.msrb.gmra.mxu2 %v10670_v60  ;;  %v8233_v60 = vld [vmem:[%s14959_s1 + $0xe98] sm:$0xf]  ;;  %v7894_v40 = vor.u32 %v9811_v2, %v7893_v43  ;;  %v8034_v59 = vor.u32 %v9846_v52, %v8033_v55  ;;  %v7674_v43 = vor.u32 %v9756_v26, %v7673_v22  ;;  %v9751_v2 = vld [vmem:[%s14959_s1 + $0xa20] sm:$0xf0]  ;;  %v9986_v55 = vld [vmem:[%s14959_s1 + $0x1178] sm:$0xf0] }
 0x286   :  { %5758 = vmatpush.bf16.msra.mxu2 %v8114_v61  ;;  %5727 = vmatmul.bf16.vlgmr.msrb.gmra.mxu3 %v10677_v1  ;;  %v9771_v1 = vld [vmem:[%s14959_s1 + $0xac0] sm:$0xf0]  ;;  %v8234_v39 = vor.u32 %v9896_v28, %v8233_v60  ;;  %v7693_v61 = vld [vmem:[%s14959_s1 + $0xa60] sm:$0xf]  ;;  %v8753_v52 = vld [vmem:[%s14959_s1 + $0x12a8] sm:$0xf] }
 0x287   :  { %5771 = vmatpush.bf16.msra.mxu3 %v8274_v23  ;;  %v7734_v37 = vor.u32 %v9771_v1, %v7733_v0  ;;  %v8194_v23 = vor.u32 %v9886_v9, %v8193_v4  ;;  %v8153_v0 = vld [vmem:[%s14959_s1 + $0xdf8] sm:$0xf]  ;;  %v9876_v1 = vld [vmem:[%s14959_s1 + $0xe08] sm:$0xf0]  ;;  %v10026_v4 = vld [vmem:[%s14959_s1 + $0x12b8] sm:$0xf0]  ;;  %v7814_v9 = vor.u32 %v9791_v35, %v7813_v34 }
 0x288   :  { %5733 = vmatpush.bf16.msra.mxu0 %v7774_v24  ;;  %v5507_v14 = vpop.f32.mrf.mxu2  ;;  %v8173_v24 = vld [vmem:[%s14959_s1 + $0xe20] sm:$0xf]  ;;  %v5483_v25 = vpop.f32.mrf.mxu0  ;;  %v8754_v3 = vor.u32 %v10026_v4, %v8753_v52  ;;  %v9936_v22 = vld [vmem:[%s14959_s1 + $0xfe8] sm:$0xf0]  ;;  %v8553_v26 = vld [vmem:[%s14959_s1 + $0x1118] sm:$0xf] }
 0x289   :  { %5746 = vmatpush.bf16.msra.mxu1 %v7934_v19  ;;  %v5508_v13 = vadd.f32 %v5507_v14, %v5495_v53  ;;  %v5520_v18 = vpop.f32.mrf.mxu3  ;;  %v9881_v19 = vld [vmem:[%s14959_s1 + $0xe30] sm:$0xf0]  ;;  %v5496_v60 = vpop.f32.mrf.mxu1  ;;  %v8413_v14 = vld [vmem:[%s14959_s1 + $0x1000] sm:$0xf]  ;;  %v8853_v34 = vld [vmem:[%s14959_s1 + $0x1370] sm:$0xf] }
 0x28a   :  { %5759 = vmatpush.bf16.msra.mxu2 %v8094_v30  ;;  %v7694_v30 = vor.u32 %v9761_v62, %v7693_v61  ;;  %v8174_v28 = vor.u32 %v9881_v19, %v8173_v24  ;;  %v8434_v61 = vor.u32 %v9946_v63, %v8433_v11  ;;  %v8893_v24 = vld [vmem:[%s14959_s1 + $0x13c0] sm:$0xf]  ;;  %v10061_v19 = vld [vmem:[%s14959_s1 + $0x13d0] sm:$0xf0]  ;;  %v9976_v60 = vld [vmem:[%s14959_s1 + $0x1128] sm:$0xf0] }
 0x28b   :  { %5772 = vmatpush.bf16.msra.mxu3 %v8254_v21  ;;  %v14434_v20 = vadd.f32 %v5520_v18, %v5508_v13  ;;  %v8014_v21 = vor.u32 %v9841_v10, %v8013_v8  ;;  %v9981_v10 = vld [vmem:[%s14959_s1 + $0x1150] sm:$0xf0]  ;;  %v8733_v13 = vld [vmem:[%s14959_s1 + $0x1280] sm:$0xf]  ;;  %v10051_v35 = vld [vmem:[%s14959_s1 + $0x1380] sm:$0xf0] }
 0x28c   :  { %5734 = vmatpush.bf16.msra.mxu0 %v7754_v29  ;;  %v9796_v29 = vld [vmem:[%s14959_s1 + $0xb88] sm:$0xf0]  ;;  %v10021_v18 = vld [vmem:[%s14959_s1 + $0x1290] sm:$0xf0]  ;;  %v8574_v25 = vor.u32 %v9981_v10, %v8573_v7  ;;  %v8513_v11 = vld [vmem:[%s14959_s1 + $0x10c8] sm:$0xf] }
 0x28d   :  { %5747 = vmatpush.bf16.msra.mxu1 %v7914_v31  ;;  %v7993_v31 = vld [vmem:[%s14959_s1 + $0xcb8] sm:$0xf]  ;;  %v7834_v33 = vor.u32 %v9796_v29, %v7833_v36  ;;  %v8894_v36 = vor.u32 %v10061_v19, %v8893_v24  ;;  %v10016_v29 = vld [vmem:[%s14959_s1 + $0x1268] sm:$0xf0]  ;;  %v8833_v52 = vld [vmem:[%s14959_s1 + $0x1348] sm:$0xf] }
 0x28e   :  { %5760 = vmatpush.bf16.msra.mxu2 %v8074_v32  ;;  %v9836_v32 = vld [vmem:[%s14959_s1 + $0xcc8] sm:$0xf0]  ;;  %v10046_v4 = vld [vmem:[%s14959_s1 + $0x1358] sm:$0xf0]  ;;  %v10001_v7 = vld [vmem:[%s14959_s1 + $0x11f0] sm:$0xf0] }
 0x28f   :  { %5773 = vmatpush.bf16.msra.mxu3 %v8234_v39  ;;  %v7653_v39 = vld [vmem:[%s14959_s1 + $0xa10] sm:$0xf]  ;;  %v7994_v57 = vor.u32 %v9836_v32, %v7993_v31  ;;  %v10056_v31 = vld [vmem:[%s14959_s1 + $0x13a8] sm:$0xf0] }
 0x290   :  { %5735 = vmatpush.bf16.msra.mxu0 %v7734_v37  ;;  %v7973_v37 = vld [vmem:[%s14959_s1 + $0xc90] sm:$0xf]  ;;  %v5509_v38 = vpop.f32.mrf.mxu2  ;;  %v7654_v51 = vor.u32 %v9751_v2, %v7653_v39  ;;  %v9971_v39 = vld [vmem:[%s14959_s1 + $0x1100] sm:$0xf0] }
 0x291   :  { %5748 = vmatpush.bf16.msra.mxu1 %v7894_v40  ;;  %v8154_v40 = vor.u32 %v9876_v1, %v8153_v0  ;;  %v5522_v45 = vpop.f32.mrf.mxu3  ;;  %v8554_v0 = vor.u32 %v9976_v60, %v8553_v26  ;;  %v8693_v2 = vld [vmem:[%s14959_s1 + $0x1230] sm:$0xf]  ;;  %v9916_v26 = vld [vmem:[%s14959_s1 + $0xf48] sm:$0xf0] }
 0x292   :  { %5761 = vmatpush.bf16.msra.mxu2 %v8054_v41  ;;  %v9831_v41 = vld [vmem:[%s14959_s1 + $0xca0] sm:$0xf0]  ;;  %v9926_v45 = vld [vmem:[%s14959_s1 + $0xf98] sm:$0xf0] }
 0x293   :  { %5774 = vmatpush.bf16.msra.mxu3 %v8214_v50  ;;  %v8593_v50 = vld [vmem:[%s14959_s1 + $0x1168] sm:$0xf]  ;;  %v7974_v53 = vor.u32 %v9831_v41, %v7973_v37 }
 0x294   :  { %5736 = vmatpush.bf16.msra.mxu0 %v7714_v56  ;;  %v8913_v56 = vld [vmem:[%s14959_s1 + $0x13e8] sm:$0xf]  ;;  %v8594_v62 = vor.u32 %v9986_v55, %v8593_v50  ;;  %v9966_v50 = vld [vmem:[%s14959_s1 + $0x10d8] sm:$0xf0] }
 0x295   :  { %5749 = vmatpush.bf16.msra.mxu1 %v7874_v58  ;;  %v10066_v58 = vld [vmem:[%s14959_s1 + $0x13f8] sm:$0xf0] }
 0x296   :  { %5762 = vmatpush.bf16.msra.mxu2 %v8034_v59  ;;  %v8134_v59 = vor.u32 %v9871_v44, %v8133_v42  ;;  %v8914_v8 = vor.u32 %v10066_v58, %v8913_v56  ;;  %v8353_v44 = vld [vmem:[%s14959_s1 + $0xf88] sm:$0xf]  ;;  %v10006_v55 = vld [vmem:[%s14959_s1 + $0x1218] sm:$0xf0]  ;;  %v8333_v58 = vld [vmem:[%s14959_s1 + $0xf60] sm:$0xf] }
 0x297   :  { %5775 = vmatpush.bf16.msra.mxu3 %v8194_v23  ;;  %v9941_v23 = vld [vmem:[%s14959_s1 + $0x1010] sm:$0xf0] }
 0x298   :  { %5737 = vmatpush.bf16.msra.mxu0 %v7694_v30  ;;  %v8414_v30 = vor.u32 %v9941_v23, %v8413_v14  ;;  %v9961_v14 = vld [vmem:[%s14959_s1 + $0x10b0] sm:$0xf0]  ;;  %v8653_v23 = vld [vmem:[%s14959_s1 + $0x11e0] sm:$0xf] }
 0x299   :  { %5750 = vmatpush.bf16.msra.mxu1 %v7854_v27  ;;  %v8734_v27 = vor.u32 %v10021_v18, %v8733_v13  ;;  %v8813_v13 = vld [vmem:[%s14959_s1 + $0x1320] sm:$0xf]  ;;  %v10041_v18 = vld [vmem:[%s14959_s1 + $0x1330] sm:$0xf0] }
 0x29a   :  { %5763 = vmatpush.bf16.msra.mxu2 %v8014_v21  ;;  %v8393_v21 = vld [vmem:[%s14959_s1 + $0xfd8] sm:$0xf]  ;;  %v8814_v60 = vor.u32 %v10041_v18, %v8813_v13  ;;  %v9013_v13 = vld [vmem:[%s14959_s1 + $0x14b0] sm:$0xf]  ;;  %v10131_v18 = vld [vmem:[%s14959_s1 + $0x1600] sm:$0xf0] }
 0x29b   :  { %5776 = vmatpush.bf16.msra.mxu3 %v8174_v28  ;;  %v8713_v28 = vld [vmem:[%s14959_s1 + $0x1258] sm:$0xf]  ;;  %v8394_v32 = vor.u32 %v9936_v22, %v8393_v21  ;;  %v8654_v21 = vor.u32 %v10001_v7, %v8653_v23  ;;  %v10136_v7 = vld [vmem:[%s14959_s1 + $0x1628] sm:$0xf0] }
 0x29c   :  { %5738 = vmatpush.bf16.msra.mxu0 %v7674_v43  ;;  %v8714_v1 = vor.u32 %v10016_v29, %v8713_v28  ;;  %v8533_v43 = vld [vmem:[%s14959_s1 + $0x10f0] sm:$0xf]  ;;  %v8313_v22 = vld [vmem:[%s14959_s1 + $0xf38] sm:$0xf]  ;;  %v9956_v28 = vld [vmem:[%s14959_s1 + $0x1088] sm:$0xf0] }
 0x29d   :  { %5751 = vmatpush.bf16.msra.mxu1 %v7834_v33  ;;  %v10011_v33 = vld [vmem:[%s14959_s1 + $0x1240] sm:$0xf0]  ;;  %v8534_v41 = vor.u32 %v9971_v39, %v8533_v43  ;;  %v8633_v29 = vld [vmem:[%s14959_s1 + $0x11b8] sm:$0xf] }
 0x29e   :  { %5764 = vmatpush.bf16.msra.mxu2 %v7994_v57  ;;  %v8694_v42 = vor.u32 %v10011_v33, %v8693_v2  ;;  %v9911_v43 = vld [vmem:[%s14959_s1 + $0xf20] sm:$0xf0]  ;;  %v8613_v33 = vld [vmem:[%s14959_s1 + $0x1190] sm:$0xf]  ;;  %v9193_v23 = vld [vmem:[%s14959_s1 + $0x1618] sm:$0xf] }
 0x29f   :  { %5777 = vmatpush.bf16.msra.mxu3 %v8154_v40  ;;  %v9951_v39 = vld [vmem:[%s14959_s1 + $0x1060] sm:$0xf0] }
 0x2a0   :  { %5739 = vmatpush.bf16.msra.mxu0 %v7654_v51  ;;  %v5533_v57 = vpop.f32.mrf.mxu0  ;;  %v8673_v51 = vld [vmem:[%s14959_s1 + $0x1208] sm:$0xf] }
 0x2a1   :  { %5752 = vmatpush.bf16.msra.mxu1 %v7814_v9  ;;  %v5534_v37 = vadd.f32 %v5533_v57, %v14434_v20  ;;  %v5546_v40 = vpop.f32.mrf.mxu1  ;;  %v8854_v20 = vor.u32 %v10051_v35, %v8853_v34  ;;  %v8354_v9 = vor.u32 %v9926_v45, %v8353_v44  ;;  %v8674_v56 = vor.u32 %v10006_v55, %v8673_v51  ;;  %v9991_v57 = vld [vmem:[%s14959_s1 + $0x11a0] sm:$0xf0]  ;;  %v8773_v34 = vld [vmem:[%s14959_s1 + $0x12d0] sm:$0xf]  ;;  %v9233_v44 = vld [vmem:[%s14959_s1 + $0x1668] sm:$0xf] }
 0x2a2   :  { %5765 = vmatpush.bf16.msra.mxu2 %v7974_v53  ;;  %v8514_v53 = vor.u32 %v9966_v50, %v8513_v11  ;;  %v10146_v45 = vld [vmem:[%s14959_s1 + $0x1678] sm:$0xf0] }
 0x2a3   :  { %5778 = vmatpush.bf16.msra.mxu3 %v8134_v59  ;;  %5740 = vmatmul.bf16.vlgmr.msra.gmra.mxu0 %v10925_v12  ;;  %v8873_v12 = vld [vmem:[%s14959_s1 + $0x1398] sm:$0xf]  ;;  %v5547_v63 = vadd.f32 %v5546_v40, %v5534_v37  ;;  %v9921_v59 = vld [vmem:[%s14959_s1 + $0xf70] sm:$0xf0]  ;;  %v10031_v37 = vld [vmem:[%s14959_s1 + $0x12e0] sm:$0xf0]  ;;  %v9234_v51 = vor.u32 %v10146_v45, %v9233_v44 }
 0x2a4   :  { %5784 = vmatpush.bf16.msrb.mxu0 %v8434_v61  ;;  %5753 = vmatmul.bf16.vlgmr.msra.gmra.mxu1 %v10935_v16  ;;  %v9931_v16 = vld [vmem:[%s14959_s1 + $0xfc0] sm:$0xf0]  ;;  %v8493_v61 = vld [vmem:[%s14959_s1 + $0x10a0] sm:$0xf]  ;;  %v8334_v19 = vor.u32 %v9921_v59, %v8333_v58  ;;  %v10106_v40 = vld [vmem:[%s14959_s1 + $0x1538] sm:$0xf0] }
 0x2a5   :  { %5797 = vmatpush.bf16.msrb.mxu1 %v8594_v62  ;;  %5766 = vmatmul.bf16.vlgmr.msra.gmra.mxu2 %v10933_v15  ;;  %v8373_v15 = vld [vmem:[%s14959_s1 + $0xfb0] sm:$0xf]  ;;  %v8834_v62 = vor.u32 %v10046_v4, %v8833_v52  ;;  %v10154_v55 = vld [vmem:[%s14961_s3 + $0x38] sm:$0xff]  ;;  %v9053_v52 = vld [vmem:[%s14959_s1 + $0x1500] sm:$0xf] }
 0x2a6   :  { %5810 = vmatpush.bf16.msrb.mxu2 %v8754_v3  ;;  %5779 = vmatmul.bf16.vlgmr.msra.gmra.mxu3 %v10937_v17  ;;  %v8874_v17 = vor.u32 %v10056_v31, %v8873_v12  ;;  %v8374_v38 = vor.u32 %v9931_v16, %v8373_v15  ;;  %v9996_v12 = vld [vmem:[%s14959_s1 + $0x11c8] sm:$0xf0]  ;;  %v8793_v31 = vld [vmem:[%s14959_s1 + $0x12f8] sm:$0xf]  ;;  %v10101_v4 = vld [vmem:[%s14959_s1 + $0x1510] sm:$0xf0] }
 0x2a7   :  { %5823 = vmatpush.bf16.msrb.mxu3 %v8914_v8  ;;  %v8634_v16 = vor.u32 %v9996_v12, %v8633_v29  ;;  %v9054_v58 = vor.u32 %v10101_v4, %v9053_v52  ;;  %v10148_v45 = vld [vmem:[%s14961_s3 + $0x8] sm:$0xff] }
 0x2a8   :  { %5785 = vmatpush.bf16.msrb.mxu0 %v8414_v30  ;;  %v5559_v3 = vpop.f32.mrf.mxu2  ;;  %v5535_v24 = vpop.f32.mrf.mxu0 }
 0x2a9   :  { %5798 = vmatpush.bf16.msrb.mxu1 %v8574_v25  ;;  %v5560_v8 = vadd.f32 %v5559_v3, %v5547_v63  ;;  %v5572_v10 = vpop.f32.mrf.mxu3  ;;  %v5548_v30 = vpop.f32.mrf.mxu1  ;;  %v8774_v63 = vor.u32 %v10031_v37, %v8773_v34  ;;  %v10096_v3 = vld [vmem:[%s14959_s1 + $0x14e8] sm:$0xf0]  ;;  %v10149_v34 = vld [vmem:[%s14961_s3 + $0x10] sm:$0xff] }
 0x2aa   :  { %5811 = vmatpush.bf16.msrb.mxu2 %v8734_v27  ;;  %v8494_v27 = vor.u32 %v9961_v14, %v8493_v61  ;;  %v10153_v61 = vld [vmem:[%s14961_s3 + $0x30] sm:$0xff]  ;;  %v10076_v37 = vld [vmem:[%s14959_s1 + $0x1448] sm:$0xf0] }
 0x2ab   :  { %5824 = vmatpush.bf16.msrb.mxu3 %v8894_v36  ;;  %v14633_v25 = vadd.f32 %v5572_v10, %v5560_v8  ;;  %v8473_v36 = vld [vmem:[%s14959_s1 + $0x1078] sm:$0xf]  ;;  %v10161_v14 = vld [vmem:[%s14961_s3 + $0x70] sm:$0xff]  ;;  %v9194_v8 = vor.u32 %v10136_v7, %v9193_v23  ;;  %v10152_v10 = vld [vmem:[%s14961_s3 + $0x28] sm:$0xff] }
 0x2ac   :  { %5786 = vmatpush.bf16.msrb.mxu0 %v8394_v32  ;;  %v10036_v32 = vld [vmem:[%s14959_s1 + $0x1308] sm:$0xf0]  ;;  %v8474_v15 = vor.u32 %v9956_v28, %v8473_v36  ;;  %v10159_v36 = vld [vmem:[%s14961_s3 + $0x60] sm:$0xff]  ;;  %v10126_v28 = vld [vmem:[%s14959_s1 + $0x15d8] sm:$0xf0] }
 0x2ad   :  { %5799 = vmatpush.bf16.msrb.mxu1 %v8554_v0  ;;  %v8314_v0 = vor.u32 %v9916_v26, %v8313_v22  ;;  %v8794_v2 = vor.u32 %v10036_v32, %v8793_v31  ;;  %v8993_v22 = vld [vmem:[%s14959_s1 + $0x1488] sm:$0xf]  ;;  %v10086_v26 = vld [vmem:[%s14959_s1 + $0x1498] sm:$0xf0]  ;;  %v8973_v32 = vld [vmem:[%s14959_s1 + $0x1460] sm:$0xf] }
 0x2ae   :  { %5812 = vmatpush.bf16.msrb.mxu2 %v8714_v1  ;;  %v8293_v1 = vld [vmem:[%s14959_s1 + $0xf10] sm:$0xf]  ;;  %v8994_v29 = vor.u32 %v10086_v26, %v8993_v22  ;;  %v10150_v31 = vld [vmem:[%s14961_s3 + $0x18] sm:$0xff] }
 0x2af   :  { %5825 = vmatpush.bf16.msrb.mxu3 %v8874_v17  ;;  %v8453_v17 = vld [vmem:[%s14959_s1 + $0x1050] sm:$0xf] }
 0x2b0   :  { %5787 = vmatpush.bf16.msrb.mxu0 %v8374_v38  ;;  %v5561_v35 = vpop.f32.mrf.mxu2  ;;  %v9073_v38 = vld [vmem:[%s14959_s1 + $0x1528] sm:$0xf]  ;;  %v8454_v11 = vor.u32 %v9951_v39, %v8453_v17  ;;  %v10177_v23 = vld [vmem:[%s14961_s3 + $0xf0] sm:$0xff] }
 0x2b1   :  { %5800 = vmatpush.bf16.msrb.mxu1 %v8534_v41  ;;  %v5574_v41 = vpop.f32.mrf.mxu3  ;;  %v9074_v50 = vor.u32 %v10106_v40, %v9073_v38  ;;  %v8953_v35 = vld [vmem:[%s14959_s1 + $0x1438] sm:$0xf]  ;;  %v10157_v38 = vld [vmem:[%s14961_s3 + $0x50] sm:$0xff] }
 0x2b2   :  { %5813 = vmatpush.bf16.msrb.mxu2 %v8694_v42  ;;  %v8294_v42 = vor.u32 %v9911_v43, %v8293_v1  ;;  %v10158_v1 = vld [vmem:[%s14961_s3 + $0x58] sm:$0xff]  ;;  %v10121_v43 = vld [vmem:[%s14959_s1 + $0x15b0] sm:$0xf0]  ;;  %v10116_v41 = vld [vmem:[%s14959_s1 + $0x1588] sm:$0xf0] }
 0x2b3   :  { %5826 = vmatpush.bf16.msrb.mxu3 %v8854_v20  ;;  %v8614_v20 = vor.u32 %v9991_v57, %v8613_v33  ;;  %v9113_v40 = vld [vmem:[%s14959_s1 + $0x1578] sm:$0xf]  ;;  %v10208_v7 = vld [vmem:[#allocation1 + $0x9] sm:$0xff] }
 0x2b4   :  { %5788 = vmatpush.bf16.msrb.mxu0 %v8354_v9  ;;  %v10162_v9 = vld [vmem:[%s14961_s3 + $0x78] sm:$0xff]  ;;  %v9114_v44 = vor.u32 %v10116_v41, %v9113_v40 }
 0x2b5   :  { %5801 = vmatpush.bf16.msrb.mxu1 %v8514_v53  ;;  %v9213_v53 = vld [vmem:[%s14959_s1 + $0x1640] sm:$0xf] }
 0x2b6   :  { %5814 = vmatpush.bf16.msrb.mxu2 %v8674_v56  ;;  %v10141_v56 = vld [vmem:[%s14959_s1 + $0x1650] sm:$0xf0] }
 0x2b7   :  { %5827 = vmatpush.bf16.msrb.mxu3 %v8834_v62  ;;  %v9214_v59 = vor.u32 %v10141_v56, %v9213_v53  ;;  %v9033_v62 = vld [vmem:[%s14959_s1 + $0x14d8] sm:$0xf]  ;;  %v10147_v53 = vld [vmem:[%s14961_s3] sm:$0xff] }
 0x2b8   :  { %5789 = vmatpush.bf16.msrb.mxu0 %v8334_v19  ;;  %v10155_v56 = vld [vmem:[%s14961_s3 + $0x40] sm:$0xff] }
 0x2b9   :  { %5802 = vmatpush.bf16.msrb.mxu1 %v8494_v27 }
 0x2ba   :  { %5815 = vmatpush.bf16.msrb.mxu2 %v8654_v21  ;;  %v10151_v21 = vld [vmem:[%s14961_s3 + $0x20] sm:$0xff] }
 0x2bb   :  { %5828 = vmatpush.bf16.msrb.mxu3 %v8814_v60  ;;  %v9153_v60 = vld [vmem:[%s14959_s1 + $0x15c8] sm:$0xf] }
 0x2bc   :  { %5790 = vmatpush.bf16.msrb.mxu0 %v8314_v0  ;;  %v9154_v12 = vor.u32 %v10126_v28, %v9153_v60  ;;  %v10081_v0 = vld [vmem:[%s14959_s1 + $0x1470] sm:$0xf0] }
 0x2bd   :  { %5803 = vmatpush.bf16.msrb.mxu1 %v8474_v15  ;;  %v10165_v60 = vld [vmem:[%s14961_s3 + $0x90] sm:$0xff] }
 0x2be   :  { %5816 = vmatpush.bf16.msrb.mxu2 %v8634_v16  ;;  %v9133_v16 = vld [vmem:[%s14959_s1 + $0x15a0] sm:$0xf] }
 0x2bf   :  { %5829 = vmatpush.bf16.msrb.mxu3 %v8794_v2  ;;  %v8974_v2 = vor.u32 %v10081_v0, %v8973_v32  ;;  %v9134_v57 = vor.u32 %v10121_v43, %v9133_v16  ;;  %v10163_v43 = vld [vmem:[%s14961_s3 + $0x80] sm:$0xff] }
 0x2c0   :  { %5791 = vmatpush.bf16.msrb.mxu0 %v8294_v42  ;;  %v14753_v24 = vpop.f32.mrf.mxu0  ;;  %v8954_v42 = vor.u32 %v10076_v37, %v8953_v35 }
 0x2c1   :  { %5804 = vmatpush.bf16.msrb.mxu1 %v8454_v11  ;;  %v14755_v30 = vpop.f32.mrf.mxu1  ;;  %v8933_v11 = vld [vmem:[%s14959_s1 + $0x1410] sm:$0xf] }
 0x2c2   :  { %5817 = vmatpush.bf16.msrb.mxu2 %v8614_v20  ;;  %v10071_v20 = vld [vmem:[%s14959_s1 + $0x1420] sm:$0xf0] }
 0x2c3   :  { %5830 = vmatpush.bf16.msrb.mxu3 %v8774_v63  ;;  %5792 = vmatmul.bf16.vlgmr.msrb.gmra.mxu0 %v11099_v46  ;;  %v9034_v46 = vor.u32 %v10096_v3, %v9033_v62  ;;  %v10156_v63 = vld [vmem:[%s14961_s3 + $0x48] sm:$0xff]  ;;  %v8934_v4 = vor.u32 %v10071_v20, %v8933_v11  ;;  %v10169_v62 = vld [vmem:[%s14961_s3 + $0xb0] sm:$0xff]  ;;  %v5863_v3 = vpack.c.bf16 %v13038_v54, %v13038_v54 }
 0x2c4   :  { %5836 = vmatpush.bf16.msra.mxu0 %v9074_v50  ;;  %5805 = vmatmul.bf16.vlgmr.msrb.gmra.mxu1 %v11103_v48  ;;  %v10160_v48 = vld [vmem:[%s14961_s3 + $0x68] sm:$0xff]  ;;  %v9093_v50 = vld [vmem:[%s14959_s1 + $0x1550] sm:$0xf] }
 0x2c5   :  { %5849 = vmatpush.bf16.msra.mxu1 %v9234_v51  ;;  %5818 = vmatmul.bf16.vlgmr.msrb.gmra.mxu2 %v11101_v47  ;;  %v10091_v47 = vld [vmem:[%s14959_s1 + $0x14c0] sm:$0xf0]  ;;  %v10176_v54 = vld [vmem:[%s14961_s3 + $0xe8] sm:$0xff] }
 0x2c6   :  { %6191 = vmatpush.bf16.msra.mxu2 %v10154_v55  ;;  %5831 = vmatmul.bf16.vlgmr.msrb.gmra.mxu3 %v11105_v49  ;;  %v9173_v49 = vld [vmem:[%s14959_s1 + $0x15f0] sm:$0xf]  ;;  %v9014_v19 = vor.u32 %v10091_v47, %v9013_v13  ;;  %v10111_v51 = vld [vmem:[%s14959_s1 + $0x1560] sm:$0xf0] }
 0x2c7   :  { %6204 = vmatpush.bf16.msra.mxu3 %v10162_v9  ;;  %v9174_v27 = vor.u32 %v10131_v18, %v9173_v49  ;;  %v9094_v9 = vor.u32 %v10111_v51, %v9093_v50  ;;  %v10175_v47 = vld [vmem:[%s14961_s3 + $0xe0] sm:$0xff]  ;;  %v10185_v50 = vld [vmem:[%s14961_s3 + $0x130] sm:$0xff] }
 0x2c8   :  { %5837 = vmatpush.bf16.msra.mxu0 %v9054_v58  ;;  %v14787_v15 = vpop.f32.mrf.mxu2  ;;  %v5587_v39 = vpop.f32.mrf.mxu0  ;;  %v10170_v58 = vld [vmem:[%s14961_s3 + $0xb8] sm:$0xff] }
 0x2c9   :  { %5850 = vmatpush.bf16.msra.mxu1 %v9214_v59  ;;  %v14795_v17 = vpop.f32.mrf.mxu3  ;;  %v5600_v33 = vpop.f32.mrf.mxu1  ;;  %v10178_v59 = vld [vmem:[%s14961_s3 + $0xf8] sm:$0xff] }
 0x2ca   :  { %6192 = vmatpush.bf16.msra.mxu2 %v10153_v61  ;;  %v5862_v61 = vpack.c.bf16 %v12198_v6, %v12198_v6  ;;  %v10168_v6 = vld [vmem:[%s14961_s3 + $0xa8] sm:$0xff] }
 0x2cb   :  { %6205 = vmatpush.bf16.msra.mxu3 %v10161_v14  ;;  %v10207_v14 = vld [vmem:[#allocation1] sm:$0xff] }
 0x2cc   :  { %5838 = vmatpush.bf16.msra.mxu0 %v9034_v46  ;;  %v10209_v46 = vld [vmem:[%s14960_s2] sm:$0x1f]  ;;  %s6346_s2 = sshll.u32 %s14965_s7, 4  ;;  %s6347_s2 = int_to_ptr.hbm [resolvable:$true] %s6346_s2 }
 0x2cd   :  { %5851 = vmatpush.bf16.msra.mxu1 %v9194_v8  ;;  %v900_v8 = vperm.slane %v10209_v46, 4 }
 0x2ce   :  { %6193 = vmatpush.bf16.msra.mxu2 %v10152_v10  ;;  %v10167_v10 = vld [vmem:[%s14961_s3 + $0xa0] sm:$0xff] }
 0x2cf   :  { %6206 = vmatpush.bf16.msra.mxu3 %v10160_v48 }
 0x2d0   :  { %5839 = vmatpush.bf16.msra.mxu0 %v9014_v19  ;;  %v5613_v55 = vpop.f32.mrf.mxu2  ;;  %v10166_v19 = vld [vmem:[%s14961_s3 + $0x98] sm:$0xff] }
 0x2d1   :  { %5852 = vmatpush.bf16.msra.mxu1 %v9174_v27  ;;  %v5626_v52 = vpop.f32.mrf.mxu3  ;;  %v10174_v27 = vld [vmem:[%s14961_s3 + $0xd8] sm:$0xff] }
 0x2d2   :  { %6194 = vmatpush.bf16.msra.mxu2 %v10151_v21 }
 0x2d3   :  { %6207 = vmatpush.bf16.msra.mxu3 %v10159_v36  ;;  %v5586_v36 = vadd.f32 %v14753_v24, %v14633_v25  ;;  %v10164_v25 = vld [vmem:[%s14961_s3 + $0x88] sm:$0xff] }
 0x2d4   :  { %5840 = vmatpush.bf16.msra.mxu0 %v8994_v29  ;;  %v10172_v24 = vld [vmem:[%s14961_s3 + $0xc8] sm:$0xff] }
 0x2d5   :  { %5853 = vmatpush.bf16.msra.mxu1 %v9154_v12  ;;  %v10173_v12 = vld [vmem:[%s14961_s3 + $0xd0] sm:$0xff]  ;;  %v5599_v32 = vadd.f32 %v14755_v30, %v5586_v36  ;;  %v10171_v30 = vld [vmem:[%s14961_s3 + $0xc0] sm:$0xff] }
 0x2d6   :  { %6195 = vmatpush.bf16.msra.mxu2 %v10150_v31 }
 0x2d7   :  { %6208 = vmatpush.bf16.msra.mxu3 %v10158_v1  ;;  %v5612_v1 = vadd.f32 %v14787_v15, %v5599_v32 }
 0x2d8   :  { %5841 = vmatpush.bf16.msra.mxu0 %v8974_v2  ;;  %v5864_v2 = vpack.c.bf16 %v13992_v5, %v13992_v5  ;;  %v10186_v5 = vld [vmem:[%s14961_s3 + $0x138] sm:$0xff] }
 0x2d9   :  { %5854 = vmatpush.bf16.msra.mxu1 %v9134_v57  ;;  %v5625_v39 = vadd.f32 %v14795_v17, %v5612_v1 }
 0x2da   :  { %6196 = vmatpush.bf16.msra.mxu2 %v10149_v34 }
 0x2db   :  { %6209 = vmatpush.bf16.msra.mxu3 %v10157_v38  ;;  %v5865_v33 = vpack.c.bf16 %v5625_v39, %v5625_v39  ;;  %v10191_v39 = vld [vmem:[%s14963_s5 + $0x20] sm:$0xff] }
 0x2dc   :  { %5842 = vmatpush.bf16.msra.mxu0 %v8954_v42 }
 0x2dd   :  { %5855 = vmatpush.bf16.msra.mxu1 %v9114_v44 }
 0x2de   :  { %6197 = vmatpush.bf16.msra.mxu2 %v10148_v45 }
 0x2df   :  { %6210 = vmatpush.bf16.msra.mxu3 %v10156_v63 }
 0x2e0   :  { %5843 = vmatpush.bf16.msra.mxu0 %v8934_v4  ;;  %v5637_v13 = vpop.f32.mrf.mxu0  ;;  %v10184_v4 = vld [vmem:[%s14961_s3 + $0x128] sm:$0xff] }
 0x2e1   :  { %5856 = vmatpush.bf16.msra.mxu1 %v9094_v9  ;;  %v5638_v48 = vadd.f32 %v5637_v13, %v900_v8  ;;  %v5650_v49 = vpop.f32.mrf.mxu1  ;;  %v10183_v9 = vld [vmem:[%s14961_s3 + $0x120] sm:$0xff] }
 0x2e2   :  { %6198 = vmatpush.bf16.msra.mxu2 %v10147_v53 }
 0x2e3   :  { %6211 = vmatpush.bf16.msra.mxu3 %v10155_v56  ;;  %5844 = vmatmul.bf16.vlgmr.msra.gmra.mxu0 %v10207_v14  ;;  %v5651_v18 = vadd.f32 %v5650_v49, %v5638_v48  ;;  %v10179_v14 = vld [vmem:[%s14961_s3 + $0x100] sm:$0xff] }
 0x2e4   :  { %6217 = vmatpush.bf16.msrb.mxu0 %v10170_v58  ;;  %5857 = vmatmul.bf16.vlgmr.msra.gmra.mxu1 %v10208_v7  ;;  %v10182_v58 = vld [vmem:[%s14961_s3 + $0x118] sm:$0xff] }
 0x2e5   :  { %6230 = vmatpush.bf16.msrb.mxu1 %v10178_v59  ;;  %6199 = vmatmul.bf16.vlgmr.msra.gmra.mxu2 %v5862_v61  ;;  %v10181_v59 = vld [vmem:[%s14961_s3 + $0x110] sm:$0xff]  ;;  %v10180_v61 = vld [vmem:[%s14961_s3 + $0x108] sm:$0xff] }
 0x2e6   :  { %6212 = vmatmul.bf16.vlgmr.msra.gmra.mxu3 %v5863_v3  ;;  %6243 = vmatpush.bf16.msrb.mxu2 %v10186_v5 }
 0x2e8   :  { %6218 = vmatpush.bf16.msrb.mxu0 %v10169_v62  ;;  %v5663_v21 = vpop.f32.mrf.mxu2  ;;  %v5639_v29 = vpop.f32.mrf.mxu0 }
 0x2e9   :  { %6231 = vmatpush.bf16.msrb.mxu1 %v10177_v23  ;;  %v5664_v22 = vadd.f32 %v5663_v21, %v5651_v18  ;;  %v5676_v26 = vpop.f32.mrf.mxu3  ;;  %v5652_v31 = vpop.f32.mrf.mxu1 }
 0x2ea   :  { %6244 = vmatpush.bf16.msrb.mxu2 %v10185_v50 }
 0x2eb   :  { %v5677_v28 = vadd.f32 %v5676_v26, %v5664_v22 }
 0x2ec   :  { %6219 = vmatpush.bf16.msrb.mxu0 %v10168_v6 }
 0x2ed   :  { %6232 = vmatpush.bf16.msrb.mxu1 %v10176_v54 }
 0x2ee   :  { %6245 = vmatpush.bf16.msrb.mxu2 %v10184_v4 }
 0x2f0   :  { %6220 = vmatpush.bf16.msrb.mxu0 %v10167_v10  ;;  %v5665_v0 = vpop.f32.mrf.mxu2 }
 0x2f1   :  { %6233 = vmatpush.bf16.msrb.mxu1 %v10175_v47  ;;  %v5678_v16 = vpop.f32.mrf.mxu3  ;;  %v10193_v0 = vld [vmem:[%s14963_s5 + $0x30] sm:$0xff] }
 0x2f2   :  { %6246 = vmatpush.bf16.msrb.mxu2 %v10183_v9  ;;  %v10192_v16 = vld [vmem:[%s14963_s5 + $0x28] sm:$0xff] }
 0x2f4   :  { %6221 = vmatpush.bf16.msrb.mxu0 %v10166_v19 }
 0x2f5   :  { %6234 = vmatpush.bf16.msrb.mxu1 %v10174_v27 }
 0x2f6   :  { %6247 = vmatpush.bf16.msrb.mxu2 %v10182_v58 }
 0x2f8   :  { %6222 = vmatpush.bf16.msrb.mxu0 %v10165_v60  ;;  %v10196_v60 = vld [vmem:[%s14962_s4] ss:$0 sm:$0xff] }
 0x2f9   :  { %6235 = vmatpush.bf16.msrb.mxu1 %v10173_v12  ;;  %v10194_v12 = vld [vmem:[%s14963_s5 + $0x38] sm:$0xff] }
 0x2fa   :  { %6248 = vmatpush.bf16.msrb.mxu2 %v10181_v59  ;;  %6325 = vmatpush.bf16.msrb.mxu3 %v10194_v12 }
 0x2fc   :  { %6223 = vmatpush.bf16.msrb.mxu0 %v10164_v25 }
 0x2fd   :  { %6236 = vmatpush.bf16.msrb.mxu1 %v10172_v24 }
 0x2fe   :  { %6249 = vmatpush.bf16.msrb.mxu2 %v10180_v61  ;;  %6326 = vmatpush.bf16.msrb.mxu3 %v10193_v0 }
 0x300   :  { %6224 = vmatpush.bf16.msrb.mxu0 %v10163_v43  ;;  %v5689_v15 = vpop.f32.mrf.mxu0 }
 0x301   :  { %6237 = vmatpush.bf16.msrb.mxu1 %v10171_v30  ;;  %v5690_v57 = vadd.f32 %v5689_v15, %v5677_v28  ;;  %v5702_v34 = vpop.f32.mrf.mxu1  ;;  %v10188_v15 = vld [vmem:[%s14963_s5 + $0x8] sm:$0xff] }
 0x302   :  { %6250 = vmatpush.bf16.msrb.mxu2 %v10179_v14  ;;  %6327 = vmatpush.bf16.msrb.mxu3 %v10192_v16 }
 0x303   :  { %6225 = vmatmul.bf16.vlgmr.msrb.gmra.mxu0 %v5864_v2  ;;  %v5703_v35 = vadd.f32 %v5702_v34, %v5690_v57  ;;  %v10190_v2 = vld [vmem:[%s14963_s5 + $0x18] sm:$0xff] }
 0x304   :  { %6238 = vmatmul.bf16.vlgmr.msrb.gmra.mxu1 %v5865_v33  ;;  %v10189_v33 = vld [vmem:[%s14963_s5 + $0x10] sm:$0xff] }
 0x306   :  { %6328 = vmatpush.bf16.msrb.mxu3 %v10191_v39 }
 0x308   :  { %v5715_v37 = vpop.f32.mrf.mxu2  ;;  %v5691_v42 = vpop.f32.mrf.mxu0 }
 0x309   :  { %v5716_v38 = vadd.f32 %v5715_v37, %v5703_v35  ;;  %v5728_v40 = vpop.f32.mrf.mxu3  ;;  %v5704_v44 = vpop.f32.mrf.mxu1 }
 0x30a   :  { %6329 = vmatpush.bf16.msrb.mxu3 %v10190_v2 }
 0x30b   :  { %v5729_v41 = vadd.f32 %v5728_v40, %v5716_v38 }
 0x30e   :  { %6330 = vmatpush.bf16.msrb.mxu3 %v10189_v33 }
 0x310   :  { %v5717_v45 = vpop.f32.mrf.mxu2 }
 0x311   :  { %v5730_v17 = vpop.f32.mrf.mxu3 }
 0x312   :  { %6331 = vmatpush.bf16.msrb.mxu3 %v10188_v15 }
 0x320   :  { %v5741_v11 = vpop.f32.mrf.mxu0 }
 0x321   :  { %v5754_v20 = vpop.f32.mrf.mxu1  ;;  %v5742_v23 = vadd.f32 %v5741_v11, %v5729_v41  ;;  %v10187_v41 = vld [vmem:[%s14963_s5] sm:$0xff] }
 0x322   :  { %6332 = vmatpush.bf16.msrb.mxu3 %v10187_v41  ;;  %v10197_v11 = vld [vmem:[%s14964_s6] ss:$0 sm:$0xff] }
 0x323   :  { %v5755_v8 = vadd.f32 %v5754_v20, %v5742_v23 }
 0x328   :  { %v5767_v63 = vpop.f32.mrf.mxu2  ;;  %v5743_v55 = vpop.f32.mrf.mxu0 }
 0x329   :  { %v5780_v51 = vpop.f32.mrf.mxu3  ;;  %v5756_v52 = vpop.f32.mrf.mxu1  ;;  %v5768_v10 = vadd.f32 %v5767_v63, %v5755_v8 }
 0x32b   :  { %v5781_v47 = vadd.f32 %v5780_v51, %v5768_v10 }
 0x330   :  { %v5769_v53 = vpop.f32.mrf.mxu2 }
 0x331   :  { %v5782_v56 = vpop.f32.mrf.mxu3 }
 0x340   :  { %v5793_v62 = vpop.f32.mrf.mxu0 }
 0x341   :  { %v5806_v3 = vpop.f32.mrf.mxu1  ;;  %v5794_v49 = vadd.f32 %v5793_v62, %v5781_v47 }
 0x343   :  { %v5807_v18 = vadd.f32 %v5806_v3, %v5794_v49 }
 0x348   :  { %v5819_v7 = vpop.f32.mrf.mxu2  ;;  %v5795_v54 = vpop.f32.mrf.mxu0 }
 0x349   :  { %v5832_v6 = vpop.f32.mrf.mxu3  ;;  %v5808_v46 = vpop.f32.mrf.mxu1  ;;  %v5820_v19 = vadd.f32 %v5819_v7, %v5807_v18 }
 0x34b   :  { %v5833_v27 = vadd.f32 %v5832_v6, %v5820_v19 }
 0x350   :  { %v5821_v13 = vpop.f32.mrf.mxu2 }
 0x351   :  { %v5834_v48 = vpop.f32.mrf.mxu3 }
 0x360   :  { %v5845_v21 = vpop.f32.mrf.mxu0 }
 0x361   :  { %v5846_v22 = vadd.f32 %v5845_v21, %v5833_v27  ;;  %v5858_v26 = vpop.f32.mrf.mxu1 }
 0x363   :  { %v5859_v36 = vadd.f32 %v5858_v26, %v5846_v22 }
 0x365   :  { %v5866_v28 = vpack.c.bf16 %v5859_v36, %v5859_v36 }
 0x367   :  { %6251 = vmatmul.bf16.vlgmr.msrb.gmra.mxu2 %v5866_v28 }
 0x368   :  { %v6200_v29 = vpop.f32.mrf.mxu2  ;;  %v5847_v25 = vpop.f32.mrf.mxu0 }
 0x369   :  { %v6201_v31 = vadd.f32 %v10196_v60, %v6200_v29  ;;  %v6213_v32 = vpop.f32.mrf.mxu3  ;;  %v5860_v24 = vpop.f32.mrf.mxu1 }
 0x36b   :  { %v6214_v1 = vadd.f32 %v6213_v32, %v6201_v31 }
 0x370   :  { %v6202_v43 = vpop.f32.mrf.mxu2 }
 0x371   :  { %v6215_v30 = vpop.f32.mrf.mxu3 }
 0x380   :  { %v6226_v57 = vpop.f32.mrf.mxu0 }
 0x381   :  { %v6227_v34 = vadd.f32 %v6226_v57, %v6214_v1  ;;  %v6239_v35 = vpop.f32.mrf.mxu1 }
 0x383   :  { %v6240_v37 = vadd.f32 %v6239_v35, %v6227_v34 }
 0x388   :  { %v6228_v38 = vpop.f32.mrf.mxu0 }
 0x389   :  { %v6241_v40 = vpop.f32.mrf.mxu1 }
 0x3ea   :  { %v6252_v42 = vpop.f32.mrf.mxu2 }
 0x3eb   :  { %v6253_v44 = vadd.f32 %v6252_v42, %v6240_v37 }
 0x3ed   :  { %v6256_v45 = vpack.c.bf16 %v6253_v44, %v6253_v44 }
 0x3ef   :  { %6333 = vmatmul.bf16.vlgmr.msrb.gmra.mxu3 %v6256_v45 }
 0x3f2   :  { %v6254_v17 = vpop.f32.mrf.mxu2 }
 0x472   :  { %v6334_v20 = vpop.f32.mrf.mxu3 }
 0x473   :  { %v6335_v5 = vadd.f32 %v10197_v11, %v6334_v20 }
 0x475   :  { %6338 = vst [vmem:[#allocation2] sm:$0x3] %v6335_v5 }
 0x476   :  { %6349 = dma.vmem_to_hbm [thread:$0]  %s6345_s13, 32, %s6347_s2, [#allocation3]  }
 0x47a   :  { %v6336_v63 = vpop.f32.mrf.mxu3 }
 0x47b   :  { %10234 = dma.done.wait [#allocation3], 32  }
 0x47c   :  { %10235 = vsyncadd [#allocation3], 4294967264 }
 0x47d   :  { %6354 = vsyncpa [#allocation3], 1 }

</bundles_post_ra>
